<compile_context>
chip_gen: v7x
topology: tpu7x:2x2x1
jax: 0.10.0
libtpu: 0.0.40
codegen_flags: <defaults>
</compile_context>

<pallas_src>
import functools

import jax
import jax.numpy as jnp
import numpy as np
from jax import lax
from jax.experimental import pallas as pl
from jax.experimental.pallas import tpu as pltpu

_EPS = 1e-5  # PyTorch default eps for all three norm layers


# --------------------------------------------------------------------------------------
# Generation-aware VMEM / tile configuration (performance review item: v5e/v6e have
# 128 MiB VMEM, v7x only 64 MiB — re-derive tile caps instead of a single fixed budget).
# --------------------------------------------------------------------------------------
def _hw_config():
    try:
        vmem_phys = int(pltpu.get_tpu_info().vmem_capacity_bytes)
    except Exception:
        vmem_phys = 64 * 1024 * 1024  # unknown -> assume the tighter (v7x-like) budget
    if vmem_phys >= 128 * 1024 * 1024:
        # v5e / v6e: worst-case apply tile (512 x 4096 f32 in + out, double-buffered)
        # is 32 MiB, comfortably under a 64 MiB scoped limit.
        return {"vmem_limit": 64 * 1024 * 1024, "tr_cap": 512, "tw_cap": 4096}
    # v7x (64 MiB physical) or unknown: 512 x 2048 tiles -> 16 MiB double-buffered.
    return {"vmem_limit": 48 * 1024 * 1024, "tr_cap": 512, "tw_cap": 2048}


_CFG = _hw_config()

# Fused single-kernel path thresholds: (R, R) group masks stay <= ~2.3 MiB each and the
# x slab stays <= 2 MiB, so total VMEM use is far below every generation's budget.
_SMALL_MAX_ROWS = 768
_SMALL_MAX_BYTES = 2 * 1024 * 1024


# --------------------------------------------------------------------------------------
# Kernels
# --------------------------------------------------------------------------------------
def _fused_kernel(x_ref, labc_ref, labr_ref, par_ref, o_ref, *, n, c, d, h, w):
    """Whole-slab fused Net1 forward: x resident in VMEM, group stats via mask matmuls."""
    del c, d  # group structure is carried entirely by the label arrays
    xf = x_ref[...].astype(jnp.float32)                        # (R, W)
    s1 = jnp.sum(xf, axis=-1, keepdims=True)                   # (R, 1) sum_w x
    s2 = jnp.sum(xf * xf, axis=-1, keepdims=True)              # (R, 1) sum_w x^2

    labc = labc_ref[...]                                       # (R, 3) int32 group labels
    labr = labr_ref[...]                                       # (3, R) int32 (transposed)
    par = par_ref[...].astype(jnp.float32)                     # (R, 3): g3, g1, b1 per row
    g3r, g1r, b1r = par[:, 0:1], par[:, 1:2], par[:, 2:3]

    def group_mask(col):
        # (R, R) 0/1 matrix: rows belonging to the same group.  Group-sum broadcast back
        # to row granularity is then a single MXU matmul (mask @ v).
        return (labc[:, col:col + 1] == labr[col:col + 1, :]).astype(jnp.float32)

    m_c, m_ncd, m_cdh = group_mask(0), group_mask(1), group_mask(2)

    def gsum(mask, v):
        return jnp.dot(mask, v, preferred_element_type=jnp.float32)

    cnt1 = float(n * 5 * 5 * w)   # BN3d count over (n, d, h, w); D = H = 5 by the module
    cnt2 = float(5 * w)           # IN2d count over (h, w)
    cnt3 = float(n * w)           # BN1d count over (n, w)

    # Layer 1: BatchNorm3d(5), batch stats per channel.  (beta3 cancels inside IN2d.)
    mu = gsum(m_c, s1) / cnt1
    var = jnp.maximum(gsum(m_c, s2) / cnt1 - mu * mu, 0.0)
    a = g3r * lax.rsqrt(var + _EPS)

    # Layer 2: InstanceNorm2d(25), per (n, c, d) over (h, w), expressed via raw-x stats.
    mx = gsum(m_ncd, s1) / cnt2
    vx = jnp.maximum(gsum(m_ncd, s2) / cnt2 - mx * mx, 0.0)
    alpha = a * lax.rsqrt(a * a * vx + _EPS)                   # z = alpha * (x - mx)

    # Layer 3: BatchNorm1d(125), per (c, d, h) over (n, w) of z.
    zs1 = alpha * (s1 - w * mx)
    zs2 = (alpha * alpha) * (s2 - 2.0 * mx * s1 + w * mx * mx)
    M = gsum(m_cdh, zs1) / cnt3
    vz = jnp.maximum(gsum(m_cdh, zs2) / cnt3 - M * M, 0.0)
    sc3 = g1r * lax.rsqrt(vz + _EPS)

    A = alpha * sc3
    B = b1r - sc3 * (alpha * mx + M)
    o_ref[...] = (xf * A + B).astype(o_ref.dtype)


def _rowstats_kernel(x_ref, s1_ref, s2_ref):
    """Accumulate per-row sum and sum-of-squares over the lane (W) axis."""
    w = pl.program_id(1)

    @pl.when(w == 0)
    def _():
        s1_ref[...] = jnp.zeros_like(s1_ref)
        s2_ref[...] = jnp.zeros_like(s2_ref)

    xf = x_ref[...].astype(jnp.float32)
    # Per review: keep the reductions on VPU/XLU.  Both kernels are HBM-bound, so the
    # MXU dot-with-ones variant is neutral on v6e/v7x and a regression risk on v5e.
    s1_ref[...] += jnp.sum(xf, axis=-1, keepdims=True)
    s2_ref[...] += jnp.sum(xf * xf, axis=-1, keepdims=True)


def _apply_kernel(x_ref, ab_ref, o_ref):
    """out = per-row scale * x + per-row shift (scale/shift packed as (tr, 2))."""
    xf = x_ref[...].astype(jnp.float32)
    ab = ab_ref[...]
    o_ref[...] = (xf * ab[:, 0:1] + ab[:, 1:2]).astype(o_ref.dtype)


# --------------------------------------------------------------------------------------
# pallas_call wrappers
# --------------------------------------------------------------------------------------
def _fused_small(x2d, labc, labr, par, N, C, D, H, W):
    R = x2d.shape[0]
    kern = functools.partial(_fused_kernel, n=N, c=C, d=D, h=H, w=W)
    flops = int(5 * R * W + 12 * R * R + 40 * R)
    return pl.pallas_call(
        kern,
        out_shape=jax.ShapeDtypeStruct((R, W), x2d.dtype),
        grid=(1,),
        in_specs=[pl.BlockSpec((R, W), lambda i: (0, 0)),
                  pl.BlockSpec((R, 3), lambda i: (0, 0)),
                  pl.BlockSpec((3, R), lambda i: (0, 0)),
                  pl.BlockSpec((R, 3), lambda i: (0, 0))],
        out_specs=pl.BlockSpec((R, W), lambda i: (0, 0)),
        compiler_params=pltpu.CompilerParams(
            dimension_semantics=("arbitrary",),
            vmem_limit_bytes=_CFG["vmem_limit"]),
        cost_estimate=pl.CostEstimate(flops=flops, transcendentals=int(3 * R),
                                      bytes_accessed=int(2 * R * W * 4 + 9 * R * 4)),
    )(x2d, labc, labr, par)


def _pick_tile(dim, unit, cap):
    """Largest multiple of `unit` that divides `dim` and is <= cap."""
    if dim % unit != 0:
        # Only reachable for a lane dim < 128 (rows are padded to a multiple of 8 and
        # lanes >= 128 are padded to a multiple of 128), so this tile stays small.
        return dim
    t = min(cap - cap % unit, dim)
    while t >= unit:
        if dim % t == 0:
            return t
        t -= unit
    return unit


def _row_stats(x2d):
    """Per-row sum and sumsq of a (R, W) slab; tiled + pipelined + megacore-parallel."""
    R, W = x2d.shape
    tr = _pick_tile(R, 8, _CFG["tr_cap"])
    tw = _pick_tile(W, 128, _CFG["tw_cap"])
    grid = (R // tr, W // tw)
    return pl.pallas_call(
        _rowstats_kernel,
        out_shape=(jax.ShapeDtypeStruct((R, 1), jnp.float32),
                   jax.ShapeDtypeStruct((R, 1), jnp.float32)),
        grid_spec=pltpu.PrefetchScalarGridSpec(
            num_scalar_prefetch=0,
            grid=grid,
            in_specs=[pl.BlockSpec((tr, tw), lambda r, w: (r, w))],
            out_specs=[pl.BlockSpec((tr, 1), lambda r, w: (r, 0)),
                       pl.BlockSpec((tr, 1), lambda r, w: (r, 0))],
        ),
        compiler_params=pltpu.CompilerParams(
            dimension_semantics=("parallel", "arbitrary"),
            vmem_limit_bytes=_CFG["vmem_limit"]),
        cost_estimate=pl.CostEstimate(flops=int(3 * R * W), transcendentals=0,
                                      bytes_accessed=int(R * W * 4 + 2 * R * 4)),
    )(x2d)


def _apply_affine(x2d, ab):
    """out[r, w] = ab[r, 0] * x[r, w] + ab[r, 1]; tiled, fully parallel grid."""
    R, W = x2d.shape
    tr = _pick_tile(R, 8, _CFG["tr_cap"])
    tw = _pick_tile(W, 128, _CFG["tw_cap"])
    grid = (R // tr, W // tw)
    return pl.pallas_call(
        _apply_kernel,
        out_shape=jax.ShapeDtypeStruct((R, W), x2d.dtype),
        grid_spec=pltpu.PrefetchScalarGridSpec(
            num_scalar_prefetch=0,
            grid=grid,
            in_specs=[pl.BlockSpec((tr, tw), lambda r, w: (r, w)),
                      pl.BlockSpec((tr, 2), lambda r, w: (r, 0))],
            out_specs=pl.BlockSpec((tr, tw), lambda r, w: (r, w)),
        ),
        compiler_params=pltpu.CompilerParams(
            dimension_semantics=("parallel", "parallel"),
            vmem_limit_bytes=_CFG["vmem_limit"]),
        cost_estimate=pl.CostEstimate(flops=int(2 * R * W), transcendentals=0,
                                      bytes_accessed=int(2 * R * W * 4 + R * 8)),
    )(x2d, ab)


# --------------------------------------------------------------------------------------
# Forward
# --------------------------------------------------------------------------------------
def _row_labels(N, C, D, H):
    """Per-row (n,c,d,h) group labels: [channel c, instance (n,c,d), feature (c,d,h)]."""
    n, c, d, h = np.meshgrid(np.arange(N), np.arange(C), np.arange(D), np.arange(H),
                             indexing="ij")
    lab_c = c.reshape(-1)
    lab_ncd = ((n * C + c) * D + d).reshape(-1)
    lab_cdh = ((c * D + d) * H + h).reshape(-1)
    return np.stack([lab_c, lab_ncd, lab_cdh], axis=1).astype(np.int32)   # (R, 3)


@jax.jit
def net1_forward(x, g3, b3, g1, b1):
    """x: (N, 5, 5, 5, W) float32 (NCDHW for BatchNorm3d(5)).  Returns (N, 125, W).

    Training-mode batch statistics.  b3 is accepted for parameter parity but BN3d's
    beta is exactly cancelled by the following InstanceNorm2d.
    """
    del b3
    N, C, D, H, W = x.shape            # C = D = H = 5 required by the flatten/norm chain
    R = N * C * D * H
    x2d = x.reshape(R, W)              # rows = (n, c, d, h) in natural order; no transposes

    if R <= _SMALL_MAX_ROWS and R * W * 4 <= _SMALL_MAX_BYTES:
        # ---- Fused single-kernel path: 1 HBM read of x, 1 write, 1 launch. ----
        labs = _row_labels(N, C, D, H)                        # numpy, trace-time constant
        labc = jnp.asarray(labs)                              # (R, 3) int32
        labr = jnp.asarray(np.ascontiguousarray(labs.T))      # (3, R) int32
        par = jnp.stack([g3[labs[:, 0]], g1[labs[:, 2]], b1[labs[:, 2]]],
                        axis=1).astype(jnp.float32)           # (R, 3) per-row parameters
        out2d = _fused_small(x2d, labc, labr, par, N, C, D, H, W)
        return out2d.reshape(N, C * D * H, W)

    # ---- Two-pass tiled path. ----
    # Pad rows to a multiple of 8 and (when W >= 128) lanes to a multiple of 128 so tiles
    # are always bounded and (8,128)-aligned and output stores are lane-dense.  Zero
    # padding does not perturb the row sums; padded rows are sliced off before the fold.
    Rp = ((R + 7) // 8) * 8
    Wp = ((W + 127) // 128) * 128 if W >= 128 else W
    x2d_p = x2d if (Rp, Wp) == (R, W) else jnp.pad(x2d, ((0, Rp - R), (0, Wp - W)))

    # Pass 1: per-row sum / sumsq over w.
    s1p, s2p = _row_stats(x2d_p)
    S1 = s1p[:R, 0].reshape(N, C, D, H)
    S2 = s2p[:R, 0].reshape(N, C, D, H)

    # Tiny scalar glue (arrays of size <= N*125): fold all three norms.
    cnt1 = N * D * H * W
    mu_c = jnp.sum(S1, axis=(0, 2, 3)) / cnt1
    ex2_c = jnp.sum(S2, axis=(0, 2, 3)) / cnt1
    var_c = jnp.maximum(ex2_c - mu_c * mu_c, 0.0)
    a_c = g3 / jnp.sqrt(var_c + _EPS)

    cnt2 = H * W
    m_x = jnp.sum(S1, axis=3) / cnt2
    v_x = jnp.maximum(jnp.sum(S2, axis=3) / cnt2 - m_x * m_x, 0.0)
    a_cb = a_c[None, :, None]
    alpha = a_cb / jnp.sqrt(a_cb * a_cb * v_x + _EPS)

    cnt3 = N * W
    m_xe = m_x[..., None]
    al_e = alpha[..., None]
    zs1 = al_e * (S1 - W * m_xe)
    zs2 = (al_e * al_e) * (S2 - 2.0 * m_xe * S1 + W * m_xe * m_xe)
    M = jnp.sum(zs1, axis=0) / cnt3
    Vz = jnp.maximum(jnp.sum(zs2, axis=0) / cnt3 - M * M, 0.0)
    g1r = g1.reshape(C, D, H)
    b1r = b1.reshape(C, D, H)
    scale3 = g1r / jnp.sqrt(Vz + _EPS)

    A = al_e * scale3[None]                                    # (N, C, D, H)
    Bf = b1r[None] - scale3[None] * (al_e * m_xe + M[None])    # (N, C, D, H)

    # Pass 2: elementwise apply with packed (Rp, 2) scale/shift side input.
    AB = jnp.stack([A.reshape(R), Bf.reshape(R)], axis=-1).astype(jnp.float32)
    if Rp != R:
        AB = jnp.pad(AB, ((0, Rp - R), (0, 0)))
    out_p = _apply_affine(x2d_p, AB)
    out2d = out_p[:R, :W] if (Rp, Wp) != (R, W) else out_p
    return out2d.reshape(N, C * D * H, W)


def net1_reference(x, g3, b3, g1, b1):
    """Pure-JAX reference of the PyTorch forward (training-mode norms)."""
    N, C, D, H, W = x.shape
    m = jnp.mean(x, axis=(0, 2, 3, 4), keepdims=True)
    v = jnp.mean((x - m) ** 2, axis=(0, 2, 3, 4), keepdims=True)
    y = (x - m) / jnp.sqrt(v + _EPS) * g3.reshape(1, C, 1, 1, 1) + b3.reshape(1, C, 1, 1, 1)
    y = y.reshape(N, C * D, H, W)
    m = jnp.mean(y, axis=(2, 3), keepdims=True)
    v = jnp.mean((y - m) ** 2, axis=(2, 3), keepdims=True)
    y = (y - m) / jnp.sqrt(v + _EPS)
    y = y.reshape(N, C * D * H, W)
    m = jnp.mean(y, axis=(0, 2), keepdims=True)
    v = jnp.mean((y - m) ** 2, axis=(0, 2), keepdims=True)
    y = (y - m) / jnp.sqrt(v + _EPS) * g1.reshape(1, -1, 1) + b1.reshape(1, -1, 1)
    return y


if __name__ == "__main__":
    key = jax.random.PRNGKey(0)
    kx, k3g, k3b, k1g, k1b = jax.random.split(key, 5)

    # Deterministic synthetic affine parameters (non-trivial gamma/beta).
    g3 = 1.0 + 0.1 * jax.random.normal(k3g, (5,), dtype=jnp.float32)
    b3 = 0.1 * jax.random.normal(k3b, (5,), dtype=jnp.float32)
    g1 = 1.0 + 0.1 * jax.random.normal(k1g, (125,), dtype=jnp.float32)
    b1 = 0.1 * jax.random.normal(k1b, (125,), dtype=jnp.float32)

    # Small input (N=2, W=16) -> fused single-kernel path.
    x_small = jax.random.normal(kx, (2, 5, 5, 5, 16), dtype=jnp.float32)
    out_small = jax.block_until_ready(net1_forward(x_small, g3, b3, g1, b1))
    ref_small = net1_reference(x_small, g3, b3, g1, b1)
    assert out_small.shape == (2, 125, 16), out_small.shape
    assert jnp.allclose(out_small, ref_small, atol=2e-3, rtol=2e-3), "small-path mismatch"

    # Larger input (N=8, W=256) -> two-pass tiled path (tr=200, tw=256 tiles).
    x_big = jax.random.normal(kx, (8, 5, 5, 5, 256), dtype=jnp.float32)
    out_big = jax.block_until_ready(net1_forward(x_big, g3, b3, g1, b1))
    ref_big = net1_reference(x_big, g3, b3, g1, b1)
    assert out_big.shape == (8, 125, 256), out_big.shape
    assert jnp.allclose(out_big, ref_big, atol=2e-3, rtol=2e-3), "tiled-path mismatch"

    print("KERNEL_OK")
</pallas_src>

<mosaic_0001>
module attributes {stable_mosaic.version = 11 : i64} {
  func.func @_fused_kernel(%arg0: i32, %arg1: memref<250x16xf32, #tpu.memory_space<vmem>>, %arg2: memref<250x3xi32, #tpu.memory_space<vmem>>, %arg3: memref<3x250xi32, #tpu.memory_space<vmem>>, %arg4: memref<250x3xf32, #tpu.memory_space<vmem>>, %arg5: memref<250x16xf32, #tpu.memory_space<vmem>>) attributes {dimension_semantics = [#tpu.dimension_semantics<arbitrary>], iteration_bounds = array<i64: 1>, scalar_prefetch = 0 : i64, scratch_operands = 0 : i64, tpu.core_type = #tpu.core_type<tc>, window_params = [{pipeline_mode = #tpu.pipeline_mode<synchronous>, transform_indices = @transform_0, window_bounds = array<i64: 250, 16>}, {pipeline_mode = #tpu.pipeline_mode<synchronous>, transform_indices = @transform_1, window_bounds = array<i64: 250, 3>}, {pipeline_mode = #tpu.pipeline_mode<synchronous>, transform_indices = @transform_2, window_bounds = array<i64: 3, 250>}, {pipeline_mode = #tpu.pipeline_mode<synchronous>, transform_indices = @transform_3, window_bounds = array<i64: 250, 3>}, {pipeline_mode = #tpu.pipeline_mode<synchronous>, transform_indices = @transform_4, window_bounds = array<i64: 250, 16>}]} {
    %c0 = arith.constant 0 : index
    %c0_0 = arith.constant 0 : index
    %0 = vector.load %arg1[%c0, %c0_0] : memref<250x16xf32, #tpu.memory_space<vmem>>, vector<250x16xf32>
    %cst = arith.constant dense<0.000000e+00> : vector<250xf32>
    %1 = vector.multi_reduction <add>, %0, %cst [1] : vector<250x16xf32> to vector<250xf32>
    %2 = vector.shape_cast %1 : vector<250xf32> to vector<250x1xf32>
    %3 = arith.mulf %0, %0 : vector<250x16xf32>
    %cst_1 = arith.constant dense<0.000000e+00> : vector<250xf32>
    %4 = vector.multi_reduction <add>, %3, %cst_1 [1] : vector<250x16xf32> to vector<250xf32>
    %5 = vector.shape_cast %4 : vector<250xf32> to vector<250x1xf32>
    %c0_2 = arith.constant 0 : index
    %c0_3 = arith.constant 0 : index
    %6 = vector.load %arg2[%c0_2, %c0_3] : memref<250x3xi32, #tpu.memory_space<vmem>>, vector<250x3xi32>
    %c0_4 = arith.constant 0 : index
    %c0_5 = arith.constant 0 : index
    %7 = vector.load %arg3[%c0_4, %c0_5] : memref<3x250xi32, #tpu.memory_space<vmem>>, vector<3x250xi32>
    %c0_6 = arith.constant 0 : index
    %c0_7 = arith.constant 0 : index
    %8 = vector.load %arg4[%c0_6, %c0_7] : memref<250x3xf32, #tpu.memory_space<vmem>>, vector<250x3xf32>
    %9 = vector.extract_strided_slice %8 {offsets = [0, 0], sizes = [250, 1], strides = [1, 1]} : vector<250x3xf32> to vector<250x1xf32>
    %10 = vector.extract_strided_slice %8 {offsets = [0, 1], sizes = [250, 1], strides = [1, 1]} : vector<250x3xf32> to vector<250x1xf32>
    %11 = vector.extract_strided_slice %8 {offsets = [0, 2], sizes = [250, 1], strides = [1, 1]} : vector<250x3xf32> to vector<250x1xf32>
    %12 = vector.extract_strided_slice %6 {offsets = [0, 0], sizes = [250, 1], strides = [1, 1]} : vector<250x3xi32> to vector<250x1xi32>
    %13 = vector.extract_strided_slice %7 {offsets = [0, 0], sizes = [1, 250], strides = [1, 1]} : vector<3x250xi32> to vector<1x250xi32>
    %14 = vector.broadcast %12 : vector<250x1xi32> to vector<250x250xi32>
    %15 = vector.broadcast %13 : vector<1x250xi32> to vector<250x250xi32>
    %16 = arith.cmpi eq, %14, %15 : vector<250x250xi32>
    %17 = arith.extui %16 : vector<250x250xi1> to vector<250x250xi32>
    %18 = arith.sitofp %17 : vector<250x250xi32> to vector<250x250xf32>
    %19 = vector.extract_strided_slice %6 {offsets = [0, 1], sizes = [250, 1], strides = [1, 1]} : vector<250x3xi32> to vector<250x1xi32>
    %20 = vector.extract_strided_slice %7 {offsets = [1, 0], sizes = [1, 250], strides = [1, 1]} : vector<3x250xi32> to vector<1x250xi32>
    %21 = vector.broadcast %19 : vector<250x1xi32> to vector<250x250xi32>
    %22 = vector.broadcast %20 : vector<1x250xi32> to vector<250x250xi32>
    %23 = arith.cmpi eq, %21, %22 : vector<250x250xi32>
    %24 = arith.extui %23 : vector<250x250xi1> to vector<250x250xi32>
    %25 = arith.sitofp %24 : vector<250x250xi32> to vector<250x250xf32>
    %26 = vector.extract_strided_slice %6 {offsets = [0, 2], sizes = [250, 1], strides = [1, 1]} : vector<250x3xi32> to vector<250x1xi32>
    %27 = vector.extract_strided_slice %7 {offsets = [2, 0], sizes = [1, 250], strides = [1, 1]} : vector<3x250xi32> to vector<1x250xi32>
    %28 = vector.broadcast %26 : vector<250x1xi32> to vector<250x250xi32>
    %29 = vector.broadcast %27 : vector<1x250xi32> to vector<250x250xi32>
    %30 = arith.cmpi eq, %28, %29 : vector<250x250xi32>
    %31 = arith.extui %30 : vector<250x250xi1> to vector<250x250xi32>
    %32 = arith.sitofp %31 : vector<250x250xi32> to vector<250x250xf32>
    %cst_8 = arith.constant dense<0.000000e+00> : vector<250x1xf32>
    %33 = tpu.matmul %18, %2, %cst_8 {dimension_numbers = #tpu.dot_dimension_numbers<[1], [0], [0], [1], [0, 0, 1, 1], [], []>} : vector<250x250xf32>, vector<250x1xf32>, vector<250x1xf32> -> vector<250x1xf32>
    %cst_9 = arith.constant 8.000000e+02 : f32
    %34 = vector.broadcast %cst_9 : f32 to vector<250x1xf32>
    %35 = arith.divf %33, %34 : vector<250x1xf32>
    %cst_10 = arith.constant dense<0.000000e+00> : vector<250x1xf32>
    %36 = tpu.matmul %18, %5, %cst_10 {dimension_numbers = #tpu.dot_dimension_numbers<[1], [0], [0], [1], [0, 0, 1, 1], [], []>} : vector<250x250xf32>, vector<250x1xf32>, vector<250x1xf32> -> vector<250x1xf32>
    %cst_11 = arith.constant 8.000000e+02 : f32
    %37 = vector.broadcast %cst_11 : f32 to vector<250x1xf32>
    %38 = arith.divf %36, %37 : vector<250x1xf32>
    %39 = arith.mulf %35, %35 : vector<250x1xf32>
    %40 = arith.subf %38, %39 : vector<250x1xf32>
    %cst_12 = arith.constant 0.000000e+00 : f32
    %41 = vector.broadcast %cst_12 : f32 to vector<250x1xf32>
    %42 = arith.maximumf %40, %41 : vector<250x1xf32>
    %cst_13 = arith.constant 9.99999974E-6 : f32
    %43 = vector.broadcast %cst_13 : f32 to vector<250x1xf32>
    %44 = arith.addf %42, %43 : vector<250x1xf32>
    %45 = math.rsqrt %44 : vector<250x1xf32>
    %46 = arith.mulf %9, %45 : vector<250x1xf32>
    %cst_14 = arith.constant dense<0.000000e+00> : vector<250x1xf32>
    %47 = tpu.matmul %25, %2, %cst_14 {dimension_numbers = #tpu.dot_dimension_numbers<[1], [0], [0], [1], [0, 0, 1, 1], [], []>} : vector<250x250xf32>, vector<250x1xf32>, vector<250x1xf32> -> vector<250x1xf32>
    %cst_15 = arith.constant 8.000000e+01 : f32
    %48 = vector.broadcast %cst_15 : f32 to vector<250x1xf32>
    %49 = arith.divf %47, %48 : vector<250x1xf32>
    %cst_16 = arith.constant dense<0.000000e+00> : vector<250x1xf32>
    %50 = tpu.matmul %25, %5, %cst_16 {dimension_numbers = #tpu.dot_dimension_numbers<[1], [0], [0], [1], [0, 0, 1, 1], [], []>} : vector<250x250xf32>, vector<250x1xf32>, vector<250x1xf32> -> vector<250x1xf32>
    %cst_17 = arith.constant 8.000000e+01 : f32
    %51 = vector.broadcast %cst_17 : f32 to vector<250x1xf32>
    %52 = arith.divf %50, %51 : vector<250x1xf32>
    %53 = arith.mulf %49, %49 : vector<250x1xf32>
    %54 = arith.subf %52, %53 : vector<250x1xf32>
    %cst_18 = arith.constant 0.000000e+00 : f32
    %55 = vector.broadcast %cst_18 : f32 to vector<250x1xf32>
    %56 = arith.maximumf %54, %55 : vector<250x1xf32>
    %57 = arith.mulf %46, %46 : vector<250x1xf32>
    %58 = arith.mulf %57, %56 : vector<250x1xf32>
    %cst_19 = arith.constant 9.99999974E-6 : f32
    %59 = vector.broadcast %cst_19 : f32 to vector<250x1xf32>
    %60 = arith.addf %58, %59 : vector<250x1xf32>
    %61 = math.rsqrt %60 : vector<250x1xf32>
    %62 = arith.mulf %46, %61 : vector<250x1xf32>
    %cst_20 = arith.constant 1.600000e+01 : f32
    %63 = vector.broadcast %cst_20 : f32 to vector<250x1xf32>
    %64 = arith.mulf %63, %49 : vector<250x1xf32>
    %65 = arith.subf %2, %64 : vector<250x1xf32>
    %66 = arith.mulf %62, %65 : vector<250x1xf32>
    %67 = arith.mulf %62, %62 : vector<250x1xf32>
    %cst_21 = arith.constant 2.000000e+00 : f32
    %68 = vector.broadcast %cst_21 : f32 to vector<250x1xf32>
    %69 = arith.mulf %68, %49 : vector<250x1xf32>
    %70 = arith.mulf %69, %2 : vector<250x1xf32>
    %71 = arith.subf %5, %70 : vector<250x1xf32>
    %cst_22 = arith.constant 1.600000e+01 : f32
    %72 = vector.broadcast %cst_22 : f32 to vector<250x1xf32>
    %73 = arith.mulf %72, %49 : vector<250x1xf32>
    %74 = arith.mulf %73, %49 : vector<250x1xf32>
    %75 = arith.addf %71, %74 : vector<250x1xf32>
    %76 = arith.mulf %67, %75 : vector<250x1xf32>
    %cst_23 = arith.constant dense<0.000000e+00> : vector<250x1xf32>
    %77 = tpu.matmul %32, %66, %cst_23 {dimension_numbers = #tpu.dot_dimension_numbers<[1], [0], [0], [1], [0, 0, 1, 1], [], []>} : vector<250x250xf32>, vector<250x1xf32>, vector<250x1xf32> -> vector<250x1xf32>
    %cst_24 = arith.constant 3.200000e+01 : f32
    %78 = vector.broadcast %cst_24 : f32 to vector<250x1xf32>
    %79 = arith.divf %77, %78 : vector<250x1xf32>
    %cst_25 = arith.constant dense<0.000000e+00> : vector<250x1xf32>
    %80 = tpu.matmul %32, %76, %cst_25 {dimension_numbers = #tpu.dot_dimension_numbers<[1], [0], [0], [1], [0, 0, 1, 1], [], []>} : vector<250x250xf32>, vector<250x1xf32>, vector<250x1xf32> -> vector<250x1xf32>
    %cst_26 = arith.constant 3.200000e+01 : f32
    %81 = vector.broadcast %cst_26 : f32 to vector<250x1xf32>
    %82 = arith.divf %80, %81 : vector<250x1xf32>
    %83 = arith.mulf %79, %79 : vector<250x1xf32>
    %84 = arith.subf %82, %83 : vector<250x1xf32>
    %cst_27 = arith.constant 0.000000e+00 : f32
    %85 = vector.broadcast %cst_27 : f32 to vector<250x1xf32>
    %86 = arith.maximumf %84, %85 : vector<250x1xf32>
    %cst_28 = arith.constant 9.99999974E-6 : f32
    %87 = vector.broadcast %cst_28 : f32 to vector<250x1xf32>
    %88 = arith.addf %86, %87 : vector<250x1xf32>
    %89 = math.rsqrt %88 : vector<250x1xf32>
    %90 = arith.mulf %10, %89 : vector<250x1xf32>
    %91 = arith.mulf %62, %90 : vector<250x1xf32>
    %92 = arith.mulf %62, %49 : vector<250x1xf32>
    %93 = arith.addf %92, %79 : vector<250x1xf32>
    %94 = arith.mulf %90, %93 : vector<250x1xf32>
    %95 = arith.subf %11, %94 : vector<250x1xf32>
    %96 = vector.broadcast %91 : vector<250x1xf32> to vector<250x16xf32>
    %97 = arith.mulf %0, %96 : vector<250x16xf32>
    %98 = vector.broadcast %95 : vector<250x1xf32> to vector<250x16xf32>
    %99 = arith.addf %97, %98 : vector<250x16xf32>
    %c0_29 = arith.constant 0 : index
    %c0_30 = arith.constant 0 : index
    %100 = vector.load %arg5[%c0_29, %c0_30] : memref<250x16xf32, #tpu.memory_space<vmem>>, vector<250x16xf32>
    tpu.vector_store %arg5[%c0_29, %c0_30], %99 {strides = array<i32>} : memref<250x16xf32, #tpu.memory_space<vmem>>, vector<250x16xf32>,
    return
  }
  func.func @transform_0(%arg0: i32) -> (i32, i32) {
    %c0_i32 = arith.constant 0 : i32
    %c0_i32_0 = arith.constant 0 : i32
    %c0_i32_1 = arith.constant 0 : i32
    return %c0_i32, %c0_i32_0 : i32, i32
  }
  func.func @transform_1(%arg0: i32) -> (i32, i32) {
    %c0_i32 = arith.constant 0 : i32
    %c0_i32_0 = arith.constant 0 : i32
    %c0_i32_1 = arith.constant 0 : i32
    return %c0_i32, %c0_i32_0 : i32, i32
  }
  func.func @transform_2(%arg0: i32) -> (i32, i32) {
    %c0_i32 = arith.constant 0 : i32
    %c0_i32_0 = arith.constant 0 : i32
    %c0_i32_1 = arith.constant 0 : i32
    return %c0_i32, %c0_i32_0 : i32, i32
  }
  func.func @transform_3(%arg0: i32) -> (i32, i32) {
    %c0_i32 = arith.constant 0 : i32
    %c0_i32_0 = arith.constant 0 : i32
    %c0_i32_1 = arith.constant 0 : i32
    return %c0_i32, %c0_i32_0 : i32, i32
  }
  func.func @transform_4(%arg0: i32) -> (i32, i32) {
    %c0_i32 = arith.constant 0 : i32
    %c0_i32_0 = arith.constant 0 : i32
    %c0_i32_1 = arith.constant 0 : i32
    return %c0_i32, %c0_i32_0 : i32, i32
  }
}

</mosaic_0001>

<bundles_post_ra>
// kernel: net1_forward.1
= control target key start
LH: loop header
LB: loop body
LE: loop exit
PB: predicated region body
PF: predicated region fallthrough
CT: control target
= control target key end

     0   :  { %vm49_vm0 = vcmask 130048   ;;  %v10137_v30 = vmov 0   ;;  %v10139_v31 = vmov 0.0|0.0   ;;  %vm143_vm1 = vcmask 123904   ;;  %s6400_s11 = smov 1   ;;  %s6401_s14 = smov 127   ;;  %s10132_s0 = inlined_call_operand.vmem [shape: f32[250,16], index: 0, kind: input, shape index: {}]   ;;  %s10133_s1 = inlined_call_operand.vmem [shape: s32[250,3], index: 1, kind: input, shape index: {}]   ;;  %s10134_s2 = inlined_call_operand.vmem [shape: s32[3,250], index: 2, kind: input, shape index: {}]   ;;  %s10135_s3 = inlined_call_operand.vmem [shape: f32[250,3], index: 3, kind: input, shape index: {}]   ;;  %s10136_s4 = inlined_call_operand.vmem [shape: f32[250,16], index: 4, kind: output, shape index: {}]  }
   0x1   :  { %v17_v0 = vld [vmem:[%s10132_s0] sm:$0xff]  ;;  %v18_v1 = vld [vmem:[%s10132_s0 + $0x8] sm:$0xff]  ;;  %v19_v7 = vld [vmem:[%s10132_s0 + $0x10] sm:$0xff]  ;;  %6037 = vset.pattern.permute.xlu1 %v10137_v30  ;;  %6036 = vset.pattern.permute.xlu0 %v10137_v30  ;;  %vm1349_vm2 = vcmask 1041408   ;;  %vm6396_vm3 = vmmov 1   ;;  %vm1252_vm6 = vcmask 998400  }
   0x2   :  { %v50_v2 = vsel %vm49_vm0, %v17_v0, 0.0  ;;  %v147_v3 = vmul.f32 %v17_v0, %v17_v0  ;;  %v148_v4 = vmul.f32 %v18_v1, %v18_v1  ;;  %v53_v6 = vsel %vm49_vm0, %v18_v1, 0.0  ;;  %v20_v9 = vld [vmem:[%s10132_s0 + $0x18] sm:$0xff]  ;;  %v21_v15 = vld [vmem:[%s10132_s0 + $0x20] sm:$0xff]  ;;  %v22_v17 = vld [vmem:[%s10132_s0 + $0x28] sm:$0xff]  ;;  %5733 = vmatprep.subr.bf16.mxu0 %v10139_v31  ;;  %5782 = vmatprep.subr.bf16.mxu1 %v10139_v31 }
   0x3   :  { %51 = vadd.xlane.f32.xlu0 %v50_v2  ;;  %v56_v10 = vsel %vm49_vm0, %v19_v7, 0.0  ;;  %v149_v11 = vmul.f32 %v19_v7, %v19_v7  ;;  %v59_v12 = vsel %vm49_vm0, %v20_v9, 0.0  ;;  %v150_v13 = vmul.f32 %v20_v9, %v20_v9  ;;  %v23_v23 = vld [vmem:[%s10132_s0 + $0x30] sm:$0xff]  ;;  %v24_v25 = vld [vmem:[%s10132_s0 + $0x38] sm:$0xff]  ;;  %v25_v33 = vld [vmem:[%s10132_s0 + $0x40] sm:$0xff] }
   0x4   :  { %v179_v5 = vsel %vm49_vm0, %v147_v3, 0.0  ;;  %v182_v8 = vsel %vm49_vm0, %v148_v4, 0.0  ;;  %v62_v18 = vsel %vm49_vm0, %v21_v15, 0.0  ;;  %v151_v19 = vmul.f32 %v21_v15, %v21_v15  ;;  %v26_v35 = vld [vmem:[%s10132_s0 + $0x48] sm:$0xff]  ;;  %v27_v41 = vld [vmem:[%s10132_s0 + $0x50] sm:$0xff]  ;;  %v28_v43 = vld [vmem:[%s10132_s0 + $0x58] sm:$0xff] }
   0x5   :  { %180 = vadd.xlane.f32.xlu1 %v179_v5  ;;  %v185_v14 = vsel %vm49_vm0, %v149_v11, 0.0  ;;  %v188_v16 = vsel %vm49_vm0, %v150_v13, 0.0  ;;  %v65_v20 = vsel %vm49_vm0, %v22_v17, 0.0  ;;  %v152_v21 = vmul.f32 %v22_v17, %v22_v17  ;;  %v29_v49 = vld [vmem:[%s10132_s0 + $0x60] sm:$0xff]  ;;  %v30_v51 = vld [vmem:[%s10132_s0 + $0x68] sm:$0xff]  ;;  %v31_v57 = vld [vmem:[%s10132_s0 + $0x70] sm:$0xff] }
   0x6   :  { %v191_v22 = vsel %vm49_vm0, %v151_v19, 0.0  ;;  %v68_v26 = vsel %vm49_vm0, %v23_v23, 0.0  ;;  %v153_v27 = vmul.f32 %v23_v23, %v23_v23  ;;  %v71_v28 = vsel %vm49_vm0, %v24_v25, 0.0  ;;  %v32_v59 = vld [vmem:[%s10132_s0 + $0x78] sm:$0xff]  ;;  %v33_v1 = vld [vmem:[%s10132_s0 + $0x80] sm:$0xff]  ;;  %v34_v3 = vld [vmem:[%s10132_s0 + $0x88] sm:$0xff] }
   0x7   :  { %54 = vadd.xlane.f32.xlu0 %v53_v6  ;;  %v194_v24 = vsel %vm49_vm0, %v152_v21, 0.0  ;;  %v154_v29 = vmul.f32 %v24_v25, %v24_v25  ;;  %v74_v36 = vsel %vm49_vm0, %v25_v33, 0.0  ;;  %v155_v37 = vmul.f32 %v25_v33, %v25_v33  ;;  %v35_v9 = vld [vmem:[%s10132_s0 + $0x90] sm:$0xff]  ;;  %v36_v11 = vld [vmem:[%s10132_s0 + $0x98] sm:$0xff]  ;;  %v37_v17 = vld [vmem:[%s10132_s0 + $0xa0] sm:$0xff] }
   0x8   :  { %v197_v32 = vsel %vm49_vm0, %v153_v27, 0.0  ;;  %v77_v38 = vsel %vm49_vm0, %v26_v35, 0.0  ;;  %v156_v39 = vmul.f32 %v26_v35, %v26_v35  ;;  %v80_v44 = vsel %vm49_vm0, %v27_v41, 0.0  ;;  %v38_v19 = vld [vmem:[%s10132_s0 + $0xa8] sm:$0xff]  ;;  %v39_v25 = vld [vmem:[%s10132_s0 + $0xb0] sm:$0xff]  ;;  %v40_v27 = vld [vmem:[%s10132_s0 + $0xb8] sm:$0xff] }
   0x9   :  { %183 = vadd.xlane.f32.xlu1 %v182_v8  ;;  %v200_v34 = vsel %vm49_vm0, %v154_v29, 0.0  ;;  %v203_v40 = vsel %vm49_vm0, %v155_v37, 0.0  ;;  %v157_v45 = vmul.f32 %v27_v41, %v27_v41  ;;  %v83_v46 = vsel %vm49_vm0, %v28_v43, 0.0  ;;  %v41_v35 = vld [vmem:[%s10132_s0 + $0xc0] sm:$0xff]  ;;  %v42_v37 = vld [vmem:[%s10132_s0 + $0xc8] sm:$0xff]  ;;  %vm7115_vm4 = vmpackc.low %vm1349_vm2, %vm6396_vm3 }
   0xa   :  { %v206_v42 = vsel %vm49_vm0, %v156_v39, 0.0  ;;  %v158_v47 = vmul.f32 %v28_v43, %v28_v43  ;;  %v86_v52 = vsel %vm49_vm0, %v29_v49, 0.0  ;;  %v159_v53 = vmul.f32 %v29_v49, %v29_v49  ;;  %v43_v43 = vld [vmem:[%s10132_s0 + $0xd0] sm:$0xff] }
   0xb   :  { %57 = vadd.xlane.f32.xlu0 %v56_v10  ;;  %v209_v48 = vsel %vm49_vm0, %v157_v45, 0.0  ;;  %v89_v54 = vsel %vm49_vm0, %v30_v51, 0.0  ;;  %v160_v55 = vmul.f32 %v30_v51, %v30_v51  ;;  %v92_v60 = vsel %vm49_vm0, %v31_v57, 0.0  ;;  %v44_v45 = vld [vmem:[%s10132_s0 + $0xd8] sm:$0xff]  ;;  %v45_v51 = vld [vmem:[%s10132_s0 + $0xe0] sm:$0xff] }
   0xc   :  { %v212_v50 = vsel %vm49_vm0, %v158_v47, 0.0  ;;  %v215_v56 = vsel %vm49_vm0, %v159_v53, 0.0  ;;  %v161_v61 = vmul.f32 %v31_v57, %v31_v57  ;;  %v95_v62 = vsel %vm49_vm0, %v32_v59, 0.0  ;;  %v46_v53 = vld [vmem:[%s10132_s0 + $0xe8] sm:$0xff] }
   0xd   :  { %60 = vadd.xlane.f32.xlu1 %v59_v12  ;;  %v218_v58 = vsel %vm49_vm0, %v160_v55, 0.0  ;;  %v162_v63 = vmul.f32 %v32_v59, %v32_v59  ;;  %v98_v4 = vsel %vm49_vm0, %v33_v1, 0.0  ;;  %v163_v5 = vmul.f32 %v33_v1, %v33_v1  ;;  %v47_v59 = vld [vmem:[%s10132_s0 + $0xf0] sm:$0xff] }
   0xe   :  { %v221_v0 = vsel %vm49_vm0, %v161_v61, 0.0  ;;  %v101_v6 = vsel %vm49_vm0, %v34_v3, 0.0  ;;  %v164_v7 = vmul.f32 %v34_v3, %v34_v3  ;;  %v104_v12 = vsel %vm49_vm0, %v35_v9, 0.0  ;;  %v48_v61 = vld [vmem:[%s10132_s0 + $0xf8] sm:$0x3] }
   0xf   :  { %186 = vadd.xlane.f32.xlu0 %v185_v14  ;;  %v224_v2 = vsel %vm49_vm0, %v162_v63, 0.0  ;;  %v227_v8 = vsel %vm49_vm0, %v163_v5, 0.0  ;;  %v165_v13 = vmul.f32 %v35_v9, %v35_v9  ;;  %v107_v14 = vsel %vm49_vm0, %v36_v11, 0.0 }
  0x10   :  { %v230_v10 = vsel %vm49_vm0, %v164_v7, 0.0  ;;  %v166_v15 = vmul.f32 %v36_v11, %v36_v11  ;;  %v167_v21 = vmul.f32 %v37_v17, %v37_v17  ;;  %v168_v23 = vmul.f32 %v38_v19, %v38_v19  ;;  %v6604_v7 = vld [vmem:[%s10133_s1] sm:$0xff] }
  0x11   :  { %189 = vadd.xlane.f32.xlu1 %v188_v16  ;;  %v233_v16 = vsel %vm49_vm0, %v165_v13, 0.0  ;;  %v169_v29 = vmul.f32 %v39_v25, %v39_v25  ;;  %v170_v33 = vmul.f32 %v40_v27, %v40_v27  ;;  %v171_v39 = vmul.f32 %v41_v35, %v41_v35  ;;  %v6630_v13 = vld [vmem:[%s10133_s1 + $0x18] sm:$0xff] }
  0x12   :  { %v172_v41 = vmul.f32 %v42_v37, %v42_v37  ;;  %v173_v47 = vmul.f32 %v43_v43, %v43_v43  ;;  %v174_v49 = vmul.f32 %v44_v45, %v44_v45  ;;  %v175_v55 = vmul.f32 %v45_v51, %v45_v51 }
  0x13   :  { %63 = vadd.xlane.f32.xlu0 %v62_v18  ;;  %v236_v18 = vsel %vm49_vm0, %v166_v15, 0.0  ;;  %v176_v57 = vmul.f32 %v46_v53, %v46_v53  ;;  %v177_v63 = vmul.f32 %v47_v59, %v47_v59  ;;  %v178_v1 = vmul.f32 %v48_v61, %v48_v61 }
  0x15   :  { %66 = vadd.xlane.f32.xlu1 %v65_v20  ;;  %v110_v20 = vsel %vm49_vm0, %v37_v17, 0.0  ;;  %v272_v3 = vsel %vm143_vm1, %v178_v1, 0.0  ;;  %v6647_v17 = vld [vmem:[%s10133_s1 + $0x58] sm:$0xff] }
  0x17   :  { %192 = vadd.xlane.f32.xlu0 %v191_v22  ;;  %v113_v22 = vsel %vm49_vm0, %v38_v19, 0.0  ;;  %v6657_v19 = vld [vmem:[%s10133_s1 + $0x20] sm:$0xff] }
  0x19   :  { %195 = vadd.xlane.f32.xlu1 %v194_v24  ;;  %v239_v24 = vsel %vm49_vm0, %v167_v21, 0.0 }
  0x1b   :  { %69 = vadd.xlane.f32.xlu0 %v68_v26  ;;  %v242_v26 = vsel %vm49_vm0, %v168_v23, 0.0 }
  0x1d   :  { %72 = vadd.xlane.f32.xlu1 %v71_v28  ;;  %v116_v28 = vsel %vm49_vm0, %v39_v25, 0.0 }
  0x1f   :  { %198 = vadd.xlane.f32.xlu0 %v197_v32  ;;  %v119_v32 = vsel %vm49_vm0, %v40_v27, 0.0  ;;  %v6691_v27 = vld [vmem:[%s10133_s1 + $0x78] sm:$0xff] }
  0x21   :  { %201 = vadd.xlane.f32.xlu1 %v200_v34  ;;  %v245_v34 = vsel %vm49_vm0, %v169_v29, 0.0  ;;  %v6701_v29 = vld [vmem:[%s10133_s1 + $0x30] sm:$0xff] }
  0x23   :  { %75 = vadd.xlane.f32.xlu0 %v74_v36  ;;  %v248_v36 = vsel %vm49_vm0, %v170_v33, 0.0 }
  0x25   :  { %78 = vadd.xlane.f32.xlu1 %v77_v38  ;;  %v122_v38 = vsel %vm49_vm0, %v41_v35, 0.0 }
  0x27   :  { %204 = vadd.xlane.f32.xlu0 %v203_v40  ;;  %v125_v40 = vsel %vm49_vm0, %v42_v37, 0.0 }
  0x29   :  { %207 = vadd.xlane.f32.xlu1 %v206_v42  ;;  %v251_v42 = vsel %vm49_vm0, %v171_v39, 0.0  ;;  %v6735_v39 = vld [vmem:[%s10133_s1 + $0x98] sm:$0xff] }
  0x2b   :  { %81 = vadd.xlane.f32.xlu0 %v80_v44  ;;  %v254_v44 = vsel %vm49_vm0, %v172_v41, 0.0  ;;  %v6745_v41 = vld [vmem:[%s10133_s1 + $0x40] sm:$0xff] }
  0x2d   :  { %84 = vadd.xlane.f32.xlu1 %v83_v46  ;;  %v128_v46 = vsel %vm49_vm0, %v43_v43, 0.0 }
  0x2f   :  { %210 = vadd.xlane.f32.xlu0 %v209_v48  ;;  %v131_v48 = vsel %vm49_vm0, %v44_v45, 0.0 }
  0x31   :  { %213 = vadd.xlane.f32.xlu1 %v212_v50  ;;  %v257_v50 = vsel %vm49_vm0, %v173_v47, 0.0 }
  0x33   :  { %87 = vadd.xlane.f32.xlu0 %v86_v52  ;;  %v260_v52 = vsel %vm49_vm0, %v174_v49, 0.0  ;;  %v6779_v49 = vld [vmem:[%s10133_s1 + $0xb8] sm:$0xff] }
  0x35   :  { %90 = vadd.xlane.f32.xlu1 %v89_v54  ;;  %v134_v54 = vsel %vm49_vm0, %v45_v51, 0.0  ;;  %v6789_v51 = vld [vmem:[%s10133_s1 + $0x60] sm:$0xff] }
  0x37   :  { %216 = vadd.xlane.f32.xlu0 %v215_v56  ;;  %v137_v56 = vsel %vm49_vm0, %v46_v53, 0.0 }
  0x39   :  { %219 = vadd.xlane.f32.xlu1 %v218_v58  ;;  %v263_v58 = vsel %vm49_vm0, %v175_v55, 0.0 }
  0x3b   :  { %93 = vadd.xlane.f32.xlu0 %v92_v60  ;;  %v266_v60 = vsel %vm49_vm0, %v176_v57, 0.0 }
  0x3d   :  { %96 = vadd.xlane.f32.xlu1 %v95_v62  ;;  %v140_v62 = vsel %vm49_vm0, %v47_v59, 0.0  ;;  %v6823_v59 = vld [vmem:[%s10133_s1 + $0xd8] sm:$0xff] }
  0x3f   :  { %222 = vadd.xlane.f32.xlu0 %v221_v0  ;;  %v144_v0 = vsel %vm143_vm1, %v48_v61, 0.0  ;;  %v6833_v61 = vld [vmem:[%s10133_s1 + $0x80] sm:$0xff] }
  0x41   :  { %225 = vadd.xlane.f32.xlu1 %v224_v2  ;;  %v269_v2 = vsel %vm49_vm0, %v177_v63, 0.0 }
  0x43   :  { %99 = vadd.xlane.f32.xlu0 %v98_v4  ;;  %v6594_v4 = vld [vmem:[%s10133_s1 + $0x8] sm:$0xff] }
  0x45   :  { %102 = vadd.xlane.f32.xlu1 %v101_v6 }
  0x47   :  { %228 = vadd.xlane.f32.xlu0 %v227_v8  ;;  %v6609_v8 = vld [vmem:[%s10133_s1 + $0x10] sm:$0xff] }
  0x49   :  { %231 = vadd.xlane.f32.xlu1 %v230_v10 }
  0x4b   :  { %105 = vadd.xlane.f32.xlu0 %v104_v12  ;;  %v6624_v12 = vld [vmem:[%s10133_s1 + $0x48] sm:$0xff] }
  0x4d   :  { %108 = vadd.xlane.f32.xlu1 %v107_v14 }
  0x4f   :  { %234 = vadd.xlane.f32.xlu0 %v233_v16 }
  0x51   :  { %237 = vadd.xlane.f32.xlu1 %v236_v18 }
  0x53   :  { %111 = vadd.xlane.f32.xlu0 %v110_v20 }
  0x55   :  { %114 = vadd.xlane.f32.xlu1 %v113_v22  ;;  %v6669_v22 = vld [vmem:[%s10133_s1 + $0x68] sm:$0xff] }
  0x57   :  { %240 = vadd.xlane.f32.xlu0 %v239_v24  ;;  %v6679_v24 = vld [vmem:[%s10133_s1 + $0x28] sm:$0xff] }
  0x59   :  { %243 = vadd.xlane.f32.xlu1 %v242_v26 }
  0x5b   :  { %117 = vadd.xlane.f32.xlu0 %v116_v28 }
  0x5d   :  { %120 = vadd.xlane.f32.xlu1 %v119_v32 }
  0x5f   :  { %246 = vadd.xlane.f32.xlu0 %v245_v34  ;;  %v6713_v34 = vld [vmem:[%s10133_s1 + $0x88] sm:$0xff] }
  0x61   :  { %249 = vadd.xlane.f32.xlu1 %v248_v36  ;;  %v6723_v36 = vld [vmem:[%s10133_s1 + $0x38] sm:$0xff] }
  0x63   :  { %123 = vadd.xlane.f32.xlu0 %v122_v38 }
  0x65   :  { %126 = vadd.xlane.f32.xlu1 %v125_v40 }
  0x67   :  { %252 = vadd.xlane.f32.xlu0 %v251_v42 }
  0x69   :  { %255 = vadd.xlane.f32.xlu1 %v254_v44  ;;  %v6757_v44 = vld [vmem:[%s10133_s1 + $0xa8] sm:$0xff] }
  0x6b   :  { %129 = vadd.xlane.f32.xlu0 %v128_v46  ;;  %v6767_v46 = vld [vmem:[%s10133_s1 + $0x50] sm:$0xff] }
  0x6d   :  { %132 = vadd.xlane.f32.xlu1 %v131_v48 }
  0x6f   :  { %258 = vadd.xlane.f32.xlu0 %v257_v50 }
  0x71   :  { %261 = vadd.xlane.f32.xlu1 %v260_v52 }
  0x73   :  { %135 = vadd.xlane.f32.xlu0 %v134_v54  ;;  %v6801_v54 = vld [vmem:[%s10133_s1 + $0xc8] sm:$0xff] }
  0x75   :  { %138 = vadd.xlane.f32.xlu1 %v137_v56  ;;  %v6811_v56 = vld [vmem:[%s10133_s1 + $0x70] sm:$0xff] }
  0x77   :  { %264 = vadd.xlane.f32.xlu0 %v263_v58 }
  0x79   :  { %267 = vadd.xlane.f32.xlu1 %v266_v60 }
  0x7b   :  { %141 = vadd.xlane.f32.xlu0 %v140_v62 }
  0x7d   :  { %145 = vadd.xlane.f32.xlu1 %v144_v0  ;;  %v6845_v0 = vld [vmem:[%s10133_s1 + $0xe8] sm:$0xff] }
  0x7f   :  { %270 = vadd.xlane.f32.xlu0 %v269_v2  ;;  %v6855_v2 = vld [vmem:[%s10133_s1 + $0x90] sm:$0xff] }
  0x81   :  { %273 = vadd.xlane.f32.xlu1 %v272_v3 }
  0x90   :  { %v6596_v5 = vpop.xlane.xlu0 %51 }
  0x92   :  { %344 = vperm.xlu1 %6037, %v6594_v4   ;;  %v6599_v6 = vpop.xlane.xlu1 %180 }
  0x94   :  { %v6611_v9 = vpop.xlane.xlu0 %54 }
  0x95   :  { %341 = vperm.xlu0 %6036, %v6604_v7   ;;  %v6616_v10 = vpack.c.bf16 %v6611_v9, %v6596_v5 }
  0x96   :  { %347 = vperm.xlu1 %6037, %v6609_v8   ;;  %v6619_v11 = vpop.xlane.xlu1 %183 }
  0x97   :  { %5735 = vmatpush1.bf16.msra.mxu0 %v6616_v10  ;;  %v6634_v14 = vpack.c.bf16 %v6619_v11, %v6599_v6 }
  0x98   :  { %v6636_v15 = vpop.xlane.xlu0 %57  ;;  %5736 = vmatprep.subr.bf16.mxu0 %v10139_v31 }
  0x99   :  { %368 = vperm.xlu0 %6036, %v6624_v12   ;;  %5784 = vmatpush1.bf16.msra.mxu1 %v6634_v14 }
  0x9a   :  { %350 = vperm.xlu1 %6037, %v6630_v13   ;;  %v6642_v16 = vpop.xlane.xlu1 %60  ;;  %5785 = vmatprep.subr.bf16.mxu1 %v10139_v31 }
  0x9b   :  { %v6652_v18 = vpack.c.bf16 %v6642_v16, %v6636_v15 }
  0x9c   :  { %v6659_v20 = vpop.xlane.xlu0 %186 }
  0x9d   :  { %10334 = vst [vmem:[#allocation2_spill] sm:$0xff] %v6659_v20  ;;  %374 = vperm.xlu0 %6036, %v6647_v17   ;;  %5738 = vmatpush1.bf16.msra.mxu0 %v6652_v18 }
  0x9e   :  { %353 = vperm.xlu1 %6037, %v6657_v19   ;;  %v6664_v21 = vpop.xlane.xlu1 %189  ;;  %5739 = vmatprep.subr.bf16.mxu0 %v10139_v31 }
  0x9f   :  { %10335 = vst [vmem:[#allocation3_spill] sm:$0xff] %v6664_v21  ;;  %v6674_v23 = vpack.c.bf16 %v6664_v21, %v6659_v20 }
  0xa0   :  { %v6681_v25 = vpop.xlane.xlu0 %63 }
  0xa1   :  { %10336 = vst [vmem:[#allocation4_spill] sm:$0xff] %v6681_v25  ;;  %380 = vperm.xlu0 %6036, %v6669_v22   ;;  %5787 = vmatpush1.bf16.msra.mxu1 %v6674_v23 }
  0xa2   :  { %356 = vperm.xlu1 %6037, %v6679_v24   ;;  %v6686_v26 = vpop.xlane.xlu1 %66  ;;  %5788 = vmatprep.subr.bf16.mxu1 %v10139_v31 }
  0xa3   :  { %10337 = vst [vmem:[#allocation5_spill] sm:$0xff] %v6686_v26  ;;  %v6696_v28 = vpack.c.bf16 %v6686_v26, %v6681_v25 }
  0xa4   :  { %v6703_v32 = vpop.xlane.xlu0 %192 }
  0xa5   :  { %10338 = vst [vmem:[#allocation6_spill] sm:$0xff] %v6703_v32  ;;  %386 = vperm.xlu0 %6036, %v6691_v27   ;;  %5741 = vmatpush1.bf16.msra.mxu0 %v6696_v28 }
  0xa6   :  { %359 = vperm.xlu1 %6037, %v6701_v29   ;;  %v6708_v33 = vpop.xlane.xlu1 %195  ;;  %5742 = vmatprep.subr.bf16.mxu0 %v10139_v31 }
  0xa7   :  { %10339 = vst [vmem:[#allocation7_spill] sm:$0xff] %v6708_v33  ;;  %v6718_v35 = vpack.c.bf16 %v6708_v33, %v6703_v32 }
  0xa8   :  { %v6725_v37 = vpop.xlane.xlu0 %69 }
  0xa9   :  { %10340 = vst [vmem:[#allocation8_spill] sm:$0xff] %v6725_v37  ;;  %392 = vperm.xlu0 %6036, %v6713_v34   ;;  %5790 = vmatpush1.bf16.msra.mxu1 %v6718_v35 }
  0xaa   :  { %362 = vperm.xlu1 %6037, %v6723_v36   ;;  %v6730_v38 = vpop.xlane.xlu1 %72  ;;  %5791 = vmatprep.subr.bf16.mxu1 %v10139_v31 }
  0xab   :  { %10341 = vst [vmem:[#allocation9_spill] sm:$0xff] %v6730_v38  ;;  %v6740_v40 = vpack.c.bf16 %v6730_v38, %v6725_v37 }
  0xac   :  { %v6747_v42 = vpop.xlane.xlu0 %198 }
  0xad   :  { %10342 = vst [vmem:[#allocation10_spill] sm:$0xff] %v6747_v42  ;;  %398 = vperm.xlu0 %6036, %v6735_v39   ;;  %5744 = vmatpush1.bf16.msra.mxu0 %v6740_v40 }
  0xae   :  { %365 = vperm.xlu1 %6037, %v6745_v41   ;;  %v6752_v43 = vpop.xlane.xlu1 %201  ;;  %5745 = vmatprep.subr.bf16.mxu0 %v10139_v31 }
  0xaf   :  { %10343 = vst [vmem:[#allocation11_spill] sm:$0xff] %v6752_v43  ;;  %v6762_v45 = vpack.c.bf16 %v6752_v43, %v6747_v42 }
  0xb0   :  { %v6769_v47 = vpop.xlane.xlu0 %75 }
  0xb1   :  { %10344 = vst [vmem:[#allocation12_spill] sm:$0xff] %v6769_v47  ;;  %404 = vperm.xlu0 %6036, %v6757_v44   ;;  %5793 = vmatpush1.bf16.msra.mxu1 %v6762_v45 }
  0xb2   :  { %371 = vperm.xlu1 %6037, %v6767_v46   ;;  %v6774_v48 = vpop.xlane.xlu1 %78  ;;  %5794 = vmatprep.subr.bf16.mxu1 %v10139_v31 }
  0xb3   :  { %10345 = vst [vmem:[#allocation13_spill] sm:$0xff] %v6774_v48  ;;  %v6784_v50 = vpack.c.bf16 %v6774_v48, %v6769_v47  ;;  %v6395_v48 = vmov 1  }
  0xb4   :  { %v6791_v52 = vpop.xlane.xlu0 %204 }
  0xb5   :  { %10346 = vst [vmem:[#allocation14_spill] sm:$0xff] %v6791_v52  ;;  %410 = vperm.xlu0 %6036, %v6779_v49   ;;  %5747 = vmatpush1.bf16.msra.mxu0 %v6784_v50 }
  0xb6   :  { %377 = vperm.xlu1 %6037, %v6789_v51   ;;  %v6796_v53 = vpop.xlane.xlu1 %207  ;;  %5748 = vmatprep.subr.bf16.mxu0 %v10139_v31 }
  0xb7   :  { %10347 = vst [vmem:[#allocation15_spill] sm:$0xff] %v6796_v53  ;;  %v6806_v55 = vpack.c.bf16 %v6796_v53, %v6791_v52 }
  0xb8   :  { %v6813_v57 = vpop.xlane.xlu0 %81 }
  0xb9   :  { %10348 = vst [vmem:[#allocation16_spill] sm:$0xff] %v6813_v57  ;;  %416 = vperm.xlu0 %6036, %v6801_v54   ;;  %5796 = vmatpush1.bf16.msra.mxu1 %v6806_v55 }
  0xba   :  { %383 = vperm.xlu1 %6037, %v6811_v56   ;;  %v6818_v58 = vpop.xlane.xlu1 %84  ;;  %5797 = vmatprep.subr.bf16.mxu1 %v10139_v31 }
  0xbb   :  { %10349 = vst [vmem:[#allocation17_spill] sm:$0xff] %v6818_v58  ;;  %v6828_v60 = vpack.c.bf16 %v6818_v58, %v6813_v57  ;;  %v6877_v58 = vld [vmem:[%s10133_s1 + $0xa0] sm:$0xff] }
  0xbc   :  { %v6835_v62 = vpop.xlane.xlu0 %210 }
  0xbd   :  { %10350 = vst [vmem:[#allocation18_spill] sm:$0xff] %v6835_v62  ;;  %422 = vperm.xlu0 %6036, %v6823_v59   ;;  %5750 = vmatpush1.bf16.msra.mxu0 %v6828_v60 }
  0xbe   :  { %389 = vperm.xlu1 %6037, %v6833_v61   ;;  %v6840_v63 = vpop.xlane.xlu1 %213  ;;  %5751 = vmatprep.subr.bf16.mxu0 %v10139_v31  ;;  %v6867_v31 = vld [vmem:[%s10133_s1 + $0xf8] sm:$0x3] }
  0xbf   :  { %10351 = vst [vmem:[#allocation19_spill] sm:$0xff] %v6840_v63  ;;  %v6850_v1 = vpack.c.bf16 %v6840_v63, %v6835_v62  ;;  %v10354_v63 = vmov 0.0|0.0  }
  0xc0   :  { %v6857_v3 = vpop.xlane.xlu0 %87 }
  0xc1   :  { %10352 = vst [vmem:[#allocation20_spill] sm:$0xff] %v6857_v3  ;;  %428 = vperm.xlu0 %6036, %v6845_v0   ;;  %5799 = vmatpush1.bf16.msra.mxu1 %v6850_v1 }
  0xc2   :  { %395 = vperm.xlu1 %6037, %v6855_v2   ;;  %v6862_v30 = vpop.xlane.xlu1 %90  ;;  %5800 = vmatprep.subr.bf16.mxu1 %v10354_v63 }
  0xc3   :  { %10353 = vst [vmem:[#allocation21_spill] sm:$0xff] %v6862_v30  ;;  %v6872_v62 = vpack.c.bf16 %v6862_v30, %v6857_v3  ;;  %v6894_v3 = vld [vmem:[%s10133_s1 + $0xb0] sm:$0xff] }
  0xc4   :  { %v6879_v57 = vpop.xlane.xlu0 %216 }
  0xc5   :  { %10355 = vst [vmem:[#allocation22_spill] sm:$0xff] %v6879_v57  ;;  %434 = vperm.xlu0 %6036, %v6867_v31   ;;  %5753 = vmatpush1.bf16.msra.mxu0 %v6872_v62 }
  0xc6   :  { %401 = vperm.xlu1 %6037, %v6877_v58   ;;  %v6884_v53 = vpop.xlane.xlu1 %219  ;;  %5754 = vmatprep.subr.bf16.mxu0 %v10354_v63 }
  0xc7   :  { %10356 = vst [vmem:[#allocation23_spill] sm:$0xff] %v6884_v53  ;;  %v6889_v30 = vpack.c.bf16 %v6884_v53, %v6879_v57  ;;  %v6910_v57 = vld [vmem:[%s10133_s1 + $0xc0] sm:$0xff] }
  0xc8   :  { %v6896_v52 = vpop.xlane.xlu0 %93 }
  0xc9   :  { %10357 = vst [vmem:[#allocation24_spill] sm:$0xff] %v6896_v52  ;;  %5802 = vmatpush1.bf16.msra.mxu1 %v6889_v30  ;;  %6039 = vset.pattern.permute.xlu0 %v6395_v48 }
  0xca   :  { %407 = vperm.xlu1 %6037, %v6894_v3   ;;  %v6900_v47 = vpop.xlane.xlu1 %96  ;;  %5803 = vmatprep.subr.bf16.mxu1 %v10354_v63 }
  0xcb   :  { %10358 = vst [vmem:[#allocation25_spill] sm:$0xff] %v6900_v47  ;;  %v6905_v53 = vpack.c.bf16 %v6900_v47, %v6896_v52  ;;  %648 = vperm.xlu0 %6039, %v6594_v4   ;;  %v6927_v52 = vld [vmem:[%s10133_s1 + $0xd0] sm:$0xff] }
  0xcc   :  { %v6913_v43 = vpop.xlane.xlu0 %222 }
  0xcd   :  { %10359 = vst [vmem:[#allocation26_spill] sm:$0xff] %v6913_v43  ;;  %5756 = vmatpush1.bf16.msra.mxu0 %v6905_v53 }
  0xce   :  { %413 = vperm.xlu1 %6037, %v6910_v57   ;;  %v6917_v42 = vpop.xlane.xlu1 %225  ;;  %5757 = vmatprep.subr.bf16.mxu0 %v10354_v63 }
  0xcf   :  { %10360 = vst [vmem:[#allocation27_spill] sm:$0xff] %v6917_v42  ;;  %v6922_v47 = vpack.c.bf16 %v6917_v42, %v6913_v43  ;;  %657 = vperm.xlu0 %6039, %v6657_v19   ;;  %v6944_v43 = vld [vmem:[%s10133_s1 + $0xe0] sm:$0xff] }
  0xd0   :  { %v6930_v4 = vpop.xlane.xlu0 %99 }
  0xd1   :  { %10361 = vst [vmem:[#allocation28_spill] sm:$0xff] %v6930_v4  ;;  %5805 = vmatpush1.bf16.msra.mxu1 %v6922_v47 }
  0xd2   :  { %419 = vperm.xlu1 %6037, %v6927_v52   ;;  %v6934_v38 = vpop.xlane.xlu1 %102  ;;  %5806 = vmatprep.subr.bf16.mxu1 %v10354_v63 }
  0xd3   :  { %10362 = vst [vmem:[#allocation29_spill] sm:$0xff] %v6934_v38  ;;  %v6939_v42 = vpack.c.bf16 %v6934_v38, %v6930_v4  ;;  %663 = vperm.xlu0 %6039, %v6701_v29   ;;  %v6961_v4 = vld [vmem:[%s10133_s1 + $0xf0] sm:$0xff] }
  0xd4   :  { %v6947_v19 = vpop.xlane.xlu0 %228 }
  0xd5   :  { %10363 = vst [vmem:[#allocation30_spill] sm:$0xff] %v6947_v19  ;;  %5759 = vmatpush1.bf16.msra.mxu0 %v6939_v42 }
  0xd6   :  { %425 = vperm.xlu1 %6037, %v6944_v43   ;;  %v6951_v37 = vpop.xlane.xlu1 %231  ;;  %5760 = vmatprep.subr.bf16.mxu0 %v10354_v63 }
  0xd7   :  { %10364 = vst [vmem:[#allocation31_spill] sm:$0xff] %v6951_v37  ;;  %v6956_v38 = vpack.c.bf16 %v6951_v37, %v6947_v19  ;;  %669 = vperm.xlu0 %6039, %v6745_v41  }
  0xd8   :  { %v6964_v29 = vpop.xlane.xlu0 %105 }
  0xd9   :  { %10365 = vst [vmem:[#allocation32_spill] sm:$0xff] %v6964_v29  ;;  %5808 = vmatpush1.bf16.msra.mxu1 %v6956_v38 }
  0xda   :  { %431 = vperm.xlu1 %6037, %v6961_v4   ;;  %v6968_v33 = vpop.xlane.xlu1 %108  ;;  %5809 = vmatprep.subr.bf16.mxu1 %v10354_v63 }
  0xdb   :  { %10366 = vst [vmem:[#allocation33_spill] sm:$0xff] %v6968_v33  ;;  %v6973_v37 = vpack.c.bf16 %v6968_v33, %v6964_v29  ;;  %675 = vperm.xlu0 %6039, %v6767_v46  }
  0xdc   :  { %v6976_v19 = vpop.xlane.xlu0 %234 }
  0xdd   :  { %10367 = vst [vmem:[#allocation34_spill] sm:$0xff] %v6976_v19  ;;  %5762 = vmatpush1.bf16.msra.mxu0 %v6973_v37 }
  0xde   :  { %6038 = vset.pattern.permute.xlu1 %v6395_v48  ;;  %v6979_v41 = vpop.xlane.xlu1 %237  ;;  %5763 = vmatprep.subr.bf16.mxu0 %v10354_v63 }
  0xdf   :  { %10368 = vst [vmem:[#allocation35_spill] sm:$0xff] %v6979_v41  ;;  %v6984_v32 = vpack.c.bf16 %v6979_v41, %v6976_v19  ;;  %645 = vperm.xlu1 %6038, %v6604_v7   ;;  %681 = vperm.xlu0 %6039, %v6789_v51  }
  0xe0   :  { %v6988_v33 = vpop.xlane.xlu0 %111 }
  0xe1   :  { %10369 = vst [vmem:[#allocation36_spill] sm:$0xff] %v6988_v33  ;;  %5811 = vmatpush1.bf16.msra.mxu1 %v6984_v32 }
  0xe2   :  { %v6991_v46 = vpop.xlane.xlu1 %114  ;;  %5812 = vmatprep.subr.bf16.mxu1 %v10354_v63 }
  0xe3   :  { %10370 = vst [vmem:[#allocation37_spill] sm:$0xff] %v6991_v46  ;;  %651 = vperm.xlu1 %6038, %v6609_v8   ;;  %v6997_v48 = vpack.c.bf16 %v6991_v46, %v6988_v33  ;;  %687 = vperm.xlu0 %6039, %v6811_v56  }
  0xe4   :  { %v7000_v41 = vpop.xlane.xlu0 %240 }
  0xe5   :  { %10371 = vst [vmem:[#allocation38_spill] sm:$0xff] %v7000_v41  ;;  %5765 = vmatpush1.bf16.msra.mxu0 %v6997_v48 }
  0xe6   :  { %v7003_v7 = vpop.xlane.xlu1 %243  ;;  %5766 = vmatprep.subr.bf16.mxu0 %v10354_v63 }
  0xe7   :  { %10372 = vst [vmem:[#allocation39_spill] sm:$0xff] %v7003_v7  ;;  %v7008_v51 = vpack.c.bf16 %v7003_v7, %v7000_v41  ;;  %654 = vperm.xlu1 %6038, %v6630_v13   ;;  %693 = vperm.xlu0 %6039, %v6833_v61  }
  0xe8   :  { %v7012_v8 = vpop.xlane.xlu0 %117 }
  0xe9   :  { %10373 = vst [vmem:[#allocation40_spill] sm:$0xff] %v7012_v8  ;;  %5814 = vmatpush1.bf16.msra.mxu1 %v7008_v51 }
  0xea   :  { %v7015_v56 = vpop.xlane.xlu1 %120  ;;  %5815 = vmatprep.subr.bf16.mxu1 %v10354_v63 }
  0xeb   :  { %10374 = vst [vmem:[#allocation41_spill] sm:$0xff] %v7015_v56  ;;  %660 = vperm.xlu1 %6038, %v6679_v24   ;;  %v7021_v46 = vpack.c.bf16 %v7015_v56, %v7012_v8  ;;  %699 = vperm.xlu0 %6039, %v6855_v2  }
  0xec   :  { %v7024_v7 = vpop.xlane.xlu0 %246 }
  0xed   :  { %10375 = vst [vmem:[#allocation42_spill] sm:$0xff] %v7024_v7  ;;  %5768 = vmatpush1.bf16.msra.mxu0 %v7021_v46 }
  0xee   :  { %v7027_v13 = vpop.xlane.xlu1 %249  ;;  %5769 = vmatprep.subr.bf16.mxu0 %v10354_v63 }
  0xef   :  { %10376 = vst [vmem:[#allocation43_spill] sm:$0xff] %v7027_v13  ;;  %v7032_v61 = vpack.c.bf16 %v7027_v13, %v7024_v7  ;;  %666 = vperm.xlu1 %6038, %v6723_v36   ;;  %705 = vperm.xlu0 %6039, %v6877_v58  }
  0xf0   :  { %v7036_v24 = vpop.xlane.xlu0 %123 }
  0xf1   :  { %10377 = vst [vmem:[#allocation44_spill] sm:$0xff] %v7036_v24  ;;  %5817 = vmatpush1.bf16.msra.mxu1 %v7032_v61 }
  0xf2   :  { %v7039_v2 = vpop.xlane.xlu1 %126  ;;  %5818 = vmatprep.subr.bf16.mxu1 %v10354_v63 }
  0xf3   :  { %10378 = vst [vmem:[#allocation45_spill] sm:$0xff] %v7039_v2  ;;  %672 = vperm.xlu1 %6038, %v6624_v12   ;;  %v7045_v41 = vpack.c.bf16 %v7039_v2, %v7036_v24  ;;  %711 = vperm.xlu0 %6039, %v6894_v3  }
  0xf4   :  { %v7048_v13 = vpop.xlane.xlu0 %252 }
  0xf5   :  { %10379 = vst [vmem:[#allocation46_spill] sm:$0xff] %v7048_v13  ;;  %5771 = vmatpush1.bf16.msra.mxu0 %v7045_v41 }
  0xf6   :  { %v7051_v36 = vpop.xlane.xlu1 %255  ;;  %5772 = vmatprep.subr.bf16.mxu0 %v10354_v63 }
  0xf7   :  { %10380 = vst [vmem:[#allocation47_spill] sm:$0xff] %v7051_v36  ;;  %v7056_v58 = vpack.c.bf16 %v7051_v36, %v7048_v13  ;;  %678 = vperm.xlu1 %6038, %v6647_v17   ;;  %717 = vperm.xlu0 %6039, %v6910_v57  }
  0xf8   :  { %v7060_v12 = vpop.xlane.xlu0 %129 }
  0xf9   :  { %10381 = vst [vmem:[#allocation48_spill] sm:$0xff] %v7060_v12  ;;  %5820 = vmatpush1.bf16.msra.mxu1 %v7056_v58 }
  0xfa   :  { %v7063_v3 = vpop.xlane.xlu1 %132  ;;  %5821 = vmatprep.subr.bf16.mxu1 %v10354_v63 }
  0xfb   :  { %10382 = vst [vmem:[#allocation49_spill] sm:$0xff] %v7063_v3  ;;  %684 = vperm.xlu1 %6038, %v6669_v22   ;;  %v7069_v7 = vpack.c.bf16 %v7063_v3, %v7060_v12  ;;  %723 = vperm.xlu0 %6039, %v6927_v52   ;;  %v436_v52 = vlaneseq }
  0xfc   :  { %v7072_v36 = vpop.xlane.xlu0 %258 }
  0xfd   :  { %10383 = vst [vmem:[#allocation50_spill] sm:$0xff] %v7072_v36  ;;  %5774 = vmatpush1.bf16.msra.mxu0 %v7069_v7 }
  0xfe   :  { %v7075_v17 = vpop.xlane.xlu1 %261  ;;  %5775 = vmatprep.subr.bf16.mxu0 %v10354_v63 }
  0xff   :  { %10384 = vst [vmem:[#allocation51_spill] sm:$0xff] %v7075_v17  ;;  %v7080_v57 = vpack.c.bf16 %v7075_v17, %v7072_v36  ;;  %690 = vperm.xlu1 %6038, %v6691_v27   ;;  %729 = vperm.xlu0 %6039, %v6944_v43   ;;  %v7099_v43 = vshrl.u32 %v436_v52, 7  ;;  %v10391_v52 = vmov 0 }
 0x100   :  { %v7084_v22 = vpop.xlane.xlu0 %135  ;;  %v10392_v52 = vsel %vm7115_vm4, 4294967295, %v10391_v52 }
 0x101   :  { %10385 = vst [vmem:[#allocation52_spill] sm:$0xff] %v7084_v22  ;;  %5823 = vmatpush1.bf16.msra.mxu1 %v7080_v57  ;;  %10393 = vst [vmem:[#allocation58_spill] sm:$0xff] %v10392_v52 }
 0x102   :  { %v7087_v13 = vpop.xlane.xlu1 %138  ;;  %5824 = vmatprep.subr.bf16.mxu1 %v10354_v63 }
 0x103   :  { %10386 = vst [vmem:[#allocation53_spill] sm:$0xff] %v7087_v13  ;;  %696 = vperm.xlu1 %6038, %v6713_v34   ;;  %v7093_v3 = vpack.c.bf16 %v7087_v13, %v7084_v22  ;;  %735 = vperm.xlu0 %6039, %v6961_v4   ;;  %v442_v4 = vsub.s32 4, %v7099_v43 }
 0x104   :  { %v7096_v27 = vpop.xlane.xlu0 %264 }
 0x105   :  { %10387 = vst [vmem:[#allocation54_spill] sm:$0xff] %v7096_v27  ;;  %5777 = vmatpush1.bf16.msra.mxu0 %v7093_v3 }
 0x106   :  { %v7101_v17 = vpop.xlane.xlu1 %267  ;;  %5778 = vmatprep.subr.bf16.mxu0 %v10354_v63 }
 0x107   :  { %10388 = vst [vmem:[#allocation55_spill] sm:$0xff] %v7101_v17  ;;  %v7106_v36 = vpack.c.bf16 %v7101_v17, %v7096_v27  ;;  %702 = vperm.xlu1 %6038, %v6735_v39   ;;  %v7123_v39 = vld [vmem:[%s10134_s2] sm:$0x77]  ;;  %v438_v27 = vsub.s32 0, %v7099_v43 }
 0x108   :  { %v7109_v34 = vpop.xlane.xlu0 %141  ;;  %v443_v22 = vrot.slane %v7123_v39, %v442_v4 }
 0x109   :  { %10389 = vst [vmem:[#allocation56_spill] sm:$0xff] %v7109_v34  ;;  %5826 = vmatpush1.bf16.msra.mxu1 %v7106_v36 }
 0x10a   :  { %v7113_v13 = vpop.xlane.xlu1 %145  ;;  %5827 = vmatprep.subr.bf16.mxu1 %v10354_v63 }
 0x10b   :  { %10390 = vst [vmem:[#allocation57_spill] sm:$0xff] %v7113_v13  ;;  %v7127_v17 = vpack.c.bf16 %v7113_v13, %v7109_v34  ;;  %708 = vperm.xlu1 %6038, %v6757_v44   ;;  %v439_v44 = vrot.slane %v7123_v39, %v438_v27  ;;  %v7149_v34 = vrot.slane %v443_v22, %v438_v27  ;;  %v10216_v22 = vmov 1.0  }
 0x10c   :  { %v7135_v12 = vpop.xlane.xlu0 %270 }
 0x10d   :  { %5781 = vmatpush1.bf16.msk.msra.mxu0 %vm7115_vm4, %v7127_v17  ;;  %10394 = vst [vmem:[#allocation59_spill] sm:$0xff] %v7135_v12  ;;  %v7153_v24 = vrot.slane %v439_v44, %v438_v27 }
 0x10e   :  { %v7137_v2 = vpop.xlane.xlu1 %273  ;;  %5831 = vmatprep.subr.bf16.mxu0 %v10354_v63 }
 0x10f   :  { %10395 = vst [vmem:[#allocation60_spill] sm:$0xff] %v7137_v2  ;;  %v7142_v13 = vpack.c.bf16 %v7137_v2, %v7135_v12  ;;  %714 = vperm.xlu1 %6038, %v6779_v49   ;;  %v10218_v12 = vmov 0.0  }
 0x111   :  { %5830 = vmatpush1.bf16.msk.msra.mxu1 %vm7115_vm4, %v7142_v13 }
 0x112   :  { %v345_v4 = vpop.permute.xlu1 %344  ;;  %5880 = vmatprep.subr.bf16.mxu1 %v10354_v63 }
 0x113   :  { %720 = vperm.xlu1 %6038, %v6801_v54   ;;  %vm455_vm5 = vcmp.eq.s32.totalorder %v345_v4, %v7149_v34  ;;  %vm454_vm10 = vcmp.eq.s32.totalorder %v345_v4, %v7153_v24 }
 0x114   :  { %v342_v2 = vpop.permute.xlu0 %341  ;;  %v5154_v54 = vsel %vm455_vm5, 1.0, %v10218_v12 }
 0x115   :  { %vm453_vm7 = vcmp.eq.s32.totalorder %v342_v2, %v7149_v34  ;;  %vm452_vm8 = vcmp.eq.s32.totalorder %v342_v2, %v7153_v24 }
 0x116   :  { %v348_v49 = vpop.permute.xlu1 %347  ;;  %v5152_v56 = vsel %vm453_vm7, 1.0, %v10218_v12 }
 0x117   :  { %726 = vperm.xlu1 %6038, %v6823_v59   ;;  %5344 = vmatprep.mubr.msk.f32.mxu0 %vm1252_vm6, %v5152_v56  ;;  %vm457_vm9 = vcmp.eq.s32.totalorder %v348_v49, %v7149_v34  ;;  %vm456_vm12 = vcmp.eq.s32.totalorder %v348_v49, %v7153_v24 }
 0x118   :  { %5409 = vmatprep.mubr.msk.f32.mxu1 %vm1252_vm6, %v5152_v56  ;;  %5345 = vmatmul.mubr.msk.f32.vlgmr.msra.gmra.mrb[0].mxu0 %vm452_vm8, %v10216_v22  ;;  %v369_v59 = vpop.permute.xlu0 %368 }
 0x119   :  { %5410 = vmatmul.mubr.msk.f32.vlgmr.msra.gmra.mrb[0].mxu1 %vm452_vm8, %v10216_v22  ;;  %5833 = vmatpush1.bf16.msra.mxu0 %v6616_v10  ;;  %v5156_v10 = vsel %vm457_vm9, 1.0, %v10218_v12 }
 0x11a   :  { %5882 = vmatpush1.bf16.msra.mxu1 %v6634_v14  ;;  %v351_v27 = vpop.permute.xlu1 %350  ;;  %5346 = vmatprep.mubr.msk.f32.mxu0 %vm1252_vm6, %v5154_v54 }
 0x11b   :  { %732 = vperm.xlu1 %6038, %v6845_v0   ;;  %5411 = vmatprep.mubr.msk.f32.mxu1 %vm1252_vm6, %v5154_v54  ;;  %vm459_vm11 = vcmp.eq.s32.totalorder %v351_v27, %v7149_v34  ;;  %vm458_vm14 = vcmp.eq.s32.totalorder %v351_v27, %v7153_v24 }
 0x11c   :  { %5834 = vmatprep.subr.bf16.mxu0 %v10354_v63  ;;  %5883 = vmatprep.subr.bf16.mxu1 %v10354_v63 }
 0x11d   :  { %5347 = vmatmul.mubr.msk.f32.gmra.mrb[2].mxu0 %vm454_vm10, %v10216_v22  ;;  %5412 = vmatmul.mubr.msk.f32.gmra.mrb[2].mxu1 %vm454_vm10, %v10216_v22 }
 0x11e   :  { %5836 = vmatpush1.bf16.msra.mxu0 %v6652_v18  ;;  %5885 = vmatpush1.bf16.msra.mxu1 %v6674_v23  ;;  %v354_v14 = vpop.permute.xlu1 %353  ;;  %v5158_v18 = vsel %vm459_vm11, 1.0, %v10218_v12  ;;  %vm471_vm11 = vcmp.eq.s32.totalorder %v369_v59, %v7149_v34 }
 0x11f   :  { %5348 = vmatprep.mubr.msk.f32.mxu0 %vm1252_vm6, %v5156_v10  ;;  %5413 = vmatprep.mubr.msk.f32.mxu1 %vm1252_vm6, %v5156_v10  ;;  %vm461_vm13 = vcmp.eq.s32.totalorder %v354_v14, %v7149_v34  ;;  %vm460_vm2 = vcmp.eq.s32.totalorder %v354_v14, %v7153_v24 }
 0x120   :  { %738 = vperm.xlu1 %6038, %v6867_v31   ;;  %5837 = vmatprep.subr.bf16.mxu0 %v10354_v63  ;;  %v5160_v31 = vsel %vm461_vm13, 1.0, %v10218_v12 }
 0x121   :  { %5886 = vmatprep.subr.bf16.mxu1 %v10354_v63  ;;  %5349 = vmatmul.mubr.msk.f32.gmra.mrb[4].mxu0 %vm456_vm12, %v10216_v22 }
 0x122   :  { %5414 = vmatmul.mubr.msk.f32.gmra.mrb[4].mxu1 %vm456_vm12, %v10216_v22  ;;  %5839 = vmatpush1.bf16.msra.mxu0 %v6696_v28  ;;  %v357_v23 = vpop.permute.xlu1 %356 }
 0x123   :  { %5888 = vmatpush1.bf16.msra.mxu1 %v6718_v35  ;;  %5350 = vmatprep.mubr.msk.f32.mxu0 %vm1252_vm6, %v5158_v18  ;;  %vm463_vm15 = vcmp.eq.s32.totalorder %v357_v23, %v7149_v34  ;;  %vm462_vm5 = vcmp.eq.s32.totalorder %v357_v23, %v7153_v24 }
 0x124   :  { %5415 = vmatprep.mubr.msk.f32.mxu1 %vm1252_vm6, %v5158_v18  ;;  %5840 = vmatprep.subr.bf16.mxu0 %v10354_v63  ;;  %v5162_v35 = vsel %vm463_vm15, 1.0, %v10218_v12 }
 0x125   :  { %5889 = vmatprep.subr.bf16.mxu1 %v10354_v63  ;;  %5351 = vmatmul.mubr.msk.f32.gmra.mrb[6].mxu0 %vm458_vm14, %v10216_v22 }
 0x126   :  { %5416 = vmatmul.mubr.msk.f32.gmra.mrb[6].mxu1 %vm458_vm14, %v10216_v22  ;;  %5842 = vmatpush1.bf16.msra.mxu0 %v6740_v40  ;;  %v360_v28 = vpop.permute.xlu1 %359  ;;  %vm470_vm14 = vcmp.eq.s32.totalorder %v369_v59, %v7153_v24 }
 0x127   :  { %5891 = vmatpush1.bf16.msra.mxu1 %v6762_v45  ;;  %5352 = vmatprep.mubr.msk.f32.mxu0 %vm1252_vm6, %v5160_v31  ;;  %vm465_vm3 = vcmp.eq.s32.totalorder %v360_v28, %v7149_v34  ;;  %vm464_vm8 = vcmp.eq.s32.totalorder %v360_v28, %v7153_v24 }
 0x128   :  { %5417 = vmatprep.mubr.msk.f32.mxu1 %vm1252_vm6, %v5160_v31  ;;  %5843 = vmatprep.subr.bf16.mxu0 %v10354_v63  ;;  %v5164_v45 = vsel %vm465_vm3, 1.0, %v10218_v12 }
 0x129   :  { %5892 = vmatprep.subr.bf16.mxu1 %v10354_v63  ;;  %5353 = vmatmul.mubr.msk.f32.gmra.mrb[8].mxu0 %vm460_vm2, %v10216_v22 }
 0x12a   :  { %5418 = vmatmul.mubr.msk.f32.gmra.mrb[8].mxu1 %vm460_vm2, %v10216_v22  ;;  %5845 = vmatpush1.bf16.msra.mxu0 %v6784_v50  ;;  %v363_v40 = vpop.permute.xlu1 %362 }
 0x12b   :  { %5894 = vmatpush1.bf16.msra.mxu1 %v6806_v55  ;;  %5354 = vmatprep.mubr.msk.f32.mxu0 %vm1252_vm6, %v5162_v35  ;;  %vm467_vm7 = vcmp.eq.s32.totalorder %v363_v40, %v7149_v34  ;;  %vm466_vm10 = vcmp.eq.s32.totalorder %v363_v40, %v7153_v24 }
 0x12c   :  { %5419 = vmatprep.mubr.msk.f32.mxu1 %vm1252_vm6, %v5162_v35  ;;  %5846 = vmatprep.subr.bf16.mxu0 %v10354_v63  ;;  %v5166_v55 = vsel %vm467_vm7, 1.0, %v10218_v12 }
 0x12d   :  { %5895 = vmatprep.subr.bf16.mxu1 %v10354_v63  ;;  %5355 = vmatmul.mubr.msk.f32.gmra.mrb[10].mxu0 %vm462_vm5, %v10216_v22 }
 0x12e   :  { %5420 = vmatmul.mubr.msk.f32.gmra.mrb[10].mxu1 %vm462_vm5, %v10216_v22  ;;  %5848 = vmatpush1.bf16.msra.mxu0 %v6828_v60  ;;  %v366_v50 = vpop.permute.xlu1 %365 }
 0x12f   :  { %5897 = vmatpush1.bf16.msra.mxu1 %v6850_v1  ;;  %5356 = vmatprep.mubr.msk.f32.mxu0 %vm1252_vm6, %v5164_v45  ;;  %vm469_vm9 = vcmp.eq.s32.totalorder %v366_v50, %v7149_v34  ;;  %vm468_vm12 = vcmp.eq.s32.totalorder %v366_v50, %v7153_v24 }
 0x130   :  { %5421 = vmatprep.mubr.msk.f32.mxu1 %vm1252_vm6, %v5164_v45  ;;  %5849 = vmatprep.subr.bf16.mxu0 %v10354_v63  ;;  %v5168_v60 = vsel %vm469_vm9, 1.0, %v10218_v12 }
 0x131   :  { %5898 = vmatprep.subr.bf16.mxu1 %v10354_v63  ;;  %5357 = vmatmul.mubr.msk.f32.gmra.mrb[12].mxu0 %vm464_vm8, %v10216_v22 }
 0x132   :  { %5422 = vmatmul.mubr.msk.f32.gmra.mrb[12].mxu1 %vm464_vm8, %v10216_v22  ;;  %5851 = vmatpush1.bf16.msra.mxu0 %v6872_v62 }
 0x133   :  { %5900 = vmatpush1.bf16.msra.mxu1 %v6889_v30  ;;  %5358 = vmatprep.mubr.msk.f32.mxu0 %vm1252_vm6, %v5166_v55  ;;  %v372_v30 = vpop.permute.xlu1 %371 }
 0x134   :  { %5423 = vmatprep.mubr.msk.f32.mxu1 %vm1252_vm6, %v5166_v55  ;;  %5852 = vmatprep.subr.bf16.mxu0 %v10354_v63  ;;  %vm473_vm13 = vcmp.eq.s32.totalorder %v372_v30, %v7149_v34  ;;  %vm472_vm2 = vcmp.eq.s32.totalorder %v372_v30, %v7153_v24  ;;  %v746_v55 = vsub.s32 5, %v7099_v43 }
 0x135   :  { %5901 = vmatprep.subr.bf16.mxu1 %v10354_v63  ;;  %5359 = vmatmul.mubr.msk.f32.gmra.mrb[14].mxu0 %vm466_vm10, %v10216_v22 }
 0x136   :  { %5424 = vmatmul.mubr.msk.f32.gmra.mrb[14].mxu1 %vm466_vm10, %v10216_v22  ;;  %5854 = vmatpush1.bf16.msra.mxu0 %v6905_v53  ;;  %v5170_v53 = vsel %vm471_vm11, 1.0, %v10218_v12  ;;  %v747_v30 = vrot.slane %v7123_v39, %v746_v55  ;;  %v6297_v55 = vld [vmem:[%s10133_s1 + $0x8] sm:$0xff] }
 0x137   :  { %5903 = vmatpush1.bf16.msra.mxu1 %v6922_v47  ;;  %5360 = vmatprep.mubr.msk.f32.mxu0 %vm1252_vm6, %v5168_v60  ;;  %v375_v47 = vpop.permute.xlu0 %374 }
 0x138   :  { %5425 = vmatprep.mubr.msk.f32.mxu1 %vm1252_vm6, %v5168_v60  ;;  %5855 = vmatprep.subr.bf16.mxu0 %v10354_v63  ;;  %vm475_vm15 = vcmp.eq.s32.totalorder %v375_v47, %v7149_v34  ;;  %vm474_vm5 = vcmp.eq.s32.totalorder %v375_v47, %v7153_v24  ;;  %v742_v47 = vsub.s32 1, %v7099_v43 }
 0x139   :  { %5904 = vmatprep.subr.bf16.mxu1 %v10354_v63  ;;  %5361 = vmatmul.mubr.msk.f32.gmra.mrb[16].mxu0 %vm468_vm12, %v10216_v22 }
 0x13a   :  { %5426 = vmatmul.mubr.msk.f32.gmra.mrb[16].mxu1 %vm468_vm12, %v10216_v22  ;;  %5857 = vmatpush1.bf16.msra.mxu0 %v6939_v42  ;;  %v5172_v42 = vsel %vm473_vm13, 1.0, %v10218_v12 }
 0x13b   :  { %5906 = vmatpush1.bf16.msra.mxu1 %v6956_v38  ;;  %5362 = vmatprep.mubr.msk.f32.mxu0 %vm1252_vm6, %v5170_v53  ;;  %v378_v38 = vpop.permute.xlu1 %377 }
 0x13c   :  { %5427 = vmatprep.mubr.msk.f32.mxu1 %vm1252_vm6, %v5170_v53  ;;  %5858 = vmatprep.subr.bf16.mxu0 %v10354_v63  ;;  %vm477_vm3 = vcmp.eq.s32.totalorder %v378_v38, %v7149_v34  ;;  %vm476_vm8 = vcmp.eq.s32.totalorder %v378_v38, %v7153_v24  ;;  %v7437_v38 = vrot.slane %v747_v30, %v742_v47 }
 0x13d   :  { %5907 = vmatprep.subr.bf16.mxu1 %v10354_v63  ;;  %5363 = vmatmul.mubr.msk.f32.gmra.mrb[18].mxu0 %vm470_vm14, %v10216_v22  ;;  %v5176_v62 = vsel %vm477_vm3, 1.0, %v10218_v12 }
 0x13e   :  { %5428 = vmatmul.mubr.msk.f32.gmra.mrb[18].mxu1 %vm470_vm14, %v10216_v22  ;;  %5860 = vmatpush1.bf16.msra.mxu0 %v6973_v37  ;;  %v5174_v37 = vsel %vm475_vm15, 1.0, %v10218_v12 }
 0x13f   :  { %5909 = vmatpush1.bf16.msra.mxu1 %v6984_v32  ;;  %5364 = vmatprep.mubr.msk.f32.mxu0 %vm1252_vm6, %v5172_v42  ;;  %v381_v32 = vpop.permute.xlu0 %380  ;;  %v384_v0 = vpop.permute.xlu1 %383 }
 0x140   :  { %5429 = vmatprep.mubr.msk.f32.mxu1 %vm1252_vm6, %v5172_v42  ;;  %5861 = vmatprep.subr.bf16.mxu0 %v10354_v63  ;;  %vm479_vm7 = vcmp.eq.s32.totalorder %v381_v32, %v7149_v34  ;;  %vm481_vm9 = vcmp.eq.s32.totalorder %v384_v0, %v7149_v34  ;;  %vm478_vm10 = vcmp.eq.s32.totalorder %v381_v32, %v7153_v24 }
 0x141   :  { %5910 = vmatprep.subr.bf16.mxu1 %v10354_v63  ;;  %5365 = vmatmul.mubr.msk.f32.gmra.mrb[20].mxu0 %vm472_vm2, %v10216_v22  ;;  %v5178_v1 = vsel %vm479_vm7, 1.0, %v10218_v12  ;;  %vm480_vm12 = vcmp.eq.s32.totalorder %v384_v0, %v7153_v24 }
 0x142   :  { %5430 = vmatmul.mubr.msk.f32.gmra.mrb[20].mxu1 %vm472_vm2, %v10216_v22  ;;  %5863 = vmatpush1.bf16.msra.mxu0 %v6997_v48 }
 0x143   :  { %5912 = vmatpush1.bf16.msra.mxu1 %v7008_v51  ;;  %5366 = vmatprep.mubr.msk.f32.mxu0 %vm1252_vm6, %v5174_v37  ;;  %v390_v48 = vpop.permute.xlu1 %389 }
 0x144   :  { %5431 = vmatprep.mubr.msk.f32.mxu1 %vm1252_vm6, %v5174_v37  ;;  %5864 = vmatprep.subr.bf16.mxu0 %v10354_v63  ;;  %vm485_vm13 = vcmp.eq.s32.totalorder %v390_v48, %v7149_v34  ;;  %vm484_vm2 = vcmp.eq.s32.totalorder %v390_v48, %v7153_v24 }
 0x145   :  { %5913 = vmatprep.subr.bf16.mxu1 %v10354_v63  ;;  %5367 = vmatmul.mubr.msk.f32.gmra.mrb[22].mxu0 %vm474_vm5, %v10216_v22  ;;  %v5184_v56 = vsel %vm485_vm13, 1.0, %v10218_v12 }
 0x146   :  { %5432 = vmatmul.mubr.msk.f32.gmra.mrb[22].mxu1 %vm474_vm5, %v10216_v22  ;;  %5866 = vmatpush1.bf16.msra.mxu0 %v7021_v46  ;;  %v387_v46 = vpop.permute.xlu0 %386 }
 0x147   :  { %5915 = vmatpush1.bf16.msra.mxu1 %v7032_v61  ;;  %5368 = vmatprep.mubr.msk.f32.mxu0 %vm1252_vm6, %v5176_v62  ;;  %vm483_vm11 = vcmp.eq.s32.totalorder %v387_v46, %v7149_v34  ;;  %vm482_vm14 = vcmp.eq.s32.totalorder %v387_v46, %v7153_v24  ;;  %v396_v61 = vpop.permute.xlu1 %395 }
 0x148   :  { %5433 = vmatprep.mubr.msk.f32.mxu1 %vm1252_vm6, %v5176_v62  ;;  %5867 = vmatprep.subr.bf16.mxu0 %v10354_v63  ;;  %vm489_vm3 = vcmp.eq.s32.totalorder %v396_v61, %v7149_v34  ;;  %v743_v62 = vrot.slane %v7123_v39, %v742_v47 }
 0x149   :  { %5916 = vmatprep.subr.bf16.mxu1 %v10354_v63  ;;  %5369 = vmatmul.mubr.msk.f32.gmra.mrb[24].mxu0 %vm476_vm8, %v10216_v22 }
 0x14a   :  { %5434 = vmatmul.mubr.msk.f32.gmra.mrb[24].mxu1 %vm476_vm8, %v10216_v22  ;;  %5869 = vmatpush1.bf16.msra.mxu0 %v7045_v41  ;;  %v5180_v41 = vsel %vm481_vm9, 1.0, %v10218_v12  ;;  %v393_v51 = vpop.permute.xlu0 %392  ;;  %vm488_vm8 = vcmp.eq.s32.totalorder %v396_v61, %v7153_v24  ;;  %v7455_v46 = vrot.slane %v743_v62, %v742_v47  ;;  %v6300_v47 = vld [vmem:[%s10133_s1 + $0x28] sm:$0xff]  ;;  %v6302_v62 = vld [vmem:[%s10133_s1 + $0x38] sm:$0xff] }
 0x14b   :  { %5918 = vmatpush1.bf16.msra.mxu1 %v7056_v58  ;;  %5370 = vmatprep.mubr.msk.f32.mxu0 %vm1252_vm6, %v5178_v1  ;;  %vm487_vm15 = vcmp.eq.s32.totalorder %v393_v51, %v7149_v34  ;;  %vm486_vm5 = vcmp.eq.s32.totalorder %v393_v51, %v7153_v24  ;;  %v402_v58 = vpop.permute.xlu1 %401 }
 0x14c   :  { %5435 = vmatprep.mubr.msk.f32.mxu1 %vm1252_vm6, %v5178_v1  ;;  %5870 = vmatprep.subr.bf16.mxu0 %v10354_v63  ;;  %v5186_v2 = vsel %vm487_vm15, 1.0, %v10218_v12  ;;  %vm493_vm9 = vcmp.eq.s32.totalorder %v402_v58, %v7149_v34 }
 0x14d   :  { %5919 = vmatprep.subr.bf16.mxu1 %v10354_v63  ;;  %5371 = vmatmul.mubr.msk.f32.gmra.mrb[26].mxu0 %vm478_vm10, %v10216_v22 }
 0x14e   :  { %5436 = vmatmul.mubr.msk.f32.gmra.mrb[26].mxu1 %vm478_vm10, %v10216_v22  ;;  %5872 = vmatpush1.bf16.msra.mxu0 %v7069_v7  ;;  %v5182_v7 = vsel %vm483_vm11, 1.0, %v10218_v12 }
 0x14f   :  { %5921 = vmatpush1.bf16.msra.mxu1 %v7080_v57  ;;  %5372 = vmatprep.mubr.msk.f32.mxu0 %vm1252_vm6, %v5180_v41  ;;  %v5192_v57 = vsel %vm493_vm9, 1.0, %v10218_v12  ;;  %v408_v44 = vpop.permute.xlu1 %407 }
 0x150   :  { %5437 = vmatprep.mubr.msk.f32.mxu1 %vm1252_vm6, %v5180_v41  ;;  %5873 = vmatprep.subr.bf16.mxu0 %v10354_v63  ;;  %vm497_vm13 = vcmp.eq.s32.totalorder %v408_v44, %v7149_v34 }
 0x151   :  { %5922 = vmatprep.subr.bf16.mxu1 %v10354_v63  ;;  %5373 = vmatmul.mubr.msk.f32.gmra.mrb[28].mxu0 %vm480_vm12, %v10216_v22  ;;  %v5196_v54 = vsel %vm497_vm13, 1.0, %v10218_v12 }
 0x152   :  { %5438 = vmatmul.mubr.msk.f32.gmra.mrb[28].mxu1 %vm480_vm12, %v10216_v22  ;;  %5875 = vmatpush1.bf16.msra.mxu0 %v7093_v3  ;;  %vm492_vm12 = vcmp.eq.s32.totalorder %v402_v58, %v7153_v24 }
 0x153   :  { %5924 = vmatpush1.bf16.msra.mxu1 %v7106_v36  ;;  %5374 = vmatprep.mubr.msk.f32.mxu0 %vm1252_vm6, %v5182_v7  ;;  %v5188_v36 = vsel %vm489_vm3, 1.0, %v10218_v12  ;;  %v414_v27 = vpop.permute.xlu1 %413 }
 0x154   :  { %5439 = vmatprep.mubr.msk.f32.mxu1 %vm1252_vm6, %v5182_v7  ;;  %5876 = vmatprep.subr.bf16.mxu0 %v10354_v63  ;;  %vm501_vm3 = vcmp.eq.s32.totalorder %v414_v27, %v7149_v34 }
 0x155   :  { %5925 = vmatprep.subr.bf16.mxu1 %v10354_v63  ;;  %5375 = vmatmul.mubr.msk.f32.gmra.mrb[30].mxu0 %vm482_vm14, %v10216_v22  ;;  %v5200_v18 = vsel %vm501_vm3, 1.0, %v10218_v12 }
 0x156   :  { %5440 = vmatmul.mubr.msk.f32.gmra.mrb[30].mxu1 %vm482_vm14, %v10216_v22  ;;  %5879 = vmatpush1.bf16.msk.msra.mxu0 %vm7115_vm4, %v7127_v17 }
 0x157   :  { %5928 = vmatpush1.bf16.msk.msra.mxu1 %vm7115_vm4, %v7142_v13  ;;  %5376 = vmatprep.mubr.msk.f32.mxu0 %vm1252_vm6, %v5184_v56  ;;  %v399_v13 = vpop.permute.xlu0 %398  ;;  %v420_v23 = vpop.permute.xlu1 %419 }
 0x158   :  { %5441 = vmatprep.mubr.msk.f32.mxu1 %vm1252_vm6, %v5184_v56  ;;  %5929 = vmatprep.subr.bf16.mxu0 %v10354_v63  ;;  %vm491_vm7 = vcmp.eq.s32.totalorder %v399_v13, %v7149_v34  ;;  %vm490_vm10 = vcmp.eq.s32.totalorder %v399_v13, %v7153_v24  ;;  %vm505_vm9 = vcmp.eq.s32.totalorder %v420_v23, %v7149_v34 }
 0x159   :  { %5377 = vmatmul.mubr.msk.f32.gmra.mrb[32].mxu0 %vm484_vm2, %v10216_v22  ;;  %5978 = vmatprep.subr.bf16.mxu1 %v10354_v63  ;;  %v5190_v3 = vsel %vm491_vm7, 1.0, %v10218_v12  ;;  %v5204_v35 = vsel %vm505_vm9, 1.0, %v10218_v12 }
 0x15a   :  { %5442 = vmatmul.mubr.msk.f32.gmra.mrb[32].mxu1 %vm484_vm2, %v10216_v22  ;;  %5378 = vmatprep.mubr.msk.f32.mxu0 %vm1252_vm6, %v5186_v2  ;;  %vm496_vm2 = vcmp.eq.s32.totalorder %v408_v44, %v7153_v24 }
 0x15b   :  { %5443 = vmatprep.mubr.msk.f32.mxu1 %vm1252_vm6, %v5186_v2  ;;  %v405_v17 = vpop.permute.xlu0 %404  ;;  %v426_v40 = vpop.permute.xlu1 %425 }
 0x15c   :  { %vm495_vm11 = vcmp.eq.s32.totalorder %v405_v17, %v7149_v34  ;;  %vm494_vm14 = vcmp.eq.s32.totalorder %v405_v17, %v7153_v24  ;;  %vm509_vm13 = vcmp.eq.s32.totalorder %v426_v40, %v7149_v34 }
 0x15d   :  { %5379 = vmatmul.mubr.msk.f32.gmra.mrb[34].mxu0 %vm486_vm5, %v10216_v22  ;;  %v5194_v4 = vsel %vm495_vm11, 1.0, %v10218_v12  ;;  %v5208_v59 = vsel %vm509_vm13, 1.0, %v10218_v12 }
 0x15e   :  { %5444 = vmatmul.mubr.msk.f32.gmra.mrb[34].mxu1 %vm486_vm5, %v10216_v22  ;;  %5380 = vmatprep.mubr.msk.f32.mxu0 %vm1252_vm6, %v5188_v36 }
 0x15f   :  { %5445 = vmatprep.mubr.msk.f32.mxu1 %vm1252_vm6, %v5188_v36  ;;  %v411_v49 = vpop.permute.xlu0 %410  ;;  %v432_v60 = vpop.permute.xlu1 %431 }
 0x160   :  { %vm499_vm15 = vcmp.eq.s32.totalorder %v411_v49, %v7149_v34  ;;  %vm498_vm5 = vcmp.eq.s32.totalorder %v411_v49, %v7153_v24  ;;  %vm513_vm3 = vcmp.eq.s32.totalorder %v432_v60, %v7149_v34  ;;  %vm512_vm9 = vcmp.eq.s32.totalorder %v432_v60, %v7153_v24 }
 0x161   :  { %5381 = vmatmul.mubr.msk.f32.gmra.mrb[36].mxu0 %vm488_vm8, %v10216_v22  ;;  %v5198_v10 = vsel %vm499_vm15, 1.0, %v10218_v12  ;;  %v5212_v37 = vsel %vm513_vm3, 1.0, %v10218_v12 }
 0x162   :  { %5446 = vmatmul.mubr.msk.f32.gmra.mrb[36].mxu1 %vm488_vm8, %v10216_v22  ;;  %5382 = vmatprep.mubr.msk.f32.mxu0 %vm1252_vm6, %v5190_v3  ;;  %vm500_vm8 = vcmp.eq.s32.totalorder %v414_v27, %v7153_v24 }
 0x163   :  { %5447 = vmatprep.mubr.msk.f32.mxu1 %vm1252_vm6, %v5190_v3  ;;  %v417_v14 = vpop.permute.xlu0 %416  ;;  %v646_v32 = vpop.permute.xlu1 %645 }
 0x164   :  { %vm503_vm7 = vcmp.eq.s32.totalorder %v417_v14, %v7149_v34 }
 0x165   :  { %5383 = vmatmul.mubr.msk.f32.gmra.mrb[38].mxu0 %vm490_vm10, %v10216_v22  ;;  %v5202_v31 = vsel %vm503_vm7, 1.0, %v10218_v12 }
 0x166   :  { %5448 = vmatmul.mubr.msk.f32.gmra.mrb[38].mxu1 %vm490_vm10, %v10216_v22  ;;  %5384 = vmatprep.mubr.msk.f32.mxu0 %vm1252_vm6, %v5192_v57  ;;  %vm502_vm10 = vcmp.eq.s32.totalorder %v417_v14, %v7153_v24 }
 0x167   :  { %5449 = vmatprep.mubr.msk.f32.mxu1 %vm1252_vm6, %v5192_v57  ;;  %v423_v28 = vpop.permute.xlu0 %422  ;;  %v652_v39 = vpop.permute.xlu1 %651 }
 0x168   :  { %vm507_vm11 = vcmp.eq.s32.totalorder %v423_v28, %v7149_v34  ;;  %vm761_vm13 = vcmp.eq.s32.totalorder %v652_v39, %v7437_v38 }
 0x169   :  { %5385 = vmatmul.mubr.msk.f32.gmra.mrb[40].mxu0 %vm492_vm12, %v10216_v22  ;;  %v5206_v45 = vsel %vm507_vm11, 1.0, %v10218_v12  ;;  %v5220_v48 = vsel %vm761_vm13, 1.0, %v10218_v12 }
 0x16a   :  { %5450 = vmatmul.mubr.msk.f32.gmra.mrb[40].mxu1 %vm492_vm12, %v10216_v22  ;;  %5386 = vmatprep.mubr.msk.f32.mxu0 %vm1252_vm6, %v5194_v4  ;;  %vm504_vm12 = vcmp.eq.s32.totalorder %v420_v23, %v7153_v24 }
 0x16b   :  { %5451 = vmatprep.mubr.msk.f32.mxu1 %vm1252_vm6, %v5194_v4  ;;  %v429_v50 = vpop.permute.xlu0 %428 }
 0x16c   :  { %vm511_vm15 = vcmp.eq.s32.totalorder %v429_v50, %v7149_v34 }
 0x16d   :  { %5387 = vmatmul.mubr.msk.f32.gmra.mrb[42].mxu0 %vm494_vm14, %v10216_v22  ;;  %v5210_v53 = vsel %vm511_vm15, 1.0, %v10218_v12 }
 0x16e   :  { %5452 = vmatmul.mubr.msk.f32.gmra.mrb[42].mxu1 %vm494_vm14, %v10216_v22  ;;  %5388 = vmatprep.mubr.msk.f32.mxu0 %vm1252_vm6, %v5196_v54  ;;  %vm506_vm14 = vcmp.eq.s32.totalorder %v423_v28, %v7153_v24 }
 0x16f   :  { %5453 = vmatprep.mubr.msk.f32.mxu1 %vm1252_vm6, %v5196_v54  ;;  %v435_v42 = vpop.permute.xlu0 %434 }
 0x170   :  { %vm515_vm7 = vcmp.eq.s32.totalorder %v435_v42, %v7149_v34  ;;  %vm514_vm11 = vcmp.eq.s32.totalorder %v435_v42, %v7153_v24 }
 0x171   :  { %5389 = vmatmul.mubr.msk.f32.gmra.mrb[44].mxu0 %vm496_vm2, %v10216_v22  ;;  %v5214_v0 = vsel %vm515_vm7, 1.0, %v10218_v12 }
 0x172   :  { %5454 = vmatmul.mubr.msk.f32.gmra.mrb[44].mxu1 %vm496_vm2, %v10216_v22  ;;  %5390 = vmatprep.mubr.msk.f32.mxu0 %vm1252_vm6, %v5198_v10  ;;  %vm508_vm2 = vcmp.eq.s32.totalorder %v426_v40, %v7153_v24  ;;  %v6296_v40 = vld [vmem:[%s10133_s1] sm:$0xff] }
 0x173   :  { %5455 = vmatprep.mubr.msk.f32.mxu1 %vm1252_vm6, %v5198_v10  ;;  %v649_v34 = vpop.permute.xlu0 %648 }
 0x175   :  { %5391 = vmatmul.mubr.msk.f32.gmra.mrb[46].mxu0 %vm498_vm5, %v10216_v22 }
 0x176   :  { %5456 = vmatmul.mubr.msk.f32.gmra.mrb[46].mxu1 %vm498_vm5, %v10216_v22  ;;  %5392 = vmatprep.mubr.msk.f32.mxu0 %vm1252_vm6, %v5200_v18  ;;  %vm510_vm5 = vcmp.eq.s32.totalorder %v429_v50, %v7153_v24  ;;  %v655_v24 = vpop.permute.xlu1 %654 }
 0x177   :  { %5457 = vmatprep.mubr.msk.f32.mxu1 %vm1252_vm6, %v5200_v18  ;;  %vm763_vm15 = vcmp.eq.s32.totalorder %v655_v24, %v7437_v38  ;;  %v658_v7 = vpop.permute.xlu0 %657 }
 0x178   :  { %v5222_v51 = vsel %vm763_vm15, 1.0, %v10218_v12  ;;  %vm765_vm3 = vcmp.eq.s32.totalorder %v658_v7, %v7437_v38 }
 0x179   :  { %5393 = vmatmul.mubr.msk.f32.gmra.mrb[48].mxu0 %vm500_vm8, %v10216_v22  ;;  %v5224_v61 = vsel %vm765_vm3, 1.0, %v10218_v12 }
 0x17a   :  { %5458 = vmatmul.mubr.msk.f32.gmra.mrb[48].mxu1 %vm500_vm8, %v10216_v22  ;;  %5394 = vmatprep.mubr.msk.f32.mxu0 %vm1252_vm6, %v5202_v31  ;;  %vm757_vm8 = vcmp.eq.s32.totalorder %v646_v32, %v7437_v38  ;;  %v661_v56 = vpop.permute.xlu1 %660 }
 0x17b   :  { %5459 = vmatprep.mubr.msk.f32.mxu1 %vm1252_vm6, %v5202_v31  ;;  %v5216_v1 = vsel %vm757_vm8, 1.0, %v10218_v12  ;;  %vm767_vm7 = vcmp.eq.s32.totalorder %v661_v56, %v7437_v38  ;;  %vm764_vm8 = vcmp.eq.s32.totalorder %v658_v7, %v7455_v46  ;;  %v664_v2 = vpop.permute.xlu0 %663  ;;  %v6306_v7 = vld [vmem:[%s10133_s1 + $0x58] sm:$0xff] }
 0x17c   :  { %v5226_v13 = vsel %vm767_vm7, 1.0, %v10218_v12 }
 0x17d   :  { %5395 = vmatmul.mubr.msk.f32.gmra.mrb[50].mxu0 %vm502_vm10, %v10216_v22 }
 0x17e   :  { %5460 = vmatmul.mubr.msk.f32.gmra.mrb[50].mxu1 %vm502_vm10, %v10216_v22  ;;  %5396 = vmatprep.mubr.msk.f32.mxu0 %vm1252_vm6, %v5204_v35  ;;  %vm759_vm10 = vcmp.eq.s32.totalorder %v649_v34, %v7437_v38  ;;  %v667_v36 = vpop.permute.xlu1 %666 }
 0x17f   :  { %5461 = vmatprep.mubr.msk.f32.mxu1 %vm1252_vm6, %v5204_v35  ;;  %v5218_v41 = vsel %vm759_vm10, 1.0, %v10218_v12  ;;  %vm766_vm10 = vcmp.eq.s32.totalorder %v661_v56, %v7455_v46  ;;  %v670_v3 = vpop.permute.xlu0 %669  ;;  %v10214_v35 = vmov 2  }
 0x180   :  { %vm773_vm13 = vcmp.eq.s32.totalorder %v670_v3, %v7437_v38  ;;  %6040 = vset.pattern.permute.xlu0 %v10214_v35  ;;  %6041 = vset.pattern.permute.xlu1 %v10214_v35 }
 0x181   :  { %5397 = vmatmul.mubr.msk.f32.gmra.mrb[52].mxu0 %vm504_vm12, %v10216_v22  ;;  %v5232_v44 = vsel %vm773_vm13, 1.0, %v10218_v12  ;;  %949 = vperm.xlu0 %6040, %v6296_v40  }
 0x182   :  { %5462 = vmatmul.mubr.msk.f32.gmra.mrb[52].mxu1 %vm504_vm12, %v10216_v22  ;;  %5398 = vmatprep.mubr.msk.f32.mxu0 %vm1252_vm6, %v5206_v45  ;;  %vm756_vm12 = vcmp.eq.s32.totalorder %v646_v32, %v7455_v46  ;;  %v673_v57 = vpop.permute.xlu1 %672  ;;  %v6301_v32 = vld [vmem:[%s10133_s1 + $0x20] sm:$0xff] }
 0x183   :  { %5463 = vmatprep.mubr.msk.f32.mxu1 %vm1252_vm6, %v5206_v45  ;;  %vm775_vm15 = vcmp.eq.s32.totalorder %v673_v57, %v7437_v38  ;;  %v676_v4 = vpop.permute.xlu0 %675  ;;  %952 = vperm.xlu1 %6041, %v6297_v55  }
 0x184   :  { %v5234_v49 = vsel %vm775_vm15, 1.0, %v10218_v12  ;;  %vm777_vm3 = vcmp.eq.s32.totalorder %v676_v4, %v7437_v38 }
 0x185   :  { %5399 = vmatmul.mubr.msk.f32.gmra.mrb[54].mxu0 %vm506_vm14, %v10216_v22  ;;  %v5236_v27 = vsel %vm777_vm3, 1.0, %v10218_v12 }
 0x186   :  { %5464 = vmatmul.mubr.msk.f32.gmra.mrb[54].mxu1 %vm506_vm14, %v10216_v22  ;;  %5400 = vmatprep.mubr.msk.f32.mxu0 %vm1252_vm6, %v5208_v59  ;;  %vm758_vm14 = vcmp.eq.s32.totalorder %v649_v34, %v7455_v46  ;;  %v679_v54 = vpop.permute.xlu1 %678 }
 0x187   :  { %5465 = vmatprep.mubr.msk.f32.mxu1 %vm1252_vm6, %v5208_v59  ;;  %vm779_vm7 = vcmp.eq.s32.totalorder %v679_v54, %v7437_v38  ;;  %v682_v10 = vpop.permute.xlu0 %681  ;;  %v6298_v59 = vld [vmem:[%s10133_s1 + $0x18] sm:$0xff] }
 0x188   :  { %v5238_v14 = vsel %vm779_vm7, 1.0, %v10218_v12  ;;  %958 = vperm.xlu0 %6040, %v6298_v59  }
 0x189   :  { %5401 = vmatmul.mubr.msk.f32.gmra.mrb[56].mxu0 %vm508_vm2, %v10216_v22 }
 0x18a   :  { %5466 = vmatmul.mubr.msk.f32.gmra.mrb[56].mxu1 %vm508_vm2, %v10216_v22  ;;  %5402 = vmatprep.mubr.msk.f32.mxu0 %vm1252_vm6, %v5210_v53  ;;  %vm760_vm2 = vcmp.eq.s32.totalorder %v652_v39, %v7455_v46  ;;  %v685_v18 = vpop.permute.xlu1 %684  ;;  %v6304_v39 = vld [vmem:[%s10133_s1 + $0x48] sm:$0xff] }
 0x18b   :  { %5467 = vmatprep.mubr.msk.f32.mxu1 %vm1252_vm6, %v5210_v53  ;;  %v688_v31 = vpop.permute.xlu0 %687  ;;  %v6299_v53 = vld [vmem:[%s10133_s1 + $0x10] sm:$0xff] }
 0x18c   :  { %vm785_vm13 = vcmp.eq.s32.totalorder %v688_v31, %v7437_v38  ;;  %955 = vperm.xlu1 %6041, %v6299_v53   ;;  %964 = vperm.xlu0 %6040, %v6300_v47  }
 0x18d   :  { %5403 = vmatmul.mubr.msk.f32.gmra.mrb[58].mxu0 %vm510_vm5, %v10216_v22  ;;  %v5244_v50 = vsel %vm785_vm13, 1.0, %v10218_v12 }
 0x18e   :  { %5468 = vmatmul.mubr.msk.f32.gmra.mrb[58].mxu1 %vm510_vm5, %v10216_v22  ;;  %5404 = vmatprep.mubr.msk.f32.mxu0 %vm1252_vm6, %v5212_v37  ;;  %vm762_vm5 = vcmp.eq.s32.totalorder %v655_v24, %v7455_v46  ;;  %v691_v45 = vpop.permute.xlu1 %690 }
 0x18f   :  { %5469 = vmatprep.mubr.msk.f32.mxu1 %vm1252_vm6, %v5212_v37  ;;  %vm787_vm15 = vcmp.eq.s32.totalorder %v691_v45, %v7437_v38  ;;  %v694_v60 = vpop.permute.xlu0 %693 }
 0x190   :  { %v5246_v30 = vsel %vm787_vm15, 1.0, %v10218_v12  ;;  %vm789_vm3 = vcmp.eq.s32.totalorder %v694_v60, %v7437_v38  ;;  %961 = vperm.xlu1 %6041, %v6301_v32   ;;  %970 = vperm.xlu0 %6040, %v6302_v62  }
 0x191   :  { %5405 = vmatmul.mubr.msk.f32.gmra.mrb[60].mxu0 %vm512_vm9, %v10216_v22  ;;  %v5248_v37 = vsel %vm789_vm3, 1.0, %v10218_v12 }
 0x192   :  { %5470 = vmatmul.mubr.msk.f32.gmra.mrb[60].mxu1 %vm512_vm9, %v10216_v22  ;;  %5406 = vmatprep.mubr.msk.f32.mxu0 %vm1252_vm6, %v5214_v0  ;;  %vm769_vm9 = vcmp.eq.s32.totalorder %v664_v2, %v7437_v38  ;;  %v697_v42 = vpop.permute.xlu1 %696 }
 0x193   :  { %5471 = vmatprep.mubr.msk.f32.mxu1 %vm1252_vm6, %v5214_v0  ;;  %v5228_v58 = vsel %vm769_vm9, 1.0, %v10218_v12  ;;  %vm781_vm9 = vcmp.eq.s32.totalorder %v682_v10, %v7437_v38  ;;  %vm791_vm7 = vcmp.eq.s32.totalorder %v697_v42, %v7437_v38  ;;  %v700_v0 = vpop.permute.xlu0 %699 }
 0x194   :  { %v5240_v23 = vsel %vm781_vm9, 1.0, %v10218_v12  ;;  %v5250_v34 = vsel %vm791_vm7, 1.0, %v10218_v12  ;;  %vm793_vm9 = vcmp.eq.s32.totalorder %v700_v0, %v7437_v38  ;;  %976 = vperm.xlu0 %6040, %v6304_v39  }
 0x195   :  { %5407 = vmatmul.mubr.msk.f32.gmra.mrb[62].mxu0 %vm514_vm11, %v10216_v22  ;;  %v5252_v24 = vsel %vm793_vm9, 1.0, %v10218_v12 }
 0x196   :  { %5472 = vmatmul.mubr.msk.f32.gmra.mrb[62].mxu1 %vm514_vm11, %v10216_v22  ;;  %5474 = vmatprep.mubr.msk.f32.mxu0 %vm1252_vm6, %v5216_v1  ;;  %vm771_vm11 = vcmp.eq.s32.totalorder %v667_v36, %v7437_v38 }
 0x197   :  { %5539 = vmatprep.mubr.msk.f32.mxu1 %vm1252_vm6, %v5216_v1  ;;  %v5230_v17 = vsel %vm771_vm11, 1.0, %v10218_v12  ;;  %vm783_vm11 = vcmp.eq.s32.totalorder %v685_v18, %v7437_v38  ;;  %v6303_v1 = vld [vmem:[%s10133_s1 + $0x30] sm:$0xff] }
 0x198   :  { %v5242_v28 = vsel %vm783_vm11, 1.0, %v10218_v12  ;;  %967 = vperm.xlu1 %6041, %v6303_v1   ;;  %982 = vperm.xlu0 %6040, %v6306_v7   ;;  %v6316_v1 = vld [vmem:[%s10133_s1 + $0xa8] sm:$0xff] }
 0x199   :  { %5475 = vmatmul.mubr.msk.f32.vlgmr.msra.gmra.mrb[64].mxu0 %vm756_vm12, %v10216_v22 }
 0x19a   :  { %5540 = vmatmul.mubr.msk.f32.vlgmr.msra.gmra.mrb[64].mxu1 %vm756_vm12, %v10216_v22  ;;  %5476 = vmatprep.mubr.msk.f32.mxu0 %vm1252_vm6, %v5218_v41  ;;  %vm768_vm12 = vcmp.eq.s32.totalorder %v664_v2, %v7455_v46  ;;  %v6308_v2 = vld [vmem:[%s10133_s1 + $0x68] sm:$0xff] }
 0x19b   :  { %5541 = vmatprep.mubr.msk.f32.mxu1 %vm1252_vm6, %v5218_v41  ;;  %v703_v41 = vpop.permute.xlu1 %702 }
 0x19c   :  { %vm795_vm11 = vcmp.eq.s32.totalorder %v703_v41, %v7437_v38  ;;  %988 = vperm.xlu0 %6040, %v6308_v2  }
 0x19d   :  { %5477 = vmatmul.mubr.msk.f32.gmra.mrb[66].mxu0 %vm758_vm14, %v10216_v22  ;;  %v5254_v56 = vsel %vm795_vm11, 1.0, %v10218_v12 }
 0x19e   :  { %5542 = vmatmul.mubr.msk.f32.gmra.mrb[66].mxu1 %vm758_vm14, %v10216_v22  ;;  %5478 = vmatprep.mubr.msk.f32.mxu0 %vm1252_vm6, %v5220_v48  ;;  %vm770_vm14 = vcmp.eq.s32.totalorder %v667_v36, %v7455_v46 }
 0x19f   :  { %5543 = vmatprep.mubr.msk.f32.mxu1 %vm1252_vm6, %v5220_v48  ;;  %v6305_v48 = vld [vmem:[%s10133_s1 + $0x40] sm:$0xff] }
 0x1a0   :  { %973 = vperm.xlu1 %6041, %v6305_v48  }
 0x1a1   :  { %5479 = vmatmul.mubr.msk.f32.gmra.mrb[68].mxu0 %vm760_vm2, %v10216_v22 }
 0x1a2   :  { %5544 = vmatmul.mubr.msk.f32.gmra.mrb[68].mxu1 %vm760_vm2, %v10216_v22  ;;  %5480 = vmatprep.mubr.msk.f32.mxu0 %vm1252_vm6, %v5222_v51  ;;  %vm772_vm2 = vcmp.eq.s32.totalorder %v670_v3, %v7455_v46  ;;  %v6310_v3 = vld [vmem:[%s10133_s1 + $0x78] sm:$0xff] }
 0x1a3   :  { %5545 = vmatprep.mubr.msk.f32.mxu1 %vm1252_vm6, %v5222_v51  ;;  %v706_v51 = vpop.permute.xlu0 %705  ;;  %994 = vperm.xlu0 %6040, %v6310_v3  }
 0x1a4   :  { %vm797_vm13 = vcmp.eq.s32.totalorder %v706_v51, %v7437_v38 }
 0x1a5   :  { %5481 = vmatmul.mubr.msk.f32.gmra.mrb[70].mxu0 %vm762_vm5, %v10216_v22  ;;  %v5256_v36 = vsel %vm797_vm13, 1.0, %v10218_v12 }
 0x1a6   :  { %5546 = vmatmul.mubr.msk.f32.gmra.mrb[70].mxu1 %vm762_vm5, %v10216_v22  ;;  %5482 = vmatprep.mubr.msk.f32.mxu0 %vm1252_vm6, %v5224_v61  ;;  %vm774_vm5 = vcmp.eq.s32.totalorder %v673_v57, %v7455_v46 }
 0x1a7   :  { %5547 = vmatprep.mubr.msk.f32.mxu1 %vm1252_vm6, %v5224_v61  ;;  %v6307_v61 = vld [vmem:[%s10133_s1 + $0x50] sm:$0xff] }
 0x1a8   :  { %979 = vperm.xlu1 %6041, %v6307_v61  }
 0x1a9   :  { %5483 = vmatmul.mubr.msk.f32.gmra.mrb[72].mxu0 %vm764_vm8, %v10216_v22 }
 0x1aa   :  { %5548 = vmatmul.mubr.msk.f32.gmra.mrb[72].mxu1 %vm764_vm8, %v10216_v22  ;;  %5484 = vmatprep.mubr.msk.f32.mxu0 %vm1252_vm6, %v5226_v13  ;;  %vm776_vm8 = vcmp.eq.s32.totalorder %v676_v4, %v7455_v46 }
 0x1ab   :  { %5549 = vmatprep.mubr.msk.f32.mxu1 %vm1252_vm6, %v5226_v13  ;;  %v709_v13 = vpop.permute.xlu1 %708 }
 0x1ac   :  { %vm799_vm15 = vcmp.eq.s32.totalorder %v709_v13, %v7437_v38 }
 0x1ad   :  { %5485 = vmatmul.mubr.msk.f32.gmra.mrb[74].mxu0 %vm766_vm10, %v10216_v22  ;;  %v5258_v57 = vsel %vm799_vm15, 1.0, %v10218_v12 }
 0x1ae   :  { %5550 = vmatmul.mubr.msk.f32.gmra.mrb[74].mxu1 %vm766_vm10, %v10216_v22  ;;  %5486 = vmatprep.mubr.msk.f32.mxu0 %vm1252_vm6, %v5228_v58  ;;  %vm778_vm10 = vcmp.eq.s32.totalorder %v679_v54, %v7455_v46 }
 0x1af   :  { %5551 = vmatprep.mubr.msk.f32.mxu1 %vm1252_vm6, %v5228_v58  ;;  %v6309_v58 = vld [vmem:[%s10133_s1 + $0x60] sm:$0xff] }
 0x1b0   :  { %985 = vperm.xlu1 %6041, %v6309_v58   ;;  %v6318_v58 = vld [vmem:[%s10133_s1 + $0xb8] sm:$0xff] }
 0x1b1   :  { %5487 = vmatmul.mubr.msk.f32.gmra.mrb[76].mxu0 %vm768_vm12, %v10216_v22 }
 0x1b2   :  { %5552 = vmatmul.mubr.msk.f32.gmra.mrb[76].mxu1 %vm768_vm12, %v10216_v22  ;;  %5488 = vmatprep.mubr.msk.f32.mxu0 %vm1252_vm6, %v5230_v17  ;;  %vm780_vm12 = vcmp.eq.s32.totalorder %v682_v10, %v7455_v46  ;;  %v6312_v10 = vld [vmem:[%s10133_s1 + $0x88] sm:$0xff] }
 0x1b3   :  { %5553 = vmatprep.mubr.msk.f32.mxu1 %vm1252_vm6, %v5230_v17  ;;  %v712_v17 = vpop.permute.xlu0 %711  ;;  %1000 = vperm.xlu0 %6040, %v6312_v10  }
 0x1b4   :  { %vm801_vm3 = vcmp.eq.s32.totalorder %v712_v17, %v7437_v38 }
 0x1b5   :  { %5489 = vmatmul.mubr.msk.f32.gmra.mrb[78].mxu0 %vm770_vm14, %v10216_v22 }
 0x1b6   :  { %5554 = vmatmul.mubr.msk.f32.gmra.mrb[78].mxu1 %vm770_vm14, %v10216_v22  ;;  %5490 = vmatprep.mubr.msk.f32.mxu0 %vm1252_vm6, %v5232_v44  ;;  %vm782_vm14 = vcmp.eq.s32.totalorder %v685_v18, %v7455_v46 }
 0x1b7   :  { %5555 = vmatprep.mubr.msk.f32.mxu1 %vm1252_vm6, %v5232_v44  ;;  %v6311_v44 = vld [vmem:[%s10133_s1 + $0x70] sm:$0xff] }
 0x1b8   :  { %991 = vperm.xlu1 %6041, %v6311_v44  }
 0x1b9   :  { %5491 = vmatmul.mubr.msk.f32.gmra.mrb[80].mxu0 %vm772_vm2, %v10216_v22 }
 0x1ba   :  { %5556 = vmatmul.mubr.msk.f32.gmra.mrb[80].mxu1 %vm772_vm2, %v10216_v22  ;;  %5492 = vmatprep.mubr.msk.f32.mxu0 %vm1252_vm6, %v5234_v49  ;;  %vm784_vm2 = vcmp.eq.s32.totalorder %v688_v31, %v7455_v46  ;;  %v6313_v31 = vld [vmem:[%s10133_s1 + $0x80] sm:$0xff] }
 0x1bb   :  { %5557 = vmatprep.mubr.msk.f32.mxu1 %vm1252_vm6, %v5234_v49 }
 0x1bc   :  { %997 = vperm.xlu1 %6041, %v6313_v31  }
 0x1bd   :  { %5493 = vmatmul.mubr.msk.f32.gmra.mrb[82].mxu0 %vm774_vm5, %v10216_v22 }
 0x1be   :  { %5558 = vmatmul.mubr.msk.f32.gmra.mrb[82].mxu1 %vm774_vm5, %v10216_v22  ;;  %5494 = vmatprep.mubr.msk.f32.mxu0 %vm1252_vm6, %v5236_v27  ;;  %vm786_vm5 = vcmp.eq.s32.totalorder %v691_v45, %v7455_v46  ;;  %v718_v45 = vpop.permute.xlu0 %717 }
 0x1bf   :  { %5559 = vmatprep.mubr.msk.f32.mxu1 %vm1252_vm6, %v5236_v27  ;;  %vm805_vm9 = vcmp.eq.s32.totalorder %v718_v45, %v7437_v38 }
 0x1c0   :  { %v5264_v7 = vsel %vm805_vm9, 1.0, %v10218_v12 }
 0x1c1   :  { %5495 = vmatmul.mubr.msk.f32.gmra.mrb[84].mxu0 %vm776_vm8, %v10216_v22 }
 0x1c2   :  { %5560 = vmatmul.mubr.msk.f32.gmra.mrb[84].mxu1 %vm776_vm8, %v10216_v22  ;;  %5496 = vmatprep.mubr.msk.f32.mxu0 %vm1252_vm6, %v5238_v14  ;;  %vm788_vm8 = vcmp.eq.s32.totalorder %v694_v60, %v7455_v46  ;;  %v6314_v60 = vld [vmem:[%s10133_s1 + $0x98] sm:$0xff] }
 0x1c3   :  { %5561 = vmatprep.mubr.msk.f32.mxu1 %vm1252_vm6, %v5238_v14  ;;  %v715_v14 = vpop.permute.xlu1 %714  ;;  %1006 = vperm.xlu0 %6040, %v6314_v60  }
 0x1c4   :  { %vm803_vm7 = vcmp.eq.s32.totalorder %v715_v14, %v7437_v38 }
 0x1c5   :  { %5497 = vmatmul.mubr.msk.f32.gmra.mrb[86].mxu0 %vm778_vm10, %v10216_v22 }
 0x1c6   :  { %5562 = vmatmul.mubr.msk.f32.gmra.mrb[86].mxu1 %vm778_vm10, %v10216_v22  ;;  %5498 = vmatprep.mubr.msk.f32.mxu0 %vm1252_vm6, %v5240_v23  ;;  %vm790_vm10 = vcmp.eq.s32.totalorder %v697_v42, %v7455_v46  ;;  %v5262_v42 = vsel %vm803_vm7, 1.0, %v10218_v12 }
 0x1c7   :  { %5563 = vmatprep.mubr.msk.f32.mxu1 %vm1252_vm6, %v5240_v23  ;;  %v5260_v23 = vsel %vm801_vm3, 1.0, %v10218_v12  ;;  %1012 = vperm.xlu0 %6040, %v6316_v1  }
 0x1c9   :  { %5499 = vmatmul.mubr.msk.f32.gmra.mrb[88].mxu0 %vm780_vm12, %v10216_v22 }
 0x1ca   :  { %5564 = vmatmul.mubr.msk.f32.gmra.mrb[88].mxu1 %vm780_vm12, %v10216_v22  ;;  %5500 = vmatprep.mubr.msk.f32.mxu0 %vm1252_vm6, %v5242_v28  ;;  %vm792_vm12 = vcmp.eq.s32.totalorder %v700_v0, %v7455_v46  ;;  %v721_v0 = vpop.permute.xlu1 %720 }
 0x1cb   :  { %5565 = vmatprep.mubr.msk.f32.mxu1 %vm1252_vm6, %v5242_v28  ;;  %vm807_vm11 = vcmp.eq.s32.totalorder %v721_v0, %v7437_v38  ;;  %1018 = vperm.xlu0 %6040, %v6318_v58  }
 0x1cd   :  { %5501 = vmatmul.mubr.msk.f32.gmra.mrb[90].mxu0 %vm782_vm14, %v10216_v22 }
 0x1ce   :  { %5566 = vmatmul.mubr.msk.f32.gmra.mrb[90].mxu1 %vm782_vm14, %v10216_v22  ;;  %5502 = vmatprep.mubr.msk.f32.mxu0 %vm1252_vm6, %v5244_v50  ;;  %vm794_vm14 = vcmp.eq.s32.totalorder %v703_v41, %v7455_v46 }
 0x1cf   :  { %5567 = vmatprep.mubr.msk.f32.mxu1 %vm1252_vm6, %v5244_v50 }
 0x1d1   :  { %5503 = vmatmul.mubr.msk.f32.gmra.mrb[92].mxu0 %vm784_vm2, %v10216_v22 }
 0x1d2   :  { %5568 = vmatmul.mubr.msk.f32.gmra.mrb[92].mxu1 %vm784_vm2, %v10216_v22  ;;  %5504 = vmatprep.mubr.msk.f32.mxu0 %vm1252_vm6, %v5246_v30  ;;  %vm796_vm2 = vcmp.eq.s32.totalorder %v706_v51, %v7455_v46  ;;  %v6317_v51 = vld [vmem:[%s10133_s1 + $0xa0] sm:$0xff] }
 0x1d3   :  { %5569 = vmatprep.mubr.msk.f32.mxu1 %vm1252_vm6, %v5246_v30 }
 0x1d5   :  { %5505 = vmatmul.mubr.msk.f32.gmra.mrb[94].mxu0 %vm786_vm5, %v10216_v22 }
 0x1d6   :  { %5570 = vmatmul.mubr.msk.f32.gmra.mrb[94].mxu1 %vm786_vm5, %v10216_v22  ;;  %5506 = vmatprep.mubr.msk.f32.mxu0 %vm1252_vm6, %v5248_v37  ;;  %vm798_vm5 = vcmp.eq.s32.totalorder %v709_v13, %v7455_v46  ;;  %v724_v13 = vpop.permute.xlu0 %723 }
 0x1d7   :  { %5571 = vmatprep.mubr.msk.f32.mxu1 %vm1252_vm6, %v5248_v37  ;;  %v6315_v37 = vld [vmem:[%s10133_s1 + $0x90] sm:$0xff]  ;;  %vm809_vm13 = vcmp.eq.s32.totalorder %v724_v13, %v7437_v38 }
 0x1d8   :  { %1003 = vperm.xlu1 %6041, %v6315_v37   ;;  %v5268_v60 = vsel %vm809_vm13, 1.0, %v10218_v12 }
 0x1d9   :  { %5507 = vmatmul.mubr.msk.f32.gmra.mrb[96].mxu0 %vm788_vm8, %v10216_v22 }
 0x1da   :  { %5572 = vmatmul.mubr.msk.f32.gmra.mrb[96].mxu1 %vm788_vm8, %v10216_v22  ;;  %5508 = vmatprep.mubr.msk.f32.mxu0 %vm1252_vm6, %v5250_v34  ;;  %vm800_vm8 = vcmp.eq.s32.totalorder %v712_v17, %v7455_v46  ;;  %v730_v37 = vpop.permute.xlu0 %729 }
 0x1db   :  { %5573 = vmatprep.mubr.msk.f32.mxu1 %vm1252_vm6, %v5250_v34  ;;  %vm813_vm3 = vcmp.eq.s32.totalorder %v730_v37, %v7437_v38 }
 0x1dc   :  { %1009 = vperm.xlu1 %6041, %v6317_v51   ;;  %v6323_v51 = vld [vmem:[%s10133_s1 + $0xd0] sm:$0xff] }
 0x1dd   :  { %5509 = vmatmul.mubr.msk.f32.gmra.mrb[98].mxu0 %vm790_vm10, %v10216_v22 }
 0x1de   :  { %5574 = vmatmul.mubr.msk.f32.gmra.mrb[98].mxu1 %vm790_vm10, %v10216_v22  ;;  %5510 = vmatprep.mubr.msk.f32.mxu0 %vm1252_vm6, %v5252_v24  ;;  %vm802_vm10 = vcmp.eq.s32.totalorder %v715_v14, %v7455_v46 }
 0x1df   :  { %5575 = vmatprep.mubr.msk.f32.mxu1 %vm1252_vm6, %v5252_v24 }
 0x1e1   :  { %5511 = vmatmul.mubr.msk.f32.gmra.mrb[100].mxu0 %vm792_vm12, %v10216_v22 }
 0x1e2   :  { %5576 = vmatmul.mubr.msk.f32.gmra.mrb[100].mxu1 %vm792_vm12, %v10216_v22  ;;  %5512 = vmatprep.mubr.msk.f32.mxu0 %vm1252_vm6, %v5254_v56  ;;  %vm804_vm12 = vcmp.eq.s32.totalorder %v718_v45, %v7455_v46 }
 0x1e3   :  { %5577 = vmatprep.mubr.msk.f32.mxu1 %vm1252_vm6, %v5254_v56 }
 0x1e5   :  { %5513 = vmatmul.mubr.msk.f32.gmra.mrb[102].mxu0 %vm794_vm14, %v10216_v22 }
 0x1e6   :  { %5578 = vmatmul.mubr.msk.f32.gmra.mrb[102].mxu1 %vm794_vm14, %v10216_v22  ;;  %5514 = vmatprep.mubr.msk.f32.mxu0 %vm1252_vm6, %v5256_v36  ;;  %vm806_vm14 = vcmp.eq.s32.totalorder %v721_v0, %v7455_v46 }
 0x1e7   :  { %5579 = vmatprep.mubr.msk.f32.mxu1 %vm1252_vm6, %v5256_v36 }
 0x1e9   :  { %5515 = vmatmul.mubr.msk.f32.gmra.mrb[104].mxu0 %vm796_vm2, %v10216_v22 }
 0x1ea   :  { %5580 = vmatmul.mubr.msk.f32.gmra.mrb[104].mxu1 %vm796_vm2, %v10216_v22  ;;  %5516 = vmatprep.mubr.msk.f32.mxu0 %vm1252_vm6, %v5258_v57  ;;  %vm808_vm2 = vcmp.eq.s32.totalorder %v724_v13, %v7455_v46 }
 0x1eb   :  { %5581 = vmatprep.mubr.msk.f32.mxu1 %vm1252_vm6, %v5258_v57  ;;  %v1419_v4 = vpop.f32.mrb[0].mxu0 }
 0x1ec   :  { %v1579_v49 = vmul.f32 0.00125, %v1419_v4  ;;  %v1680_v54 = vpop.f32.mrb[0].mxu1  ;;  %v1421_v27 = vpop.f32.mrb[1].mxu0  ;;  %v5266_v4 = vsel %vm807_vm11, 1.0, %v10218_v12 }
 0x1ed   :  { %v1682_v18 = vpop.f32.mrb[1].mxu1  ;;  %5517 = vmatmul.mubr.msk.f32.gmra.mrb[106].mxu0 %vm798_vm5, %v10216_v22  ;;  %v7672_v40 = vmul.f32 0.00125, %v1680_v54  ;;  %v727_v27 = vpop.permute.xlu1 %726 }
 0x1ee   :  { %v7670_v28 = vmul.f32 %v1579_v49, %v1579_v49  ;;  %5582 = vmatmul.mubr.msk.f32.gmra.mrb[106].mxu1 %vm798_vm5, %v10216_v22  ;;  %5518 = vmatprep.mubr.msk.f32.mxu0 %vm1252_vm6, %v5260_v23  ;;  %v6319_v49 = vld [vmem:[%s10133_s1 + $0xb0] sm:$0xff]  ;;  %vm811_vm15 = vcmp.eq.s32.totalorder %v727_v27, %v7437_v38  ;;  %vm810_vm5 = vcmp.eq.s32.totalorder %v727_v27, %v7455_v46  ;;  %v6325_v27 = vld [vmem:[%s10133_s1 + $0xe0] sm:$0xff] }
 0x1ef   :  { %5583 = vmatprep.mubr.msk.f32.mxu1 %vm1252_vm6, %v5260_v23  ;;  %1015 = vperm.xlu1 %6041, %v6319_v49   ;;  %v6320_v23 = vld [vmem:[%s10133_s1 + $0xc8] sm:$0xff] }
 0x1f0   :  { %v1424_v55 = vpop.f32.mrb[2].mxu0  ;;  %v1685_v59 = vpop.f32.mrb[2].mxu1  ;;  %1024 = vperm.xlu0 %6040, %v6320_v23   ;;  %v10397_v8 = vsub.f32 %v7672_v40, %v7670_v28 }
 0x1f1   :  { %v1580_v30 = vmul.f32 0.00125, %v1424_v55  ;;  %v1426_v53 = vpop.f32.mrb[3].mxu0  ;;  %v1687_v47 = vpop.f32.mrb[3].mxu1  ;;  %5519 = vmatmul.mubr.msk.f32.gmra.mrb[108].mxu0 %vm800_vm8, %v10216_v22  ;;  %v7695_v62 = vmul.f32 0.00125, %v1685_v59 }
 0x1f2   :  { %5584 = vmatmul.mubr.msk.f32.gmra.mrb[108].mxu1 %vm800_vm8, %v10216_v22  ;;  %5520 = vmatprep.mubr.msk.f32.mxu0 %vm1252_vm6, %v5262_v42  ;;  %v733_v13 = vpop.permute.xlu1 %732  ;;  %vm812_vm8 = vcmp.eq.s32.totalorder %v730_v37, %v7455_v46  ;;  %v6327_v37 = vld [vmem:[%s10133_s1 + $0xf0] sm:$0xff] }
 0x1f3   :  { %v7693_v32 = vmul.f32 %v1580_v30, %v1580_v30  ;;  %5585 = vmatprep.mubr.msk.f32.mxu1 %vm1252_vm6, %v5262_v42  ;;  %v6321_v30 = vld [vmem:[%s10133_s1 + $0xc0] sm:$0xff]  ;;  %vm815_vm7 = vcmp.eq.s32.totalorder %v733_v13, %v7437_v38 }
 0x1f4   :  { %v1429_v34 = vpop.f32.mrb[4].mxu0  ;;  %1021 = vperm.xlu1 %6041, %v6321_v30   ;;  %v6326_v30 = vld [vmem:[%s10133_s1 + $0xf8] sm:$0x3] }
 0x1f5   :  { %v1581_v41 = vmul.f32 0.00125, %v1429_v34  ;;  %v1690_v24 = vpop.f32.mrb[4].mxu1  ;;  %v1431_v48 = vpop.f32.mrb[5].mxu0  ;;  %5521 = vmatmul.mubr.msk.f32.gmra.mrb[110].mxu0 %vm802_vm10, %v10216_v22  ;;  %v6322_v34 = vld [vmem:[%s10133_s1 + $0xd8] sm:$0xff] }
 0x1f6   :  { %v1692_v56 = vpop.f32.mrb[5].mxu1  ;;  %5586 = vmatmul.mubr.msk.f32.gmra.mrb[110].mxu1 %vm802_vm10, %v10216_v22  ;;  %5522 = vmatprep.mubr.msk.f32.mxu0 %vm1252_vm6, %v5264_v7  ;;  %v7716_v2 = vmul.f32 0.00125, %v1690_v24  ;;  %vm814_vm10 = vcmp.eq.s32.totalorder %v733_v13, %v7455_v46 }
 0x1f7   :  { %v7714_v61 = vmul.f32 %v1581_v41, %v1581_v41  ;;  %5587 = vmatprep.mubr.msk.f32.mxu1 %vm1252_vm6, %v5264_v7  ;;  %1030 = vperm.xlu0 %6040, %v6322_v34   ;;  %v5270_v7 = vsel %vm811_vm15, 1.0, %v10218_v12 }
 0x1f8   :  { %v1434_v36 = vpop.f32.mrb[6].mxu0  ;;  %1027 = vperm.xlu1 %6041, %v6323_v51  }
 0x1f9   :  { %v1582_v17 = vmul.f32 0.00125, %v1434_v36  ;;  %v1695_v57 = vpop.f32.mrb[6].mxu1  ;;  %v1436_v44 = vpop.f32.mrb[7].mxu0  ;;  %5523 = vmatmul.mubr.msk.f32.gmra.mrb[112].mxu0 %vm804_vm12, %v10216_v22 }
 0x1fa   :  { %v1697_v54 = vpop.f32.mrb[7].mxu1  ;;  %5588 = vmatmul.mubr.msk.f32.gmra.mrb[112].mxu1 %vm804_vm12, %v10216_v22  ;;  %5524 = vmatprep.mubr.msk.f32.mxu0 %vm1252_vm6, %v5266_v4  ;;  %v7737_v14 = vmul.f32 0.00125, %v1695_v57  ;;  %v6324_v57 = vld [vmem:[%s10133_s1 + $0xe8] sm:$0xff] }
 0x1fb   :  { %v7735_v10 = vmul.f32 %v1582_v17, %v1582_v17  ;;  %5589 = vmatprep.mubr.msk.f32.mxu1 %vm1252_vm6, %v5266_v4  ;;  %1036 = vperm.xlu0 %6040, %v6324_v57  }
 0x1fc   :  { %v1439_v18 = vpop.f32.mrb[8].mxu0  ;;  %1033 = vperm.xlu1 %6041, %v6325_v27   ;;  %v10396_v27 = vmov 0  }
 0x1fd   :  { %v1583_v45 = vmul.f32 0.00125, %v1439_v18  ;;  %v1700_v55 = vpop.f32.mrb[8].mxu1  ;;  %v1441_v59 = vpop.f32.mrb[9].mxu0  ;;  %5525 = vmatmul.mubr.msk.f32.gmra.mrb[114].mxu0 %vm806_vm14, %v10216_v22  ;;  %v5272_v18 = vsel %vm813_vm3, 1.0, %v10218_v12 }
 0x1fe   :  { %v1702_v53 = vpop.f32.mrb[9].mxu1  ;;  %5590 = vmatmul.mubr.msk.f32.gmra.mrb[114].mxu1 %vm806_vm14, %v10216_v22  ;;  %5526 = vmatprep.mubr.msk.f32.mxu0 %vm1252_vm6, %v5268_v60  ;;  %v7758_v42 = vmul.f32 0.00125, %v1700_v55 }
 0x1ff   :  { %v7756_v47 = vmul.f32 %v1583_v45, %v1583_v45  ;;  %5591 = vmatprep.mubr.msk.f32.mxu1 %vm1252_vm6, %v5268_v60  ;;  %v736_v45 = vpop.permute.xlu0 %735  ;;  %1042 = vperm.xlu0 %6040, %v6326_v30  }
 0x200   :  { %v1444_v0 = vpop.f32.mrb[10].mxu0  ;;  %1039 = vperm.xlu1 %6041, %v6327_v37   ;;  %vm817_vm9 = vcmp.eq.s32.totalorder %v736_v45, %v7437_v38  ;;  %vm816_vm12 = vcmp.eq.s32.totalorder %v736_v45, %v7455_v46 }
 0x201   :  { %v1584_v41 = vmul.f32 0.00125, %v1444_v0  ;;  %v1705_v24 = vpop.f32.mrb[10].mxu1  ;;  %v1446_v48 = vpop.f32.mrb[11].mxu0  ;;  %5527 = vmatmul.mubr.msk.f32.gmra.mrb[116].mxu0 %vm808_vm2, %v10216_v22 }
 0x202   :  { %v1707_v56 = vpop.f32.mrb[11].mxu1  ;;  %5592 = vmatmul.mubr.msk.f32.gmra.mrb[116].mxu1 %vm808_vm2, %v10216_v22  ;;  %5528 = vmatprep.mubr.msk.f32.mxu0 %vm1252_vm6, %v5270_v7  ;;  %v7779_v58 = vmul.f32 0.00125, %v1705_v24  ;;  %v5274_v24 = vsel %vm815_vm7, 1.0, %v10218_v12 }
 0x203   :  { %v7777_v36 = vmul.f32 %v1584_v41, %v1584_v41  ;;  %5593 = vmatprep.mubr.msk.f32.mxu1 %vm1252_vm6, %v5270_v7  ;;  %v739_v7 = vpop.permute.xlu1 %738 }
 0x204   :  { %v1449_v17 = vpop.f32.mrb[12].mxu0  ;;  %6042 = vset.pattern.permute.xlu1 %v10396_v27  ;;  %vm819_vm11 = vcmp.eq.s32.totalorder %v739_v7, %v7437_v38  ;;  %vm818_vm13 = vcmp.eq.s32.totalorder %v739_v7, %v7455_v46 }
 0x205   :  { %v1585_v4 = vmul.f32 0.00125, %v1449_v17  ;;  %v1710_v49 = vpop.f32.mrb[12].mxu1  ;;  %v1451_v54 = vpop.f32.mrb[13].mxu0  ;;  %5529 = vmatmul.mubr.msk.f32.gmra.mrb[118].mxu0 %vm810_vm5, %v10216_v22 }
 0x206   :  { %v1712_v23 = vpop.f32.mrb[13].mxu1  ;;  %5594 = vmatmul.mubr.msk.f32.gmra.mrb[118].mxu1 %vm810_vm5, %v10216_v22  ;;  %5530 = vmatprep.mubr.msk.f32.mxu0 %vm1252_vm6, %v5272_v18  ;;  %v7800_v59 = vmul.f32 0.00125, %v1710_v49 }
 0x207   :  { %v7798_v55 = vmul.f32 %v1585_v4, %v1585_v4  ;;  %5595 = vmatprep.mubr.msk.f32.mxu1 %vm1252_vm6, %v5272_v18  ;;  %v5276_v18 = vsel %vm817_vm9, 1.0, %v10218_v12 }
 0x208   :  { %v1454_v60 = vpop.f32.mrb[14].mxu0 }
 0x209   :  { %v1586_v0 = vmul.f32 0.00125, %v1454_v60  ;;  %v1715_v34 = vpop.f32.mrb[14].mxu1  ;;  %v1456_v41 = vpop.f32.mrb[15].mxu0  ;;  %5531 = vmatmul.mubr.msk.f32.gmra.mrb[120].mxu0 %vm812_vm8, %v10216_v22 }
 0x20a   :  { %v1717_v48 = vpop.f32.mrb[15].mxu1  ;;  %5596 = vmatmul.mubr.msk.f32.gmra.mrb[120].mxu1 %vm812_vm8, %v10216_v22  ;;  %5532 = vmatprep.mubr.msk.f32.mxu0 %vm1252_vm6, %v5274_v24  ;;  %v7821_v56 = vmul.f32 0.00125, %v1715_v34 }
 0x20b   :  { %v7819_v51 = vmul.f32 %v1586_v0, %v1586_v0  ;;  %5597 = vmatprep.mubr.msk.f32.mxu1 %vm1252_vm6, %v5274_v24  ;;  %v5278_v24 = vsel %vm819_vm11, 1.0, %v10218_v12 }
 0x20c   :  { %v1459_v17 = vpop.f32.mrb[16].mxu0 }
 0x20d   :  { %v1587_v4 = vmul.f32 0.00125, %v1459_v17  ;;  %v1720_v49 = vpop.f32.mrb[16].mxu1  ;;  %v1461_v54 = vpop.f32.mrb[17].mxu0  ;;  %5533 = vmatmul.mubr.msk.f32.gmra.mrb[122].mxu0 %vm814_vm10, %v10216_v22 }
 0x20e   :  { %v1722_v23 = vpop.f32.mrb[17].mxu1  ;;  %5598 = vmatmul.mubr.msk.f32.gmra.mrb[122].mxu1 %vm814_vm10, %v10216_v22  ;;  %5534 = vmatprep.mubr.msk.f32.mxu0 %vm1252_vm6, %v5276_v18  ;;  %v7835_v60 = vmul.f32 0.00125, %v1720_v49 }
 0x20f   :  { %v7833_v13 = vmul.f32 %v1587_v4, %v1587_v4  ;;  %5599 = vmatprep.mubr.msk.f32.mxu1 %vm1252_vm6, %v5276_v18 }
 0x210   :  { %v1464_v30 = vpop.f32.mrb[18].mxu0 }
 0x211   :  { %v1588_v34 = vmul.f32 0.00125, %v1464_v30  ;;  %v1725_v41 = vpop.f32.mrb[18].mxu1  ;;  %v1466_v38 = vpop.f32.mrb[19].mxu0  ;;  %5535 = vmatmul.mubr.msk.f32.gmra.mrb[124].mxu0 %vm816_vm12, %v10216_v22 }
 0x212   :  { %v1727_v37 = vpop.f32.mrb[19].mxu1  ;;  %5600 = vmatmul.mubr.msk.f32.gmra.mrb[124].mxu1 %vm816_vm12, %v10216_v22  ;;  %5536 = vmatprep.mubr.msk.f32.mxu0 %vm1252_vm6, %v5278_v24  ;;  %v7847_v17 = vmul.f32 0.00125, %v1725_v41 }
 0x213   :  { %v7845_v48 = vmul.f32 %v1588_v34, %v1588_v34  ;;  %5601 = vmatprep.mubr.msk.f32.mxu1 %vm1252_vm6, %v5278_v24 }
 0x214   :  { %v1469_v45 = vpop.f32.mrb[20].mxu0 }
 0x215   :  { %v1589_v49 = vmul.f32 0.00125, %v1469_v45  ;;  %v1730_v54 = vpop.f32.mrb[20].mxu1  ;;  %v1471_v18 = vpop.f32.mrb[21].mxu0  ;;  %5537 = vmatmul.mubr.msk.f32.gmra.mrb[126].mxu0 %vm818_vm13, %v10216_v22 }
 0x216   :  { %v1732_v23 = vpop.f32.mrb[21].mxu1  ;;  %5602 = vmatmul.mubr.msk.f32.gmra.mrb[126].mxu1 %vm818_vm13, %v10216_v22  ;;  %v7857_v34 = vmul.f32 0.00125, %v1730_v54 }
 0x217   :  { %v7855_v30 = vmul.f32 %v1589_v49, %v1589_v49 }
 0x218   :  { %v1474_v41 = vpop.f32.mrb[22].mxu0 }
 0x219   :  { %v1590_v46 = vmul.f32 0.00125, %v1474_v41  ;;  %v1735_v7 = vpop.f32.mrb[22].mxu1  ;;  %v1476_v24 = vpop.f32.mrb[23].mxu0 }
 0x21a   :  { %v1737_v37 = vpop.f32.mrb[23].mxu1  ;;  %v7863_v18 = vmul.f32 0.00125, %v1735_v7 }
 0x21b   :  { %v7861_v45 = vmul.f32 %v1590_v46, %v1590_v46 }
 0x21c   :  { %v1479_v35 = vpop.f32.mrb[24].mxu0 }
 0x21d   :  { %v1591_v49 = vmul.f32 0.00125, %v1479_v35  ;;  %v1740_v22 = vpop.f32.mrb[24].mxu1  ;;  %v1481_v54 = vpop.f32.mrb[25].mxu0 }
 0x21e   :  { %v1742_v12 = vpop.f32.mrb[25].mxu1  ;;  %v7869_v0 = vmul.f32 0.00125, %v1740_v22 }
 0x21f   :  { %v7867_v4 = vmul.f32 %v1591_v49, %v1591_v49 }
 0x220   :  { %v1484_v41 = vpop.f32.mrb[26].mxu0 }
 0x221   :  { %v1592_v46 = vmul.f32 0.00125, %v1484_v41  ;;  %v1745_v37 = vpop.f32.mrb[26].mxu1  ;;  %v1486_v7 = vpop.f32.mrb[27].mxu0 }
 0x222   :  { %v1747_v38 = vpop.f32.mrb[27].mxu1  ;;  %v7875_v53 = vmul.f32 0.00125, %v1745_v37 }
 0x223   :  { %v7873_v57 = vmul.f32 %v1592_v46, %v1592_v46 }
 0x224   :  { %v1489_v35 = vpop.f32.mrb[28].mxu0 }
 0x225   :  { %v1593_v49 = vmul.f32 0.00125, %v1489_v35  ;;  %v1750_v54 = vpop.f32.mrb[28].mxu1  ;;  %v1491_v22 = vpop.f32.mrb[29].mxu0 }
 0x226   :  { %v1752_v23 = vpop.f32.mrb[29].mxu1  ;;  %v7881_v1 = vmul.f32 0.00125, %v1750_v54 }
 0x227   :  { %v7879_v44 = vmul.f32 %v1593_v49, %v1593_v49 }
 0x228   :  { %v1494_v41 = vpop.f32.mrb[30].mxu0 }
 0x229   :  { %v1594_v46 = vmul.f32 0.00125, %v1494_v41  ;;  %v1755_v7 = vpop.f32.mrb[30].mxu1  ;;  %v1496_v37 = vpop.f32.mrb[31].mxu0 }
 0x22a   :  { %v1757_v24 = vpop.f32.mrb[31].mxu1  ;;  %v7887_v3 = vmul.f32 0.00125, %v1755_v7 }
 0x22b   :  { %v7885_v31 = vmul.f32 %v1594_v46, %v1594_v46  ;;  %v1935_v24 = vmax.f32 %v10397_v8, 0.0  ;;  %v10398_v8 = vsub.f32 %v7695_v62, %v7693_v32 }
 0x22c   :  { %v1499_v35 = vpop.f32.mrb[32].mxu0 }
 0x22d   :  { %v1595_v49 = vmul.f32 0.00125, %v1499_v35  ;;  %v1760_v22 = vpop.f32.mrb[32].mxu1  ;;  %v1501_v54 = vpop.f32.mrb[33].mxu0  ;;  %v1936_v28 = vmax.f32 %v10398_v8, 0.0 }
 0x22e   :  { %v1762_v12 = vpop.f32.mrb[33].mxu1  ;;  %v7893_v50 = vmul.f32 0.00125, %v1760_v22 }
 0x22f   :  { %v7891_v39 = vmul.f32 %v1595_v49, %v1595_v49 }
 0x230   :  { %v1504_v41 = vpop.f32.mrb[34].mxu0 }
 0x231   :  { %v1596_v46 = vmul.f32 0.00125, %v1504_v41  ;;  %v1765_v37 = vpop.f32.mrb[34].mxu1  ;;  %v1506_v7 = vpop.f32.mrb[35].mxu0 }
 0x232   :  { %v1767_v38 = vpop.f32.mrb[35].mxu1  ;;  %v7899_v52 = vmul.f32 0.00125, %v1765_v37 }
 0x233   :  { %v7897_v27 = vmul.f32 %v1596_v46, %v1596_v46 }
 0x234   :  { %v1509_v35 = vpop.f32.mrb[36].mxu0 }
 0x235   :  { %v1597_v49 = vmul.f32 0.00125, %v1509_v35  ;;  %v1770_v54 = vpop.f32.mrb[36].mxu1  ;;  %v1511_v22 = vpop.f32.mrb[37].mxu0  ;;  %v1967_v35 = vadd.f32 1e-05, %v1935_v24 }
 0x236   :  { %v1772_v23 = vpop.f32.mrb[37].mxu1  ;;  %v7908_v7 = vmul.f32 0.00125, %v1770_v54 }
 0x237   :  { %v7906_v41 = vmul.f32 %v1597_v49, %v1597_v49  ;;  %6104 = vrsqrt.f32 %v1967_v35  ;;  %v10399_v35 = vsub.f32 %v7716_v2, %v7714_v61 }
 0x238   :  { %v1514_v38 = vpop.f32.mrb[38].mxu0 }
 0x239   :  { %v1598_v37 = vmul.f32 0.00125, %v1514_v38  ;;  %v1775_v19 = vpop.f32.mrb[38].mxu1  ;;  %v1516_v33 = vpop.f32.mrb[39].mxu0 }
 0x23a   :  { %v1777_v12 = vpop.f32.mrb[39].mxu1  ;;  %v7914_v23 = vmul.f32 0.00125, %v1775_v19  ;;  %v1968_v19 = vadd.f32 1e-05, %v1936_v28 }
 0x23b   :  { %v7912_v29 = vmul.f32 %v1598_v37, %v1598_v37 }
 0x23c   :  { %v1519_v22 = vpop.f32.mrb[40].mxu0  ;;  %6106 = vrsqrt.f32 %v1968_v19  ;;  %v10401_v19 = vsub.f32 %v7758_v42, %v7756_v47 }
 0x23d   :  { %v1599_v49 = vmul.f32 0.00125, %v1519_v22  ;;  %v1780_v54 = vpop.f32.mrb[40].mxu1  ;;  %v1521_v46 = vpop.f32.mrb[41].mxu0 }
 0x23e   :  { %v1782_v38 = vpop.f32.mrb[41].mxu1  ;;  %v7923_v24 = vmul.f32 0.00125, %v1780_v54  ;;  %v1939_v61 = vmax.f32 %v10401_v19, 0.0 }
 0x23f   :  { %v7921_v33 = vmul.f32 %v1599_v49, %v1599_v49  ;;  %v1937_v49 = vmax.f32 %v10399_v35, 0.0 }
 0x240   :  { %v1524_v12 = vpop.f32.mrb[42].mxu0  ;;  %v1971_v40 = vadd.f32 1e-05, %v1939_v61  ;;  %v10405_v61 = vsub.f32 %v7835_v60, %v7833_v13  ;;  %v10407_v13 = vsub.f32 %v7857_v34, %v7855_v30  ;;  %v10409_v34 = vsub.f32 %v7869_v0, %v7867_v4 }
 0x241   :  { %v1600_v26 = vmul.f32 0.00125, %v1524_v12  ;;  %v1785_v32 = vpop.f32.mrb[42].mxu1  ;;  %v1526_v62 = vpop.f32.mrb[43].mxu0 }
 0x242   :  { %v1787_v8 = vpop.f32.mrb[43].mxu1  ;;  %v7929_v22 = vmul.f32 0.00125, %v1785_v32  ;;  %v10400_v62 = vsub.f32 %v7737_v14, %v7735_v10  ;;  %v6105_v35 = vpop.eup %6104  ;;  %v1945_v60 = vmax.f32 %v10407_v13, 0.0 }
 0x243   :  { %v7927_v25 = vmul.f32 %v1600_v26, %v1600_v26 }
 0x244   :  { %v1529_v46 = vpop.f32.mrb[44].mxu0  ;;  %v1938_v26 = vmax.f32 %v10400_v62, 0.0 }
 0x245   :  { %v1601_v54 = vmul.f32 0.00125, %v1529_v46  ;;  %v1790_v38 = vpop.f32.mrb[44].mxu1  ;;  %v1531_v37 = vpop.f32.mrb[45].mxu0  ;;  %v308_v46 = vld [vmem:[%s10135_s3] sm:$0xff] }
 0x246   :  { %v1792_v12 = vpop.f32.mrb[45].mxu1  ;;  %v7941_v32 = vmul.f32 0.00125, %v1790_v38  ;;  %v1969_v37 = vadd.f32 1e-05, %v1937_v49  ;;  %v10402_v38 = vsub.f32 %v7779_v58, %v7777_v36  ;;  %v10403_v49 = vsub.f32 %v7800_v59, %v7798_v55 }
 0x247   :  { %v7939_v8 = vmul.f32 %v1601_v54, %v1601_v54  ;;  %v1970_v47 = vadd.f32 1e-05, %v1938_v26  ;;  %v7961_v12 = vmul.f32 %v6105_v35, %v308_v46  ;;  %v1943_v55 = vmax.f32 %v10405_v61, 0.0 }
 0x248   :  { %v1534_v2 = vpop.f32.mrb[46].mxu0  ;;  %v1940_v62 = vmax.f32 %v10402_v38, 0.0  ;;  %v1941_v21 = vmax.f32 %v10403_v49, 0.0  ;;  %6108 = vrsqrt.f32 %v1969_v37  ;;  %v10406_v46 = vsub.f32 %v7847_v17, %v7845_v48 }
 0x249   :  { %v1602_v10 = vmul.f32 0.00125, %v1534_v2  ;;  %v1795_v14 = vpop.f32.mrb[46].mxu1  ;;  %v1536_v54 = vpop.f32.mrb[47].mxu0  ;;  %v10404_v2 = vsub.f32 %v7821_v56, %v7819_v51  ;;  %6110 = vrsqrt.f32 %v1970_v47  ;;  %v10408_v38 = vsub.f32 %v7863_v18, %v7861_v45 }
 0x24a   :  { %v1797_v28 = vpop.f32.mrb[47].mxu1  ;;  %v7956_v19 = vmul.f32 0.00125, %v1795_v14  ;;  %v1972_v14 = vadd.f32 1e-05, %v1940_v62  ;;  %v6107_v54 = vpop.eup %6106  ;;  %v1944_v35 = vmax.f32 %v10406_v46, 0.0  ;;  %v7989_v48 = vmul.f32 %v7961_v12, %v7961_v12 }
 0x24b   :  { %v7954_v42 = vmul.f32 %v1602_v10, %v1602_v10  ;;  %v1942_v36 = vmax.f32 %v10404_v2, 0.0  ;;  %v1973_v37 = vadd.f32 1e-05, %v1941_v21  ;;  %v1946_v62 = vmax.f32 %v10408_v38, 0.0 }
 0x24c   :  { %v1539_v20 = vpop.f32.mrb[48].mxu0  ;;  %6112 = vrsqrt.f32 %v1971_v40  ;;  %v1975_v30 = vadd.f32 1e-05, %v1943_v55  ;;  %v1947_v45 = vmax.f32 %v10409_v34, 0.0  ;;  %v10410_v40 = vsub.f32 %v7875_v53, %v7873_v57 }
 0x24d   :  { %v1926_v58 = vsub.f32 %v7956_v19, %v7954_v42  ;;  %v1603_v28 = vmul.f32 0.00125, %v1539_v20  ;;  %v1800_v26 = vpop.f32.mrb[48].mxu1  ;;  %v1541_v10 = vpop.f32.mrb[49].mxu0  ;;  %v309_v20 = vld [vmem:[%s10135_s3 + $0x8] sm:$0xff]  ;;  %6114 = vrsqrt.f32 %v1972_v14  ;;  %v10411_v55 = vsub.f32 %v7881_v1, %v7879_v44 }
 0x24e   :  { %v1802_v59 = vpop.f32.mrb[49].mxu1  ;;  %v7976_v56 = vmul.f32 0.00125, %v1800_v26  ;;  %v1974_v17 = vadd.f32 1e-05, %v1942_v36  ;;  %v7996_v26 = vmul.f32 %v6107_v54, %v309_v20  ;;  %v1948_v36 = vmax.f32 %v10410_v40, 0.0 }
 0x24f   :  { %v7974_v51 = vmul.f32 %v1603_v28, %v1603_v28  ;;  %v1976_v10 = vadd.f32 1e-05, %v1944_v35  ;;  %6116 = vrsqrt.f32 %v1973_v37  ;;  %v1977_v46 = vadd.f32 1e-05, %v1945_v60 }
 0x250   :  { %v1544_v47 = vpop.f32.mrb[50].mxu0  ;;  %v1978_v14 = vadd.f32 1e-05, %v1946_v62  ;;  %v1949_v0 = vmax.f32 %v10411_v55, 0.0  ;;  %6118 = vrsqrt.f32 %v1974_v17  ;;  %v10412_v54 = vsub.f32 %v7887_v3, %v7885_v31  ;;  %v310_v17 = vld [vmem:[%s10135_s3 + $0x10] sm:$0xff] }
 0x251   :  { %v1927_v49 = vsub.f32 %v7976_v56, %v7974_v51  ;;  %v1604_v2 = vmul.f32 0.00125, %v1544_v47  ;;  %v1805_v21 = vpop.f32.mrb[50].mxu1  ;;  %v1546_v28 = vpop.f32.mrb[51].mxu0  ;;  %6120 = vrsqrt.f32 %v1975_v30  ;;  %v1979_v37 = vadd.f32 1e-05, %v1947_v45 }
 0x252   :  { %v1807_v18 = vpop.f32.mrb[51].mxu1  ;;  %v8003_v59 = vmul.f32 0.00125, %v1805_v21  ;;  %v1950_v35 = vmax.f32 %v10412_v54, 0.0  ;;  %v10413_v60 = vsub.f32 %v7893_v50, %v7891_v39  ;;  %v8018_v44 = vmul.f32 %v7996_v26, %v7996_v26  ;;  %v6109_v62 = vpop.eup %6108 }
 0x253   :  { %v8001_v61 = vmul.f32 %v1604_v2, %v1604_v2  ;;  %6122 = vrsqrt.f32 %v1976_v10  ;;  %v1980_v3 = vadd.f32 1e-05, %v1948_v36  ;;  %v1981_v2 = vadd.f32 1e-05, %v1949_v0  ;;  %v6111_v34 = vpop.eup %6110 }
 0x254   :  { %v1549_v4 = vpop.f32.mrb[52].mxu0  ;;  %v1951_v38 = vmax.f32 %v10413_v60, 0.0  ;;  %6124 = vrsqrt.f32 %v1977_v46  ;;  %v10414_v50 = vsub.f32 %v7899_v52, %v7897_v27  ;;  %v10415_v21 = vsub.f32 %v7908_v7, %v7906_v41 }
 0x255   :  { %v1928_v53 = vsub.f32 %v8003_v59, %v8001_v61  ;;  %v1605_v57 = vmul.f32 0.00125, %v1549_v4  ;;  %v1810_v20 = vpop.f32.mrb[52].mxu1  ;;  %v1551_v13 = vpop.f32.mrb[53].mxu0  ;;  %6126 = vrsqrt.f32 %v1978_v14  ;;  %v1982_v45 = vadd.f32 1e-05, %v1950_v35 }
 0x256   :  { %v1812_v1 = vpop.f32.mrb[53].mxu1  ;;  %v8022_v47 = vmul.f32 0.00125, %v1810_v20  ;;  %v1952_v39 = vmax.f32 %v10414_v50, 0.0  ;;  %v1953_v28 = vmax.f32 %v10415_v21, 0.0  ;;  %6128 = vrsqrt.f32 %v1979_v37  ;;  %v6113_v41 = vpop.eup %6112  ;;  %v311_v35 = vld [vmem:[%s10135_s3 + $0x18] sm:$0xff] }
 0x257   :  { %v8020_v31 = vmul.f32 %v1605_v57, %v1605_v57  ;;  %v1983_v46 = vadd.f32 1e-05, %v1951_v38  ;;  %v10416_v52 = vsub.f32 %v7914_v23, %v7912_v29  ;;  %v8038_v0 = vmul.f32 %v6109_v62, %v310_v17  ;;  %v6115_v57 = vpop.eup %6114  ;;  %v313_v21 = vld [vmem:[%s10135_s3 + $0x28] sm:$0xff]  ;;  %v314_v61 = vld [vmem:[%s10135_s3 + $0x30] sm:$0xff] }
 0x258   :  { %v1554_v30 = vpop.f32.mrb[54].mxu0  ;;  %6130 = vrsqrt.f32 %v1980_v3  ;;  %v10417_v7 = vsub.f32 %v7923_v24, %v7921_v33  ;;  %v1984_v29 = vadd.f32 1e-05, %v1952_v39  ;;  %v1985_v23 = vadd.f32 1e-05, %v1953_v28  ;;  %v312_v3 = vld [vmem:[%s10135_s3 + $0x20] sm:$0xff] }
 0x259   :  { %v1929_v18 = vsub.f32 %v8022_v47, %v8020_v31  ;;  %v1606_v10 = vmul.f32 0.00125, %v1554_v30  ;;  %v1815_v40 = vpop.f32.mrb[54].mxu1  ;;  %v1556_v36 = vpop.f32.mrb[55].mxu0  ;;  %v1954_v27 = vmax.f32 %v10416_v52, 0.0  ;;  %6132 = vrsqrt.f32 %v1981_v2 }
 0x25a   :  { %v1817_v55 = vpop.f32.mrb[55].mxu1  ;;  %v1955_v14 = vmax.f32 %v10417_v7, 0.0  ;;  %v8045_v54 = vmul.f32 0.00125, %v1815_v40  ;;  %v10418_v20 = vsub.f32 %v7929_v22, %v7927_v25  ;;  %6134 = vrsqrt.f32 %v1982_v45  ;;  %v6117_v31 = vpop.eup %6116 }
 0x25b   :  { %v8043_v4 = vmul.f32 %v1606_v10, %v1606_v10  ;;  %v10419_v33 = vsub.f32 %v7941_v32, %v7939_v8  ;;  %6136 = vrsqrt.f32 %v1983_v46  ;;  %v1986_v25 = vadd.f32 1e-05, %v1954_v27  ;;  %v8066_v32 = vpop.eup %6118 }
 0x25c   :  { %v1956_v13 = vmax.f32 %v10418_v20, 0.0  ;;  %v1559_v37 = vpop.f32.mrb[56].mxu0  ;;  %v1958_v22 = vmax.f32 %v1926_v58, 0.0  ;;  %v8064_v8 = vmul.f32 %v6111_v34, %v311_v35  ;;  %v1987_v17 = vadd.f32 1e-05, %v1955_v14  ;;  %v6121_v42 = vpop.eup %6120 }
 0x25d   :  { %v1957_v24 = vmax.f32 %v10419_v33, 0.0  ;;  %v1930_v60 = vsub.f32 %v8045_v54, %v8043_v4  ;;  %v1607_v38 = vmul.f32 0.00125, %v1559_v37  ;;  %v1820_v1 = vpop.f32.mrb[56].mxu1  ;;  %v1561_v62 = vpop.f32.mrb[57].mxu0  ;;  %v1959_v2 = vmax.f32 %v1927_v49, 0.0 }
 0x25e   :  { %v1822_v47 = vpop.f32.mrb[57].mxu1  ;;  %v8073_v39 = vmul.f32 0.00125, %v1820_v1  ;;  %6138 = vrsqrt.f32 %v1984_v29  ;;  %v1988_v19 = vadd.f32 1e-05, %v1956_v13  ;;  %v1960_v58 = vmax.f32 %v1928_v53, 0.0  ;;  %v6123_v51 = vpop.eup %6122 }
 0x25f   :  { %v8071_v50 = vmul.f32 %v1607_v38, %v1607_v38  ;;  %v8081_v30 = vmul.f32 %v6113_v41, %v312_v3  ;;  %6140 = vrsqrt.f32 %v1985_v23  ;;  %v1989_v56 = vadd.f32 1e-05, %v1957_v24  ;;  %v6125_v40 = vpop.eup %6124  ;;  %v315_v29 = vld [vmem:[%s10135_s3 + $0x38] sm:$0xff]  ;;  %v316_v38 = vld [vmem:[%s10135_s3 + $0x40] sm:$0xff]  ;;  %v317_v1 = vld [vmem:[%s10135_s3 + $0x48] sm:$0xff] }
 0x260   :  { %v1564_v28 = vpop.f32.mrb[58].mxu0  ;;  %6142 = vrsqrt.f32 %v1986_v25  ;;  %v1990_v36 = vadd.f32 1e-05, %v1958_v22  ;;  %v1961_v46 = vmax.f32 %v1929_v18, 0.0  ;;  %v8085_v27 = vmul.f32 %v6115_v57, %v313_v21  ;;  %v6127_v59 = vpop.eup %6126  ;;  %v318_v47 = vld [vmem:[%s10135_s3 + $0x50] sm:$0xff] }
 0x261   :  { %v1608_v34 = vmul.f32 0.00125, %v1564_v28  ;;  %v1825_v45 = vpop.f32.mrb[58].mxu1  ;;  %v1566_v10 = vpop.f32.mrb[59].mxu0  ;;  %6144 = vrsqrt.f32 %v1987_v17  ;;  %v1991_v53 = vadd.f32 1e-05, %v1959_v2  ;;  %v8096_v18 = vmul.f32 %v8038_v0, %v8038_v0 }
 0x262   :  { %v1827_v52 = vpop.f32.mrb[59].mxu1  ;;  %v8092_v41 = vmul.f32 0.00125, %v1825_v45  ;;  %v6129_v7 = vpop.eup %6128  ;;  %6146 = vrsqrt.f32 %v1988_v19  ;;  %v1992_v14 = vadd.f32 1e-05, %v1960_v58  ;;  %v8100_v57 = vmul.f32 %v8064_v8, %v8064_v8  ;;  %v319_v58 = vld [vmem:[%s10135_s3 + $0x58] sm:$0xff] }
 0x263   :  { %v8090_v55 = vmul.f32 %v1608_v34, %v1608_v34  ;;  %v6131_v23 = vpop.eup %6130  ;;  %6148 = vrsqrt.f32 %v1989_v56  ;;  %v8107_v24 = vmul.f32 %v6117_v31, %v314_v61  ;;  %v1993_v3 = vadd.f32 1e-05, %v1961_v46  ;;  %v320_v28 = vld [vmem:[%s10135_s3 + $0x60] sm:$0xff]  ;;  %v321_v56 = vld [vmem:[%s10135_s3 + $0x68] sm:$0xff]  ;;  %v322_v10 = vld [vmem:[%s10135_s3 + $0x70] sm:$0xff] }
 0x264   :  { %v1569_v35 = vpop.f32.mrb[60].mxu0  ;;  %v6133_v62 = vpop.eup %6132  ;;  %6150 = vrsqrt.f32 %v1990_v36  ;;  %v8117_v22 = vmul.f32 %v8081_v30, %v8081_v30  ;;  %v8121_v31 = vmul.f32 %v8085_v27, %v8085_v27  ;;  %v1962_v2 = vmax.f32 %v1930_v60, 0.0  ;;  %v330_v49 = vld [vmem:[%s10135_s3 + $0xb0] sm:$0xff] }
 0x265   :  { %v1609_v13 = vmul.f32 0.00125, %v1569_v35  ;;  %v1830_v37 = vpop.f32.mrb[60].mxu1  ;;  %v1571_v33 = vpop.f32.mrb[61].mxu0  ;;  %6152 = vrsqrt.f32 %v1991_v53  ;;  %v8143_v54 = vmul.f32 %v8066_v32, %v315_v29  ;;  %v8145_v60 = vmul.f32 %v6121_v42, %v316_v38  ;;  %v323_v42 = vld [vmem:[%s10135_s3 + $0x78] sm:$0xff] }
 0x266   :  { %v1832_v25 = vpop.f32.mrb[61].mxu1  ;;  %v6135_v17 = vpop.eup %6134  ;;  %v8131_v19 = vmul.f32 0.00125, %v1830_v37  ;;  %6154 = vrsqrt.f32 %v1992_v14  ;;  %v8147_v45 = vmul.f32 %v6123_v51, %v317_v1  ;;  %v8156_v53 = vmul.f32 %v8107_v24, %v8107_v24  ;;  %v324_v37 = vld [vmem:[%s10135_s3 + $0x80] sm:$0xff] }
 0x267   :  { %v8129_v21 = vmul.f32 %v1609_v13, %v1609_v13  ;;  %v6137_v34 = vpop.eup %6136  ;;  %v8158_v32 = vmul.f32 %v6125_v40, %v318_v47  ;;  %6156 = vrsqrt.f32 %v1993_v3  ;;  %v8163_v35 = vmul.f32 %v6127_v59, %v319_v58  ;;  %v325_v40 = vld [vmem:[%s10135_s3 + $0x88] sm:$0xff] }
 0x268   :  { %v1574_v4 = vpop.f32.mrb[62].mxu0  ;;  %10420 = vst [vmem:[#allocation61_spill] sm:$0xff] %v8147_v45  ;;  %v6139_v51 = vpop.eup %6138  ;;  %v8165_v29 = vmul.f32 %v6129_v7, %v320_v28  ;;  %v8167_v13 = vmul.f32 %v6131_v23, %v321_v56  ;;  %v1994_v38 = vadd.f32 1e-05, %v1962_v2  ;;  %v8179_v59 = vmul.f32 %v6133_v62, %v322_v10  ;;  %v326_v62 = vld [vmem:[%s10135_s3 + $0x90] sm:$0xff]  ;;  %v327_v28 = vld [vmem:[%s10135_s3 + $0x98] sm:$0xff] }
 0x269   :  { %v1610_v46 = vmul.f32 0.00125, %v1574_v4  ;;  %v1835_v52 = vpop.f32.mrb[62].mxu1  ;;  %v1576_v61 = vpop.f32.mrb[63].mxu0  ;;  %10421 = vst [vmem:[#allocation62_spill] sm:$0xff] %v8158_v32  ;;  %10422 = vst [vmem:[#allocation63_spill] sm:$0xff] %v8163_v35  ;;  %v8183_v23 = vmul.f32 %v8143_v54, %v8143_v54  ;;  %v8187_v47 = vmul.f32 %v8145_v60, %v8145_v60  ;;  %v8191_v58 = vmul.f32 %v8147_v45, %v8147_v45 }
 0x26a   :  { %v1837_v14 = vpop.f32.mrb[63].mxu1  ;;  %10423 = vst [vmem:[#allocation64_spill] sm:$0xff] %v8165_v29  ;;  %10424 = vst [vmem:[#allocation65_spill] sm:$0xff] %v8167_v13  ;;  %v6141_v33 = vpop.eup %6140  ;;  %v8177_v3 = vmul.f32 0.00125, %v1835_v52  ;;  %v8193_v2 = vmul.f32 %v6135_v17, %v323_v42  ;;  %v8205_v61 = vmul.f32 %v6137_v34, %v324_v37  ;;  %v8207_v17 = vmul.f32 %v6139_v51, %v325_v40  ;;  %v328_v42 = vld [vmem:[%s10135_s3 + $0xa0] sm:$0xff] }
 0x26b   :  { %v8175_v1 = vmul.f32 %v1610_v46, %v1610_v46  ;;  %10425 = vst [vmem:[#allocation66_spill] sm:$0xff] %v8179_v59  ;;  %v6143_v7 = vpop.eup %6142  ;;  %v8214_v20 = vmul.f32 %v8158_v32, %v8158_v32  ;;  %v8222_v34 = vmul.f32 %v8165_v29, %v8165_v29  ;;  %v8226_v51 = vmul.f32 %v8167_v13, %v8167_v13  ;;  %v329_v4 = vld [vmem:[%s10135_s3 + $0xa8] sm:$0xff] }
 0x26c   :  { %v2225_v25 = vpop.f32.mrb[64].mxu0  ;;  %10426 = vst [vmem:[#allocation67_spill] sm:$0xff] %v8193_v2  ;;  %v6145_v56 = vpop.eup %6144  ;;  %10428 = vst [vmem:[#allocation69_spill] sm:$0xff] %v8205_v61  ;;  %6158 = vrsqrt.f32 %v1994_v38  ;;  %v8232_v40 = vmul.f32 %v6141_v33, %v326_v62  ;;  %v8246_v33 = vmul.f32 %v8193_v2, %v8193_v2  ;;  %v331_v62 = vld [vmem:[%s10135_s3 + $0xb8] sm:$0xff] }
 0x26d   :  { %v8203_v10 = vmul.f32 0.0125, %v2225_v25  ;;  %v2483_v46 = vpop.f32.mrb[64].mxu1  ;;  %v2227_v52 = vpop.f32.mrb[65].mxu0  ;;  %10429 = vst [vmem:[#allocation70_spill] sm:$0xff] %v8207_v17  ;;  %v8218_v25 = vmul.f32 %v8163_v35, %v8163_v35  ;;  %10430 = vst [vmem:[#allocation71_spill] sm:$0xff] %v8226_v51  ;;  %v8260_v51 = vmul.f32 %v8205_v61, %v8205_v61 }
 0x26e   :  { %v6147_v14 = vpop.eup %6146  ;;  %v2485_v36 = vpop.f32.mrb[65].mxu1  ;;  %10432 = vst [vmem:[#allocation73_spill] sm:$0xff] %v8232_v40  ;;  %v8234_v52 = vmul.f32 %v6143_v7, %v327_v28  ;;  %v2642_v29 = vmul.f32 0.0125, %v2483_v46  ;;  %10434 = vst [vmem:[#allocation75_spill] sm:$0xff] %v8246_v33  ;;  %v8248_v7 = vmul.f32 %v6145_v56, %v328_v42  ;;  %v8264_v56 = vmul.f32 %v8207_v17, %v8207_v17  ;;  %v332_v42 = vld [vmem:[%s10135_s3 + $0xc0] sm:$0xff] }
 0x26f   :  { %10427 = vst [vmem:[#allocation68_spill] sm:$0xff] %v8203_v10  ;;  %v6149_v37 = vpop.eup %6148  ;;  %v8230_v36 = vmul.f32 %v8179_v59, %v8179_v59  ;;  %v2674_v38 = vmul.f32 %v8203_v10, %v8203_v10  ;;  %v10436_v59 = vsub.f32 %v8073_v39, %v8071_v50  ;;  %10438 = vst [vmem:[#allocation78_spill] sm:$0xff] %v8260_v51  ;;  %v333_v17 = vld [vmem:[%s10135_s3 + $0xc8] sm:$0xff] }
 0x270   :  { %10433 = vst [vmem:[#allocation74_spill] sm:$0xff] %v8234_v52  ;;  %v6151_v13 = vpop.eup %6150  ;;  %v2230_v35 = vpop.f32.mrb[66].mxu0  ;;  %10435 = vst [vmem:[#allocation76_spill] sm:$0xff] %v8248_v7  ;;  %v10440_v50 = vsub.f32 %v8092_v41, %v8090_v55  ;;  %v8274_v33 = vmul.f32 %v6149_v37, %v330_v49  ;;  %v8283_v51 = vmul.f32 %v8232_v40, %v8232_v40  ;;  %v334_v37 = vld [vmem:[%s10135_s3 + $0xd0] sm:$0xff] }
 0x271   :  { %10431 = vst [vmem:[#allocation72_spill] sm:$0xff] %v8230_v36  ;;  %v6153_v28 = vpop.eup %6152  ;;  %v1963_v36 = vmax.f32 %v10436_v59, 0.0  ;;  %v8256_v46 = vmul.f32 0.0125, %v2230_v35  ;;  %v2488_v32 = vpop.f32.mrb[66].mxu1  ;;  %10439 = vst [vmem:[#allocation79_spill] sm:$0xff] %v8264_v56  ;;  %v2706_v35 = vsub.f32 %v2642_v29, %v2674_v38  ;;  %v8287_v55 = vmul.f32 %v8234_v52, %v8234_v52 }
 0x272   :  { %v2232_v45 = vpop.f32.mrb[67].mxu0  ;;  %v6155_v2 = vpop.eup %6154  ;;  %v1964_v39 = vmax.f32 %v10440_v50, 0.0  ;;  %v2643_v61 = vmul.f32 0.0125, %v2488_v32  ;;  %v8295_v32 = vmul.f32 %v6153_v28, %v332_v42 }
 0x273   :  { %10437 = vst [vmem:[#allocation77_spill] sm:$0xff] %v8256_v46  ;;  %v2490_v59 = vpop.f32.mrb[67].mxu1  ;;  %v8272_v45 = vmul.f32 %v6147_v14, %v329_v4  ;;  %v2675_v56 = vmul.f32 %v8256_v46, %v8256_v46  ;;  %10441 = vst [vmem:[#allocation80_spill] sm:$0xff] %v8287_v55  ;;  %v6157_v41 = vpop.eup %6156  ;;  %v2738_v29 = vmax.f32 %v2706_v35, 0.0  ;;  %v8291_v4 = vmul.f32 %v8248_v7, %v8248_v7 }
 0x274   :  { %v2235_v49 = vpop.f32.mrb[68].mxu0  ;;  %v8293_v14 = vmul.f32 %v6151_v13, %v331_v62  ;;  %10444 = vst [vmem:[#allocation83_spill] sm:$0xff] %v8295_v32  ;;  %v1995_v38 = vadd.f32 1e-05, %v1963_v36  ;;  %v8302_v35 = vmul.f32 %v6155_v2, %v333_v17  ;;  %v1996_v55 = vadd.f32 1e-05, %v1964_v39 }
 0x275   :  { %10442 = vst [vmem:[#allocation81_spill] sm:$0xff] %v8291_v4  ;;  %v2707_v50 = vsub.f32 %v2643_v61, %v2675_v56  ;;  %v8300_v59 = vmul.f32 0.0125, %v2235_v49  ;;  %v2493_v52 = vpop.f32.mrb[68].mxu1  ;;  %v2237_v40 = vpop.f32.mrb[69].mxu0  ;;  %v2802_v7 = vmul.f32 %v7989_v48, %v2738_v29  ;;  %v8307_v13 = vmul.f32 %v8272_v45, %v8272_v45 }
 0x276   :  { %10443 = vst [vmem:[#allocation82_spill] sm:$0xff] %v8293_v14  ;;  %10446 = vst [vmem:[#allocation85_spill] sm:$0xff] %v8302_v35  ;;  %v2495_v4 = vpop.f32.mrb[69].mxu1  ;;  %v8311_v62 = vmul.f32 %v8274_v33, %v8274_v33  ;;  %v2644_v61 = vmul.f32 0.0125, %v2493_v52  ;;  %v8315_v40 = vmul.f32 %v6157_v41, %v334_v37  ;;  %v10448_v2 = vsub.f32 %v8131_v19, %v8129_v21  ;;  %v6159_v52 = vpop.eup %6158  ;;  %v335_v19 = vld [vmem:[%s10135_s3 + $0xd8] sm:$0xff] }
 0x277   :  { %10445 = vst [vmem:[#allocation84_spill] sm:$0xff] %v8300_v59  ;;  %v2739_v36 = vmax.f32 %v2707_v50, 0.0  ;;  %v2676_v28 = vmul.f32 %v8300_v59, %v8300_v59  ;;  %v2834_v17 = vadd.f32 1e-05, %v2802_v7  ;;  %v8322_v42 = vmul.f32 %v8293_v14, %v8293_v14 }
 0x278   :  { %10447 = vst [vmem:[#allocation86_spill] sm:$0xff] %v8315_v40  ;;  %v1965_v48 = vmax.f32 %v10448_v2, 0.0  ;;  %v2240_v56 = vpop.f32.mrb[70].mxu0  ;;  %v8326_v39 = vmul.f32 %v8295_v32, %v8295_v32  ;;  %6160 = vrsqrt.f32 %v1995_v38  ;;  %v8331_v21 = vmul.f32 %v8302_v35, %v8302_v35 }
 0x279   :  { %v2803_v29 = vmul.f32 %v8018_v44, %v2739_v36  ;;  %v2708_v41 = vsub.f32 %v2644_v61, %v2676_v28  ;;  %v2498_v49 = vpop.f32.mrb[70].mxu1  ;;  %v2242_v4 = vpop.f32.mrb[71].mxu0  ;;  %v10449_v7 = vsub.f32 %v8177_v3, %v8175_v1  ;;  %v3058_v50 = vmul.f32 2.0, %v8203_v10 }
 0x27a   :  { %6162 = vrsqrt.f32 %v2834_v17  ;;  %v8340_v38 = vmul.f32 0.0125, %v2240_v56  ;;  %v2500_v44 = vpop.f32.mrb[71].mxu1  ;;  %v8344_v28 = vmul.f32 %v8315_v40, %v8315_v40  ;;  %v1997_v2 = vadd.f32 1e-05, %v1965_v48 }
 0x27b   :  { %v1966_v37 = vmax.f32 %v10449_v7, 0.0  ;;  %6164 = vrsqrt.f32 %v1996_v55  ;;  %v2835_v36 = vadd.f32 1e-05, %v2803_v29  ;;  %v2740_v61 = vmax.f32 %v2708_v41, 0.0 }
 0x27c   :  { %10450 = vst [vmem:[#allocation87_spill] sm:$0xff] %v8344_v28  ;;  %v2645_v4 = vmul.f32 0.0125, %v2498_v49  ;;  %v2677_v35 = vmul.f32 %v8340_v38, %v8340_v38  ;;  %v2245_v1 = vpop.f32.mrb[72].mxu0  ;;  %v8348_v3 = vmul.f32 %v6159_v52, %v335_v19  ;;  %v8351_v17 = vmul.f32 16.0, %v8203_v10 }
 0x27d   :  { %6166 = vrsqrt.f32 %v2835_v36  ;;  %v2804_v55 = vmul.f32 %v8096_v18, %v2740_v61  ;;  %v8354_v56 = vmul.f32 0.0125, %v2245_v1  ;;  %v2503_v29 = vpop.f32.mrb[72].mxu1  ;;  %v2247_v41 = vpop.f32.mrb[73].mxu0  ;;  %v1998_v7 = vadd.f32 1e-05, %v1966_v37 }
 0x27e   :  { %10451 = vst [vmem:[#allocation88_spill] sm:$0xff] %v8348_v3  ;;  %v3090_v48 = vmul.f32 %v3058_v50, %v6596_v5  ;;  %v2709_v49 = vsub.f32 %v2645_v4, %v2677_v35  ;;  %v2505_v44 = vpop.f32.mrb[73].mxu1  ;;  %v8358_v40 = vsub.s32 2, %v7099_v43  ;;  %v3059_v52 = vmul.f32 2.0, %v8256_v46 }
 0x27f   :  { %10452 = vst [vmem:[#allocation89_spill] sm:$0xff] %v8354_v56  ;;  %v2836_v19 = vadd.f32 1e-05, %v2804_v55  ;;  %v2646_v32 = vmul.f32 0.0125, %v2503_v29  ;;  %v2678_v36 = vmul.f32 %v8354_v56, %v8354_v56  ;;  %6168 = vrsqrt.f32 %v1997_v2 }
 0x280   :  { %v2741_v18 = vmax.f32 %v2709_v49, 0.0  ;;  %v2250_v61 = vpop.f32.mrb[74].mxu0  ;;  %v1050_v1 = vsub.s32 6, %v7099_v43  ;;  %v8366_v37 = vmul.f32 %v8348_v3, %v8348_v3  ;;  %v3154_v35 = vmul.f32 %v8351_v17, %v8203_v10  ;;  %v8379_v44 = vld [vmem:[%s10134_s2] sm:$0x77] }
 0x281   :  { %6170 = vrsqrt.f32 %v2836_v19  ;;  %v2710_v50 = vsub.f32 %v2646_v32, %v2678_v36  ;;  %v2508_v4 = vpop.f32.mrb[74].mxu1  ;;  %v2252_v55 = vpop.f32.mrb[75].mxu0  ;;  %v2962_v29 = vsub.f32 %v6596_v5, %v8351_v17  ;;  %v2931_v2 = vmul.f32 16.0, %v8256_v46 }
 0x282   :  { %10453 = vst [vmem:[#allocation90_spill] sm:$0xff] %v8366_v37  ;;  %v2805_v41 = vmul.f32 %v8100_v57, %v2741_v18  ;;  %v8374_v49 = vmul.f32 0.0125, %v2250_v61  ;;  %v2510_v43 = vpop.f32.mrb[75].mxu1  ;;  %v8383_v19 = vpop.eup %6160  ;;  %6172 = vrsqrt.f32 %v1998_v7  ;;  %v3091_v5 = vmul.f32 %v3059_v52, %v6611_v9 }
 0x283   :  { %10455 = vst [vmem:[#allocation92_spill] sm:$0xff] %v8383_v19  ;;  %v2742_v17 = vmax.f32 %v2710_v50, 0.0  ;;  %v3122_v36 = vsub.f32 %v6599_v6, %v3090_v48  ;;  %v8388_v18 = vmul.f32 16.0, %v8300_v59  ;;  %v2647_v55 = vmul.f32 0.0125, %v2508_v4 }
 0x284   :  { %10454 = vst [vmem:[#allocation91_spill] sm:$0xff] %v8374_v49  ;;  %v6163_v57 = vpop.eup %6162  ;;  %v2837_v61 = vadd.f32 1e-05, %v2805_v41  ;;  %v2679_v43 = vmul.f32 %v8374_v49, %v8374_v49  ;;  %v2255_v10 = vpop.f32.mrb[76].mxu0  ;;  %v3060_v7 = vmul.f32 2.0, %v8300_v59  ;;  %v3155_v41 = vmul.f32 %v2931_v2, %v8256_v46 }
 0x285   :  { %v8392_v3 = vpop.eup %6164  ;;  %v8395_v32 = vmul.f32 %v6163_v57, %v7961_v12  ;;  %v2806_v52 = vmul.f32 %v8117_v22, %v2742_v17  ;;  %v8399_v6 = vmul.f32 0.0125, %v2255_v10  ;;  %v2513_v48 = vpop.f32.mrb[76].mxu1  ;;  %v8403_v37 = vrot.slane %v8379_v44, %v1050_v1 }
 0x286   :  { %10456 = vst [vmem:[#allocation93_spill] sm:$0xff] %v8392_v3  ;;  %v2257_v50 = vpop.f32.mrb[77].mxu0  ;;  %6174 = vrsqrt.f32 %v2837_v61  ;;  %v2711_v4 = vsub.f32 %v2647_v55, %v2679_v43  ;;  %v2515_v19 = vpop.f32.mrb[77].mxu1  ;;  %v2963_v12 = vsub.f32 %v6611_v9, %v2931_v2  ;;  %v3123_v57 = vsub.f32 %v6619_v11, %v3091_v5 }
 0x287   :  { %10457 = vst [vmem:[#allocation94_spill] sm:$0xff] %v8399_v6  ;;  %v6167_v3 = vpop.eup %6166  ;;  %v2838_v14 = vadd.f32 1e-05, %v2806_v52  ;;  %v3186_v28 = vadd.f32 %v3154_v35, %v3122_v36  ;;  %v2648_v17 = vmul.f32 0.0125, %v2513_v48  ;;  %v2680_v61 = vmul.f32 %v8399_v6, %v8399_v6 }
 0x288   :  { %v8408_v22 = vmul.f32 %v6167_v3, %v7996_v26  ;;  %v2743_v10 = vmax.f32 %v2711_v4, 0.0  ;;  %v2260_v55 = vpop.f32.mrb[78].mxu0  ;;  %v8413_v19 = vmul.f32 %v3060_v7, %v6636_v15  ;;  %v8417_v1 = vmul.f32 %v8388_v18, %v8300_v59 }
 0x289   :  { %6176 = vrsqrt.f32 %v2838_v14  ;;  %v8419_v9 = vmul.f32 0.0125, %v2260_v55  ;;  %v2518_v11 = vpop.f32.mrb[78].mxu1  ;;  %v2262_v35 = vpop.f32.mrb[79].mxu0  ;;  %v2712_v2 = vsub.f32 %v2648_v17, %v2680_v61  ;;  %v2994_v36 = vmul.f32 %v2962_v29, %v8395_v32 }
 0x28a   :  { %10458 = vst [vmem:[#allocation95_spill] sm:$0xff] %v8408_v22  ;;  %v8421_v26 = vpop.eup %6168  ;;  %v2807_v3 = vmul.f32 %v8121_v31, %v2743_v10  ;;  %v2520_v5 = vpop.f32.mrb[79].mxu1  ;;  %v2995_v43 = vmul.f32 %v2963_v12, %v8408_v22  ;;  %v3061_v52 = vmul.f32 2.0, %v8340_v38  ;;  %v2649_v48 = vmul.f32 0.0125, %v2518_v11 }
 0x28b   :  { %10459 = vst [vmem:[#allocation96_spill] sm:$0xff] %v8419_v9  ;;  %v6171_v7 = vpop.eup %6170  ;;  %v2681_v14 = vmul.f32 %v8419_v9, %v8419_v9  ;;  %v3187_v50 = vadd.f32 %v3155_v41, %v3123_v57  ;;  %v2744_v35 = vmax.f32 %v2712_v2, 0.0  ;;  %v2933_v29 = vmul.f32 16.0, %v8340_v38 }
 0x28c   :  { %v8430_v4 = vmul.f32 %v6171_v7, %v8038_v0  ;;  %v2839_v55 = vadd.f32 1e-05, %v2807_v3  ;;  %v2265_v31 = vpop.f32.mrb[80].mxu0  ;;  %v5930_v10 = vpack.c.bf16 %v2995_v43, %v2994_v36  ;;  %v8432_v17 = vpop.eup %6172  ;;  %v3026_v59 = vmul.f32 %v8395_v32, %v8395_v32  ;;  %v10461_v7 = vld [vmem:[#allocation2_spill] sm:$0xff] }
 0x28d   :  { %v2713_v12 = vsub.f32 %v2649_v48, %v2681_v14  ;;  %v8435_v61 = vmul.f32 0.0125, %v2265_v31  ;;  %v2523_v5 = vpop.f32.mrb[80].mxu1  ;;  %v2267_v11 = vpop.f32.mrb[81].mxu0  ;;  %v2808_v0 = vmul.f32 %v8156_v53, %v2744_v35  ;;  %v3027_v57 = vmul.f32 %v8408_v22, %v8408_v22 }
 0x28e   :  { %6178 = vrsqrt.f32 %v2839_v55  ;;  %v2525_v41 = vpop.f32.mrb[81].mxu1  ;;  %5931 = vmatpush1.bf16.msra.mxu0 %v5930_v10  ;;  %v2964_v3 = vsub.f32 %v6636_v15, %v8388_v18  ;;  %v3093_v2 = vmul.f32 %v3061_v52, %v6642_v16  ;;  %v3124_v48 = vsub.f32 %v10461_v7, %v8413_v19 }
 0x28f   :  { %10460 = vst [vmem:[#allocation97_spill] sm:$0xff] %v8435_v61  ;;  %v2745_v36 = vmax.f32 %v2713_v12, 0.0  ;;  %v2682_v43 = vmul.f32 %v8435_v61, %v8435_v61  ;;  %5932 = vmatprep.subr.bf16.mxu0 %v10354_v63  ;;  %v8451_v14 = vmul.f32 16.0, %v8354_v56  ;;  %v2840_v55 = vadd.f32 1e-05, %v2808_v0 }
 0x290   :  { %v6175_v53 = vpop.eup %6174  ;;  %v2650_v35 = vmul.f32 0.0125, %v2523_v5  ;;  %v2270_v31 = vpop.f32.mrb[82].mxu0  ;;  %v3219_v10 = vmul.f32 %v3187_v50, %v3027_v57  ;;  %v3218_v12 = vmul.f32 %v3186_v28, %v3026_v59  ;;  %v2965_v41 = vsub.f32 %v6642_v16, %v2933_v29 }
 0x291   :  { %v8454_v15 = vmul.f32 %v6175_v53, %v8064_v8  ;;  %v2809_v18 = vmul.f32 %v8183_v23, %v2745_v36  ;;  %v2528_v52 = vpop.f32.mrb[82].mxu1  ;;  %v2272_v11 = vpop.f32.mrb[83].mxu0  ;;  %v3062_v19 = vmul.f32 2.0, %v8354_v56  ;;  %6180 = vrsqrt.f32 %v2840_v55  ;;  %v10465_v36 = vld [vmem:[#allocation3_spill] sm:$0xff] }
 0x292   :  { %v2714_v7 = vsub.f32 %v2650_v35, %v2682_v43  ;;  %v8459_v22 = vmul.f32 0.0125, %v2270_v31  ;;  %v2530_v0 = vpop.f32.mrb[83].mxu1  ;;  %v5979_v50 = vpack.c.bf16 %v3219_v10, %v3218_v12  ;;  %v2996_v8 = vmul.f32 %v2964_v3, %v8430_v4 }
 0x293   :  { %10462 = vst [vmem:[#allocation2_spill] sm:$0xff] %v8454_v15  ;;  %v6177_v5 = vpop.eup %6176  ;;  %v2841_v46 = vadd.f32 1e-05, %v2809_v18  ;;  %v2997_v57 = vmul.f32 %v2965_v41, %v8454_v15  ;;  %v2651_v28 = vmul.f32 0.0125, %v2528_v52  ;;  %v3125_v53 = vsub.f32 %v10465_v36, %v3093_v2  ;;  %v10467_v2 = vld [vmem:[#allocation4_spill] sm:$0xff] }
 0x294   :  { %10463 = vst [vmem:[#allocation98_spill] sm:$0xff] %v8459_v22  ;;  %v8464_v23 = vmul.f32 %v6177_v5, %v8081_v30  ;;  %v2746_v59 = vmax.f32 %v2714_v7, 0.0  ;;  %v2275_v16 = vpop.f32.mrb[84].mxu0  ;;  %v2683_v43 = vmul.f32 %v8459_v22, %v8459_v22  ;;  %5980 = vmatpush1.bf16.msra.mxu1 %v5979_v50  ;;  %v3157_v10 = vmul.f32 %v2933_v29, %v8340_v38 }
 0x295   :  { %6182 = vrsqrt.f32 %v2841_v46  ;;  %v8469_v55 = vmul.f32 0.0125, %v2275_v16  ;;  %v2533_v35 = vpop.f32.mrb[84].mxu1  ;;  %v2277_v31 = vpop.f32.mrb[85].mxu0  ;;  %v5933_v3 = vpack.c.bf16 %v2997_v57, %v2996_v8  ;;  %v2935_v30 = vmul.f32 16.0, %v8374_v49  ;;  %5981 = vmatprep.subr.bf16.mxu1 %v10354_v63 }
 0x296   :  { %10464 = vst [vmem:[#allocation99_spill] sm:$0xff] %v8464_v23  ;;  %v2810_v18 = vmul.f32 %v8187_v47, %v2746_v59  ;;  %v2535_v52 = vpop.f32.mrb[85].mxu1  ;;  %v3188_v46 = vadd.f32 %v8417_v1, %v3124_v48  ;;  %v8477_v12 = vmul.f32 %v3062_v19, %v10467_v2  ;;  %v2715_v11 = vsub.f32 %v2651_v28, %v2683_v43 }
 0x297   :  { %10466 = vst [vmem:[#allocation3_spill] sm:$0xff] %v8469_v55  ;;  %v2684_v41 = vmul.f32 %v8469_v55, %v8469_v55  ;;  %5934 = vmatpush1.bf16.msra.mxu0 %v5933_v3  ;;  %v3028_v29 = vmul.f32 %v8430_v4, %v8430_v4  ;;  %v8485_v47 = vmul.f32 %v8451_v14, %v8354_v56  ;;  %v2652_v5 = vmul.f32 0.0125, %v2533_v35  ;;  %v10470_v35 = vld [vmem:[#allocation5_spill] sm:$0xff] }
 0x298   :  { %v6179_v7 = vpop.eup %6178  ;;  %v2842_v0 = vadd.f32 1e-05, %v2810_v18  ;;  %v2280_v50 = vpop.f32.mrb[86].mxu0  ;;  %v3029_v1 = vmul.f32 %v8454_v15, %v8454_v15  ;;  %5935 = vmatprep.subr.bf16.mxu0 %v10354_v63  ;;  %v3063_v48 = vmul.f32 2.0, %v8374_v49  ;;  %v2747_v8 = vmax.f32 %v2715_v11, 0.0 }
 0x299   :  { %v8492_v19 = vmul.f32 %v6179_v7, %v8085_v27  ;;  %v2538_v57 = vpop.f32.mrb[86].mxu1  ;;  %v3189_v59 = vadd.f32 %v3157_v10, %v3125_v53  ;;  %v2282_v28 = vpop.f32.mrb[87].mxu0  ;;  %v2716_v16 = vsub.f32 %v2652_v5, %v2684_v41  ;;  %v8494_v36 = vmul.f32 0.0125, %v2280_v50 }
 0x29a   :  { %6184 = vrsqrt.f32 %v2842_v0  ;;  %v2540_v43 = vpop.f32.mrb[87].mxu1  ;;  %v2967_v31 = vsub.f32 %v10470_v35, %v2935_v30  ;;  %v2811_v3 = vmul.f32 %v8191_v58, %v2747_v8  ;;  %v3220_v18 = vmul.f32 %v3188_v46, %v3028_v29 }
 0x29b   :  { %10468 = vst [vmem:[#allocation4_spill] sm:$0xff] %v8492_v19  ;;  %10469 = vst [vmem:[#allocation100_spill] sm:$0xff] %v8494_v36  ;;  %v3221_v52 = vmul.f32 %v3189_v59, %v3029_v1  ;;  %v2966_v56 = vsub.f32 %v10467_v2, %v8451_v14  ;;  %v6181_v27 = vpop.eup %6180  ;;  %v2748_v7 = vmax.f32 %v2716_v16, 0.0  ;;  %v2653_v11 = vmul.f32 0.0125, %v2538_v57  ;;  %v10473_v57 = vld [vmem:[#allocation6_spill] sm:$0xff] }
 0x29c   :  { %v2685_v53 = vmul.f32 %v8494_v36, %v8494_v36  ;;  %v2285_v10 = vpop.f32.mrb[88].mxu0  ;;  %v2999_v41 = vmul.f32 %v2967_v31, %v8492_v19  ;;  %v8504_v0 = vmul.f32 %v6181_v27, %v8107_v24  ;;  %v2843_v5 = vadd.f32 1e-05, %v2811_v3 }
 0x29d   :  { %v5982_v50 = vpack.c.bf16 %v3221_v52, %v3220_v18  ;;  %v8506_v58 = vmul.f32 0.0125, %v2285_v10  ;;  %v2543_v46 = vpop.f32.mrb[88].mxu1  ;;  %v2287_v29 = vpop.f32.mrb[89].mxu0  ;;  %v3095_v14 = vmul.f32 %v3063_v48, %v10470_v35  ;;  %v2812_v2 = vmul.f32 %v8214_v20, %v2748_v7 }
 0x29e   :  { %10471 = vst [vmem:[#allocation5_spill] sm:$0xff] %v8504_v0  ;;  %v2717_v1 = vsub.f32 %v2653_v11, %v2685_v53  ;;  %v2545_v8 = vpop.f32.mrb[89].mxu1  ;;  %v3126_v59 = vsub.f32 %v10473_v57, %v8477_v12  ;;  %v3159_v16 = vmul.f32 %v2935_v30, %v8374_v49  ;;  %6186 = vrsqrt.f32 %v2843_v5 }
 0x29f   :  { %10472 = vst [vmem:[#allocation101_spill] sm:$0xff] %v8506_v58  ;;  %v6183_v28 = vpop.eup %6182  ;;  %5983 = vmatpush1.bf16.msra.mxu1 %v5982_v50  ;;  %v2654_v24 = vmul.f32 0.0125, %v2543_v46  ;;  %v2998_v43 = vmul.f32 %v2966_v56, %v8464_v23  ;;  %v2844_v3 = vadd.f32 1e-05, %v2812_v2  ;;  %v2686_v20 = vmul.f32 %v8506_v58, %v8506_v58  ;;  %v10476_v8 = vld [vmem:[#allocation7_spill] sm:$0xff] }
 0x2a0   :  { %v8515_v31 = vmul.f32 %v6183_v28, %v8143_v54  ;;  %v2749_v48 = vmax.f32 %v2717_v1, 0.0  ;;  %5984 = vmatprep.subr.bf16.mxu1 %v10354_v63  ;;  %v2290_v35 = vpop.f32.mrb[90].mxu0  ;;  %v8521_v12 = vmul.f32 16.0, %v8399_v6  ;;  %v3064_v30 = vmul.f32 2.0, %v8399_v6 }
 0x2a1   :  { %v5936_v18 = vpack.c.bf16 %v2999_v41, %v2998_v43  ;;  %v8524_v52 = vmul.f32 0.0125, %v2290_v35  ;;  %v2548_v56 = vpop.f32.mrb[90].mxu1  ;;  %v2292_v27 = vpop.f32.mrb[91].mxu0  ;;  %v2937_v54 = vmul.f32 16.0, %v8419_v9  ;;  %6188 = vrsqrt.f32 %v2844_v3  ;;  %v10478_v35 = vld [vmem:[#allocation8_spill] sm:$0xff] }
 0x2a2   :  { %10474 = vst [vmem:[#allocation6_spill] sm:$0xff] %v8515_v31  ;;  %v2813_v7 = vmul.f32 %v8218_v25, %v2749_v48  ;;  %v2718_v11 = vsub.f32 %v2654_v24, %v2686_v20  ;;  %v2550_v53 = vpop.f32.mrb[91].mxu1  ;;  %v3065_v10 = vmul.f32 2.0, %v8419_v9  ;;  %v2655_v5 = vmul.f32 0.0125, %v2548_v56 }
 0x2a3   :  { %10475 = vst [vmem:[#allocation102_spill] sm:$0xff] %v8524_v52  ;;  %5937 = vmatpush1.bf16.msra.mxu0 %v5936_v18  ;;  %v2687_v50 = vmul.f32 %v8524_v52, %v8524_v52  ;;  %v3030_v41 = vmul.f32 %v8464_v23, %v8464_v23  ;;  %v3031_v1 = vmul.f32 %v8492_v19, %v8492_v19 }
 0x2a4   :  { %v6185_v46 = vpop.eup %6184  ;;  %v2845_v29 = vadd.f32 1e-05, %v2813_v7  ;;  %v2750_v2 = vmax.f32 %v2718_v11, 0.0  ;;  %v3127_v25 = vsub.f32 %v10476_v8, %v3095_v14  ;;  %v2295_v57 = vpop.f32.mrb[92].mxu0  ;;  %5938 = vmatprep.subr.bf16.mxu0 %v10354_v63  ;;  %v3190_v43 = vadd.f32 %v8485_v47, %v3126_v59  ;;  %v10479_v7 = vld [vmem:[#allocation9_spill] sm:$0xff] }
 0x2a5   :  { %v8538_v28 = vmul.f32 %v6185_v46, %v8145_v60  ;;  %v2719_v24 = vsub.f32 %v2655_v5, %v2687_v50  ;;  %v2553_v3 = vpop.f32.mrb[92].mxu1  ;;  %v2297_v48 = vpop.f32.mrb[93].mxu0  ;;  %v8543_v20 = vrot.slane %v8403_v37, %v8358_v40  ;;  %v3096_v18 = vmul.f32 %v3064_v30, %v10478_v35 }
 0x2a6   :  { %6190 = vrsqrt.f32 %v2845_v29  ;;  %v2814_v14 = vmul.f32 %v8222_v34, %v2750_v2  ;;  %v3191_v56 = vadd.f32 %v3159_v16, %v3127_v25  ;;  %v2555_v27 = vpop.f32.mrb[93].mxu1  ;;  %v3160_v60 = vmul.f32 %v8521_v12, %v8399_v6  ;;  %v10480_v29 = vld [vmem:[#allocation71_spill] sm:$0xff] }
 0x2a7   :  { %10477 = vst [vmem:[#allocation7_spill] sm:$0xff] %v8538_v28  ;;  %v3097_v11 = vmul.f32 %v3065_v10, %v10479_v7  ;;  %v2751_v53 = vmax.f32 %v2719_v24, 0.0  ;;  %v8550_v47 = vmul.f32 0.0125, %v2295_v57  ;;  %v3161_v59 = vmul.f32 %v2937_v54, %v8419_v9  ;;  %v10481_v57 = vld [vmem:[#allocation61_spill] sm:$0xff]  ;;  %v10490_v9 = vld [vmem:[#allocation63_spill] sm:$0xff] }
 0x2a8   :  { %v2846_v5 = vadd.f32 1e-05, %v2814_v14  ;;  %v3222_v37 = vmul.f32 %v3190_v43, %v3030_v41  ;;  %v3223_v50 = vmul.f32 %v3191_v56, %v3031_v1  ;;  %v2300_v46 = vpop.f32.mrb[94].mxu0  ;;  %v6187_v30 = vpop.eup %6186  ;;  %v2656_v34 = vmul.f32 0.0125, %v2553_v3 }
 0x2a9   :  { %v2815_v8 = vmul.f32 %v10480_v29, %v2751_v53  ;;  %v2688_v16 = vmul.f32 %v8550_v47, %v8550_v47  ;;  %v2968_v2 = vsub.f32 %v10478_v35, %v8521_v12  ;;  %v2558_v10 = vpop.f32.mrb[94].mxu1  ;;  %v2302_v25 = vpop.f32.mrb[95].mxu0  ;;  %v8559_v24 = vmul.f32 %v6187_v30, %v10481_v57 }
 0x2aa   :  { %6192 = vrsqrt.f32 %v2846_v5  ;;  %v5985_v48 = vpack.c.bf16 %v3223_v50, %v3222_v37  ;;  %v2969_v41 = vsub.f32 %v10479_v7, %v2937_v54  ;;  %v2560_v1 = vpop.f32.mrb[95].mxu1  ;;  %v2938_v43 = vmul.f32 16.0, %v8435_v61  ;;  %v10483_v37 = vld [vmem:[#allocation62_spill] sm:$0xff] }
 0x2ab   :  { %10482 = vst [vmem:[#allocation8_spill] sm:$0xff] %v8559_v24  ;;  %v3066_v3 = vmul.f32 2.0, %v8435_v61  ;;  %v2847_v14 = vadd.f32 1e-05, %v2815_v8  ;;  %v2720_v56 = vsub.f32 %v2656_v34, %v2688_v16  ;;  %v6189_v27 = vpop.eup %6188  ;;  %v2939_v53 = vmul.f32 16.0, %v8459_v22  ;;  %v10485_v50 = vld [vmem:[#allocation10_spill] sm:$0xff] }
 0x2ac   :  { %5986 = vmatpush1.bf16.msra.mxu1 %v5985_v48  ;;  %v3000_v12 = vmul.f32 %v2968_v2, %v8504_v0  ;;  %v3001_v35 = vmul.f32 %v2969_v41, %v8515_v31  ;;  %v8567_v30 = vmul.f32 0.0125, %v2300_v46  ;;  %v2305_v5 = vpop.f32.mrb[96].mxu0  ;;  %v8570_v54 = vmul.f32 %v6189_v27, %v10483_v37  ;;  %v10486_v48 = vld [vmem:[#allocation72_spill] sm:$0xff] }
 0x2ad   :  { %6194 = vrsqrt.f32 %v2847_v14  ;;  %v2752_v7 = vmax.f32 %v2720_v56, 0.0  ;;  %5987 = vmatprep.subr.bf16.mxu1 %v10354_v63  ;;  %v3128_v29 = vsub.f32 %v10485_v50, %v3096_v18  ;;  %v2563_v8 = vpop.f32.mrb[96].mxu1  ;;  %v2307_v34 = vpop.f32.mrb[97].mxu0  ;;  %v2657_v25 = vmul.f32 0.0125, %v2558_v10  ;;  %v10487_v14 = vld [vmem:[#allocation11_spill] sm:$0xff] }
 0x2ae   :  { %10484 = vst [vmem:[#allocation9_spill] sm:$0xff] %v8570_v54  ;;  %v5939_v16 = vpack.c.bf16 %v3001_v35, %v3000_v12  ;;  %v2689_v2 = vmul.f32 %v8567_v30, %v8567_v30  ;;  %v3032_v46 = vmul.f32 %v8504_v0, %v8504_v0  ;;  %v2565_v57 = vpop.f32.mrb[97].mxu1  ;;  %v3033_v1 = vmul.f32 %v8515_v31, %v8515_v31  ;;  %v10489_v37 = vld [vmem:[#allocation12_spill] sm:$0xff] }
 0x2af   :  { %v2816_v41 = vmul.f32 %v10486_v48, %v2752_v7  ;;  %v3129_v56 = vsub.f32 %v10487_v14, %v3097_v11  ;;  %v8582_v27 = vmul.f32 0.0125, %v2305_v5  ;;  %v3098_v12 = vmul.f32 %v3066_v3, %v10489_v37 }
 0x2b0   :  { %v6191_v18 = vpop.eup %6190  ;;  %v3067_v10 = vmul.f32 2.0, %v8459_v22  ;;  %5940 = vmatpush1.bf16.msra.mxu0 %v5939_v16  ;;  %v2721_v35 = vsub.f32 %v2657_v25, %v2689_v2  ;;  %v3192_v50 = vadd.f32 %v3160_v60, %v3128_v29  ;;  %v2310_v34 = vpop.f32.mrb[98].mxu0  ;;  %v3162_v57 = vmul.f32 %v2938_v43, %v8435_v61  ;;  %v10492_v2 = vld [vmem:[#allocation13_spill] sm:$0xff] }
 0x2b1   :  { %10488 = vst [vmem:[#allocation71_spill] sm:$0xff] %v8582_v27  ;;  %v8588_v7 = vmul.f32 %v6191_v18, %v10490_v9  ;;  %v2848_v48 = vadd.f32 1e-05, %v2816_v41  ;;  %v3193_v31 = vadd.f32 %v3161_v59, %v3129_v56  ;;  %5941 = vmatprep.subr.bf16.mxu0 %v10354_v63  ;;  %v2568_v11 = vpop.f32.mrb[98].mxu1  ;;  %v2312_v5 = vpop.f32.mrb[99].mxu0  ;;  %v2690_v16 = vmul.f32 %v8582_v27, %v8582_v27  ;;  %v10493_v56 = vld [vmem:[#allocation75_spill] sm:$0xff] }
 0x2b2   :  { %v2753_v14 = vmax.f32 %v2721_v35, 0.0  ;;  %v3224_v0 = vmul.f32 %v3192_v50, %v3032_v46  ;;  %v2658_v3 = vmul.f32 0.0125, %v2563_v8  ;;  %v2570_v25 = vpop.f32.mrb[99].mxu1  ;;  %v2970_v29 = vsub.f32 %v10489_v37, %v2938_v43  ;;  %v10494_v50 = vld [vmem:[#allocation64_spill] sm:$0xff] }
 0x2b3   :  { %10491 = vst [vmem:[#allocation61_spill] sm:$0xff] %v8588_v7  ;;  %6196 = vrsqrt.f32 %v2848_v48  ;;  %v3225_v60 = vmul.f32 %v3193_v31, %v3033_v1  ;;  %v2971_v9 = vsub.f32 %v10492_v2, %v2939_v53  ;;  %v3099_v59 = vmul.f32 %v3067_v10, %v10492_v2 }
 0x2b4   :  { %v6193_v18 = vpop.eup %6192  ;;  %v8597_v41 = vmul.f32 16.0, %v8469_v55  ;;  %v2817_v35 = vmul.f32 %v10493_v56, %v2753_v14  ;;  %v2722_v46 = vsub.f32 %v2658_v3, %v2690_v16  ;;  %v2315_v8 = vpop.f32.mrb[100].mxu0  ;;  %v3002_v31 = vmul.f32 %v2970_v29, %v8538_v28  ;;  %v10500_v56 = vld [vmem:[#allocation78_spill] sm:$0xff] }
 0x2b5   :  { %v8601_v5 = vmul.f32 %v6193_v18, %v10494_v50  ;;  %v5988_v25 = vpack.c.bf16 %v3225_v60, %v3224_v0  ;;  %v3003_v43 = vmul.f32 %v2971_v9, %v8559_v24  ;;  %v2573_v1 = vpop.f32.mrb[100].mxu1  ;;  %v2317_v37 = vpop.f32.mrb[101].mxu0  ;;  %v3163_v48 = vmul.f32 %v2939_v53, %v8459_v22  ;;  %v10497_v60 = vld [vmem:[#allocation14_spill] sm:$0xff]  ;;  %v10498_v18 = vld [vmem:[#allocation65_spill] sm:$0xff]  ;;  %v10501_v50 = vld [vmem:[#allocation15_spill] sm:$0xff] }
 0x2b6   :  { %v2849_v10 = vadd.f32 1e-05, %v2817_v35  ;;  %v2754_v2 = vmax.f32 %v2722_v46, 0.0  ;;  %v8606_v61 = vmul.f32 0.0125, %v2310_v34  ;;  %v2575_v6 = vpop.f32.mrb[101].mxu1  ;;  %v3130_v29 = vsub.f32 %v10497_v60, %v3098_v12 }
 0x2b7   :  { %10495 = vst [vmem:[#allocation62_spill] sm:$0xff] %v8601_v5  ;;  %v6195_v14 = vpop.eup %6194  ;;  %v3068_v3 = vmul.f32 2.0, %v8469_v55  ;;  %v2941_v16 = vmul.f32 16.0, %v8494_v36  ;;  %5989 = vmatpush1.bf16.msra.mxu1 %v5988_v25  ;;  %v5942_v0 = vpack.c.bf16 %v3003_v43, %v3002_v31  ;;  %v3034_v6 = vmul.f32 %v8538_v28, %v8538_v28 }
 0x2b8   :  { %10496 = vst [vmem:[#allocation10_spill] sm:$0xff] %v8606_v61  ;;  %v8612_v9 = vmul.f32 %v6195_v14, %v10498_v18  ;;  %6198 = vrsqrt.f32 %v2849_v10  ;;  %v2818_v53 = vmul.f32 %v10500_v56, %v2754_v2  ;;  %5990 = vmatprep.subr.bf16.mxu1 %v10354_v63  ;;  %v2320_v34 = vpop.f32.mrb[102].mxu0  ;;  %v2659_v35 = vmul.f32 0.0125, %v2568_v11 }
 0x2b9   :  { %5943 = vmatpush1.bf16.msra.mxu0 %v5942_v0  ;;  %v2691_v46 = vmul.f32 %v8606_v61, %v8606_v61  ;;  %v3035_v12 = vmul.f32 %v8559_v24, %v8559_v24  ;;  %v3131_v25 = vsub.f32 %v10501_v50, %v3099_v59  ;;  %v2578_v31 = vpop.f32.mrb[102].mxu1  ;;  %v2322_v43 = vpop.f32.mrb[103].mxu0  ;;  %v3069_v37 = vmul.f32 2.0, %v8494_v36  ;;  %v10503_v0 = vld [vmem:[#allocation16_spill] sm:$0xff] }
 0x2ba   :  { %10499 = vst [vmem:[#allocation72_spill] sm:$0xff] %v8612_v9  ;;  %v2850_v10 = vadd.f32 1e-05, %v2818_v53  ;;  %v3194_v2 = vadd.f32 %v3162_v57, %v3130_v29  ;;  %v8624_v14 = vmul.f32 0.0125, %v2315_v8  ;;  %5944 = vmatprep.subr.bf16.mxu0 %v10354_v63  ;;  %v3100_v11 = vmul.f32 %v3068_v3, %v10503_v0  ;;  %v2580_v24 = vpop.f32.mrb[103].mxu1 }
 0x2bb   :  { %v3164_v60 = vmul.f32 %v8597_v41, %v8469_v55  ;;  %v2723_v18 = vsub.f32 %v2659_v35, %v2691_v46  ;;  %v3195_v56 = vadd.f32 %v3163_v48, %v3131_v25  ;;  %v2660_v50 = vmul.f32 0.0125, %v2573_v1  ;;  %v10504_v3 = vld [vmem:[#allocation17_spill] sm:$0xff]  ;;  %v10506_v25 = vld [vmem:[#allocation79_spill] sm:$0xff] }
 0x2bc   :  { %10502 = vst [vmem:[#allocation11_spill] sm:$0xff] %v8624_v14  ;;  %6200 = vrsqrt.f32 %v2850_v10  ;;  %v3226_v59 = vmul.f32 %v3194_v2, %v3034_v6  ;;  %v2692_v43 = vmul.f32 %v8624_v14, %v8624_v14  ;;  %v2325_v53 = vpop.f32.mrb[104].mxu0  ;;  %v2972_v22 = vsub.f32 %v10503_v0, %v8597_v41  ;;  %v10505_v6 = vld [vmem:[#allocation66_spill] sm:$0xff] }
 0x2bd   :  { %v6197_v57 = vpop.eup %6196  ;;  %v2755_v8 = vmax.f32 %v2723_v18, 0.0  ;;  %v3227_v29 = vmul.f32 %v3195_v56, %v3035_v12  ;;  %v2973_v28 = vsub.f32 %v10504_v3, %v2941_v16  ;;  %v2583_v19 = vpop.f32.mrb[104].mxu1  ;;  %v3101_v48 = vmul.f32 %v3069_v37, %v10504_v3 }
 0x2be   :  { %v2327_v55 = vpop.f32.mrb[105].mxu0  ;;  %v3165_v24 = vmul.f32 %v2941_v16, %v8494_v36  ;;  %v8638_v1 = vmul.f32 %v6197_v57, %v10505_v6  ;;  %v2724_v35 = vsub.f32 %v2660_v50, %v2692_v43  ;;  %v2585_v46 = vpop.f32.mrb[105].mxu1  ;;  %v3004_v12 = vmul.f32 %v2972_v22, %v8570_v54  ;;  %v10508_v43 = vld [vmem:[#allocation18_spill] sm:$0xff] }
 0x2bf   :  { %v2819_v10 = vmul.f32 %v10506_v25, %v2755_v8  ;;  %v5991_v2 = vpack.c.bf16 %v3227_v29, %v3226_v59  ;;  %v3005_v41 = vmul.f32 %v2973_v28, %v8588_v7  ;;  %v2942_v0 = vmul.f32 16.0, %v8506_v58  ;;  %v10509_v46 = vld [vmem:[#allocation67_spill] sm:$0xff] }
 0x2c0   :  { %v3070_v55 = vmul.f32 2.0, %v8506_v58  ;;  %v2756_v18 = vmax.f32 %v2724_v35, 0.0  ;;  %v8645_v37 = vmul.f32 0.0125, %v2320_v34  ;;  %v2330_v16 = vpop.f32.mrb[106].mxu0  ;;  %v2943_v56 = vmul.f32 16.0, %v8524_v52 }
 0x2c1   :  { %v2851_v57 = vadd.f32 1e-05, %v2819_v10  ;;  %5992 = vmatpush1.bf16.msra.mxu1 %v5991_v2  ;;  %v5945_v50 = vpack.c.bf16 %v3005_v41, %v3004_v12  ;;  %v3132_v8 = vsub.f32 %v10508_v43, %v3100_v11  ;;  %v2588_v59 = vpop.f32.mrb[106].mxu1  ;;  %v2332_v29 = vpop.f32.mrb[107].mxu0  ;;  %v2661_v3 = vmul.f32 0.0125, %v2578_v31 }
 0x2c2   :  { %10507 = vst [vmem:[#allocation12_spill] sm:$0xff] %v8645_v37  ;;  %v6199_v22 = vpop.eup %6198  ;;  %v2820_v28 = vmul.f32 %v8283_v51, %v2756_v18  ;;  %5993 = vmatprep.subr.bf16.mxu1 %v10354_v63  ;;  %v2693_v34 = vmul.f32 %v8645_v37, %v8645_v37  ;;  %v3036_v6 = vmul.f32 %v8570_v54, %v8570_v54  ;;  %v2590_v35 = vpop.f32.mrb[107].mxu1  ;;  %v10511_v10 = vld [vmem:[#allocation19_spill] sm:$0xff]  ;;  %v10512_v2 = vld [vmem:[#allocation20_spill] sm:$0xff]  ;;  %v3071_v29 = vmul.f32 2.0, %v8524_v52 }
 0x2c3   :  { %v8656_v25 = vmul.f32 %v6199_v22, %v10509_v46  ;;  %6202 = vrsqrt.f32 %v2851_v57  ;;  %5946 = vmatpush1.bf16.msra.mxu0 %v5945_v50  ;;  %v3037_v11 = vmul.f32 %v8588_v7, %v8588_v7  ;;  %v3133_v51 = vsub.f32 %v10511_v10, %v3101_v48  ;;  %v10514_v10 = vld [vmem:[#allocation21_spill] sm:$0xff] }
 0x2c4   :  { %v3102_v12 = vmul.f32 %v3070_v55, %v10512_v2  ;;  %v3166_v31 = vmul.f32 %v2942_v0, %v8506_v58  ;;  %v2852_v41 = vadd.f32 1e-05, %v2820_v28  ;;  %v2725_v18 = vsub.f32 %v2661_v3, %v2693_v34  ;;  %5947 = vmatprep.subr.bf16.mxu0 %v10354_v63  ;;  %v2335_v43 = vpop.f32.mrb[108].mxu0  ;;  %v10515_v3 = vld [vmem:[#allocation69_spill] sm:$0xff] }
 0x2c5   :  { %10510 = vst [vmem:[#allocation63_spill] sm:$0xff] %v8656_v25  ;;  %v3196_v22 = vadd.f32 %v3164_v60, %v3132_v8  ;;  %v3197_v35 = vadd.f32 %v3165_v24, %v3133_v51  ;;  %v8665_v57 = vmul.f32 0.0125, %v2325_v53  ;;  %v2593_v50 = vpop.f32.mrb[108].mxu1  ;;  %v2337_v46 = vpop.f32.mrb[109].mxu0  ;;  %v2974_v55 = vsub.f32 %v10512_v2, %v2942_v0  ;;  %v10517_v60 = vld [vmem:[#allocation80_spill] sm:$0xff] }
 0x2c6   :  { %v6201_v7 = vpop.eup %6200  ;;  %6204 = vrsqrt.f32 %v2852_v41  ;;  %v2757_v48 = vmax.f32 %v2725_v18, 0.0  ;;  %v2975_v58 = vsub.f32 %v10514_v10, %v2943_v56  ;;  %v2595_v28 = vpop.f32.mrb[109].mxu1  ;;  %v2662_v49 = vmul.f32 0.0125, %v2583_v19 }
 0x2c7   :  { %10513 = vst [vmem:[#allocation13_spill] sm:$0xff] %v8665_v57  ;;  %v8670_v34 = vmul.f32 %v6201_v7, %v10515_v3  ;;  %v3228_v36 = vmul.f32 %v3196_v22, %v3036_v6  ;;  %v3229_v54 = vmul.f32 %v3197_v35, %v3037_v11  ;;  %v2694_v53 = vmul.f32 %v8665_v57, %v8665_v57 }
 0x2c8   :  { %v2821_v24 = vmul.f32 %v10517_v60, %v2757_v48  ;;  %v3006_v8 = vmul.f32 %v2974_v55, %v8601_v5  ;;  %v3007_v51 = vmul.f32 %v2975_v58, %v8612_v9  ;;  %v8677_v41 = vpop.f32.mrb[110].mxu0  ;;  %v3103_v0 = vmul.f32 %v3071_v29, %v10514_v10 }
 0x2c9   :  { %10516 = vst [vmem:[#allocation75_spill] sm:$0xff] %v8670_v34  ;;  %v3167_v2 = vmul.f32 %v2943_v56, %v8524_v52  ;;  %v5994_v7 = vpack.c.bf16 %v3229_v54, %v3228_v36  ;;  %v8681_v18 = vmul.f32 0.0125, %v2330_v16  ;;  %v8683_v6 = vpop.f32.mrb[110].mxu1  ;;  %v2342_v19 = vpop.f32.mrb[111].mxu0  ;;  %v2944_v11 = vmul.f32 16.0, %v8550_v47 }
 0x2ca   :  { %v2853_v22 = vadd.f32 1e-05, %v2821_v24  ;;  %v2726_v35 = vsub.f32 %v2662_v49, %v2694_v53  ;;  %v5948_v46 = vpack.c.bf16 %v3007_v51, %v3006_v8  ;;  %v2600_v48 = vpop.f32.mrb[111].mxu1  ;;  %v3072_v58 = vmul.f32 2.0, %v8550_v47  ;;  %v10519_v49 = vld [vmem:[#allocation22_spill] sm:$0xff]  ;;  %v10520_v24 = vld [vmem:[#allocation23_spill] sm:$0xff] }
 0x2cb   :  { %10518 = vst [vmem:[#allocation64_spill] sm:$0xff] %v8681_v18  ;;  %v3073_v55 = vmul.f32 2.0, %v8567_v30  ;;  %5995 = vmatpush1.bf16.msra.mxu1 %v5994_v7  ;;  %v2663_v29 = vmul.f32 0.0125, %v2588_v59  ;;  %v2695_v36 = vmul.f32 %v8681_v18, %v8681_v18  ;;  %v3038_v16 = vmul.f32 %v8601_v5, %v8601_v5  ;;  %v10521_v7 = vld [vmem:[#allocation70_spill] sm:$0xff]  ;;  %v10526_v52 = vld [vmem:[#allocation25_spill] sm:$0xff] }
 0x2cc   :  { %6206 = vrsqrt.f32 %v2853_v22  ;;  %v2758_v54 = vmax.f32 %v2726_v35, 0.0  ;;  %5949 = vmatpush1.bf16.msra.mxu0 %v5948_v46  ;;  %5996 = vmatprep.subr.bf16.mxu1 %v10354_v63  ;;  %v3134_v56 = vsub.f32 %v10519_v49, %v3102_v12  ;;  %v8694_v10 = vpop.f32.mrb[112].mxu0  ;;  %v2945_v3 = vmul.f32 16.0, %v8567_v30  ;;  %v10523_v12 = vld [vmem:[#allocation81_spill] sm:$0xff] }
 0x2cd   :  { %v6203_v28 = vpop.eup %6202  ;;  %v2727_v60 = vsub.f32 %v2663_v29, %v2695_v36  ;;  %v3039_v59 = vmul.f32 %v8612_v9, %v8612_v9  ;;  %v3135_v53 = vsub.f32 %v10520_v24, %v3103_v0  ;;  %5950 = vmatprep.subr.bf16.mxu0 %v10354_v63  ;;  %v8701_v8 = vpop.f32.mrb[112].mxu1  ;;  %v8707_v46 = vmul.f32 0.0125, %v2335_v43  ;;  %v10525_v29 = vld [vmem:[#allocation24_spill] sm:$0xff] }
 0x2ce   :  { %v2347_v51 = vpop.f32.mrb[113].mxu0  ;;  %v8704_v19 = vmul.f32 %v6203_v28, %v10521_v7  ;;  %v2822_v22 = vmul.f32 %v10523_v12, %v2758_v54  ;;  %v3198_v35 = vadd.f32 %v3166_v31, %v3134_v56  ;;  %v2605_v48 = vpop.f32.mrb[113].mxu1  ;;  %v3104_v36 = vmul.f32 %v3072_v58, %v10525_v29  ;;  %v10527_v7 = vld [vmem:[#allocation73_spill] sm:$0xff] }
 0x2cf   :  { %10524 = vst [vmem:[#allocation65_spill] sm:$0xff] %v8707_v46  ;;  %v3168_v49 = vmul.f32 %v2944_v11, %v8550_v47  ;;  %v2759_v9 = vmax.f32 %v2727_v60, 0.0  ;;  %v3199_v0 = vadd.f32 %v3167_v2, %v3135_v53  ;;  %v3105_v5 = vmul.f32 %v3073_v55, %v10526_v52 }
 0x2d0   :  { %10522 = vst [vmem:[#allocation14_spill] sm:$0xff] %v8704_v19  ;;  %v6205_v24 = vpop.eup %6204  ;;  %v2854_v23 = vadd.f32 1e-05, %v2822_v22  ;;  %v3230_v51 = vmul.f32 %v3198_v35, %v3038_v16  ;;  %v2664_v15 = vmul.f32 0.0125, %v2593_v50  ;;  %v8712_v28 = vpop.f32.mrb[114].mxu0  ;;  %v2696_v58 = vmul.f32 %v8707_v46, %v8707_v46 }
 0x2d1   :  { %v8715_v54 = vmul.f32 %v6205_v24, %v10527_v7  ;;  %v2823_v31 = vmul.f32 %v8307_v13, %v2759_v9  ;;  %v3231_v43 = vmul.f32 %v3199_v0, %v3039_v59  ;;  %v8720_v56 = vpop.f32.mrb[114].mxu1  ;;  %v2352_v2 = vpop.f32.mrb[115].mxu0  ;;  %v3169_v60 = vmul.f32 %v2945_v3, %v8567_v30 }
 0x2d2   :  { %6208 = vrsqrt.f32 %v2854_v23  ;;  %v2976_v55 = vsub.f32 %v10525_v29, %v2944_v11  ;;  %v2977_v50 = vsub.f32 %v10526_v52, %v2945_v3  ;;  %v2610_v16 = vpop.f32.mrb[115].mxu1  ;;  %v2946_v53 = vmul.f32 16.0, %v8582_v27  ;;  %v10530_v3 = vld [vmem:[#allocation26_spill] sm:$0xff] }
 0x2d3   :  { %10528 = vst [vmem:[#allocation78_spill] sm:$0xff] %v8715_v54  ;;  %v2855_v12 = vadd.f32 1e-05, %v2823_v31  ;;  %v5997_v22 = vpack.c.bf16 %v3231_v43, %v3230_v51  ;;  %v2728_v13 = vsub.f32 %v2664_v15, %v2696_v58  ;;  %v3074_v9 = vmul.f32 2.0, %v8582_v27  ;;  %v10531_v58 = vld [vmem:[#allocation74_spill] sm:$0xff] }
 0x2d4   :  { %v3008_v59 = vmul.f32 %v2976_v55, %v8638_v1  ;;  %v3009_v35 = vmul.f32 %v2977_v50, %v8656_v25  ;;  %v8730_v48 = vmul.f32 0.0125, %v8677_v41  ;;  %v8732_v23 = vpop.f32.mrb[116].mxu0  ;;  %v2947_v11 = vmul.f32 16.0, %v8606_v61  ;;  %v10533_v50 = vld [vmem:[#allocation27_spill] sm:$0xff] }
 0x2d5   :  { %6210 = vrsqrt.f32 %v2855_v12  ;;  %5998 = vmatpush1.bf16.msra.mxu1 %v5997_v22  ;;  %v2760_v52 = vmax.f32 %v2728_v13, 0.0  ;;  %v3136_v29 = vsub.f32 %v10530_v3, %v3104_v36  ;;  %v8736_v0 = vpop.f32.mrb[116].mxu1  ;;  %v2357_v15 = vpop.f32.mrb[117].mxu0  ;;  %v2665_v7 = vmul.f32 0.0125, %v8683_v6 }
 0x2d6   :  { %10529 = vst [vmem:[#allocation15_spill] sm:$0xff] %v8730_v48  ;;  %v6207_v24 = vpop.eup %6206  ;;  %v5951_v51 = vpack.c.bf16 %v3009_v35, %v3008_v59  ;;  %5999 = vmatprep.subr.bf16.mxu1 %v10354_v63  ;;  %v2697_v41 = vmul.f32 %v8730_v48, %v8730_v48  ;;  %v3040_v31 = vmul.f32 %v8638_v1, %v8638_v1  ;;  %v2615_v43 = vpop.f32.mrb[117].mxu1  ;;  %v3075_v12 = vmul.f32 2.0, %v8606_v61  ;;  %v10535_v35 = vld [vmem:[#allocation28_spill] sm:$0xff] }
 0x2d7   :  { %v8745_v2 = vmul.f32 %v6207_v24, %v10531_v58  ;;  %v2824_v36 = vmul.f32 %v8311_v62, %v2760_v52  ;;  %v3041_v55 = vmul.f32 %v8656_v25, %v8656_v25  ;;  %v3137_v16 = vsub.f32 %v10533_v50, %v3105_v5 }
 0x2d8   :  { %5952 = vmatpush1.bf16.msra.mxu0 %v5951_v51  ;;  %v2729_v6 = vsub.f32 %v2665_v7, %v2697_v41  ;;  %v3200_v22 = vadd.f32 %v3168_v49, %v3136_v29  ;;  %v8753_v13 = vmul.f32 0.0125, %v8694_v10  ;;  %v8755_v59 = vpop.f32.mrb[118].mxu0  ;;  %v3106_v3 = vmul.f32 %v3074_v9, %v10535_v35  ;;  %v10536_v41 = vld [vmem:[#allocation29_spill] sm:$0xff] }
 0x2d9   :  { %10532 = vst [vmem:[#allocation16_spill] sm:$0xff] %v8745_v2  ;;  %v3076_v15 = vmul.f32 2.0, %v8624_v14  ;;  %v2856_v62 = vadd.f32 1e-05, %v2824_v36  ;;  %v3201_v52 = vadd.f32 %v3169_v60, %v3137_v16  ;;  %5953 = vmatprep.subr.bf16.mxu0 %v10354_v63  ;;  %v8760_v24 = vpop.f32.mrb[118].mxu1  ;;  %v2362_v5 = vpop.f32.mrb[119].mxu0  ;;  %v2978_v9 = vsub.f32 %v10535_v35, %v2946_v53 }
 0x2da   :  { %10534 = vst [vmem:[#allocation17_spill] sm:$0xff] %v8753_v13  ;;  %v2761_v43 = vmax.f32 %v2729_v6, 0.0  ;;  %v3232_v51 = vmul.f32 %v3200_v22, %v3040_v31  ;;  %v2666_v49 = vmul.f32 0.0125, %v8701_v8  ;;  %v2698_v10 = vmul.f32 %v8753_v13, %v8753_v13  ;;  %v2620_v29 = vpop.f32.mrb[119].mxu1  ;;  %v10537_v8 = vld [vmem:[#allocation76_spill] sm:$0xff] }
 0x2db   :  { %6212 = vrsqrt.f32 %v2856_v62  ;;  %v3233_v7 = vmul.f32 %v3201_v52, %v3041_v55  ;;  %v2979_v58 = vsub.f32 %v10536_v41, %v2947_v11  ;;  %v3170_v36 = vmul.f32 %v2946_v53, %v8582_v27 }
 0x2dc   :  { %v6209_v60 = vpop.eup %6208  ;;  %v3107_v50 = vmul.f32 %v3075_v12, %v10536_v41  ;;  %v2825_v16 = vmul.f32 %v8322_v42, %v2761_v43  ;;  %v2730_v31 = vsub.f32 %v2666_v49, %v2698_v10  ;;  %v8770_v6 = vpop.f32.mrb[120].mxu0  ;;  %v3010_v55 = vmul.f32 %v2978_v9, %v8670_v34  ;;  %v10540_v41 = vld [vmem:[#allocation32_spill] sm:$0xff]  ;;  %v10541_v9 = vld [vmem:[#allocation30_spill] sm:$0xff] }
 0x2dd   :  { %v8773_v22 = vmul.f32 %v6209_v60, %v10537_v8  ;;  %v6000_v5 = vpack.c.bf16 %v3233_v7, %v3232_v51  ;;  %v3011_v35 = vmul.f32 %v2979_v58, %v8704_v19  ;;  %v8777_v62 = vpop.f32.mrb[120].mxu1  ;;  %v2367_v52 = vpop.f32.mrb[121].mxu0  ;;  %v3171_v53 = vmul.f32 %v2947_v11, %v8606_v61 }
 0x2de   :  { %v2857_v29 = vadd.f32 1e-05, %v2825_v16  ;;  %v2762_v12 = vmax.f32 %v2730_v31, 0.0  ;;  %v8781_v42 = vmul.f32 0.0125, %v8712_v28  ;;  %v2625_v43 = vpop.f32.mrb[121].mxu1  ;;  %v8785_v51 = vmul.f32 %v3076_v15, %v10540_v41 }
 0x2df   :  { %10538 = vst [vmem:[#allocation66_spill] sm:$0xff] %v8773_v22  ;;  %v6211_v49 = vpop.eup %6210  ;;  %v2948_v10 = vmul.f32 16.0, %v8624_v14  ;;  %6001 = vmatpush1.bf16.msra.mxu1 %v6000_v5  ;;  %v5954_v7 = vpack.c.bf16 %v3011_v35, %v3010_v55  ;;  %v3138_v58 = vsub.f32 %v10541_v9, %v3106_v3  ;;  %v3042_v28 = vmul.f32 %v8670_v34, %v8670_v34  ;;  %v10543_v3 = vld [vmem:[#allocation31_spill] sm:$0xff] }
 0x2e0   :  { %10539 = vst [vmem:[#allocation79_spill] sm:$0xff] %v8781_v42  ;;  %v8789_v60 = vmul.f32 %v6211_v49, %v8272_v45  ;;  %6214 = vrsqrt.f32 %v2857_v29  ;;  %v2826_v11 = vmul.f32 %v8326_v39, %v2762_v12  ;;  %6002 = vmatprep.subr.bf16.mxu1 %v10354_v63  ;;  %v8795_v16 = vpop.f32.mrb[122].mxu0  ;;  %v2667_v15 = vmul.f32 0.0125, %v8720_v56 }
 0x2e1   :  { %5955 = vmatpush1.bf16.msra.mxu0 %v5954_v7  ;;  %v2699_v31 = vmul.f32 %v8781_v42, %v8781_v42  ;;  %v3043_v45 = vmul.f32 %v8704_v19, %v8704_v19  ;;  %v3139_v8 = vsub.f32 %v10543_v3, %v3107_v50  ;;  %v8803_v5 = vpop.f32.mrb[122].mxu1  ;;  %v2372_v39 = vpop.f32.mrb[123].mxu0  ;;  %v2949_v55 = vmul.f32 16.0, %v8645_v37 }
 0x2e2   :  { %10542 = vst [vmem:[#allocation18_spill] sm:$0xff] %v8789_v60  ;;  %v3077_v35 = vmul.f32 2.0, %v8645_v37  ;;  %v2858_v52 = vadd.f32 1e-05, %v2826_v11  ;;  %v8808_v29 = vmul.f32 0.0125, %v8732_v23  ;;  %5956 = vmatprep.subr.bf16.mxu0 %v10354_v63  ;;  %v8812_v56 = vmul.f32 %v2948_v10, %v8624_v14 }
 0x2e3   :  { %v2731_v12 = vsub.f32 %v2667_v15, %v2699_v31  ;;  %v3202_v43 = vadd.f32 %v3170_v36, %v3138_v58  ;;  %v3203_v49 = vadd.f32 %v3171_v53, %v3139_v8  ;;  %v2630_v50 = vpop.f32.mrb[123].mxu1  ;;  %v3078_v7 = vmul.f32 2.0, %v8665_v57  ;;  %v10545_v58 = vld [vmem:[#allocation33_spill] sm:$0xff] }
 0x2e4   :  { %10544 = vst [vmem:[#allocation67_spill] sm:$0xff] %v8808_v29  ;;  %6216 = vrsqrt.f32 %v2858_v52  ;;  %v2668_v9 = vmul.f32 0.0125, %v8736_v0  ;;  %v2700_v11 = vmul.f32 %v8808_v29, %v8808_v29  ;;  %v8818_v3 = vpop.f32.mrb[124].mxu0  ;;  %v8821_v39 = vmul.f32 16.0, %v8665_v57 }
 0x2e5   :  { %v6213_v23 = vpop.eup %6212  ;;  %v2763_v14 = vmax.f32 %v2731_v12, 0.0  ;;  %v3234_v19 = vmul.f32 %v3202_v43, %v3042_v28  ;;  %v3235_v15 = vmul.f32 %v3203_v49, %v3043_v45  ;;  %v8823_v36 = vpop.f32.mrb[124].mxu1  ;;  %v3109_v31 = vmul.f32 %v3077_v35, %v10545_v58  ;;  %v10547_v45 = vld [vmem:[#allocation36_spill] sm:$0xff] }
 0x2e6   :  { %v2377_v53 = vpop.f32.mrb[125].mxu0  ;;  %v3173_v8 = vmul.f32 %v2949_v55, %v8645_v37  ;;  %v8828_v0 = vmul.f32 %v6213_v23, %v8274_v33  ;;  %v2732_v52 = vsub.f32 %v2668_v9, %v2700_v11  ;;  %v2635_v50 = vpop.f32.mrb[125].mxu1  ;;  %v2980_v27 = vsub.f32 %v10540_v41, %v2948_v10 }
 0x2e7   :  { %v2827_v61 = vmul.f32 %v8331_v21, %v2763_v14  ;;  %v6003_v34 = vpack.c.bf16 %v3235_v15, %v3234_v19  ;;  %v2981_v28 = vsub.f32 %v10545_v58, %v2949_v55  ;;  %v8834_v12 = vmul.f32 %v3078_v7, %v10547_v45  ;;  %v10550_v15 = vld [vmem:[#allocation82_spill] sm:$0xff]  ;;  %v10553_v50 = vld [vmem:[#allocation37_spill] sm:$0xff] }
 0x2e8   :  { %10546 = vst [vmem:[#allocation19_spill] sm:$0xff] %v8828_v0  ;;  %v3079_v43 = vmul.f32 2.0, %v8681_v18  ;;  %v2764_v35 = vmax.f32 %v2732_v52, 0.0  ;;  %v8838_v49 = vmul.f32 0.0125, %v8755_v59  ;;  %v8840_v33 = vpop.f32.mrb[126].mxu0  ;;  %v8844_v9 = vmul.f32 %v8821_v39, %v8665_v57 }
 0x2e9   :  { %v2859_v21 = vadd.f32 1e-05, %v2827_v61  ;;  %6004 = vmatpush1.bf16.msra.mxu1 %v6003_v34  ;;  %v3012_v14 = vmul.f32 %v2980_v27, %v8715_v54  ;;  %v3013_v19 = vmul.f32 %v2981_v28, %v8745_v2  ;;  %v8848_v10 = vpop.f32.mrb[126].mxu1  ;;  %v2382_v41 = vpop.f32.mrb[127].mxu0  ;;  %v2951_v7 = vmul.f32 16.0, %v8681_v18  ;;  %v10549_v59 = vld [vmem:[#allocation87_spill] sm:$0xff] }
 0x2ea   :  { %10548 = vst [vmem:[#allocation20_spill] sm:$0xff] %v8838_v49  ;;  %v6215_v55 = vpop.eup %6214  ;;  %v2828_v11 = vmul.f32 %v10549_v59, %v2764_v35  ;;  %6005 = vmatprep.subr.bf16.mxu1 %v10354_v63  ;;  %v2669_v23 = vmul.f32 0.0125, %v8760_v24  ;;  %v2701_v61 = vmul.f32 %v8838_v49, %v8838_v49  ;;  %v2640_v34 = vpop.f32.mrb[127].mxu1  ;;  %v10552_v58 = vld [vmem:[#allocation34_spill] sm:$0xff]  ;;  %v8862_v28 = vmul.f32 %v3079_v43, %v10553_v50 }
 0x2eb   :  { %v8857_v27 = vmul.f32 %v6215_v55, %v10550_v15  ;;  %6218 = vrsqrt.f32 %v2859_v21  ;;  %v5957_v53 = vpack.c.bf16 %v3013_v19, %v3012_v14  ;;  %v3140_v52 = vsub.f32 %v10552_v58, %v8785_v51  ;;  %v10554_v14 = vld [vmem:[#allocation35_spill] sm:$0xff]  ;;  %v336_v51 = vld [vmem:[%s10135_s3 + $0xe0] sm:$0xff] }
 0x2ec   :  { %v8865_v35 = vmul.f32 16.0, %v8707_v46  ;;  %v2860_v41 = vadd.f32 1e-05, %v2828_v11  ;;  %v2733_v24 = vsub.f32 %v2669_v23, %v2701_v61  ;;  %v3080_v59 = vmul.f32 2.0, %v8707_v46  ;;  %v10556_v15 = vld [vmem:[#allocation83_spill] sm:$0xff] }
 0x2ed   :  { %10551 = vst [vmem:[#allocation21_spill] sm:$0xff] %v8857_v27  ;;  %5958 = vmatpush1.bf16.msra.mxu0 %v5957_v53  ;;  %v3044_v55 = vmul.f32 %v8715_v54, %v8715_v54  ;;  %v3045_v21 = vmul.f32 %v8745_v2, %v8745_v2  ;;  %v3141_v19 = vsub.f32 %v10554_v14, %v3109_v31  ;;  %v3081_v34 = vmul.f32 2.0, %v8730_v48  ;;  %v10558_v14 = vld [vmem:[#allocation90_spill] sm:$0xff]  ;;  %v10559_v2 = vld [vmem:[#allocation92_spill] sm:$0xff] }
 0x2ee   :  { %v6217_v43 = vpop.eup %6216  ;;  %6220 = vrsqrt.f32 %v2860_v41  ;;  %v2765_v11 = vmax.f32 %v2733_v24, 0.0  ;;  %v8878_v23 = vmul.f32 0.0125, %v8770_v6  ;;  %5959 = vmatprep.subr.bf16.mxu0 %v10354_v63  ;;  %v8882_v61 = vmul.f32 16.0, %v8730_v48  ;;  %v10560_v54 = vld [vmem:[#allocation40_spill] sm:$0xff] }
 0x2ef   :  { %v8885_v53 = vmul.f32 %v6217_v43, %v10556_v15  ;;  %v3204_v31 = vadd.f32 %v8812_v56, %v3140_v52  ;;  %v3205_v58 = vadd.f32 %v3173_v8, %v3141_v19  ;;  %v8890_v37 = vmul.f32 %v10559_v2, %v336_v51  ;;  %v10561_v8 = vld [vmem:[#allocation41_spill] sm:$0xff] }
 0x2f0   :  { %10555 = vst [vmem:[#allocation69_spill] sm:$0xff] %v8878_v23  ;;  %v2829_v57 = vmul.f32 %v10558_v14, %v2765_v11  ;;  %v2670_v41 = vmul.f32 0.0125, %v8777_v62  ;;  %v2702_v6 = vmul.f32 %v8878_v23, %v8878_v23  ;;  %v3175_v24 = vmul.f32 %v2951_v7, %v8681_v18  ;;  %v10562_v14 = vld [vmem:[#allocation85_spill] sm:$0xff] }
 0x2f1   :  { %10557 = vst [vmem:[#allocation80_spill] sm:$0xff] %v8885_v53  ;;  %v8897_v25 = vmul.f32 %v3080_v59, %v10560_v54  ;;  %v3236_v43 = vmul.f32 %v3204_v31, %v3044_v55  ;;  %v3237_v15 = vmul.f32 %v3205_v58, %v3045_v21  ;;  %v8901_v56 = vmul.f32 %v8865_v35, %v8707_v46  ;;  %v337_v21 = vld [vmem:[%s10135_s3 + $0xe8] sm:$0xff] }
 0x2f2   :  { %v8904_v52 = vmul.f32 %v3081_v34, %v10561_v8  ;;  %v2861_v2 = vadd.f32 1e-05, %v2829_v57  ;;  %v2734_v19 = vsub.f32 %v2670_v41, %v2702_v6  ;;  %v8908_v62 = vmul.f32 %v8882_v61, %v8730_v48 }
 0x2f3   :  { %v6006_v51 = vpack.c.bf16 %v3237_v15, %v3236_v43  ;;  %v2982_v59 = vsub.f32 %v10547_v45, %v8821_v39  ;;  %v2983_v55 = vsub.f32 %v10553_v50, %v2951_v7  ;;  %v2798_v57 = vmul.f32 %v8890_v37, %v8890_v37 }
 0x2f4   :  { %6222 = vrsqrt.f32 %v2861_v2  ;;  %v2766_v11 = vmax.f32 %v2734_v19, 0.0  ;;  %v8919_v34 = vmul.f32 0.0125, %v8795_v16  ;;  %v8922_v58 = vmul.f32 16.0, %v8753_v13  ;;  %v10564_v16 = vld [vmem:[#allocation93_spill] sm:$0xff] }
 0x2f5   :  { %v6219_v31 = vpop.eup %6218  ;;  %v3082_v39 = vmul.f32 2.0, %v8753_v13  ;;  %6007 = vmatpush1.bf16.msra.mxu1 %v6006_v51  ;;  %v3014_v45 = vmul.f32 %v2982_v59, %v8773_v22  ;;  %v3015_v7 = vmul.f32 %v2983_v55, %v8789_v60  ;;  %v8928_v50 = vmul.f32 16.0, %v8781_v42  ;;  %v10565_v51 = vld [vmem:[#allocation38_spill] sm:$0xff] }
 0x2f6   :  { %v8931_v41 = vmul.f32 %v6219_v31, %v10562_v14  ;;  %v2830_v6 = vmul.f32 %v2798_v57, %v2766_v11  ;;  %6008 = vmatprep.subr.bf16.mxu1 %v10354_v63  ;;  %v8935_v43 = vmul.f32 %v10564_v16, %v337_v21  ;;  %v2671_v2 = vmul.f32 0.0125, %v8803_v5  ;;  %v10566_v21 = vld [vmem:[#allocation39_spill] sm:$0xff]  ;;  %v10568_v14 = vld [vmem:[#allocation86_spill] sm:$0xff]  ;;  %v338_v16 = vld [vmem:[%s10135_s3 + $0xf0] sm:$0xff] }
 0x2f7   :  { %v5960_v15 = vpack.c.bf16 %v3015_v7, %v3014_v45  ;;  %v2703_v19 = vmul.f32 %v8919_v34, %v8919_v34  ;;  %v3142_v59 = vsub.f32 %v10565_v51, %v8834_v12  ;;  %v3046_v31 = vmul.f32 %v8773_v22, %v8773_v22  ;;  %v10567_v45 = vld [vmem:[#allocation44_spill] sm:$0xff] }
 0x2f8   :  { %10563 = vst [vmem:[#allocation22_spill] sm:$0xff] %v8931_v41  ;;  %v6221_v55 = vpop.eup %6220  ;;  %v2862_v48 = vadd.f32 1e-05, %v2830_v6  ;;  %v3047_v11 = vmul.f32 %v8789_v60, %v8789_v60  ;;  %v3143_v57 = vsub.f32 %v10566_v21, %v8862_v28  ;;  %v8949_v7 = vmul.f32 %v3082_v39, %v10567_v45 }
 0x2f9   :  { %v8953_v5 = vmul.f32 %v8922_v58, %v8753_v13  ;;  %v8956_v12 = vmul.f32 %v6221_v55, %v10568_v14  ;;  %5961 = vmatpush1.bf16.msra.mxu0 %v5960_v15  ;;  %v2735_v6 = vsub.f32 %v2671_v2, %v2703_v19  ;;  %v3206_v51 = vadd.f32 %v8844_v9, %v3142_v59 }
 0x2fa   :  { %6224 = vrsqrt.f32 %v2862_v48  ;;  %v3207_v28 = vadd.f32 %v3175_v24, %v3143_v57  ;;  %v8963_v39 = vmul.f32 0.0125, %v8818_v3  ;;  %5962 = vmatprep.subr.bf16.mxu0 %v10354_v63  ;;  %v3083_v21 = vmul.f32 2.0, %v8781_v42 }
 0x2fb   :  { %10569 = vst [vmem:[#allocation23_spill] sm:$0xff] %v8956_v12  ;;  %v8969_v55 = vmul.f32 %v8928_v50, %v8781_v42  ;;  %v2767_v15 = vmax.f32 %v2735_v6, 0.0  ;;  %v2799_v2 = vmul.f32 %v8935_v43, %v8935_v43  ;;  %v3238_v19 = vmul.f32 %v3206_v51, %v3046_v31 }
 0x2fc   :  { %v3239_v48 = vmul.f32 %v3207_v28, %v3047_v11  ;;  %v8974_v9 = vmul.f32 %v8421_v26, %v338_v16  ;;  %v2704_v3 = vmul.f32 %v8963_v39, %v8963_v39  ;;  %v8979_v24 = vmul.f32 16.0, %v8808_v29  ;;  %v10570_v16 = vld [vmem:[#allocation88_spill] sm:$0xff] }
 0x2fd   :  { %v3084_v59 = vmul.f32 2.0, %v8808_v29  ;;  %v2831_v57 = vmul.f32 %v2799_v2, %v2767_v15  ;;  %v2672_v14 = vmul.f32 0.0125, %v8823_v36  ;;  %v8984_v42 = vmul.f32 16.0, %v8838_v49  ;;  %v339_v36 = vld [vmem:[%s10135_s3 + $0xf8] sm:$0x3] }
 0x2fe   :  { %v6223_v6 = vpop.eup %6222  ;;  %v3085_v31 = vmul.f32 2.0, %v8838_v49  ;;  %v6009_v11 = vpack.c.bf16 %v3239_v48, %v3238_v19  ;;  %v2984_v26 = vsub.f32 %v10560_v54, %v8865_v35  ;;  %v2985_v15 = vsub.f32 %v10561_v8, %v8882_v61 }
 0x2ff   :  { %v8990_v51 = vmul.f32 %v6223_v6, %v10570_v16  ;;  %v2863_v28 = vadd.f32 1e-05, %v2831_v57  ;;  %v2736_v13 = vsub.f32 %v2672_v14, %v2704_v3  ;;  %v8998_v2 = vmul.f32 16.0, %v8878_v23  ;;  %v10572_v3 = vld [vmem:[#allocation45_spill] sm:$0xff]  ;;  %v10573_v14 = vld [vmem:[#allocation48_spill] sm:$0xff]  ;;  %v9020_v16 = vpop.permute.xlu0 %949 }
 0x300   :  { %v3086_v19 = vmul.f32 2.0, %v8878_v23  ;;  %6010 = vmatpush1.bf16.msra.mxu1 %v6009_v11  ;;  %v2800_v54 = vmul.f32 %v8974_v9, %v8974_v9  ;;  %v9004_v35 = vmul.f32 0.0125, %v8840_v33  ;;  %v3016_v61 = vmul.f32 %v2984_v26, %v8828_v0 }
 0x301   :  { %10571 = vst [vmem:[#allocation70_spill] sm:$0xff] %v8990_v51  ;;  %6226 = vrsqrt.f32 %v2863_v28  ;;  %v2768_v48 = vmax.f32 %v2736_v13, 0.0  ;;  %v3017_v8 = vmul.f32 %v2985_v15, %v8857_v27  ;;  %6011 = vmatprep.subr.bf16.mxu1 %v10354_v63  ;;  %v3115_v57 = vmul.f32 %v3083_v21, %v10572_v3 }
 0x302   :  { %v9011_v6 = vmul.f32 %v3084_v59, %v10573_v14  ;;  %v9015_v11 = vmul.f32 %v8979_v24, %v8808_v29  ;;  %v9018_v33 = vmul.f32 %v8432_v17, %v339_v36  ;;  %v2673_v28 = vmul.f32 0.0125, %v8848_v10  ;;  %v10574_v59 = vld [vmem:[#allocation49_spill] sm:$0xff]  ;;  %v10575_v36 = vld [vmem:[#allocation52_spill] sm:$0xff] }
 0x303   :  { %v2832_v13 = vmul.f32 %v2800_v54, %v2768_v48  ;;  %v5963_v26 = vpack.c.bf16 %v3017_v8, %v3016_v61  ;;  %v2705_v15 = vmul.f32 %v9004_v35, %v9004_v35  ;;  %vm1061_vm14 = vcmp.eq.s32.totalorder %v9020_v16, %v8543_v20 }
 0x304   :  { %v6225_v21 = vpop.eup %6224  ;;  %v9028_v46 = vmul.f32 %v3085_v31, %v10574_v59  ;;  %v9032_v17 = vmul.f32 %v8984_v42, %v8838_v49  ;;  %v9035_v29 = vmul.f32 %v3086_v19, %v10575_v36  ;;  %v9039_v10 = vmul.f32 %v8998_v2, %v8878_v23  ;;  %v10577_v49 = vld [vmem:[#allocation42_spill] sm:$0xff]  ;;  %v10578_v23 = vld [vmem:[#allocation43_spill] sm:$0xff] }
 0x305   :  { %v9042_v54 = vmul.f32 %v6225_v21, %v8890_v37  ;;  %v9045_v48 = vmul.f32 16.0, %v8919_v34  ;;  %v2864_v61 = vadd.f32 1e-05, %v2832_v13  ;;  %5964 = vmatpush1.bf16.msra.mxu0 %v5963_v26  ;;  %v2737_v31 = vsub.f32 %v2673_v28, %v2705_v15 }
 0x306   :  { %v3048_v8 = vmul.f32 %v8828_v0, %v8828_v0  ;;  %v3049_v19 = vmul.f32 %v8857_v27, %v8857_v27  ;;  %v3144_v60 = vsub.f32 %v10577_v49, %v8897_v25  ;;  %v3145_v18 = vsub.f32 %v10578_v23, %v8904_v52  ;;  %5965 = vmatprep.subr.bf16.mxu0 %v10354_v63 }
 0x307   :  { %10576 = vst [vmem:[#allocation81_spill] sm:$0xff] %v9042_v54  ;;  %v3087_v37 = vmul.f32 2.0, %v8919_v34  ;;  %6228 = vrsqrt.f32 %v2864_v61  ;;  %v2769_v13 = vmax.f32 %v2737_v31, 0.0  ;;  %v2801_v26 = vmul.f32 %v9018_v33, %v9018_v33 }
 0x308   :  { %v3088_v28 = vmul.f32 2.0, %v8963_v39  ;;  %v3208_v15 = vadd.f32 %v8901_v56, %v3144_v60  ;;  %v3209_v21 = vadd.f32 %v8908_v62, %v3145_v18  ;;  %v2986_v25 = vsub.f32 %v10567_v45, %v8922_v58  ;;  %v10579_v58 = vld [vmem:[#allocation46_spill] sm:$0xff] }
 0x309   :  { %v3089_v49 = vmul.f32 2.0, %v9004_v35  ;;  %v2833_v23 = vmul.f32 %v2801_v26, %v2769_v13  ;;  %v2987_v52 = vsub.f32 %v10572_v3, %v8928_v50  ;;  %v3050_v61 = vmul.f32 %v8885_v53, %v8885_v53  ;;  %v10580_v13 = vld [vmem:[#allocation47_spill] sm:$0xff]  ;;  %v10581_v50 = vld [vmem:[#allocation53_spill] sm:$0xff] }
 0x30a   :  { %v3240_v31 = vmul.f32 %v3208_v15, %v3048_v8  ;;  %v3241_v27 = vmul.f32 %v3209_v21, %v3049_v19  ;;  %v3018_v0 = vmul.f32 %v2986_v25, %v8885_v53  ;;  %v3051_v60 = vmul.f32 %v8931_v41, %v8931_v41 }
 0x30b   :  { %v6227_v18 = vpop.eup %6226  ;;  %v2865_v56 = vadd.f32 1e-05, %v2833_v23  ;;  %v3019_v62 = vmul.f32 %v2987_v52, %v8931_v41  ;;  %v3146_v45 = vsub.f32 %v10579_v58, %v8949_v7  ;;  %v3147_v26 = vsub.f32 %v10580_v13, %v3115_v57  ;;  %v10583_v23 = vld [vmem:[#allocation56_spill] sm:$0xff]  ;;  %v10584_v52 = vld [vmem:[#allocation57_spill] sm:$0xff]  ;;  %v10588_v58 = vld [vmem:[#allocation59_spill] sm:$0xff] }
 0x30c   :  { %v3119_v3 = vmul.f32 %v3087_v37, %v10581_v50  ;;  %v9078_v22 = vmul.f32 %v6227_v18, %v8935_v43  ;;  %v9081_v8 = vmul.f32 16.0, %v8963_v39  ;;  %v6012_v19 = vpack.c.bf16 %v3241_v27, %v3240_v31 }
 0x30d   :  { %6230 = vrsqrt.f32 %v2865_v56  ;;  %v5966_v15 = vpack.c.bf16 %v3019_v62, %v3018_v0  ;;  %v3210_v21 = vadd.f32 %v8953_v5, %v3146_v45  ;;  %v3211_v25 = vadd.f32 %v8969_v55, %v3147_v26  ;;  %v10587_v56 = vld [vmem:[#allocation51_spill] sm:$0xff] }
 0x30e   :  { %10582 = vst [vmem:[#allocation24_spill] sm:$0xff] %v9078_v22  ;;  %v3183_v7 = vmul.f32 %v9045_v48, %v8919_v34  ;;  %v3120_v57 = vmul.f32 %v3088_v28, %v10583_v23  ;;  %6013 = vmatpush1.bf16.msra.mxu1 %v6012_v19  ;;  %v2988_v43 = vsub.f32 %v10573_v14, %v8979_v24  ;;  %v10585_v55 = vmov 0.0   ;;  %v10586_v14 = vld [vmem:[#allocation50_spill] sm:$0xff] }
 0x30f   :  { %v2989_v37 = vsub.f32 %v10574_v59, %v8984_v42  ;;  %v3121_v27 = vmul.f32 %v3089_v49, %v10584_v52  ;;  %5967 = vmatpush1.bf16.msra.mxu0 %v5966_v15  ;;  %6014 = vmatprep.subr.bf16.mxu1 %v10354_v63  ;;  %v3242_v0 = vmul.f32 %v3210_v21, %v3050_v61  ;;  %v5280_v31 = vsel %vm1061_vm14, 1.0, %v10585_v55 }
 0x310   :  { %v3243_v5 = vmul.f32 %v3211_v25, %v3051_v60  ;;  %5968 = vmatprep.subr.bf16.mxu0 %v10354_v63  ;;  %v3020_v28 = vmul.f32 %v2988_v43, %v8956_v12  ;;  %v3052_v42 = vmul.f32 %v8956_v12, %v8956_v12  ;;  %v3148_v59 = vsub.f32 %v10586_v14, %v9011_v6  ;;  %v10590_v25 = vld [vmem:[#allocation60_spill] sm:$0xff] }
 0x311   :  { %v3021_v24 = vmul.f32 %v2989_v37, %v8990_v51  ;;  %v6229_v49 = vpop.eup %6228  ;;  %v3184_v61 = vmul.f32 %v9081_v8, %v8963_v39  ;;  %v3053_v18 = vmul.f32 %v8990_v51, %v8990_v51  ;;  %v3149_v62 = vsub.f32 %v10587_v56, %v9028_v46  ;;  %5604 = vmatprep.mubr.msk.f32.mxu0 %vm1252_vm6, %v5280_v31 }
 0x312   :  { %v6015_v60 = vpack.c.bf16 %v3243_v5, %v3242_v0  ;;  %v3152_v45 = vsub.f32 %v10588_v58, %v3120_v57  ;;  %v9114_v13 = vmul.f32 %v6229_v49, %v8974_v9  ;;  %v3212_v6 = vadd.f32 %v9015_v11, %v3148_v59  ;;  %5669 = vmatprep.mubr.msk.f32.mxu1 %vm1252_vm6, %v5280_v31  ;;  %v10592_v0 = vld [vmem:[#allocation55_spill] sm:$0xff] }
 0x313   :  { %v5969_v26 = vpack.c.bf16 %v3021_v24, %v3020_v28  ;;  %v2961_v19 = vmul.f32 16.0, %v9004_v35  ;;  %v3213_v15 = vadd.f32 %v9032_v17, %v3149_v62  ;;  %v2990_v46 = vsub.f32 %v10575_v36, %v8998_v2  ;;  %v10591_v2 = vld [vmem:[#allocation54_spill] sm:$0xff] }
 0x314   :  { %10589 = vst [vmem:[#allocation25_spill] sm:$0xff] %v9114_v13  ;;  %6016 = vmatpush1.bf16.msra.mxu1 %v6015_v60  ;;  %v2991_v21 = vsub.f32 %v10581_v50, %v9045_v48  ;;  %v3153_v57 = vsub.f32 %v10590_v25, %v3121_v27  ;;  %v3244_v9 = vmul.f32 %v3212_v6, %v3052_v42  ;;  %v953_v60 = vpop.permute.xlu1 %952 }
 0x315   :  { %5970 = vmatpush1.bf16.msra.mxu0 %v5969_v26  ;;  %6017 = vmatprep.subr.bf16.mxu1 %v10354_v63  ;;  %v3054_v11 = vmul.f32 %v9042_v54, %v9042_v54  ;;  %v3245_v43 = vmul.f32 %v3213_v15, %v3053_v18  ;;  %v3022_v17 = vmul.f32 %v2990_v46, %v9042_v54  ;;  %v959_v15 = vpop.permute.xlu0 %958 }
 0x316   :  { %5971 = vmatprep.subr.bf16.mxu0 %v10354_v63  ;;  %v3023_v37 = vmul.f32 %v2991_v21, %v9078_v22  ;;  %v3150_v36 = vsub.f32 %v10591_v2, %v9035_v29  ;;  %v2992_v48 = vsub.f32 %v10583_v23, %v9081_v8  ;;  %v3216_v50 = vadd.f32 %v3184_v61, %v3152_v45 }
 0x317   :  { %v3055_v27 = vmul.f32 %v9078_v22, %v9078_v22  ;;  %v3151_v5 = vsub.f32 %v10592_v0, %v3119_v3  ;;  %v6231_v31 = vpop.eup %6230  ;;  %v3185_v28 = vmul.f32 %v2961_v19, %v9004_v35  ;;  %v6018_v24 = vpack.c.bf16 %v3245_v43, %v3244_v9 }
 0x318   :  { %v5972_v42 = vpack.c.bf16 %v3023_v37, %v3022_v17  ;;  %v3214_v14 = vadd.f32 %v9039_v10, %v3150_v36  ;;  %v2993_v59 = vsub.f32 %v10584_v52, %v2961_v19  ;;  %v9142_v29 = vmul.f32 %v6231_v31, %v9018_v33 }
 0x319   :  { %v3215_v49 = vadd.f32 %v3183_v7, %v3151_v5  ;;  %v3056_v8 = vmul.f32 %v9114_v13, %v9114_v13  ;;  %v3217_v23 = vadd.f32 %v3185_v28, %v3153_v57  ;;  %6019 = vmatpush1.bf16.msra.mxu1 %v6018_v24  ;;  %v3024_v61 = vmul.f32 %v2992_v48, %v9114_v13  ;;  %v965_v21 = vpop.permute.xlu0 %964 }
 0x31a   :  { %10593 = vst [vmem:[#allocation73_spill] sm:$0xff] %v9142_v29  ;;  %5973 = vmatpush1.bf16.msra.mxu0 %v5972_v42  ;;  %v3246_v3 = vmul.f32 %v3214_v14, %v3054_v11  ;;  %6020 = vmatprep.subr.bf16.mxu1 %v10354_v63  ;;  %v3025_v10 = vmul.f32 %v2993_v59, %v9142_v29 }
 0x31b   :  { %v3247_v18 = vmul.f32 %v3215_v49, %v3055_v27  ;;  %5974 = vmatprep.subr.bf16.mxu0 %v10354_v63  ;;  %v3057_v33 = vmul.f32 %v9142_v29, %v9142_v29  ;;  %v10594_v7 = vrot.slane %v8379_v44, %v8358_v40  ;;  %vm1063_vm15 = vcmp.eq.s32.totalorder %v953_v60, %v8543_v20 }
 0x31c   :  { %v5975_v62 = vpack.c.bf16 %v3025_v10, %v3024_v61  ;;  %v3248_v58 = vmul.f32 %v3216_v50, %v3056_v8  ;;  %v5282_v19 = vsel %vm1063_vm15, 1.0, %v10585_v55  ;;  %v10596_v44 = vmov 1.0  }
 0x31d   :  { %v9156_v52 = vrot.slane %v10594_v7, %v8358_v40  ;;  %v6021_v56 = vpack.c.bf16 %v3247_v18, %v3246_v3  ;;  %v3249_v45 = vmul.f32 %v3217_v23, %v3057_v33  ;;  %v956_v40 = vpop.permute.xlu1 %955  ;;  %vm1067_vm7 = vcmp.eq.s32.totalorder %v959_v15, %v8543_v20  ;;  %v971_v11 = vpop.permute.xlu0 %970 }
 0x31e   :  { %5977 = vmatpush1.bf16.msk.msra.mxu0 %vm7115_vm4, %v5975_v62  ;;  %vm1065_vm3 = vcmp.eq.s32.totalorder %v956_v40, %v8543_v20  ;;  %v5286_v46 = vsel %vm1067_vm7, 1.0, %v10585_v55  ;;  %vm1071_vm10 = vcmp.eq.s32.totalorder %v965_v21, %v8543_v20  ;;  %vm1075_vm14 = vcmp.eq.s32.totalorder %v971_v11, %v8543_v20 }
 0x31f   :  { %6022 = vmatpush1.bf16.msra.mxu1 %v6021_v56  ;;  %v6024_v6 = vpack.c.bf16 %v3249_v45, %v3248_v58  ;;  %vm1060_vm2 = vcmp.eq.s32.totalorder %v9020_v16, %v9156_v52  ;;  %vm1062_vm5 = vcmp.eq.s32.totalorder %v953_v60, %v9156_v52  ;;  %vm1064_vm8 = vcmp.eq.s32.totalorder %v956_v40, %v9156_v52 }
 0x320   :  { %6023 = vmatprep.subr.bf16.mxu1 %v10354_v63  ;;  %v5284_v63 = vsel %vm1065_vm3, 1.0, %v10585_v55  ;;  %vm1066_vm9 = vcmp.eq.s32.totalorder %v959_v15, %v9156_v52  ;;  %v5290_v9 = vsel %vm1071_vm10, 1.0, %v10585_v55  ;;  %vm1070_vm13 = vcmp.eq.s32.totalorder %v965_v21, %v9156_v52 }
 0x321   :  { %5605 = vmatmul.mubr.msk.f32.vlgmr.msra.gmra.mrb[128].mxu0 %vm1060_vm2, %v10596_v44  ;;  %v962_v16 = vpop.permute.xlu1 %961  ;;  %v5294_v37 = vsel %vm1075_vm14, 1.0, %v10585_v55  ;;  %vm1074_vm3 = vcmp.eq.s32.totalorder %v971_v11, %v9156_v52  ;;  %v977_v2 = vpop.permute.xlu0 %976 }
 0x322   :  { %5606 = vmatprep.mubr.msk.f32.mxu0 %vm1252_vm6, %v5282_v19  ;;  %vm1068_vm11 = vcmp.eq.s32.totalorder %v962_v16, %v9156_v52 }
 0x323   :  { %6026 = vmatpush1.bf16.msk.msra.mxu1 %vm7115_vm4, %v6024_v6  ;;  %vm1069_vm4 = vcmp.eq.s32.totalorder %v962_v16, %v8543_v20 }
 0x324   :  { %v5288_v25 = vsel %vm1069_vm4, 1.0, %v10585_v55  ;;  %vm1078_vm4 = vcmp.eq.s32.totalorder %v977_v2, %v9156_v52 }
 0x325   :  { %5607 = vmatmul.mubr.msk.f32.gmra.mrb[130].mxu0 %vm1062_vm5, %v10596_v44  ;;  %v968_v57 = vpop.permute.xlu1 %967  ;;  %v983_v27 = vpop.permute.xlu0 %982 }
 0x326   :  { %5670 = vmatmul.mubr.msk.f32.vlgmr.msra.gmra.mrb[128].mxu1 %vm1060_vm2, %v10596_v44  ;;  %5608 = vmatprep.mubr.msk.f32.mxu0 %vm1252_vm6, %v5284_v63  ;;  %vm1073_vm12 = vcmp.eq.s32.totalorder %v968_v57, %v8543_v20  ;;  %vm1072_vm15 = vcmp.eq.s32.totalorder %v968_v57, %v9156_v52 }
 0x327   :  { %5671 = vmatprep.mubr.msk.f32.mxu1 %vm1252_vm6, %v5282_v19  ;;  %v5292_v43 = vsel %vm1073_vm12, 1.0, %v10585_v55  ;;  %vm1082_vm12 = vcmp.eq.s32.totalorder %v983_v27, %v9156_v52 }
 0x329   :  { %5609 = vmatmul.mubr.msk.f32.gmra.mrb[132].mxu0 %vm1064_vm8, %v10596_v44  ;;  %v974_v17 = vpop.permute.xlu1 %973  ;;  %v989_v28 = vpop.permute.xlu0 %988 }
 0x32a   :  { %5672 = vmatmul.mubr.msk.f32.gmra.mrb[130].mxu1 %vm1062_vm5, %v10596_v44  ;;  %5610 = vmatprep.mubr.msk.f32.mxu0 %vm1252_vm6, %v5286_v46  ;;  %vm1077_vm2 = vcmp.eq.s32.totalorder %v974_v17, %v8543_v20  ;;  %vm1079_vm5 = vcmp.eq.s32.totalorder %v977_v2, %v8543_v20  ;;  %vm1076_vm7 = vcmp.eq.s32.totalorder %v974_v17, %v9156_v52 }
 0x32b   :  { %5673 = vmatprep.mubr.msk.f32.mxu1 %vm1252_vm6, %v5284_v63  ;;  %v5296_v36 = vsel %vm1077_vm2, 1.0, %v10585_v55  ;;  %v5298_v50 = vsel %vm1079_vm5, 1.0, %v10585_v55  ;;  %vm1086_vm2 = vcmp.eq.s32.totalorder %v989_v28, %v9156_v52 }
 0x32d   :  { %5611 = vmatmul.mubr.msk.f32.gmra.mrb[134].mxu0 %vm1066_vm9, %v10596_v44  ;;  %v980_v48 = vpop.permute.xlu1 %979  ;;  %v995_v59 = vpop.permute.xlu0 %994 }
 0x32e   :  { %5674 = vmatmul.mubr.msk.f32.gmra.mrb[132].mxu1 %vm1064_vm8, %v10596_v44  ;;  %5612 = vmatprep.mubr.msk.f32.mxu0 %vm1252_vm6, %v5288_v25  ;;  %vm1081_vm8 = vcmp.eq.s32.totalorder %v980_v48, %v8543_v20  ;;  %vm1080_vm10 = vcmp.eq.s32.totalorder %v980_v48, %v9156_v52 }
 0x32f   :  { %5675 = vmatprep.mubr.msk.f32.mxu1 %vm1252_vm6, %v5286_v46  ;;  %v5300_v0 = vsel %vm1081_vm8, 1.0, %v10585_v55  ;;  %vm1090_vm8 = vcmp.eq.s32.totalorder %v995_v59, %v9156_v52 }
 0x331   :  { %5613 = vmatmul.mubr.msk.f32.gmra.mrb[136].mxu0 %vm1068_vm11, %v10596_v44  ;;  %v986_v5 = vpop.permute.xlu1 %985  ;;  %v1001_v3 = vpop.permute.xlu0 %1000 }
 0x332   :  { %5676 = vmatmul.mubr.msk.f32.gmra.mrb[134].mxu1 %vm1066_vm9, %v10596_v44  ;;  %5614 = vmatprep.mubr.msk.f32.mxu0 %vm1252_vm6, %v5290_v9  ;;  %vm1083_vm9 = vcmp.eq.s32.totalorder %v983_v27, %v8543_v20  ;;  %vm1084_vm14 = vcmp.eq.s32.totalorder %v986_v5, %v9156_v52 }
 0x333   :  { %5677 = vmatprep.mubr.msk.f32.mxu1 %vm1252_vm6, %v5288_v25  ;;  %v5302_v31 = vsel %vm1083_vm9, 1.0, %v10585_v55 }
 0x335   :  { %5615 = vmatmul.mubr.msk.f32.gmra.mrb[138].mxu0 %vm1070_vm13, %v10596_v44  ;;  %v992_v42 = vpop.permute.xlu1 %991  ;;  %v1007_v10 = vpop.permute.xlu0 %1006 }
 0x336   :  { %5678 = vmatmul.mubr.msk.f32.gmra.mrb[136].mxu1 %vm1068_vm11, %v10596_v44  ;;  %5616 = vmatprep.mubr.msk.f32.mxu0 %vm1252_vm6, %v5292_v43  ;;  %vm1085_vm11 = vcmp.eq.s32.totalorder %v986_v5, %v8543_v20  ;;  %vm1088_vm5 = vcmp.eq.s32.totalorder %v992_v42, %v9156_v52 }
 0x337   :  { %5679 = vmatprep.mubr.msk.f32.mxu1 %vm1252_vm6, %v5290_v9  ;;  %v5304_v24 = vsel %vm1085_vm11, 1.0, %v10585_v55  ;;  %vm1094_vm11 = vcmp.eq.s32.totalorder %v1001_v3, %v9156_v52 }
 0x339   :  { %5617 = vmatmul.mubr.msk.f32.gmra.mrb[140].mxu0 %vm1072_vm15, %v10596_v44  ;;  %v998_v8 = vpop.permute.xlu1 %997  ;;  %v1013_v62 = vpop.permute.xlu0 %1012 }
 0x33a   :  { %5680 = vmatmul.mubr.msk.f32.gmra.mrb[138].mxu1 %vm1070_vm13, %v10596_v44  ;;  %5618 = vmatprep.mubr.msk.f32.mxu0 %vm1252_vm6, %v5294_v37  ;;  %vm1087_vm13 = vcmp.eq.s32.totalorder %v989_v28, %v8543_v20  ;;  %vm1092_vm9 = vcmp.eq.s32.totalorder %v998_v8, %v9156_v52 }
 0x33b   :  { %5681 = vmatprep.mubr.msk.f32.mxu1 %vm1252_vm6, %v5292_v43  ;;  %v5306_v14 = vsel %vm1087_vm13, 1.0, %v10585_v55 }
 0x33d   :  { %5619 = vmatmul.mubr.msk.f32.gmra.mrb[142].mxu0 %vm1074_vm3, %v10596_v44  ;;  %v1004_v60 = vpop.permute.xlu1 %1003  ;;  %v1019_v6 = vpop.permute.xlu0 %1018 }
 0x33e   :  { %5682 = vmatmul.mubr.msk.f32.gmra.mrb[140].mxu1 %vm1072_vm15, %v10596_v44  ;;  %5620 = vmatprep.mubr.msk.f32.mxu0 %vm1252_vm6, %v5296_v36  ;;  %vm1089_vm15 = vcmp.eq.s32.totalorder %v992_v42, %v8543_v20  ;;  %vm1096_vm13 = vcmp.eq.s32.totalorder %v1004_v60, %v9156_v52 }
 0x33f   :  { %5683 = vmatprep.mubr.msk.f32.mxu1 %vm1252_vm6, %v5294_v37  ;;  %v5308_v49 = vsel %vm1089_vm15, 1.0, %v10585_v55  ;;  %vm1098_vm15 = vcmp.eq.s32.totalorder %v1007_v10, %v9156_v52 }
 0x341   :  { %5621 = vmatmul.mubr.msk.f32.gmra.mrb[144].mxu0 %vm1076_vm7, %v10596_v44  ;;  %v1010_v7 = vpop.permute.xlu1 %1009  ;;  %v1025_v63 = vpop.permute.xlu0 %1024 }
 0x342   :  { %5684 = vmatmul.mubr.msk.f32.gmra.mrb[142].mxu1 %vm1074_vm3, %v10596_v44  ;;  %5622 = vmatprep.mubr.msk.f32.mxu0 %vm1252_vm6, %v5298_v50  ;;  %vm1091_vm3 = vcmp.eq.s32.totalorder %v995_v59, %v8543_v20 }
 0x343   :  { %5685 = vmatprep.mubr.msk.f32.mxu1 %vm1252_vm6, %v5296_v36  ;;  %v5310_v23 = vsel %vm1091_vm3, 1.0, %v10585_v55  ;;  %vm1100_vm3 = vcmp.eq.s32.totalorder %v1010_v7, %v9156_v52 }
 0x345   :  { %5623 = vmatmul.mubr.msk.f32.gmra.mrb[146].mxu0 %vm1078_vm4, %v10596_v44  ;;  %v1016_v45 = vpop.permute.xlu1 %1015  ;;  %v1031_v25 = vpop.permute.xlu0 %1030 }
 0x346   :  { %5686 = vmatmul.mubr.msk.f32.gmra.mrb[144].mxu1 %vm1076_vm7, %v10596_v44  ;;  %5624 = vmatprep.mubr.msk.f32.mxu0 %vm1252_vm6, %v5300_v0  ;;  %vm1093_vm7 = vcmp.eq.s32.totalorder %v998_v8, %v8543_v20  ;;  %v10599_v8 = vld [vmem:[#allocation95_spill] sm:$0xff] }
 0x347   :  { %5687 = vmatprep.mubr.msk.f32.mxu1 %vm1252_vm6, %v5298_v50  ;;  %v5312_v61 = vsel %vm1093_vm7, 1.0, %v10585_v55  ;;  %vm1102_vm7 = vcmp.eq.s32.totalorder %v1013_v62, %v9156_v52 }
 0x349   :  { %5625 = vmatmul.mubr.msk.f32.gmra.mrb[148].mxu0 %vm1080_vm10, %v10596_v44  ;;  %v1022_v40 = vpop.permute.xlu1 %1021  ;;  %v1037_v43 = vpop.permute.xlu0 %1036 }
 0x34a   :  { %5688 = vmatmul.mubr.msk.f32.gmra.mrb[146].mxu1 %vm1078_vm4, %v10596_v44  ;;  %5626 = vmatprep.mubr.msk.f32.mxu0 %vm1252_vm6, %v5302_v31  ;;  %vm1095_vm4 = vcmp.eq.s32.totalorder %v1001_v3, %v8543_v20 }
 0x34b   :  { %5689 = vmatprep.mubr.msk.f32.mxu1 %vm1252_vm6, %v5300_v0  ;;  %v5314_v18 = vsel %vm1095_vm4, 1.0, %v10585_v55  ;;  %vm1104_vm4 = vcmp.eq.s32.totalorder %v1016_v45, %v9156_v52  ;;  %v10597_v0 = vld [vmem:[#allocation68_spill] sm:$0xff] }
 0x34c   :  { %v4347_v5 = vmul.f32 %v8395_v32, %v10597_v0 }
 0x34d   :  { %5627 = vmatmul.mubr.msk.f32.gmra.mrb[150].mxu0 %vm1082_vm12, %v10596_v44  ;;  %v1028_v46 = vpop.permute.xlu1 %1027  ;;  %v1043_v36 = vpop.permute.xlu0 %1042 }
 0x34e   :  { %5690 = vmatmul.mubr.msk.f32.gmra.mrb[148].mxu1 %vm1080_vm10, %v10596_v44  ;;  %5628 = vmatprep.mubr.msk.f32.mxu0 %vm1252_vm6, %v5304_v24  ;;  %vm1097_vm10 = vcmp.eq.s32.totalorder %v1004_v60, %v8543_v20 }
 0x34f   :  { %5691 = vmatprep.mubr.msk.f32.mxu1 %vm1252_vm6, %v5302_v31  ;;  %v5316_v33 = vsel %vm1097_vm10, 1.0, %v10585_v55  ;;  %vm1106_vm10 = vcmp.eq.s32.totalorder %v1019_v6, %v9156_v52 }
 0x351   :  { %5629 = vmatmul.mubr.msk.f32.gmra.mrb[152].mxu0 %vm1084_vm14, %v10596_v44  ;;  %v1034_v9 = vpop.permute.xlu1 %1033 }
 0x352   :  { %5692 = vmatmul.mubr.msk.f32.gmra.mrb[150].mxu1 %vm1082_vm12, %v10596_v44  ;;  %5630 = vmatprep.mubr.msk.f32.mxu0 %vm1252_vm6, %v5306_v14  ;;  %vm1099_vm12 = vcmp.eq.s32.totalorder %v1007_v10, %v8543_v20 }
 0x353   :  { %5693 = vmatprep.mubr.msk.f32.mxu1 %vm1252_vm6, %v5304_v24  ;;  %v5318_v56 = vsel %vm1099_vm12, 1.0, %v10585_v55  ;;  %vm1108_vm12 = vcmp.eq.s32.totalorder %v1022_v40, %v9156_v52 }
 0x355   :  { %5631 = vmatmul.mubr.msk.f32.gmra.mrb[154].mxu0 %vm1086_vm2, %v10596_v44  ;;  %v1040_v37 = vpop.permute.xlu1 %1039 }
 0x356   :  { %5694 = vmatmul.mubr.msk.f32.gmra.mrb[152].mxu1 %vm1084_vm14, %v10596_v44  ;;  %5632 = vmatprep.mubr.msk.f32.mxu0 %vm1252_vm6, %v5308_v49  ;;  %vm1101_vm14 = vcmp.eq.s32.totalorder %v1010_v7, %v8543_v20 }
 0x357   :  { %5695 = vmatprep.mubr.msk.f32.mxu1 %vm1252_vm6, %v5306_v14  ;;  %v5320_v58 = vsel %vm1101_vm14, 1.0, %v10585_v55  ;;  %vm1110_vm14 = vcmp.eq.s32.totalorder %v1025_v63, %v9156_v52 }
 0x359   :  { %5633 = vmatmul.mubr.msk.f32.gmra.mrb[156].mxu0 %vm1088_vm5, %v10596_v44 }
 0x35a   :  { %5696 = vmatmul.mubr.msk.f32.gmra.mrb[154].mxu1 %vm1086_vm2, %v10596_v44  ;;  %5634 = vmatprep.mubr.msk.f32.mxu0 %vm1252_vm6, %v5310_v23  ;;  %vm1103_vm2 = vcmp.eq.s32.totalorder %v1013_v62, %v8543_v20 }
 0x35b   :  { %5697 = vmatprep.mubr.msk.f32.mxu1 %vm1252_vm6, %v5308_v49  ;;  %v5322_v26 = vsel %vm1103_vm2, 1.0, %v10585_v55  ;;  %vm1112_vm2 = vcmp.eq.s32.totalorder %v1028_v46, %v9156_v52  ;;  %v10598_v49 = vld [vmem:[#allocation77_spill] sm:$0xff] }
 0x35d   :  { %5635 = vmatmul.mubr.msk.f32.gmra.mrb[158].mxu0 %vm1090_vm8, %v10596_v44 }
 0x35e   :  { %5698 = vmatmul.mubr.msk.f32.gmra.mrb[156].mxu1 %vm1088_vm5, %v10596_v44  ;;  %5636 = vmatprep.mubr.msk.f32.mxu0 %vm1252_vm6, %v5312_v61  ;;  %vm1105_vm5 = vcmp.eq.s32.totalorder %v1016_v45, %v8543_v20 }
 0x35f   :  { %5699 = vmatprep.mubr.msk.f32.mxu1 %vm1252_vm6, %v5310_v23  ;;  %v5324_v19 = vsel %vm1105_vm5, 1.0, %v10585_v55  ;;  %vm1114_vm5 = vcmp.eq.s32.totalorder %v1031_v25, %v9156_v52  ;;  %v4348_v23 = vmul.f32 %v10599_v8, %v10598_v49 }
 0x361   :  { %5637 = vmatmul.mubr.msk.f32.gmra.mrb[160].mxu0 %vm1092_vm9, %v10596_v44 }
 0x362   :  { %5700 = vmatmul.mubr.msk.f32.gmra.mrb[158].mxu1 %vm1090_vm8, %v10596_v44  ;;  %5638 = vmatprep.mubr.msk.f32.mxu0 %vm1252_vm6, %v5314_v18  ;;  %vm1107_vm8 = vcmp.eq.s32.totalorder %v1019_v6, %v8543_v20 }
 0x363   :  { %5701 = vmatprep.mubr.msk.f32.mxu1 %vm1252_vm6, %v5312_v61  ;;  %v5326_v15 = vsel %vm1107_vm8, 1.0, %v10585_v55  ;;  %vm1116_vm8 = vcmp.eq.s32.totalorder %v1034_v9, %v9156_v52 }
 0x365   :  { %5639 = vmatmul.mubr.msk.f32.gmra.mrb[162].mxu0 %vm1094_vm11, %v10596_v44 }
 0x366   :  { %5702 = vmatmul.mubr.msk.f32.gmra.mrb[160].mxu1 %vm1092_vm9, %v10596_v44  ;;  %5640 = vmatprep.mubr.msk.f32.mxu0 %vm1252_vm6, %v5316_v33  ;;  %vm1109_vm9 = vcmp.eq.s32.totalorder %v1022_v40, %v8543_v20 }
 0x367   :  { %5703 = vmatprep.mubr.msk.f32.mxu1 %vm1252_vm6, %v5314_v18  ;;  %v5328_v16 = vsel %vm1109_vm9, 1.0, %v10585_v55  ;;  %vm1118_vm9 = vcmp.eq.s32.totalorder %v1037_v43, %v9156_v52 }
 0x369   :  { %5641 = vmatmul.mubr.msk.f32.gmra.mrb[164].mxu0 %vm1096_vm13, %v10596_v44 }
 0x36a   :  { %5704 = vmatmul.mubr.msk.f32.gmra.mrb[162].mxu1 %vm1094_vm11, %v10596_v44  ;;  %5642 = vmatprep.mubr.msk.f32.mxu0 %vm1252_vm6, %v5318_v56  ;;  %vm1111_vm11 = vcmp.eq.s32.totalorder %v1025_v63, %v8543_v20 }
 0x36b   :  { %5705 = vmatprep.mubr.msk.f32.mxu1 %vm1252_vm6, %v5316_v33  ;;  %v5330_v21 = vsel %vm1111_vm11, 1.0, %v10585_v55  ;;  %vm1120_vm11 = vcmp.eq.s32.totalorder %v1040_v37, %v9156_v52 }
 0x36d   :  { %5643 = vmatmul.mubr.msk.f32.gmra.mrb[166].mxu0 %vm1098_vm15, %v10596_v44 }
 0x36e   :  { %5706 = vmatmul.mubr.msk.f32.gmra.mrb[164].mxu1 %vm1096_vm13, %v10596_v44  ;;  %5644 = vmatprep.mubr.msk.f32.mxu0 %vm1252_vm6, %v5320_v58  ;;  %vm1113_vm13 = vcmp.eq.s32.totalorder %v1028_v46, %v8543_v20 }
 0x36f   :  { %5707 = vmatprep.mubr.msk.f32.mxu1 %vm1252_vm6, %v5318_v56  ;;  %v5332_v57 = vsel %vm1113_vm13, 1.0, %v10585_v55 }
 0x371   :  { %5645 = vmatmul.mubr.msk.f32.gmra.mrb[168].mxu0 %vm1100_vm3, %v10596_v44 }
 0x372   :  { %5708 = vmatmul.mubr.msk.f32.gmra.mrb[166].mxu1 %vm1098_vm15, %v10596_v44  ;;  %5646 = vmatprep.mubr.msk.f32.mxu0 %vm1252_vm6, %v5322_v26  ;;  %vm1115_vm15 = vcmp.eq.s32.totalorder %v1031_v25, %v8543_v20 }
 0x373   :  { %5709 = vmatprep.mubr.msk.f32.mxu1 %vm1252_vm6, %v5320_v58  ;;  %v5334_v11 = vsel %vm1115_vm15, 1.0, %v10585_v55  ;;  %v10600_v58 = vld [vmem:[#allocation84_spill] sm:$0xff] }
 0x374   :  { %v4349_v45 = vmul.f32 %v8430_v4, %v10600_v58 }
 0x375   :  { %5647 = vmatmul.mubr.msk.f32.gmra.mrb[170].mxu0 %vm1102_vm7, %v10596_v44 }
 0x376   :  { %5710 = vmatmul.mubr.msk.f32.gmra.mrb[168].mxu1 %vm1100_vm3, %v10596_v44  ;;  %5648 = vmatprep.mubr.msk.f32.mxu0 %vm1252_vm6, %v5324_v19  ;;  %vm1117_vm3 = vcmp.eq.s32.totalorder %v1034_v9, %v8543_v20  ;;  %v10601_v9 = vld [vmem:[#allocation2_spill] sm:$0xff] }
 0x377   :  { %5711 = vmatprep.mubr.msk.f32.mxu1 %vm1252_vm6, %v5322_v26  ;;  %v5336_v17 = vsel %vm1117_vm3, 1.0, %v10585_v55 }
 0x379   :  { %5649 = vmatmul.mubr.msk.f32.gmra.mrb[172].mxu0 %vm1104_vm4, %v10596_v44 }
 0x37a   :  { %5712 = vmatmul.mubr.msk.f32.gmra.mrb[170].mxu1 %vm1102_vm7, %v10596_v44  ;;  %5650 = vmatprep.mubr.msk.f32.mxu0 %vm1252_vm6, %v5326_v15  ;;  %vm1119_vm7 = vcmp.eq.s32.totalorder %v1037_v43, %v8543_v20 }
 0x37b   :  { %5713 = vmatprep.mubr.msk.f32.mxu1 %vm1252_vm6, %v5324_v19  ;;  %v5338_v2 = vsel %vm1119_vm7, 1.0, %v10585_v55 }
 0x37d   :  { %5651 = vmatmul.mubr.msk.f32.gmra.mrb[174].mxu0 %vm1106_vm10, %v10596_v44 }
 0x37e   :  { %5714 = vmatmul.mubr.msk.f32.gmra.mrb[172].mxu1 %vm1104_vm4, %v10596_v44  ;;  %5652 = vmatprep.mubr.msk.f32.mxu0 %vm1252_vm6, %v5328_v16  ;;  %vm1121_vm4 = vcmp.eq.s32.totalorder %v1040_v37, %v8543_v20 }
 0x37f   :  { %5715 = vmatprep.mubr.msk.f32.mxu1 %vm1252_vm6, %v5326_v15  ;;  %v5340_v48 = vsel %vm1121_vm4, 1.0, %v10585_v55 }
 0x381   :  { %5653 = vmatmul.mubr.msk.f32.gmra.mrb[176].mxu0 %vm1108_vm12, %v10596_v44 }
 0x382   :  { %5716 = vmatmul.mubr.msk.f32.gmra.mrb[174].mxu1 %vm1106_vm10, %v10596_v44  ;;  %5654 = vmatprep.mubr.msk.f32.mxu0 %vm1252_vm6, %v5330_v21  ;;  %vm1123_vm10 = vcmp.eq.s32.totalorder %v1043_v36, %v8543_v20 }
 0x383   :  { %5717 = vmatprep.mubr.msk.f32.mxu1 %vm1252_vm6, %v5328_v16  ;;  %v5342_v50 = vsel %vm1123_vm10, 1.0, %v10585_v55 }
 0x385   :  { %5655 = vmatmul.mubr.msk.f32.gmra.mrb[178].mxu0 %vm1110_vm14, %v10596_v44 }
 0x386   :  { %5718 = vmatmul.mubr.msk.f32.gmra.mrb[176].mxu1 %vm1108_vm12, %v10596_v44  ;;  %5656 = vmatprep.mubr.msk.f32.mxu0 %vm1252_vm6, %v5332_v57  ;;  %vm1122_vm12 = vcmp.eq.s32.totalorder %v1043_v36, %v9156_v52 }
 0x387   :  { %5719 = vmatprep.mubr.msk.f32.mxu1 %vm1252_vm6, %v5330_v21 }
 0x389   :  { %5657 = vmatmul.mubr.msk.f32.gmra.mrb[180].mxu0 %vm1112_vm2, %v10596_v44 }
 0x38a   :  { %5720 = vmatmul.mubr.msk.f32.gmra.mrb[178].mxu1 %vm1110_vm14, %v10596_v44  ;;  %5658 = vmatprep.mubr.msk.f32.mxu0 %vm1252_vm6, %v5334_v11 }
 0x38b   :  { %5721 = vmatprep.mubr.msk.f32.mxu1 %vm1252_vm6, %v5332_v57 }
 0x38d   :  { %5659 = vmatmul.mubr.msk.f32.gmra.mrb[182].mxu0 %vm1114_vm5, %v10596_v44 }
 0x38e   :  { %5722 = vmatmul.mubr.msk.f32.gmra.mrb[180].mxu1 %vm1112_vm2, %v10596_v44  ;;  %5660 = vmatprep.mubr.msk.f32.mxu0 %vm1252_vm6, %v5336_v17 }
 0x38f   :  { %5723 = vmatprep.mubr.msk.f32.mxu1 %vm1252_vm6, %v5334_v11  ;;  %v4350_v11 = vmul.f32 %v10601_v9, %v8340_v38 }
 0x391   :  { %5661 = vmatmul.mubr.msk.f32.gmra.mrb[184].mxu0 %vm1116_vm8, %v10596_v44 }
 0x392   :  { %5724 = vmatmul.mubr.msk.f32.gmra.mrb[182].mxu1 %vm1114_vm5, %v10596_v44  ;;  %5662 = vmatprep.mubr.msk.f32.mxu0 %vm1252_vm6, %v5338_v2 }
 0x393   :  { %5725 = vmatprep.mubr.msk.f32.mxu1 %vm1252_vm6, %v5336_v17 }
 0x395   :  { %5663 = vmatmul.mubr.msk.f32.gmra.mrb[186].mxu0 %vm1118_vm9, %v10596_v44 }
 0x396   :  { %5726 = vmatmul.mubr.msk.f32.gmra.mrb[184].mxu1 %vm1116_vm8, %v10596_v44  ;;  %5664 = vmatprep.mubr.msk.f32.mxu0 %vm1252_vm6, %v5340_v48 }
 0x397   :  { %5727 = vmatprep.mubr.msk.f32.mxu1 %vm1252_vm6, %v5338_v2 }
 0x399   :  { %5665 = vmatmul.mubr.msk.f32.gmra.mrb[188].mxu0 %vm1120_vm11, %v10596_v44 }
 0x39a   :  { %5728 = vmatmul.mubr.msk.f32.gmra.mrb[186].mxu1 %vm1118_vm9, %v10596_v44  ;;  %5666 = vmatprep.mubr.msk.f32.mxu0 %vm1252_vm6, %v5342_v50 }
 0x39b   :  { %5729 = vmatprep.mubr.msk.f32.mxu1 %vm1252_vm6, %v5340_v48 }
 0x39d   :  { %5667 = vmatmul.mubr.msk.f32.gmra.mrb[190].mxu0 %vm1122_vm12, %v10596_v44 }
 0x39e   :  { %5730 = vmatmul.mubr.msk.f32.gmra.mrb[188].mxu1 %vm1120_vm11, %v10596_v44 }
 0x39f   :  { %5731 = vmatprep.mubr.msk.f32.mxu1 %vm1252_vm6, %v5342_v50 }
 0x3a2   :  { %5732 = vmatmul.mubr.msk.f32.gmra.mrb[190].mxu1 %vm1122_vm12, %v10596_v44 }
 0x3f4   :  { %v3415_v20 = vpop.f32.mrb[128].mxu0 }
 0x3f5   :  { %v3575_v27 = vmul.f32 0.03125, %v3415_v20  ;;  %v3417_v55 = vpop.f32.mrb[129].mxu0 }
 0x3f6   :  { %v10602_v55 = vld [vmem:[#allocation89_spill] sm:$0xff] }
 0x3f7   :  { %v3867_v31 = vmul.f32 %v3575_v27, %v3575_v27  ;;  %v4379_v28 = vadd.f32 %v4347_v5, %v3575_v27 }
 0x3f8   :  { %v3420_v42 = vpop.f32.mrb[130].mxu0 }
 0x3f9   :  { %v3676_v24 = vpop.f32.mrb[128].mxu1  ;;  %v3576_v59 = vmul.f32 0.03125, %v3420_v42  ;;  %4443 = vrot.lane.b32.xlu1 %v4379_v28, %s6400_s11  ;;  %v3422_v44 = vpop.f32.mrb[131].mxu0 }
 0x3fa   :  { %v3835_v14 = vmul.f32 0.03125, %v3676_v24  ;;  %v3678_v52 = vpop.f32.mrb[129].mxu1 }
 0x3fb   :  { %v3868_v61 = vmul.f32 %v3576_v59, %v3576_v59  ;;  %v4380_v60 = vadd.f32 %v4348_v23, %v3576_v59 }
 0x3fc   :  { %v3899_v3 = vsub.f32 %v3835_v14, %v3867_v31  ;;  %v3425_v10 = vpop.f32.mrb[132].mxu0  ;;  %v10603_v31 = vld [vmem:[#allocation99_spill] sm:$0xff] }
 0x3fd   :  { %v3681_v18 = vpop.f32.mrb[130].mxu1  ;;  %v3577_v62 = vmul.f32 0.03125, %v3425_v10  ;;  %4445 = vrot.lane.b32.xlu0 %v4380_v60, %s6400_s11  ;;  %v3427_v26 = vpop.f32.mrb[133].mxu0  ;;  %v4351_v28 = vmul.f32 %v10603_v31, %v10602_v55  ;;  %v10604_v60 = vld [vmem:[#allocation91_spill] sm:$0xff] }
 0x3fe   :  { %v3931_v33 = vmax.f32 %v3899_v3, 0.0  ;;  %v3836_v7 = vmul.f32 0.03125, %v3681_v18  ;;  %v3683_v56 = vpop.f32.mrb[131].mxu1  ;;  %v10605_v18 = vld [vmem:[#allocation4_spill] sm:$0xff] }
 0x3ff   :  { %v3869_v40 = vmul.f32 %v3577_v62, %v3577_v62  ;;  %v4381_v15 = vadd.f32 %v4349_v45, %v3577_v62  ;;  %v4352_v10 = vmul.f32 %v10605_v18, %v10604_v60  ;;  %v10610_v60 = vld [vmem:[#allocation97_spill] sm:$0xff] }
 0x400   :  { %v3963_v6 = vadd.f32 1e-05, %v3931_v33  ;;  %v3900_v19 = vsub.f32 %v3836_v7, %v3868_v61  ;;  %v3430_v16 = vpop.f32.mrb[134].mxu0 }
 0x401   :  { %v3686_v63 = vpop.f32.mrb[132].mxu1  ;;  %v3578_v57 = vmul.f32 0.03125, %v3430_v16  ;;  %4447 = vrot.lane.b32.xlu1 %v4381_v15, %s6400_s11  ;;  %v3432_v43 = vpop.f32.mrb[135].mxu0  ;;  %v10606_v16 = vld [vmem:[#allocation94_spill] sm:$0xff] }
 0x402   :  { %v3932_v46 = vmax.f32 %v3900_v19, 0.0  ;;  %v3837_v21 = vmul.f32 0.03125, %v3686_v63  ;;  %v3688_v25 = vpop.f32.mrb[133].mxu1  ;;  %6232 = vrsqrt.f32 %v3963_v6 }
 0x403   :  { %v3870_v2 = vmul.f32 %v3578_v57, %v3578_v57  ;;  %v4382_v36 = vadd.f32 %v4350_v11, %v3578_v57 }
 0x404   :  { %v3964_v17 = vadd.f32 1e-05, %v3932_v46  ;;  %v3901_v37 = vsub.f32 %v3837_v21, %v3869_v40  ;;  %v3435_v50 = vpop.f32.mrb[136].mxu0  ;;  %v10607_v46 = vld [vmem:[#allocation5_spill] sm:$0xff] }
 0x405   :  { %v3691_v48 = vpop.f32.mrb[134].mxu1  ;;  %v3579_v5 = vmul.f32 0.03125, %v3435_v50  ;;  %4449 = vrot.lane.b32.xlu0 %v4382_v36, %s6400_s11  ;;  %v3437_v38 = vpop.f32.mrb[137].mxu0  ;;  %v4353_v21 = vmul.f32 %v10607_v46, %v10606_v16 }
 0x406   :  { %v3933_v20 = vmax.f32 %v3901_v37, 0.0  ;;  %v3838_v27 = vmul.f32 0.03125, %v3691_v48  ;;  %v3693_v0 = vpop.f32.mrb[135].mxu1  ;;  %6234 = vrsqrt.f32 %v3964_v17 }
 0x407   :  { %v3871_v14 = vmul.f32 %v3579_v5, %v3579_v5  ;;  %v4383_v52 = vadd.f32 %v4351_v28, %v3579_v5  ;;  %v10608_v0 = vld [vmem:[#allocation96_spill] sm:$0xff]  ;;  %v10609_v5 = vld [vmem:[#allocation6_spill] sm:$0xff] }
 0x408   :  { %v3965_v24 = vadd.f32 1e-05, %v3933_v20  ;;  %v3902_v42 = vsub.f32 %v3838_v27, %v3870_v2  ;;  %v3440_v49 = vpop.f32.mrb[138].mxu0  ;;  %v4354_v55 = vmul.f32 %v10609_v5, %v10608_v0 }
 0x409   :  { %v3696_v59 = vpop.f32.mrb[136].mxu1  ;;  %v3580_v61 = vmul.f32 0.03125, %v3440_v49  ;;  %4451 = vrot.lane.b32.xlu1 %v4383_v52, %s6400_s11  ;;  %v3442_v33 = vpop.f32.mrb[139].mxu0 }
 0x40a   :  { %v3934_v23 = vmax.f32 %v3902_v42, 0.0  ;;  %v3839_v44 = vmul.f32 0.03125, %v3696_v59  ;;  %v3698_v3 = vpop.f32.mrb[137].mxu1  ;;  %6236 = vrsqrt.f32 %v3965_v24 }
 0x40b   :  { %v3872_v62 = vmul.f32 %v3580_v61, %v3580_v61  ;;  %v4384_v58 = vadd.f32 %v4352_v10, %v3580_v61  ;;  %v10611_v10 = vld [vmem:[#allocation7_spill] sm:$0xff] }
 0x40c   :  { %v3966_v7 = vadd.f32 1e-05, %v3934_v23  ;;  %v3903_v56 = vsub.f32 %v3839_v44, %v3871_v14  ;;  %v6233_v45 = vpop.eup %6232  ;;  %v3445_v6 = vpop.f32.mrb[140].mxu0  ;;  %v4355_v33 = vmul.f32 %v10611_v10, %v10610_v60 }
 0x40d   :  { %v3701_v26 = vpop.f32.mrb[138].mxu1  ;;  %v3581_v63 = vmul.f32 0.03125, %v3445_v6  ;;  %4059 = vrot.lane.b32.xlu1 %v6233_v45, %s6400_s11  ;;  %4453 = vrot.lane.b32.xlu0 %v4384_v58, %s6400_s11  ;;  %v3447_v25 = vpop.f32.mrb[141].mxu0 }
 0x40e   :  { %v3935_v19 = vmax.f32 %v3903_v56, 0.0  ;;  %v3840_v40 = vmul.f32 0.03125, %v3701_v26  ;;  %v3703_v15 = vpop.f32.mrb[139].mxu1  ;;  %6238 = vrsqrt.f32 %v3966_v7  ;;  %v10613_v25 = vld [vmem:[#allocation8_spill] sm:$0xff] }
 0x40f   :  { %v3873_v43 = vmul.f32 %v3581_v63, %v3581_v63  ;;  %v4385_v17 = vadd.f32 %v4353_v21, %v3581_v63  ;;  %v10612_v21 = vld [vmem:[#allocation98_spill] sm:$0xff] }
 0x410   :  { %v3967_v57 = vadd.f32 1e-05, %v3935_v19  ;;  %v3904_v11 = vsub.f32 %v3840_v40, %v3872_v62  ;;  %v6235_v37 = vpop.eup %6234  ;;  %v3450_v36 = vpop.f32.mrb[142].mxu0 }
 0x411   :  { %v3706_v2 = vpop.f32.mrb[140].mxu1  ;;  %v3582_v27 = vmul.f32 0.03125, %v3450_v36  ;;  %4061 = vrot.lane.b32.xlu0 %v6235_v37, %s6400_s11  ;;  %4455 = vrot.lane.b32.xlu1 %v4385_v17, %s6400_s11  ;;  %v3452_v28 = vpop.f32.mrb[143].mxu0 }
 0x412   :  { %v3936_v48 = vmax.f32 %v3904_v11, 0.0  ;;  %v3841_v50 = vmul.f32 0.03125, %v3706_v2  ;;  %v3708_v20 = vpop.f32.mrb[141].mxu1  ;;  %6240 = vrsqrt.f32 %v3967_v57  ;;  %v4356_v57 = vmul.f32 %v10613_v25, %v10612_v21  ;;  %v10614_v28 = vld [vmem:[#allocation3_spill] sm:$0xff] }
 0x413   :  { %v3874_v42 = vmul.f32 %v3582_v27, %v3582_v27  ;;  %v4386_v14 = vadd.f32 %v4354_v55, %v3582_v27 }
 0x414   :  { %v3968_v38 = vadd.f32 1e-05, %v3936_v48  ;;  %v3905_v24 = vsub.f32 %v3841_v50, %v3873_v43  ;;  %v6237_v52 = vpop.eup %6236  ;;  %v3455_v49 = vpop.f32.mrb[144].mxu0 }
 0x415   :  { %v3711_v59 = vpop.f32.mrb[142].mxu1  ;;  %v3583_v61 = vmul.f32 0.03125, %v3455_v49  ;;  %4063 = vrot.lane.b32.xlu1 %v6237_v52, %s6400_s11  ;;  %4457 = vrot.lane.b32.xlu0 %v4386_v14, %s6400_s11  ;;  %v3457_v7 = vpop.f32.mrb[145].mxu0 }
 0x416   :  { %v3937_v23 = vmax.f32 %v3905_v24, 0.0  ;;  %v3842_v44 = vmul.f32 0.03125, %v3711_v59  ;;  %v3713_v3 = vpop.f32.mrb[143].mxu1  ;;  %6242 = vrsqrt.f32 %v3968_v38  ;;  %v10615_v38 = vld [vmem:[#allocation9_spill] sm:$0xff] }
 0x417   :  { %v3875_v58 = vmul.f32 %v3583_v61, %v3583_v61  ;;  %v4387_v45 = vadd.f32 %v4355_v33, %v3583_v61  ;;  %v4357_v24 = vmul.f32 %v10615_v38, %v10614_v28 }
 0x418   :  { %v3969_v56 = vadd.f32 1e-05, %v3937_v23  ;;  %v3906_v62 = vsub.f32 %v3842_v44, %v3874_v42  ;;  %v6239_v26 = vpop.eup %6238  ;;  %v3460_v19 = vpop.f32.mrb[146].mxu0 }
 0x419   :  { %v3716_v6 = vpop.f32.mrb[144].mxu1  ;;  %v3584_v16 = vmul.f32 0.03125, %v3460_v19  ;;  %4065 = vrot.lane.b32.xlu0 %v6239_v26, %s6400_s11  ;;  %4459 = vrot.lane.b32.xlu1 %v4387_v45, %s6400_s11  ;;  %v3462_v11 = vpop.f32.mrb[147].mxu0 }
 0x41a   :  { %v3938_v40 = vmax.f32 %v3906_v62, 0.0  ;;  %v3843_v15 = vmul.f32 0.03125, %v3716_v6  ;;  %v3718_v63 = vpop.f32.mrb[145].mxu1  ;;  %6244 = vrsqrt.f32 %v3969_v56  ;;  %v10616_v56 = vld [vmem:[#allocation100_spill] sm:$0xff]  ;;  %v10617_v62 = vld [vmem:[#allocation61_spill] sm:$0xff] }
 0x41b   :  { %v3876_v37 = vmul.f32 %v3584_v16, %v3584_v16  ;;  %v4388_v2 = vadd.f32 %v4356_v57, %v3584_v16 }
 0x41c   :  { %v3970_v43 = vadd.f32 1e-05, %v3938_v40  ;;  %v3907_v17 = vsub.f32 %v3843_v15, %v3875_v58  ;;  %v6241_v36 = vpop.eup %6240  ;;  %v3465_v50 = vpop.f32.mrb[148].mxu0  ;;  %v4358_v58 = vmul.f32 %v10617_v62, %v10616_v56 }
 0x41d   :  { %v3721_v48 = vpop.f32.mrb[146].mxu1  ;;  %v3585_v55 = vmul.f32 0.03125, %v3465_v50  ;;  %4067 = vrot.lane.b32.xlu1 %v6241_v36, %s6400_s11  ;;  %4461 = vrot.lane.b32.xlu0 %v4388_v2, %s6400_s11  ;;  %v3467_v42 = vpop.f32.mrb[149].mxu0 }
 0x41e   :  { %v3939_v20 = vmax.f32 %v3907_v17, 0.0  ;;  %v3844_v27 = vmul.f32 0.03125, %v3721_v48  ;;  %v3723_v0 = vpop.f32.mrb[147].mxu1  ;;  %6246 = vrsqrt.f32 %v3970_v43  ;;  %v10618_v17 = vld [vmem:[#allocation101_spill] sm:$0xff] }
 0x41f   :  { %v3877_v59 = vmul.f32 %v3585_v55, %v3585_v55  ;;  %v4389_v49 = vadd.f32 %v4357_v24, %v3585_v55 }
 0x420   :  { %v3971_v14 = vadd.f32 1e-05, %v3939_v20  ;;  %v3908_v52 = vsub.f32 %v3844_v27, %v3876_v37  ;;  %v6243_v23 = vpop.eup %6242  ;;  %v3470_v3 = vpop.f32.mrb[150].mxu0  ;;  %v10619_v37 = vld [vmem:[#allocation62_spill] sm:$0xff] }
 0x421   :  { %v3726_v44 = vpop.f32.mrb[148].mxu1  ;;  %v3586_v7 = vmul.f32 0.03125, %v3470_v3  ;;  %4069 = vrot.lane.b32.xlu0 %v6243_v23, %s6400_s11  ;;  %4463 = vrot.lane.b32.xlu1 %v4389_v49, %s6400_s11  ;;  %v3472_v45 = vpop.f32.mrb[151].mxu0  ;;  %v4359_v2 = vmul.f32 %v10619_v37, %v10618_v17  ;;  %v10621_v49 = vld [vmem:[#allocation72_spill] sm:$0xff] }
 0x422   :  { %v3940_v61 = vmax.f32 %v3908_v52, 0.0  ;;  %v3845_v60 = vmul.f32 0.03125, %v3726_v44  ;;  %v3728_v33 = vpop.f32.mrb[149].mxu1  ;;  %6248 = vrsqrt.f32 %v3971_v14 }
 0x423   :  { %v3878_v19 = vmul.f32 %v3586_v7, %v3586_v7  ;;  %v4390_v40 = vadd.f32 %v4358_v58, %v3586_v7 }
 0x424   :  { %v3972_v26 = vadd.f32 1e-05, %v3940_v61  ;;  %v3909_v6 = vsub.f32 %v3845_v60, %v3877_v59  ;;  %v6245_v15 = vpop.eup %6244  ;;  %v3475_v16 = vpop.f32.mrb[152].mxu0  ;;  %v10620_v59 = vld [vmem:[#allocation102_spill] sm:$0xff] }
 0x425   :  { %v3731_v63 = vpop.f32.mrb[150].mxu1  ;;  %v3587_v43 = vmul.f32 0.03125, %v3475_v16  ;;  %4071 = vrot.lane.b32.xlu1 %v6245_v15, %s6400_s11  ;;  %4465 = vrot.lane.b32.xlu0 %v4390_v40, %s6400_s11  ;;  %v3477_v36 = vpop.f32.mrb[153].mxu0  ;;  %v4360_v23 = vmul.f32 %v10621_v49, %v10620_v59  ;;  %v4361_v40 = vmul.f32 %v8638_v1, %v8550_v47 }
 0x426   :  { %v3941_v21 = vmax.f32 %v3909_v6, 0.0  ;;  %v3846_v57 = vmul.f32 0.03125, %v3731_v63  ;;  %v3733_v11 = vpop.f32.mrb[151].mxu1  ;;  %6250 = vrsqrt.f32 %v3972_v26 }
 0x427   :  { %v3879_v20 = vmul.f32 %v3587_v43, %v3587_v43  ;;  %v4391_v27 = vadd.f32 %v4359_v2, %v3587_v43 }
 0x428   :  { %v3973_v48 = vadd.f32 1e-05, %v3941_v21  ;;  %v3910_v50 = vsub.f32 %v3846_v57, %v3878_v19  ;;  %v6247_v0 = vpop.eup %6246  ;;  %v3480_v28 = vpop.f32.mrb[154].mxu0 }
 0x429   :  { %v3736_v55 = vpop.f32.mrb[152].mxu1  ;;  %v3588_v52 = vmul.f32 0.03125, %v3480_v28  ;;  %4073 = vrot.lane.b32.xlu0 %v6247_v0, %s6400_s11  ;;  %4467 = vrot.lane.b32.xlu1 %v4391_v27, %s6400_s11  ;;  %v3482_v44 = vpop.f32.mrb[155].mxu0 }
 0x42a   :  { %v3942_v24 = vmax.f32 %v3910_v50, 0.0  ;;  %v3847_v42 = vmul.f32 0.03125, %v3736_v55  ;;  %v3738_v14 = vpop.f32.mrb[153].mxu1  ;;  %6252 = vrsqrt.f32 %v3973_v48 }
 0x42b   :  { %v3880_v60 = vmul.f32 %v3588_v52, %v3588_v52  ;;  %v4392_v33 = vadd.f32 %v4360_v23, %v3588_v52 }
 0x42c   :  { %v3974_v3 = vadd.f32 1e-05, %v3942_v24  ;;  %v3911_v61 = vsub.f32 %v3847_v42, %v3879_v20  ;;  %v6249_v7 = vpop.eup %6248  ;;  %v3485_v58 = vpop.f32.mrb[156].mxu0  ;;  %v10622_v20 = vld [vmem:[#allocation63_spill] sm:$0xff] }
 0x42d   :  { %v3741_v56 = vpop.f32.mrb[154].mxu1  ;;  %v3589_v19 = vmul.f32 0.03125, %v3485_v58  ;;  %4075 = vrot.lane.b32.xlu1 %v6249_v7, %s6400_s11  ;;  %4469 = vrot.lane.b32.xlu0 %v4392_v33, %s6400_s11  ;;  %v3487_v15 = vpop.f32.mrb[157].mxu0  ;;  %v4362_v47 = vmul.f32 %v10622_v20, %v8567_v30 }
 0x42e   :  { %v3943_v45 = vmax.f32 %v3911_v61, 0.0  ;;  %v3848_v26 = vmul.f32 0.03125, %v3741_v56  ;;  %v3743_v6 = vpop.f32.mrb[155].mxu1  ;;  %6254 = vrsqrt.f32 %v3974_v3  ;;  %v10623_v61 = vld [vmem:[#allocation71_spill] sm:$0xff] }
 0x42f   :  { %v3881_v21 = vmul.f32 %v3589_v19, %v3589_v19  ;;  %v4393_v57 = vadd.f32 %v4361_v40, %v3589_v19 }
 0x430   :  { %v3975_v63 = vadd.f32 1e-05, %v3943_v45  ;;  %v3912_v16 = vsub.f32 %v3848_v26, %v3880_v60  ;;  %v6251_v11 = vpop.eup %6250  ;;  %v3490_v17 = vpop.f32.mrb[158].mxu0  ;;  %v10624_v60 = vld [vmem:[#allocation75_spill] sm:$0xff] }
 0x431   :  { %v3746_v43 = vpop.f32.mrb[156].mxu1  ;;  %v3590_v50 = vmul.f32 0.03125, %v3490_v17  ;;  %4077 = vrot.lane.b32.xlu0 %v6251_v11, %s6400_s11  ;;  %4471 = vrot.lane.b32.xlu1 %v4393_v57, %s6400_s11  ;;  %v3492_v27 = vpop.f32.mrb[159].mxu0  ;;  %v4363_v30 = vmul.f32 %v10624_v60, %v10623_v61  ;;  %v10626_v57 = vld [vmem:[#allocation14_spill] sm:$0xff] }
 0x432   :  { %v3944_v2 = vmax.f32 %v3912_v16, 0.0  ;;  %v3849_v36 = vmul.f32 0.03125, %v3746_v43  ;;  %v3748_v48 = vpop.f32.mrb[157].mxu1  ;;  %6256 = vrsqrt.f32 %v3975_v63 }
 0x433   :  { %v3882_v28 = vmul.f32 %v3590_v50, %v3590_v50  ;;  %v4394_v24 = vadd.f32 %v4362_v47, %v3590_v50 }
 0x434   :  { %v3976_v0 = vadd.f32 1e-05, %v3944_v2  ;;  %v3913_v55 = vsub.f32 %v3849_v36, %v3881_v21  ;;  %v6253_v42 = vpop.eup %6252  ;;  %v3495_v52 = vpop.f32.mrb[160].mxu0  ;;  %v10625_v21 = vld [vmem:[#allocation10_spill] sm:$0xff] }
 0x435   :  { %v3751_v14 = vpop.f32.mrb[158].mxu1  ;;  %v3591_v3 = vmul.f32 0.03125, %v3495_v52  ;;  %4079 = vrot.lane.b32.xlu1 %v6253_v42, %s6400_s11  ;;  %4473 = vrot.lane.b32.xlu0 %v4394_v24, %s6400_s11  ;;  %v3497_v33 = vpop.f32.mrb[161].mxu0  ;;  %v4364_v11 = vmul.f32 %v10626_v57, %v10625_v21  ;;  %v10627_v42 = vld [vmem:[#allocation11_spill] sm:$0xff] }
 0x436   :  { %v3945_v59 = vmax.f32 %v3913_v55, 0.0  ;;  %v3850_v23 = vmul.f32 0.03125, %v3751_v14  ;;  %v3753_v44 = vpop.f32.mrb[159].mxu1  ;;  %6258 = vrsqrt.f32 %v3976_v0  ;;  %v10628_v14 = vld [vmem:[#allocation78_spill] sm:$0xff] }
 0x437   :  { %v3883_v58 = vmul.f32 %v3591_v3, %v3591_v3  ;;  %v4395_v45 = vadd.f32 %v4363_v30, %v3591_v3  ;;  %v4365_v52 = vmul.f32 %v10628_v14, %v10627_v42 }
 0x438   :  { %v3977_v7 = vadd.f32 1e-05, %v3945_v59  ;;  %v3914_v56 = vsub.f32 %v3850_v23, %v3882_v28  ;;  %v6255_v26 = vpop.eup %6254  ;;  %v3500_v19 = vpop.f32.mrb[162].mxu0 }
 0x439   :  { %v3756_v6 = vpop.f32.mrb[160].mxu1  ;;  %v3592_v16 = vmul.f32 0.03125, %v3500_v19  ;;  %4081 = vrot.lane.b32.xlu0 %v6255_v26, %s6400_s11  ;;  %4475 = vrot.lane.b32.xlu1 %v4395_v45, %s6400_s11  ;;  %v3502_v43 = vpop.f32.mrb[163].mxu0  ;;  %v10630_v19 = vld [vmem:[#allocation16_spill] sm:$0xff] }
 0x43a   :  { %v3946_v40 = vmax.f32 %v3914_v56, 0.0  ;;  %v3851_v15 = vmul.f32 0.03125, %v3756_v6  ;;  %v3758_v63 = vpop.f32.mrb[161].mxu1  ;;  %6260 = vrsqrt.f32 %v3977_v7  ;;  %v10629_v6 = vld [vmem:[#allocation12_spill] sm:$0xff] }
 0x43b   :  { %v3884_v36 = vmul.f32 %v3592_v16, %v3592_v16  ;;  %v4396_v48 = vadd.f32 %v4364_v11, %v3592_v16 }
 0x43c   :  { %v3978_v17 = vadd.f32 1e-05, %v3946_v40  ;;  %v3915_v2 = vsub.f32 %v3851_v15, %v3883_v58  ;;  %v6257_v50 = vpop.eup %6256  ;;  %v3505_v27 = vpop.f32.mrb[164].mxu0  ;;  %v4366_v40 = vmul.f32 %v10630_v19, %v10629_v6 }
 0x43d   :  { %v3761_v47 = vpop.f32.mrb[162].mxu1  ;;  %v3593_v24 = vmul.f32 0.03125, %v3505_v27  ;;  %4083 = vrot.lane.b32.xlu1 %v6257_v50, %s6400_s11  ;;  %4477 = vrot.lane.b32.xlu0 %v4396_v48, %s6400_s11  ;;  %v3507_v59 = vpop.f32.mrb[165].mxu0  ;;  %v10631_v27 = vld [vmem:[#allocation13_spill] sm:$0xff] }
 0x43e   :  { %v3947_v0 = vmax.f32 %v3915_v2, 0.0  ;;  %v3852_v55 = vmul.f32 0.03125, %v3761_v47  ;;  %v3763_v28 = vpop.f32.mrb[163].mxu1  ;;  %6262 = vrsqrt.f32 %v3978_v17 }
 0x43f   :  { %v3885_v3 = vmul.f32 %v3593_v24, %v3593_v24  ;;  %v4397_v61 = vadd.f32 %v4365_v52, %v3593_v24 }
 0x440   :  { %v3979_v23 = vadd.f32 1e-05, %v3947_v0  ;;  %v3916_v44 = vsub.f32 %v3852_v55, %v3884_v36  ;;  %v6259_v30 = vpop.eup %6258  ;;  %v3510_v7 = vpop.f32.mrb[166].mxu0  ;;  %v10632_v0 = vld [vmem:[#allocation66_spill] sm:$0xff] }
 0x441   :  { %v3766_v33 = vpop.f32.mrb[164].mxu1  ;;  %v3594_v26 = vmul.f32 0.03125, %v3510_v7  ;;  %4085 = vrot.lane.b32.xlu0 %v6259_v30, %s6400_s11  ;;  %4479 = vrot.lane.b32.xlu1 %v4397_v61, %s6400_s11  ;;  %v3512_v15 = vpop.f32.mrb[167].mxu0  ;;  %v4367_v55 = vmul.f32 %v10632_v0, %v10631_v27 }
 0x442   :  { %v3948_v56 = vmax.f32 %v3916_v44, 0.0  ;;  %v3853_v58 = vmul.f32 0.03125, %v3766_v33  ;;  %v3768_v45 = vpop.f32.mrb[165].mxu1  ;;  %6264 = vrsqrt.f32 %v3979_v23 }
 0x443   :  { %v3886_v21 = vmul.f32 %v3594_v26, %v3594_v26  ;;  %v4398_v11 = vadd.f32 %v4366_v40, %v3594_v26 }
 0x444   :  { %v3980_v63 = vadd.f32 1e-05, %v3948_v56  ;;  %v3917_v16 = vsub.f32 %v3853_v58, %v3885_v3  ;;  %v6261_v43 = vpop.eup %6260  ;;  %v3515_v2 = vpop.f32.mrb[168].mxu0  ;;  %v10633_v56 = vld [vmem:[#allocation64_spill] sm:$0xff]  ;;  %v10634_v58 = vld [vmem:[#allocation18_spill] sm:$0xff] }
 0x445   :  { %v3771_v17 = vpop.f32.mrb[166].mxu1  ;;  %v3595_v47 = vmul.f32 0.03125, %v3515_v2  ;;  %4087 = vrot.lane.b32.xlu1 %v6261_v43, %s6400_s11  ;;  %4481 = vrot.lane.b32.xlu0 %v4398_v11, %s6400_s11  ;;  %v3517_v28 = vpop.f32.mrb[169].mxu0  ;;  %v4368_v45 = vmul.f32 %v10634_v58, %v10633_v56 }
 0x446   :  { %v3949_v36 = vmax.f32 %v3917_v16, 0.0  ;;  %v3854_v48 = vmul.f32 0.03125, %v3771_v17  ;;  %v3773_v50 = vpop.f32.mrb[167].mxu1  ;;  %6266 = vrsqrt.f32 %v3980_v63 }
 0x447   :  { %v3887_v52 = vmul.f32 %v3595_v47, %v3595_v47  ;;  %v4399_v59 = vadd.f32 %v4367_v55, %v3595_v47  ;;  %v10636_v50 = vld [vmem:[#allocation19_spill] sm:$0xff] }
 0x448   :  { %v3981_v24 = vadd.f32 1e-05, %v3949_v36  ;;  %v3918_v42 = vsub.f32 %v3854_v48, %v3886_v21  ;;  %v6263_v23 = vpop.eup %6262  ;;  %v3520_v3 = vpop.f32.mrb[170].mxu0  ;;  %v10635_v48 = vld [vmem:[#allocation65_spill] sm:$0xff] }
 0x449   :  { %v3776_v44 = vpop.f32.mrb[168].mxu1  ;;  %v3596_v7 = vmul.f32 0.03125, %v3520_v3  ;;  %4089 = vrot.lane.b32.xlu0 %v6263_v23, %s6400_s11  ;;  %4483 = vrot.lane.b32.xlu1 %v4399_v59, %s6400_s11  ;;  %v3522_v26 = vpop.f32.mrb[171].mxu0  ;;  %v4369_v47 = vmul.f32 %v10636_v50, %v10635_v48 }
 0x44a   :  { %v3950_v61 = vmax.f32 %v3918_v42, 0.0  ;;  %v3855_v30 = vmul.f32 0.03125, %v3776_v44  ;;  %v3778_v33 = vpop.f32.mrb[169].mxu1  ;;  %6268 = vrsqrt.f32 %v3981_v24 }
 0x44b   :  { %v3888_v15 = vmul.f32 %v3596_v7, %v3596_v7  ;;  %v4400_v63 = vadd.f32 %v4368_v45, %v3596_v7  ;;  %v10637_v33 = vld [vmem:[#allocation15_spill] sm:$0xff]  ;;  %v10638_v7 = vld [vmem:[#allocation21_spill] sm:$0xff] }
 0x44c   :  { %v3982_v6 = vadd.f32 1e-05, %v3950_v61  ;;  %v3919_v40 = vsub.f32 %v3855_v30, %v3887_v52  ;;  %v6265_v16 = vpop.eup %6264  ;;  %v3525_v11 = vpop.f32.mrb[172].mxu0  ;;  %v4370_v56 = vmul.f32 %v10638_v7, %v10637_v33 }
 0x44d   :  { %v3781_v21 = vpop.f32.mrb[170].mxu1  ;;  %v3597_v36 = vmul.f32 0.03125, %v3525_v11  ;;  %4091 = vrot.lane.b32.xlu1 %v6265_v16, %s6400_s11  ;;  %4485 = vrot.lane.b32.xlu0 %v4400_v63, %s6400_s11  ;;  %v3527_v27 = vpop.f32.mrb[173].mxu0 }
 0x44e   :  { %v3951_v43 = vmax.f32 %v3919_v40, 0.0  ;;  %v3856_v17 = vmul.f32 0.03125, %v3781_v21  ;;  %v3783_v2 = vpop.f32.mrb[171].mxu1  ;;  %6270 = vrsqrt.f32 %v3982_v6 }
 0x44f   :  { %v3889_v24 = vmul.f32 %v3597_v36, %v3597_v36  ;;  %v4401_v42 = vadd.f32 %v4369_v47, %v3597_v36  ;;  %v10639_v36 = vld [vmem:[#allocation17_spill] sm:$0xff] }
 0x450   :  { %v3983_v55 = vadd.f32 1e-05, %v3951_v43  ;;  %v3920_v28 = vsub.f32 %v3856_v17, %v3888_v15  ;;  %v6267_v52 = vpop.eup %6266  ;;  %v3530_v23 = vpop.f32.mrb[174].mxu0  ;;  %v4371_v48 = vmul.f32 %v8885_v53, %v10639_v36 }
 0x451   :  { %v3786_v59 = vpop.f32.mrb[172].mxu1  ;;  %v3598_v30 = vmul.f32 0.03125, %v3530_v23  ;;  %4093 = vrot.lane.b32.xlu0 %v6267_v52, %s6400_s11  ;;  %4487 = vrot.lane.b32.xlu1 %v4401_v42, %s6400_s11  ;;  %v3532_v45 = vpop.f32.mrb[175].mxu0 }
 0x452   :  { %v3952_v44 = vmax.f32 %v3920_v28, 0.0  ;;  %v3857_v3 = vmul.f32 0.03125, %v3786_v59  ;;  %v3788_v61 = vpop.f32.mrb[173].mxu1  ;;  %6272 = vrsqrt.f32 %v3983_v55 }
 0x453   :  { %v3890_v40 = vmul.f32 %v3598_v30, %v3598_v30  ;;  %v4402_v15 = vadd.f32 %v4370_v56, %v3598_v30  ;;  %v10640_v30 = vld [vmem:[#allocation79_spill] sm:$0xff] }
 0x454   :  { %v3984_v26 = vadd.f32 1e-05, %v3952_v44  ;;  %v3921_v6 = vsub.f32 %v3857_v3, %v3889_v24  ;;  %v6269_v63 = vpop.eup %6268  ;;  %v3535_v21 = vpop.f32.mrb[176].mxu0  ;;  %v4372_v33 = vmul.f32 %v8931_v41, %v10640_v30 }
 0x455   :  { %v3791_v16 = vpop.f32.mrb[174].mxu1  ;;  %v3599_v2 = vmul.f32 0.03125, %v3535_v21  ;;  %4095 = vrot.lane.b32.xlu1 %v6269_v63, %s6400_s11  ;;  %4489 = vrot.lane.b32.xlu0 %v4402_v15, %s6400_s11  ;;  %v3537_v47 = vpop.f32.mrb[177].mxu0 }
 0x456   :  { %v3953_v11 = vmax.f32 %v3921_v6, 0.0  ;;  %v3858_v43 = vmul.f32 0.03125, %v3791_v16  ;;  %v3793_v17 = vpop.f32.mrb[175].mxu1  ;;  %6274 = vrsqrt.f32 %v3984_v26 }
 0x457   :  { %v3891_v28 = vmul.f32 %v3599_v2, %v3599_v2  ;;  %v4403_v24 = vadd.f32 %v4371_v48, %v3599_v2  ;;  %v10641_v2 = vld [vmem:[#allocation67_spill] sm:$0xff] }
 0x458   :  { %v3985_v27 = vadd.f32 1e-05, %v3953_v11  ;;  %v3922_v55 = vsub.f32 %v3858_v43, %v3890_v40  ;;  %v6271_v42 = vpop.eup %6270  ;;  %v3540_v59 = vpop.f32.mrb[178].mxu0  ;;  %v4373_v36 = vmul.f32 %v8956_v12, %v10641_v2 }
 0x459   :  { %v3796_v52 = vpop.f32.mrb[176].mxu1  ;;  %v3600_v61 = vmul.f32 0.03125, %v3540_v59  ;;  %4097 = vrot.lane.b32.xlu0 %v6271_v42, %s6400_s11  ;;  %4491 = vrot.lane.b32.xlu1 %v4403_v24, %s6400_s11  ;;  %v3542_v56 = vpop.f32.mrb[179].mxu0 }
 0x45a   :  { %v3954_v23 = vmax.f32 %v3922_v55, 0.0  ;;  %v3859_v44 = vmul.f32 0.03125, %v3796_v52  ;;  %v3798_v3 = vpop.f32.mrb[177].mxu1  ;;  %6276 = vrsqrt.f32 %v3985_v27 }
 0x45b   :  { %v3892_v6 = vmul.f32 %v3600_v61, %v3600_v61  ;;  %v4404_v40 = vadd.f32 %v4372_v33, %v3600_v61  ;;  %v10642_v61 = vld [vmem:[#allocation20_spill] sm:$0xff] }
 0x45c   :  { %v3986_v45 = vadd.f32 1e-05, %v3954_v23  ;;  %v3923_v26 = vsub.f32 %v3859_v44, %v3891_v28  ;;  %v6273_v15 = vpop.eup %6272  ;;  %v3545_v16 = vpop.f32.mrb[180].mxu0  ;;  %v4374_v30 = vmul.f32 %v8990_v51, %v10642_v61 }
 0x45d   :  { %v3801_v63 = vpop.f32.mrb[178].mxu1  ;;  %v3601_v17 = vmul.f32 0.03125, %v3545_v16  ;;  %4099 = vrot.lane.b32.xlu1 %v6273_v15, %s6400_s11  ;;  %4493 = vrot.lane.b32.xlu0 %v4404_v40, %s6400_s11  ;;  %v3547_v48 = vpop.f32.mrb[181].mxu0 }
 0x45e   :  { %v3955_v21 = vmax.f32 %v3923_v26, 0.0  ;;  %v3860_v11 = vmul.f32 0.03125, %v3801_v63  ;;  %v3803_v43 = vpop.f32.mrb[179].mxu1  ;;  %6278 = vrsqrt.f32 %v3986_v45 }
 0x45f   :  { %v3893_v55 = vmul.f32 %v3601_v17, %v3601_v17  ;;  %v4405_v28 = vadd.f32 %v4373_v36, %v3601_v17  ;;  %v10643_v17 = vld [vmem:[#allocation69_spill] sm:$0xff] }
 0x460   :  { %v3987_v47 = vadd.f32 1e-05, %v3955_v21  ;;  %v3924_v27 = vsub.f32 %v3860_v11, %v3892_v6  ;;  %v6275_v24 = vpop.eup %6274  ;;  %v3550_v52 = vpop.f32.mrb[182].mxu0  ;;  %v4375_v2 = vmul.f32 %v9042_v54, %v10643_v17 }
 0x461   :  { %v3806_v42 = vpop.f32.mrb[180].mxu1  ;;  %v3602_v3 = vmul.f32 0.03125, %v3550_v52  ;;  %4101 = vrot.lane.b32.xlu0 %v6275_v24, %s6400_s11  ;;  %4495 = vrot.lane.b32.xlu1 %v4405_v28, %s6400_s11  ;;  %v3552_v33 = vpop.f32.mrb[183].mxu0 }
 0x462   :  { %v3956_v59 = vmax.f32 %v3924_v27, 0.0  ;;  %v3861_v23 = vmul.f32 0.03125, %v3806_v42  ;;  %v3808_v44 = vpop.f32.mrb[181].mxu1  ;;  %6280 = vrsqrt.f32 %v3987_v47 }
 0x463   :  { %v3894_v26 = vmul.f32 %v3602_v3, %v3602_v3  ;;  %v4406_v6 = vadd.f32 %v4374_v30, %v3602_v3  ;;  %v4376_v3 = vmul.f32 %v9078_v22, %v8919_v34  ;;  %v4377_v34 = vmul.f32 %v9114_v13, %v8963_v39 }
 0x464   :  { %v3988_v56 = vadd.f32 1e-05, %v3956_v59  ;;  %v3925_v45 = vsub.f32 %v3861_v23, %v3893_v55  ;;  %v6277_v40 = vpop.eup %6276  ;;  %v3555_v63 = vpop.f32.mrb[184].mxu0 }
 0x465   :  { %v3811_v15 = vpop.f32.mrb[182].mxu1  ;;  %v3603_v43 = vmul.f32 0.03125, %v3555_v63  ;;  %4103 = vrot.lane.b32.xlu1 %v6277_v40, %s6400_s11  ;;  %4497 = vrot.lane.b32.xlu0 %v4406_v6, %s6400_s11  ;;  %v3557_v36 = vpop.f32.mrb[185].mxu0 }
 0x466   :  { %v3957_v16 = vmax.f32 %v3925_v45, 0.0  ;;  %v3862_v21 = vmul.f32 0.03125, %v3811_v15  ;;  %v3813_v11 = vpop.f32.mrb[183].mxu1  ;;  %6282 = vrsqrt.f32 %v3988_v56 }
 0x467   :  { %v3895_v27 = vmul.f32 %v3603_v43, %v3603_v43  ;;  %v4407_v55 = vadd.f32 %v4375_v2, %v3603_v43 }
 0x468   :  { %v3989_v48 = vadd.f32 1e-05, %v3957_v16  ;;  %v3926_v47 = vsub.f32 %v3862_v21, %v3894_v26  ;;  %v6279_v28 = vpop.eup %6278  ;;  %v3560_v42 = vpop.f32.mrb[186].mxu0 }
 0x469   :  { %v3816_v24 = vpop.f32.mrb[184].mxu1  ;;  %v3604_v44 = vmul.f32 0.03125, %v3560_v42  ;;  %4105 = vrot.lane.b32.xlu0 %v6279_v28, %s6400_s11  ;;  %4499 = vrot.lane.b32.xlu1 %v4407_v55, %s6400_s11  ;;  %v3562_v61 = vpop.f32.mrb[187].mxu0  ;;  %v4378_v55 = vmul.f32 %v9142_v29, %v9004_v35 }
 0x46a   :  { %v3958_v52 = vmax.f32 %v3926_v47, 0.0  ;;  %v3863_v59 = vmul.f32 0.03125, %v3816_v24  ;;  %v3818_v23 = vpop.f32.mrb[185].mxu1  ;;  %6284 = vrsqrt.f32 %v3989_v48 }
 0x46b   :  { %v3896_v56 = vmul.f32 %v3604_v44, %v3604_v44  ;;  %v4408_v45 = vadd.f32 %v4376_v3, %v3604_v44  ;;  %v4444_v23 = vpop.permute.xlu1 %4443 }
 0x46c   :  { %v3990_v30 = vadd.f32 1e-05, %v3958_v52  ;;  %v3927_v33 = vsub.f32 %v3863_v59, %v3895_v27  ;;  %v6281_v26 = vpop.eup %6280  ;;  %v3565_v40 = vpop.f32.mrb[188].mxu0 }
 0x46d   :  { %v3821_v6 = vpop.f32.mrb[186].mxu1  ;;  %v3605_v21 = vmul.f32 0.03125, %v3565_v40  ;;  %4107 = vrot.lane.b32.xlu1 %v6281_v26, %s6400_s11  ;;  %4501 = vrot.lane.b32.xlu0 %v4408_v45, %s6400_s11  ;;  %v3567_v11 = vpop.f32.mrb[189].mxu0 }
 0x46e   :  { %v3959_v15 = vmax.f32 %v3927_v33, 0.0  ;;  %v3864_v63 = vmul.f32 0.03125, %v3821_v6  ;;  %v3823_v16 = vpop.f32.mrb[187].mxu1  ;;  %6286 = vrsqrt.f32 %v3990_v30 }
 0x46f   :  { %v3897_v2 = vmul.f32 %v3605_v21, %v3605_v21  ;;  %v4409_v36 = vadd.f32 %v4377_v34, %v3605_v21  ;;  %v4446_v26 = vpop.permute.xlu0 %4445 }
 0x470   :  { %v3991_v43 = vadd.f32 1e-05, %v3959_v15  ;;  %v3928_v17 = vsub.f32 %v3864_v63, %v3896_v56  ;;  %v6283_v48 = vpop.eup %6282  ;;  %v3570_v27 = vpop.f32.mrb[190].mxu0 }
 0x471   :  { %v3826_v47 = vpop.f32.mrb[188].mxu1  ;;  %v3606_v42 = vmul.f32 0.03125, %v3570_v27  ;;  %4109 = vrot.lane.b32.xlu0 %v6283_v48, %s6400_s11  ;;  %4503 = vrot.lane.b32.xlu1 %v4409_v36, %s6400_s11  ;;  %v3572_v52 = vpop.f32.mrb[191].mxu0  ;;  %v9513_v48 = vld [vmem:[%s10135_s3] sm:$0xff] }
 0x472   :  { %6288 = vrsqrt.f32 %v3991_v43  ;;  %v3960_v28 = vmax.f32 %v3928_v17, 0.0  ;;  %v3865_v24 = vmul.f32 0.03125, %v3826_v47  ;;  %v3828_v39 = vpop.f32.mrb[189].mxu1 }
 0x473   :  { %v3898_v3 = vmul.f32 %v3606_v42, %v3606_v42  ;;  %v4410_v61 = vadd.f32 %v4378_v55, %v3606_v42  ;;  %v4448_v40 = vpop.permute.xlu1 %4447 }
 0x474   :  { %v3992_v59 = vadd.f32 1e-05, %v3960_v28  ;;  %v3929_v44 = vsub.f32 %v3865_v24, %v3897_v2  ;;  %v6285_v30 = vpop.eup %6284  ;;  %v9520_v24 = vld [vmem:[%s10135_s3 + $0x8] sm:$0xff] }
 0x475   :  { %v3831_v33 = vpop.f32.mrb[190].mxu1  ;;  %4111 = vrot.lane.b32.xlu1 %v6285_v30, %s6400_s11  ;;  %4505 = vrot.lane.b32.xlu0 %v4410_v61, %s6400_s11  ;;  %v9530_v61 = vld [vmem:[%s10135_s3 + $0x10] sm:$0xff] }
 0x476   :  { %6290 = vrsqrt.f32 %v3992_v59  ;;  %v3866_v56 = vmul.f32 0.03125, %v3831_v33  ;;  %v3833_v35 = vpop.f32.mrb[191].mxu1  ;;  %v3961_v45 = vmax.f32 %v3929_v44, 0.0 }
 0x477   :  { %v4450_v34 = vpop.permute.xlu0 %4449 }
 0x478   :  { %v3930_v6 = vsub.f32 %v3866_v56, %v3898_v3  ;;  %v6287_v15 = vpop.eup %6286  ;;  %v3993_v16 = vadd.f32 1e-05, %v3961_v45 }
 0x479   :  { %4113 = vrot.lane.b32.xlu0 %v6287_v15, %s6400_s11 }
 0x47a   :  { %v3962_v21 = vmax.f32 %v3930_v6, 0.0  ;;  %6292 = vrsqrt.f32 %v3993_v16 }
 0x47b   :  { %v4452_v11 = vpop.permute.xlu1 %4451 }
 0x47c   :  { %v6289_v63 = vpop.eup %6288  ;;  %v3994_v17 = vadd.f32 1e-05, %v3962_v21  ;;  %v9546_v21 = vld [vmem:[%s10135_s3 + $0x20] sm:$0xff] }
 0x47d   :  { %4115 = vrot.lane.b32.xlu1 %v6289_v63, %s6400_s11 }
 0x47e   :  { %6294 = vrsqrt.f32 %v3994_v17 }
 0x47f   :  { %v4060_v2 = vpop.permute.xlu1 %4059  ;;  %v4454_v36 = vpop.permute.xlu0 %4453 }
 0x480   :  { %v6291_v43 = vpop.eup %6290  ;;  %v4155_v47 = vmul.f32 %v9513_v48, %v4060_v2 }
 0x481   :  { %4117 = vrot.lane.b32.xlu0 %v6291_v43, %s6400_s11 }
 0x482   :  { %4219 = vrot.lane.b32.xlu1 %v4155_v47, %s6401_s14  ;;  %v4539_v28 = vmul.f32 %v4444_v23, %v4155_v47  ;;  %v9554_v47 = vld [vmem:[%s10135_s3 + $0x28] sm:$0xff] }
 0x483   :  { %v4456_v27 = vpop.permute.xlu1 %4455  ;;  %v4062_v55 = vpop.permute.xlu0 %4061 }
 0x484   :  { %v4156_v39 = vmul.f32 %v9520_v24, %v4062_v55  ;;  %v6293_v44 = vpop.eup %6292 }
 0x486   :  { %4603 = vrot.lane.b32.xlu1 %v4539_v28, %s6400_s11  ;;  %4221 = vrot.lane.b32.xlu0 %v4156_v39, %s6401_s14  ;;  %v4540_v59 = vmul.f32 %v4446_v26, %v4156_v39  ;;  %v9538_v26 = vld [vmem:[%s10135_s3 + $0x18] sm:$0xff] }
 0x487   :  { %v4064_v42 = vpop.permute.xlu1 %4063  ;;  %v4458_v52 = vpop.permute.xlu0 %4457 }
 0x488   :  { %v4157_v30 = vmul.f32 %v9530_v61, %v4064_v42  ;;  %v6295_v33 = vpop.eup %6294  ;;  %v9562_v42 = vld [vmem:[%s10135_s3 + $0x30] sm:$0xff] }
 0x48a   :  { %4119 = vrot.lane.b32.xlu1 %v6293_v44, %s6400_s11  ;;  %4605 = vrot.lane.b32.xlu0 %v4540_v59, %s6400_s11  ;;  %v4541_v45 = vmul.f32 %v4448_v40, %v4157_v30 }
 0x48b   :  { %v4460_v23 = vpop.permute.xlu1 %4459  ;;  %v4066_v3 = vpop.permute.xlu0 %4065 }
 0x48c   :  { %v4158_v6 = vmul.f32 %v9538_v26, %v4066_v3 }
 0x48e   :  { %4223 = vrot.lane.b32.xlu1 %v4157_v30, %s6401_s14  ;;  %4121 = vrot.lane.b32.xlu0 %v6295_v33, %s6400_s11  ;;  %v4542_v16 = vmul.f32 %v4450_v34, %v4158_v6  ;;  %v9570_v30 = vld [vmem:[%s10135_s3 + $0x38] sm:$0xff] }
 0x48f   :  { %v4068_v56 = vpop.permute.xlu1 %4067  ;;  %v4462_v35 = vpop.permute.xlu0 %4461 }
 0x490   :  { %v4159_v40 = vmul.f32 %v9546_v21, %v4068_v56 }
 0x492   :  { %4607 = vrot.lane.b32.xlu1 %v4541_v45, %s6400_s11  ;;  %4225 = vrot.lane.b32.xlu0 %v4158_v6, %s6401_s14  ;;  %v4543_v2 = vmul.f32 %v4452_v11, %v4159_v40  ;;  %v9578_v6 = vld [vmem:[%s10135_s3 + $0x40] sm:$0xff] }
 0x493   :  { %v4464_v15 = vpop.permute.xlu1 %4463  ;;  %v4070_v63 = vpop.permute.xlu0 %4069 }
 0x494   :  { %v4160_v34 = vmul.f32 %v9554_v47, %v4070_v63 }
 0x496   :  { %4227 = vrot.lane.b32.xlu1 %v4159_v40, %s6401_s14  ;;  %4609 = vrot.lane.b32.xlu0 %v4542_v16, %s6400_s11  ;;  %v4544_v39 = vmul.f32 %v4454_v36, %v4160_v34 }
 0x497   :  { %v4072_v43 = vpop.permute.xlu1 %4071  ;;  %v4466_v17 = vpop.permute.xlu0 %4465 }
 0x498   :  { %v4161_v11 = vmul.f32 %v9562_v42, %v4072_v43  ;;  %v9586_v43 = vld [vmem:[%s10135_s3 + $0x48] sm:$0xff] }
 0x49a   :  { %4611 = vrot.lane.b32.xlu1 %v4543_v2, %s6400_s11  ;;  %4229 = vrot.lane.b32.xlu0 %v4160_v34, %s6401_s14  ;;  %v4545_v3 = vmul.f32 %v4456_v27, %v4161_v11 }
 0x49b   :  { %v4468_v55 = vpop.permute.xlu1 %4467  ;;  %v4074_v28 = vpop.permute.xlu0 %4073 }
 0x49c   :  { %v4162_v36 = vmul.f32 %v9570_v30, %v4074_v28 }
 0x49e   :  { %4231 = vrot.lane.b32.xlu1 %v4161_v11, %s6401_s14  ;;  %4613 = vrot.lane.b32.xlu0 %v4544_v39, %s6400_s11  ;;  %v4546_v45 = vmul.f32 %v4458_v52, %v4162_v36  ;;  %v9594_v39 = vld [vmem:[%s10135_s3 + $0x50] sm:$0xff] }
 0x49f   :  { %v4076_v59 = vpop.permute.xlu1 %4075  ;;  %v4470_v44 = vpop.permute.xlu0 %4469 }
 0x4a0   :  { %v4163_v27 = vmul.f32 %v9578_v6, %v4076_v59 }
 0x4a2   :  { %4615 = vrot.lane.b32.xlu1 %v4545_v3, %s6400_s11  ;;  %4233 = vrot.lane.b32.xlu0 %v4162_v36, %s6401_s14  ;;  %v4547_v40 = vmul.f32 %v4460_v23, %v4163_v27  ;;  %v9602_v36 = vld [vmem:[%s10135_s3 + $0x58] sm:$0xff] }
 0x4a3   :  { %v4472_v33 = vpop.permute.xlu1 %4471  ;;  %v4078_v56 = vpop.permute.xlu0 %4077 }
 0x4a4   :  { %v4164_v52 = vmul.f32 %v9586_v43, %v4078_v56 }
 0x4a6   :  { %4235 = vrot.lane.b32.xlu1 %v4163_v27, %s6401_s14  ;;  %4617 = vrot.lane.b32.xlu0 %v4546_v45, %s6400_s11  ;;  %v4548_v28 = vmul.f32 %v4462_v35, %v4164_v52 }
 0x4a7   :  { %v4080_v63 = vpop.permute.xlu1 %4079  ;;  %v4474_v16 = vpop.permute.xlu0 %4473 }
 0x4a8   :  { %v4165_v23 = vmul.f32 %v9594_v39, %v4080_v63  ;;  %v9610_v63 = vld [vmem:[%s10135_s3 + $0x60] sm:$0xff] }
 0x4aa   :  { %4619 = vrot.lane.b32.xlu1 %v4547_v40, %s6400_s11  ;;  %4237 = vrot.lane.b32.xlu0 %v4164_v52, %s6401_s14  ;;  %v4549_v3 = vmul.f32 %v4464_v15, %v4165_v23 }
 0x4ab   :  { %v4476_v2 = vpop.permute.xlu1 %4475  ;;  %v4082_v34 = vpop.permute.xlu0 %4081 }
 0x4ac   :  { %v4166_v35 = vmul.f32 %v9602_v36, %v4082_v34 }
 0x4ae   :  { %4239 = vrot.lane.b32.xlu1 %v4165_v23, %s6401_s14  ;;  %4621 = vrot.lane.b32.xlu0 %v4548_v28, %s6400_s11  ;;  %v4550_v27 = vmul.f32 %v4466_v17, %v4166_v35  ;;  %v9618_v28 = vld [vmem:[%s10135_s3 + $0x68] sm:$0xff] }
 0x4af   :  { %v4084_v11 = vpop.permute.xlu1 %4083  ;;  %v4478_v59 = vpop.permute.xlu0 %4477 }
 0x4b0   :  { %v4167_v15 = vmul.f32 %v9610_v63, %v4084_v11 }
 0x4b2   :  { %4623 = vrot.lane.b32.xlu1 %v4549_v3, %s6400_s11  ;;  %4241 = vrot.lane.b32.xlu0 %v4166_v35, %s6401_s14  ;;  %v4551_v34 = vmul.f32 %v4468_v55, %v4167_v15  ;;  %v9626_v35 = vld [vmem:[%s10135_s3 + $0x70] sm:$0xff] }
 0x4b3   :  { %v4480_v56 = vpop.permute.xlu1 %4479  ;;  %v4086_v45 = vpop.permute.xlu0 %4085 }
 0x4b4   :  { %v4168_v17 = vmul.f32 %v9618_v28, %v4086_v45 }
 0x4b6   :  { %4243 = vrot.lane.b32.xlu1 %v4167_v15, %s6401_s14  ;;  %4625 = vrot.lane.b32.xlu0 %v4550_v27, %s6400_s11  ;;  %v4552_v3 = vmul.f32 %v4470_v44, %v4168_v17 }
 0x4b7   :  { %v4088_v40 = vpop.permute.xlu1 %4087  ;;  %v4482_v52 = vpop.permute.xlu0 %4481 }
 0x4b8   :  { %v4169_v55 = vmul.f32 %v9626_v35, %v4088_v40 }
 0x4ba   :  { %4627 = vrot.lane.b32.xlu1 %v4551_v34, %s6400_s11  ;;  %4245 = vrot.lane.b32.xlu0 %v4168_v17, %s6401_s14  ;;  %v4553_v15 = vmul.f32 %v4472_v33, %v4169_v55  ;;  %v9634_v34 = vld [vmem:[%s10135_s3 + $0x78] sm:$0xff] }
 0x4bb   :  { %v4484_v23 = vpop.permute.xlu1 %4483  ;;  %v4090_v11 = vpop.permute.xlu0 %4089 }
 0x4bc   :  { %v4170_v44 = vmul.f32 %v9634_v34, %v4090_v11 }
 0x4be   :  { %4247 = vrot.lane.b32.xlu1 %v4169_v55, %s6401_s14  ;;  %4629 = vrot.lane.b32.xlu0 %v4552_v3, %s6400_s11  ;;  %v4554_v29 = vmul.f32 %v4474_v16, %v4170_v44  ;;  %v9642_v3 = vld [vmem:[%s10135_s3 + $0x80] sm:$0xff] }
 0x4bf   :  { %v4092_v27 = vpop.permute.xlu1 %4091  ;;  %v4486_v45 = vpop.permute.xlu0 %4485 }
 0x4c0   :  { %v4171_v33 = vmul.f32 %v9642_v3, %v4092_v27 }
 0x4c2   :  { %4631 = vrot.lane.b32.xlu1 %v4553_v15, %s6400_s11  ;;  %4249 = vrot.lane.b32.xlu0 %v4170_v44, %s6401_s14  ;;  %v4555_v22 = vmul.f32 %v4476_v2, %v4171_v33  ;;  %v9650_v15 = vld [vmem:[%s10135_s3 + $0x88] sm:$0xff] }
 0x4c3   :  { %v4488_v17 = vpop.permute.xlu1 %4487  ;;  %v4094_v40 = vpop.permute.xlu0 %4093 }
 0x4c4   :  { %v4172_v16 = vmul.f32 %v9650_v15, %v4094_v40 }
 0x4c6   :  { %4251 = vrot.lane.b32.xlu1 %v4171_v33, %s6401_s14  ;;  %4633 = vrot.lane.b32.xlu0 %v4554_v29, %s6400_s11  ;;  %v4556_v13 = vmul.f32 %v4478_v59, %v4172_v16  ;;  %v9658_v29 = vld [vmem:[%s10135_s3 + $0x90] sm:$0xff] }
 0x4c7   :  { %v4096_v55 = vpop.permute.xlu1 %4095  ;;  %v4490_v11 = vpop.permute.xlu0 %4489 }
 0x4c8   :  { %v4173_v2 = vmul.f32 %v9658_v29, %v4096_v55 }
 0x4ca   :  { %4635 = vrot.lane.b32.xlu1 %v4555_v22, %s6400_s11  ;;  %4253 = vrot.lane.b32.xlu0 %v4172_v16, %s6401_s14  ;;  %v4557_v51 = vmul.f32 %v4480_v56, %v4173_v2  ;;  %v9666_v22 = vld [vmem:[%s10135_s3 + $0x98] sm:$0xff] }
 0x4cb   :  { %v4492_v44 = vpop.permute.xlu1 %4491  ;;  %v4098_v27 = vpop.permute.xlu0 %4097 }
 0x4cc   :  { %v4174_v59 = vmul.f32 %v9666_v22, %v4098_v27 }
 0x4ce   :  { %4255 = vrot.lane.b32.xlu1 %v4173_v2, %s6401_s14  ;;  %4637 = vrot.lane.b32.xlu0 %v4556_v13, %s6400_s11  ;;  %v4558_v54 = vmul.f32 %v4482_v52, %v4174_v59  ;;  %v9674_v13 = vld [vmem:[%s10135_s3 + $0xa0] sm:$0xff] }
 0x4cf   :  { %v4100_v33 = vpop.permute.xlu1 %4099  ;;  %v4494_v40 = vpop.permute.xlu0 %4493 }
 0x4d0   :  { %v4175_v56 = vmul.f32 %v9674_v13, %v4100_v33 }
 0x4d2   :  { %4639 = vrot.lane.b32.xlu1 %v4557_v51, %s6400_s11  ;;  %4257 = vrot.lane.b32.xlu0 %v4174_v59, %s6401_s14  ;;  %v4559_v41 = vmul.f32 %v4484_v23, %v4175_v56  ;;  %v9682_v51 = vld [vmem:[%s10135_s3 + $0xa8] sm:$0xff] }
 0x4d3   :  { %v4496_v16 = vpop.permute.xlu1 %4495  ;;  %v4102_v55 = vpop.permute.xlu0 %4101 }
 0x4d4   :  { %v4176_v52 = vmul.f32 %v9682_v51, %v4102_v55 }
 0x4d6   :  { %4259 = vrot.lane.b32.xlu1 %v4175_v56, %s6401_s14  ;;  %4641 = vrot.lane.b32.xlu0 %v4558_v54, %s6400_s11  ;;  %v4560_v12 = vmul.f32 %v4486_v45, %v4176_v52  ;;  %v9690_v54 = vld [vmem:[%s10135_s3 + $0xb0] sm:$0xff] }
 0x4d7   :  { %v4104_v2 = vpop.permute.xlu1 %4103  ;;  %v4498_v27 = vpop.permute.xlu0 %4497 }
 0x4d8   :  { %v4177_v23 = vmul.f32 %v9690_v54, %v4104_v2 }
 0x4da   :  { %4643 = vrot.lane.b32.xlu1 %v4559_v41, %s6400_s11  ;;  %4261 = vrot.lane.b32.xlu0 %v4176_v52, %s6401_s14  ;;  %v4561_v7 = vmul.f32 %v4488_v17, %v4177_v23  ;;  %v9698_v41 = vld [vmem:[%s10135_s3 + $0xb8] sm:$0xff] }
 0x4db   :  { %v4500_v59 = vpop.permute.xlu1 %4499  ;;  %v4106_v33 = vpop.permute.xlu0 %4105 }
 0x4dc   :  { %v4178_v45 = vmul.f32 %v9698_v41, %v4106_v33 }
 0x4de   :  { %4263 = vrot.lane.b32.xlu1 %v4177_v23, %s6401_s14  ;;  %4645 = vrot.lane.b32.xlu0 %v4560_v12, %s6400_s11  ;;  %v4562_v53 = vmul.f32 %v4490_v11, %v4178_v45  ;;  %v9706_v12 = vld [vmem:[%s10135_s3 + $0xc0] sm:$0xff] }
 0x4df   :  { %v4108_v56 = vpop.permute.xlu1 %4107  ;;  %v4502_v55 = vpop.permute.xlu0 %4501  ;;  %10644 = vst [vmem:[#allocation26_spill] sm:$0xff] %v9706_v12 }
 0x4e0   :  { %v4179_v17 = vmul.f32 %v9706_v12, %v4108_v56 }
 0x4e2   :  { %4647 = vrot.lane.b32.xlu1 %v4561_v7, %s6400_s11  ;;  %4265 = vrot.lane.b32.xlu0 %v4178_v45, %s6401_s14  ;;  %v4563_v33 = vmul.f32 %v4492_v44, %v4179_v17  ;;  %v9716_v7 = vld [vmem:[%s10135_s3 + $0xc8] sm:$0xff] }
 0x4e3   :  { %v4504_v52 = vpop.permute.xlu1 %4503  ;;  %v4110_v2 = vpop.permute.xlu0 %4109  ;;  %10645 = vst [vmem:[#allocation74_spill] sm:$0xff] %v9716_v7 }
 0x4e4   :  { %v4180_v11 = vmul.f32 %v9716_v7, %v4110_v2  ;;  %v9732_v2 = vld [vmem:[%s10135_s3 + $0xd8] sm:$0xff] }
 0x4e5   :  { %10647 = vst [vmem:[#allocation28_spill] sm:$0xff] %v9732_v2 }
 0x4e6   :  { %4267 = vrot.lane.b32.xlu1 %v4179_v17, %s6401_s14  ;;  %4649 = vrot.lane.b32.xlu0 %v4562_v53, %s6400_s11  ;;  %v4564_v56 = vmul.f32 %v4494_v40, %v4180_v11  ;;  %v9724_v53 = vld [vmem:[%s10135_s3 + $0xd0] sm:$0xff] }
 0x4e7   :  { %v9711_v23 = vpop.permute.xlu0 %4505  ;;  %v4112_v45 = vpop.permute.xlu1 %4111  ;;  %10646 = vst [vmem:[#allocation27_spill] sm:$0xff] %v9724_v53 }
 0x4e8   :  { %v4181_v44 = vmul.f32 %v9724_v53, %v4112_v45  ;;  %v9740_v45 = vld [vmem:[%s10135_s3 + $0xe0] sm:$0xff] }
 0x4e9   :  { %10648 = vst [vmem:[#allocation29_spill] sm:$0xff] %v9740_v45 }
 0x4ea   :  { %4651 = vrot.lane.b32.xlu1 %v4563_v33, %s6400_s11  ;;  %4269 = vrot.lane.b32.xlu0 %v4180_v11, %s6401_s14  ;;  %v4565_v12 = vmul.f32 %v4496_v16, %v4181_v44 }
 0x4eb   :  { %v4114_v17 = vpop.permute.xlu0 %4113 }
 0x4ec   :  { %v4182_v40 = vmul.f32 %v9732_v2, %v4114_v17 }
 0x4ee   :  { %4271 = vrot.lane.b32.xlu1 %v4181_v44, %s6401_s14  ;;  %4653 = vrot.lane.b32.xlu0 %v4564_v56, %s6400_s11  ;;  %v4566_v11 = vmul.f32 %v4498_v27, %v4182_v40 }
 0x4ef   :  { %v4116_v33 = vpop.permute.xlu1 %4115 }
 0x4f0   :  { %v4183_v16 = vmul.f32 %v9740_v45, %v4116_v33 }
 0x4f2   :  { %4655 = vrot.lane.b32.xlu1 %v4565_v12, %s6400_s11  ;;  %4273 = vrot.lane.b32.xlu0 %v4182_v40, %s6401_s14  ;;  %v4567_v17 = vmul.f32 %v4500_v59, %v4183_v16  ;;  %v9748_v12 = vld [vmem:[%s10135_s3 + $0xe8] sm:$0xff] }
 0x4f3   :  { %v4118_v56 = vpop.permute.xlu0 %4117 }
 0x4f4   :  { %v4220_v44 = vpop.permute.xlu1 %4219  ;;  %v4184_v27 = vmul.f32 %v9748_v12, %v4118_v56 }
 0x4f5   :  { %v4315_v45 = vmul.f32 %v4220_v44, %v8395_v32  ;;  %v10650_v32 = vmov 2  }
 0x4f6   :  { %4275 = vrot.lane.b32.xlu1 %v4183_v16, %s6401_s14  ;;  %4657 = vrot.lane.b32.xlu0 %v4566_v11, %s6400_s11  ;;  %v4568_v33 = vmul.f32 %v4502_v55, %v4184_v27  ;;  %v9759_v11 = vld [vmem:[%s10135_s3 + $0xf0] sm:$0xff] }
 0x4f7   :  { %10649 = vst [vmem:[#allocation76_spill] sm:$0xff] %v9759_v11 }
 0x4f8   :  { %v4604_v40 = vpop.permute.xlu1 %4603  ;;  %v4222_v53 = vpop.permute.xlu0 %4221 }
 0x4f9   :  { %v4699_v59 = vsub.f32 %v9513_v48, %v4604_v40  ;;  %v10651_v48 = vmov 0  }
 0x4fa   :  { %4659 = vrot.lane.b32.xlu1 %v4567_v17, %s6400_s11  ;;  %4277 = vrot.lane.b32.xlu0 %v4184_v27, %s6401_s14  ;;  %v4316_v27 = vmul.f32 %v4222_v53, %v10599_v8 }
 0x4fc   :  { %v4120_v2 = vpop.permute.xlu1 %4119  ;;  %v4606_v7 = vpop.permute.xlu0 %4605 }
 0x4fd   :  { %v4185_v16 = vmul.f32 %v9759_v11, %v4120_v2  ;;  %v4700_v40 = vsub.f32 %v9520_v24, %v4606_v7 }
 0x4fe   :  { %4733 = vperm.xlu1 %6042, %v4315_v45   ;;  %4661 = vrot.lane.b32.xlu0 %v4568_v33, %s6400_s11 }
 0x4ff   :  { %v4569_v55 = vmul.f32 %v4504_v52, %v4185_v16 }
 0x500   :  { %v4224_v56 = vpop.permute.xlu1 %4223  ;;  %v4122_v17 = vpop.permute.xlu0 %4121 }
 0x502   :  { %4279 = vrot.lane.b32.xlu1 %v4185_v16, %s6401_s14  ;;  %4925 = vperm.xlu0 %6040, %v4699_v59   ;;  %v9771_v59 = vld [vmem:[%s10135_s3 + $0xf8] sm:$0x3]  ;;  %v4317_v16 = vmul.f32 %v4224_v56, %v8430_v4 }
 0x503   :  { %6044 = vset.pattern.permute.xlu1 %v10650_v32  ;;  %v4186_v52 = vmul.f32 %v9771_v59, %v4122_v17 }
 0x504   :  { %v4608_v45 = vpop.permute.xlu1 %4607  ;;  %v4226_v44 = vpop.permute.xlu0 %4225 }
 0x505   :  { %v4570_v24 = vmul.f32 %v9711_v23, %v4186_v52  ;;  %v4318_v23 = vmul.f32 %v4226_v44, %v10601_v9 }
 0x506   :  { %4663 = vrot.lane.b32.xlu1 %v4569_v55, %s6400_s11  ;;  %6043 = vset.pattern.permute.xlu0 %v10651_v48 }
 0x507   :  { %4738 = vperm.xlu0 %6043, %v4316_v27   ;;  %v4701_v27 = vsub.f32 %v9530_v61, %v4608_v45 }
 0x508   :  { %v4228_v2 = vpop.permute.xlu1 %4227  ;;  %v4610_v33 = vpop.permute.xlu0 %4609 }
 0x509   :  { %v4702_v17 = vsub.f32 %v9538_v26, %v4610_v33  ;;  %v4319_v4 = vmul.f32 %v4228_v2, %v10603_v31 }
 0x50a   :  { %4930 = vperm.xlu1 %6044, %v4700_v40  }
 0x50b   :  { %4281 = vrot.lane.b32.xlu0 %v4186_v52, %s6401_s14 }
 0x50c   :  { %v4612_v8 = vpop.permute.xlu1 %4611  ;;  %v4230_v53 = vpop.permute.xlu0 %4229  ;;  %6048 = vset.pattern.permute.xlu0 %v10650_v32 }
 0x50d   :  { %v4703_v26 = vsub.f32 %v9546_v21, %v4612_v8  ;;  %v4320_v2 = vmul.f32 %v4230_v53, %v10605_v18 }
 0x50e   :  { %6045 = vset.pattern.permute.xlu1 %v10651_v48 }
 0x50f   :  { %4743 = vperm.xlu1 %6045, %v4317_v16   ;;  %4665 = vrot.lane.b32.xlu0 %v4570_v24, %s6400_s11 }
 0x510   :  { %v4232_v7 = vpop.permute.xlu1 %4231  ;;  %v4614_v55 = vpop.permute.xlu0 %4613 }
 0x511   :  { %v4704_v61 = vsub.f32 %v9554_v47, %v4614_v55  ;;  %v4321_v9 = vmul.f32 %v4232_v7, %v10607_v46 }
 0x513   :  { %6046 = vset.pattern.permute.xlu1 %v10650_v32  ;;  %4940 = vperm.xlu0 %6048, %v4702_v17  }
 0x514   :  { %v4616_v40 = vpop.permute.xlu1 %4615  ;;  %4935 = vperm.xlu1 %6046, %v4701_v27   ;;  %v4234_v11 = vpop.permute.xlu0 %4233 }
 0x515   :  { %v4705_v16 = vsub.f32 %v9562_v42, %v4616_v40  ;;  %v4322_v24 = vmul.f32 %v4234_v11, %v10609_v5 }
 0x517   :  { %6049 = vset.pattern.permute.xlu0 %v10651_v48 }
 0x518   :  { %v4236_v56 = vpop.permute.xlu1 %4235  ;;  %6047 = vset.pattern.permute.xlu1 %v10651_v48  ;;  %4753 = vperm.xlu0 %6049, %v4319_v4   ;;  %v4618_v52 = vpop.permute.xlu0 %4617 }
 0x519   :  { %4748 = vperm.xlu1 %6047, %v4318_v23   ;;  %v4706_v8 = vsub.f32 %v9570_v30, %v4618_v52  ;;  %v4323_v53 = vmul.f32 %v4236_v56, %v10611_v10 }
 0x51c   :  { %v4620_v45 = vpop.permute.xlu1 %4619  ;;  %6052 = vset.pattern.permute.xlu0 %v10650_v32  ;;  %v4238_v33 = vpop.permute.xlu0 %4237 }
 0x51d   :  { %6050 = vset.pattern.permute.xlu1 %v10650_v32  ;;  %4950 = vperm.xlu0 %6052, %v4704_v61   ;;  %v4707_v55 = vsub.f32 %v9578_v6, %v4620_v45  ;;  %v4324_v40 = vmul.f32 %v4238_v33, %v10613_v25 }
 0x51e   :  { %4945 = vperm.xlu1 %6050, %v4703_v26  }
 0x520   :  { %v4240_v31 = vpop.permute.xlu1 %4239  ;;  %v4622_v44 = vpop.permute.xlu0 %4621 }
 0x521   :  { %6053 = vset.pattern.permute.xlu0 %v10651_v48  ;;  %v4708_v42 = vsub.f32 %v9586_v43, %v4622_v44  ;;  %v4325_v5 = vmul.f32 %v4240_v31, %v10615_v38 }
 0x522   :  { %6051 = vset.pattern.permute.xlu1 %v10651_v48  ;;  %4763 = vperm.xlu0 %6053, %v4321_v9  }
 0x523   :  { %4758 = vperm.xlu1 %6051, %v4320_v2  }
 0x524   :  { %v4624_v21 = vpop.permute.xlu1 %4623  ;;  %v4242_v47 = vpop.permute.xlu0 %4241 }
 0x525   :  { %v4709_v23 = vsub.f32 %v9594_v39, %v4624_v21  ;;  %v4326_v52 = vmul.f32 %v4242_v47, %v10617_v62 }
 0x526   :  { %6056 = vset.pattern.permute.xlu0 %v10650_v32 }
 0x527   :  { %6054 = vset.pattern.permute.xlu1 %v10650_v32  ;;  %4960 = vperm.xlu0 %6056, %v4706_v8  }
 0x528   :  { %v4244_v46 = vpop.permute.xlu1 %4243  ;;  %4955 = vperm.xlu1 %6054, %v4705_v16   ;;  %v4626_v18 = vpop.permute.xlu0 %4625 }
 0x529   :  { %v4710_v4 = vsub.f32 %v9602_v36, %v4626_v18  ;;  %v4327_v56 = vmul.f32 %v4244_v46, %v10619_v37 }
 0x52b   :  { %6057 = vset.pattern.permute.xlu0 %v10651_v48 }
 0x52c   :  { %v4628_v7 = vpop.permute.xlu1 %4627  ;;  %6055 = vset.pattern.permute.xlu1 %v10651_v48  ;;  %4773 = vperm.xlu0 %6057, %v4323_v53   ;;  %v4246_v30 = vpop.permute.xlu0 %4245 }
 0x52d   :  { %4768 = vperm.xlu1 %6055, %v4322_v24   ;;  %v4711_v26 = vsub.f32 %v9610_v63, %v4628_v7  ;;  %v4328_v31 = vmul.f32 %v4246_v30, %v10621_v49 }
 0x530   :  { %v4248_v17 = vpop.permute.xlu1 %4247  ;;  %6060 = vset.pattern.permute.xlu0 %v10650_v32  ;;  %v4630_v27 = vpop.permute.xlu0 %4629 }
 0x531   :  { %6058 = vset.pattern.permute.xlu1 %v10650_v32  ;;  %4970 = vperm.xlu0 %6060, %v4708_v42   ;;  %v4712_v39 = vsub.f32 %v9618_v28, %v4630_v27  ;;  %v4329_v62 = vmul.f32 %v4248_v17, %v8638_v1 }
 0x532   :  { %4965 = vperm.xlu1 %6058, %v4707_v55  }
 0x534   :  { %v4632_v10 = vpop.permute.xlu1 %4631  ;;  %v4250_v11 = vpop.permute.xlu0 %4249 }
 0x535   :  { %6061 = vset.pattern.permute.xlu0 %v10651_v48  ;;  %v4713_v2 = vsub.f32 %v9626_v35, %v4632_v10  ;;  %v4330_v47 = vmul.f32 %v4250_v11, %v10622_v20  ;;  %v10653_v11 = vld [vmem:[#allocation21_spill] sm:$0xff] }
 0x536   :  { %6059 = vset.pattern.permute.xlu1 %v10651_v48  ;;  %4783 = vperm.xlu0 %6061, %v4325_v5  }
 0x537   :  { %4778 = vperm.xlu1 %6059, %v4324_v40  }
 0x538   :  { %v4252_v6 = vpop.permute.xlu1 %4251  ;;  %v4634_v43 = vpop.permute.xlu0 %4633 }
 0x539   :  { %v4714_v44 = vsub.f32 %v9634_v34, %v4634_v43  ;;  %v4331_v21 = vmul.f32 %v4252_v6, %v10624_v60  ;;  %v10654_v6 = vld [vmem:[#allocation74_spill] sm:$0xff] }
 0x53a   :  { %6064 = vset.pattern.permute.xlu0 %v10650_v32 }
 0x53b   :  { %6062 = vset.pattern.permute.xlu1 %v10650_v32  ;;  %4980 = vperm.xlu0 %6064, %v4710_v4   ;;  %v10655_v4 = vld [vmem:[#allocation26_spill] sm:$0xff] }
 0x53c   :  { %v4636_v38 = vpop.permute.xlu1 %4635  ;;  %4975 = vperm.xlu1 %6062, %v4709_v23   ;;  %v4254_v25 = vpop.permute.xlu0 %4253 }
 0x53d   :  { %v4715_v16 = vsub.f32 %v9642_v3, %v4636_v38  ;;  %v4332_v18 = vmul.f32 %v4254_v25, %v10626_v57  ;;  %v6361_v38 = vld [vmem:[%s10132_s0] sm:$0xff] }
 0x53f   :  { %6065 = vset.pattern.permute.xlu0 %v10651_v48 }
 0x540   :  { %v4256_v61 = vpop.permute.xlu1 %4255  ;;  %6063 = vset.pattern.permute.xlu1 %v10651_v48  ;;  %4793 = vperm.xlu0 %6065, %v4327_v56   ;;  %v4638_v36 = vpop.permute.xlu0 %4637 }
 0x541   :  { %4788 = vperm.xlu1 %6063, %v4326_v52   ;;  %v4716_v35 = vsub.f32 %v9650_v15, %v4638_v36  ;;  %v4333_v60 = vmul.f32 %v4256_v61, %v10628_v14  ;;  %v10656_v36 = vld [vmem:[#allocation23_spill] sm:$0xff] }
 0x544   :  { %v4640_v45 = vpop.permute.xlu1 %4639  ;;  %6068 = vset.pattern.permute.xlu0 %v10650_v32  ;;  %v4258_v33 = vpop.permute.xlu0 %4257 }
 0x545   :  { %6066 = vset.pattern.permute.xlu1 %v10650_v32  ;;  %4990 = vperm.xlu0 %6068, %v4712_v39   ;;  %v4717_v24 = vsub.f32 %v9658_v29, %v4640_v45  ;;  %v4334_v7 = vmul.f32 %v4258_v33, %v10630_v19 }
 0x546   :  { %4985 = vperm.xlu1 %6066, %v4711_v26   ;;  %v10657_v26 = vld [vmem:[#allocation22_spill] sm:$0xff] }
 0x548   :  { %v4260_v37 = vpop.permute.xlu1 %4259  ;;  %v4642_v9 = vpop.permute.xlu0 %4641 }
 0x549   :  { %6069 = vset.pattern.permute.xlu0 %v10651_v48  ;;  %v4718_v3 = vsub.f32 %v9666_v22, %v4642_v9  ;;  %v4335_v14 = vmul.f32 %v4260_v37, %v10632_v0  ;;  %v6362_v37 = vld [vmem:[%s10132_s0 + $0x8] sm:$0xff] }
 0x54a   :  { %6067 = vset.pattern.permute.xlu1 %v10651_v48  ;;  %4803 = vperm.xlu0 %6069, %v4329_v62  }
 0x54b   :  { %4798 = vperm.xlu1 %6067, %v4328_v31   ;;  %v10658_v31 = vld [vmem:[#allocation28_spill] sm:$0xff] }
 0x54c   :  { %v4644_v63 = vpop.permute.xlu1 %4643  ;;  %v4262_v28 = vpop.permute.xlu0 %4261 }
 0x54d   :  { %v4719_v42 = vsub.f32 %v9674_v13, %v4644_v63  ;;  %v4336_v0 = vmul.f32 %v4262_v28, %v10634_v58 }
 0x54e   :  { %6072 = vset.pattern.permute.xlu0 %v10650_v32 }
 0x54f   :  { %6070 = vset.pattern.permute.xlu1 %v10650_v32  ;;  %5000 = vperm.xlu0 %6072, %v4714_v44   ;;  %v10659_v44 = vld [vmem:[#allocation27_spill] sm:$0xff] }
 0x550   :  { %v4264_v1 = vpop.permute.xlu1 %4263  ;;  %4995 = vperm.xlu1 %6070, %v4713_v2   ;;  %v4646_v49 = vpop.permute.xlu0 %4645 }
 0x551   :  { %v4720_v29 = vsub.f32 %v9682_v51, %v4646_v49  ;;  %v4337_v19 = vmul.f32 %v4264_v1, %v10636_v50  ;;  %v10652_v50 = vld [vmem:[#allocation80_spill] sm:$0xff] }
 0x553   :  { %6073 = vset.pattern.permute.xlu0 %v10651_v48 }
 0x554   :  { %6071 = vset.pattern.permute.xlu1 %v10651_v48  ;;  %4813 = vperm.xlu0 %6073, %v4331_v21   ;;  %v4266_v34 = vpop.permute.xlu0 %4265  ;;  %v4648_v8 = vpop.permute.xlu1 %4647  ;;  %v10660_v21 = vld [vmem:[#allocation81_spill] sm:$0xff] }
 0x555   :  { %4808 = vperm.xlu1 %6071, %v4330_v47   ;;  %v4721_v27 = vsub.f32 %v9690_v54, %v4648_v8  ;;  %v4338_v40 = vmul.f32 %v4266_v34, %v10653_v11  ;;  %v6366_v11 = vld [vmem:[%s10132_s0 + $0x28] sm:$0xff] }
 0x558   :  { %6076 = vset.pattern.permute.xlu0 %v10650_v32  ;;  %v4650_v46 = vpop.permute.xlu0 %4649  ;;  %v4268_v20 = vpop.permute.xlu1 %4267 }
 0x559   :  { %6074 = vset.pattern.permute.xlu1 %v10650_v32  ;;  %5010 = vperm.xlu0 %6076, %v4716_v35   ;;  %v4722_v13 = vsub.f32 %v9698_v41, %v4650_v46  ;;  %v4339_v10 = vmul.f32 %v4268_v20, %v10652_v50  ;;  %v10661_v35 = vld [vmem:[#allocation70_spill] sm:$0xff]  ;;  %v6363_v46 = vld [vmem:[%s10132_s0 + $0x10] sm:$0xff] }
 0x55a   :  { %5005 = vperm.xlu1 %6074, %v4715_v16   ;;  %v10666_v50 = vld [vmem:[#allocation76_spill] sm:$0xff] }
 0x55c   :  { %v9843_v15 = vpop.permute.xlu0 %4269  ;;  %v4652_v53 = vpop.permute.xlu1 %4651 }
 0x55d   :  { %6077 = vset.pattern.permute.xlu0 %v10651_v48  ;;  %v4723_v23 = vsub.f32 %v10655_v4, %v4652_v53  ;;  %v4340_v45 = vmul.f32 %v9843_v15, %v10657_v26 }
 0x55e   :  { %6075 = vset.pattern.permute.xlu1 %v10651_v48  ;;  %4823 = vperm.xlu0 %6077, %v4333_v60  }
 0x55f   :  { %4818 = vperm.xlu1 %6075, %v4332_v18  }
 0x560   :  { %v4654_v57 = vpop.permute.xlu0 %4653  ;;  %v4272_v30 = vpop.permute.xlu1 %4271 }
 0x561   :  { %v4724_v43 = vsub.f32 %v10654_v6, %v4654_v57  ;;  %v4341_v39 = vmul.f32 %v4272_v30, %v10656_v36 }
 0x562   :  { %6080 = vset.pattern.permute.xlu0 %v10650_v32 }
 0x563   :  { %6078 = vset.pattern.permute.xlu1 %v10650_v32  ;;  %5020 = vperm.xlu0 %6080, %v4718_v3   ;;  %v10662_v3 = vld [vmem:[#allocation29_spill] sm:$0xff] }
 0x564   :  { %5015 = vperm.xlu1 %6078, %v4717_v24   ;;  %v9854_v22 = vpop.permute.xlu0 %4273  ;;  %v4656_v55 = vpop.permute.xlu1 %4655 }
 0x565   :  { %v4725_v2 = vsub.f32 %v10659_v44, %v4656_v55  ;;  %v4342_v16 = vmul.f32 %v9854_v22, %v10661_v35  ;;  %v6364_v22 = vld [vmem:[%s10132_s0 + $0x18] sm:$0xff]  ;;  %v6373_v35 = vld [vmem:[%s10132_s0 + $0x60] sm:$0xff] }
 0x567   :  { %6081 = vset.pattern.permute.xlu0 %v10651_v48 }
 0x568   :  { %6079 = vset.pattern.permute.xlu1 %v10651_v48  ;;  %4833 = vperm.xlu0 %6081, %v4335_v14   ;;  %v4658_v17 = vpop.permute.xlu0 %4657  ;;  %v4276_v51 = vpop.permute.xlu1 %4275  ;;  %v10663_v14 = vld [vmem:[#allocation25_spill] sm:$0xff] }
 0x569   :  { %4828 = vperm.xlu1 %6079, %v4334_v7   ;;  %v4726_v63 = vsub.f32 %v10658_v31, %v4658_v17  ;;  %v4343_v47 = vmul.f32 %v4276_v51, %v10660_v21  ;;  %v10665_v51 = vld [vmem:[#allocation73_spill] sm:$0xff] }
 0x56c   :  { %6084 = vset.pattern.permute.xlu0 %v10650_v32  ;;  %v9866_v5 = vpop.permute.xlu0 %4277  ;;  %v4660_v58 = vpop.permute.xlu1 %4659 }
 0x56d   :  { %6082 = vset.pattern.permute.xlu1 %v10650_v32  ;;  %5030 = vperm.xlu0 %6084, %v4720_v29   ;;  %v4727_v53 = vsub.f32 %v10662_v3, %v4660_v58  ;;  %v6374_v3 = vld [vmem:[%s10132_s0 + $0x68] sm:$0xff] }
 0x56e   :  { %5025 = vperm.xlu1 %6082, %v4719_v42  }
 0x570   :  { %v4662_v41 = vpop.permute.xlu0 %4661 }
 0x571   :  { %6085 = vset.pattern.permute.xlu0 %v10651_v48  ;;  %v4728_v18 = vsub.f32 %v9748_v12, %v4662_v41  ;;  %v10664_v12 = vld [vmem:[#allocation24_spill] sm:$0xff] }
 0x572   :  { %6083 = vset.pattern.permute.xlu1 %v10651_v48  ;;  %4843 = vperm.xlu0 %6085, %v4337_v19   ;;  %v4344_v29 = vmul.f32 %v9866_v5, %v10664_v12  ;;  %v6365_v19 = vld [vmem:[%s10132_s0 + $0x20] sm:$0xff] }
 0x573   :  { %4838 = vperm.xlu1 %6083, %v4336_v0  }
 0x576   :  { %6088 = vset.pattern.permute.xlu0 %v10650_v32 }
 0x577   :  { %6086 = vset.pattern.permute.xlu1 %v10650_v32  ;;  %5040 = vperm.xlu0 %6088, %v4722_v13  }
 0x578   :  { %5035 = vperm.xlu1 %6086, %v4721_v27  }
 0x57b   :  { %6089 = vset.pattern.permute.xlu0 %v10651_v48 }
 0x57c   :  { %6087 = vset.pattern.permute.xlu1 %v10651_v48  ;;  %4853 = vperm.xlu0 %6089, %v4339_v10  }
 0x57d   :  { %v4734_v54 = vpop.permute.xlu1 %4733  ;;  %4848 = vperm.xlu1 %6087, %v4338_v40  }
 0x57e   :  { %v4891_v25 = vmul.f32 %v6361_v38, %v4734_v54  ;;  %v6367_v54 = vld [vmem:[%s10132_s0 + $0x30] sm:$0xff] }
 0x580   :  { %6092 = vset.pattern.permute.xlu0 %v10650_v32 }
 0x581   :  { %v4280_v56 = vpop.permute.xlu1 %4279  ;;  %6090 = vset.pattern.permute.xlu1 %v10650_v32  ;;  %5050 = vperm.xlu0 %6092, %v4724_v43   ;;  %v4926_v52 = vpop.permute.xlu0 %4925 }
 0x582   :  { %v5083_v61 = vadd.f32 %v4926_v52, %v4891_v25  ;;  %5045 = vperm.xlu1 %6090, %v4723_v23   ;;  %v4345_v7 = vmul.f32 %v4280_v56, %v10663_v14  ;;  %v6368_v25 = vld [vmem:[%s10132_s0 + $0x38] sm:$0xff] }
 0x584   :  { %5115 = vst.msk [vmem:[%s10136_s4] sm:$0xff] %vm49_vm0, %v5083_v61  ;;  %v6369_v61 = vld [vmem:[%s10132_s0 + $0x40] sm:$0xff] }
 0x585   :  { %v9887_v33 = vpop.permute.xlu1 %4663  ;;  %6093 = vset.pattern.permute.xlu0 %v10651_v48 }
 0x586   :  { %6091 = vset.pattern.permute.xlu1 %v10651_v48  ;;  %4863 = vperm.xlu0 %6093, %v4341_v39   ;;  %v4739_v62 = vpop.permute.xlu0 %4738 }
 0x587   :  { %v4892_v9 = vmul.f32 %v6362_v37, %v4739_v62  ;;  %4858 = vperm.xlu1 %6091, %v4340_v45   ;;  %v6370_v37 = vld [vmem:[%s10132_s0 + $0x48] sm:$0xff] }
 0x589   :  { %v4931_v28 = vpop.permute.xlu1 %4930 }
 0x58a   :  { %v5084_v1 = vadd.f32 %v4931_v28, %v4892_v9  ;;  %6096 = vset.pattern.permute.xlu0 %v10650_v32  ;;  %v4282_v49 = vpop.permute.xlu0 %4281 }
 0x58b   :  { %6094 = vset.pattern.permute.xlu1 %v10650_v32  ;;  %5060 = vperm.xlu0 %6096, %v4726_v63   ;;  %v4346_v13 = vmul.f32 %v4282_v49, %v10665_v51  ;;  %v6371_v63 = vld [vmem:[%s10132_s0 + $0x50] sm:$0xff] }
 0x58c   :  { %5116 = vst.msk [vmem:[%s10136_s4 + $0x8] sm:$0xff] %vm49_vm0, %v5084_v1  ;;  %5055 = vperm.xlu1 %6094, %v4725_v2  }
 0x58e   :  { %v4744_v34 = vpop.permute.xlu1 %4743  ;;  %v4666_v8 = vpop.permute.xlu0 %4665 }
 0x58f   :  { %6097 = vset.pattern.permute.xlu0 %v10651_v48  ;;  %v4893_v20 = vmul.f32 %v6363_v46, %v4744_v34  ;;  %v4730_v27 = vsub.f32 %v9771_v59, %v4666_v8  ;;  %v4729_v59 = vsub.f32 %v10666_v50, %v9887_v33 }
 0x590   :  { %6095 = vset.pattern.permute.xlu1 %v10651_v48  ;;  %4873 = vperm.xlu0 %6097, %v4343_v47   ;;  %v6372_v47 = vld [vmem:[%s10132_s0 + $0x58] sm:$0xff] }
 0x591   :  { %4868 = vperm.xlu1 %6095, %v4342_v16  }
 0x592   :  { %v4941_v60 = vpop.permute.xlu0 %4940 }
 0x593   :  { %v4936_v15 = vpop.permute.xlu1 %4935 }
 0x594   :  { %v5085_v24 = vadd.f32 %v4936_v15, %v4893_v20  ;;  %6100 = vset.pattern.permute.xlu0 %v10650_v32 }
 0x595   :  { %6098 = vset.pattern.permute.xlu1 %v10650_v32  ;;  %5070 = vperm.xlu0 %6100, %v4728_v18  }
 0x596   :  { %5117 = vst.msk [vmem:[%s10136_s4 + $0x10] sm:$0xff] %vm49_vm0, %v5085_v24  ;;  %5065 = vperm.xlu1 %6098, %v4727_v53  }
 0x597   :  { %v4754_v57 = vpop.permute.xlu0 %4753 }
 0x598   :  { %v4749_v30 = vpop.permute.xlu1 %4748  ;;  %v4895_v0 = vmul.f32 %v6365_v19, %v4754_v57  ;;  %v6375_v57 = vld [vmem:[%s10132_s0 + $0x70] sm:$0xff] }
 0x599   :  { %v4894_v42 = vmul.f32 %v6364_v22, %v4749_v30  ;;  %6101 = vset.pattern.permute.xlu0 %v10651_v48 }
 0x59a   :  { %6099 = vset.pattern.permute.xlu1 %v10651_v48  ;;  %4883 = vperm.xlu0 %6101, %v4345_v7  }
 0x59b   :  { %v5086_v55 = vadd.f32 %v4941_v60, %v4894_v42  ;;  %4878 = vperm.xlu1 %6099, %v4344_v29   ;;  %v6376_v42 = vld [vmem:[%s10132_s0 + $0x78] sm:$0xff] }
 0x59c   :  { %v4951_v17 = vpop.permute.xlu0 %4950 }
 0x59d   :  { %5118 = vst.msk [vmem:[%s10136_s4 + $0x18] sm:$0xff] %vm49_vm0, %v5086_v55  ;;  %v4946_v5 = vpop.permute.xlu1 %4945 }
 0x59e   :  { %v5087_v48 = vadd.f32 %v4946_v5, %v4895_v0  ;;  %6103 = vset.pattern.permute.xlu0 %v10650_v32  ;;  %v6377_v0 = vld [vmem:[%s10132_s0 + $0x80] sm:$0xff] }
 0x59f   :  { %4888 = vperm.xlu1 %6099, %v4346_v13   ;;  %5080 = vperm.xlu0 %6103, %v4730_v27  }
 0x5a0   :  { %5119 = vst.msk [vmem:[%s10136_s4 + $0x20] sm:$0xff] %vm49_vm0, %v5087_v48 }
 0x5a1   :  { %v4764_v58 = vpop.permute.xlu0 %4763 }
 0x5a2   :  { %v4759_v10 = vpop.permute.xlu1 %4758  ;;  %v4897_v6 = vmul.f32 %v6367_v54, %v4764_v58  ;;  %v6378_v58 = vld [vmem:[%s10132_s0 + $0x88] sm:$0xff] }
 0x5a3   :  { %v4896_v40 = vmul.f32 %v6366_v11, %v4759_v10  ;;  %6102 = vset.pattern.permute.xlu1 %v10650_v32  ;;  %v6379_v10 = vld [vmem:[%s10132_s0 + $0x90] sm:$0xff] }
 0x5a4   :  { %5075 = vperm.xlu1 %6102, %v4729_v59  }
 0x5a5   :  { %v5088_v41 = vadd.f32 %v4951_v17, %v4896_v40 }
 0x5a6   :  { %v4961_v43 = vpop.permute.xlu0 %4960 }
 0x5a7   :  { %5120 = vst.msk [vmem:[%s10136_s4 + $0x28] sm:$0xff] %vm49_vm0, %v5088_v41  ;;  %v4956_v4 = vpop.permute.xlu1 %4955 }
 0x5a8   :  { %v5089_v23 = vadd.f32 %v4956_v4, %v4897_v6  ;;  %v6380_v4 = vld [vmem:[%s10132_s0 + $0x98] sm:$0xff] }
 0x5aa   :  { %5121 = vst.msk [vmem:[%s10136_s4 + $0x30] sm:$0xff] %vm49_vm0, %v5089_v23 }
 0x5ab   :  { %v4774_v32 = vpop.permute.xlu0 %4773 }
 0x5ac   :  { %v4769_v38 = vpop.permute.xlu1 %4768  ;;  %v4899_v36 = vmul.f32 %v6369_v61, %v4774_v32 }
 0x5ad   :  { %v4898_v56 = vmul.f32 %v6368_v25, %v4769_v38  ;;  %v6381_v38 = vld [vmem:[%s10132_s0 + $0xa0] sm:$0xff] }
 0x5af   :  { %v5090_v52 = vadd.f32 %v4961_v43, %v4898_v56 }
 0x5b0   :  { %v4971_v39 = vpop.permute.xlu0 %4970 }
 0x5b1   :  { %5122 = vst.msk [vmem:[%s10136_s4 + $0x38] sm:$0xff] %vm49_vm0, %v5090_v52  ;;  %v4966_v26 = vpop.permute.xlu1 %4965 }
 0x5b2   :  { %v5091_v45 = vadd.f32 %v4966_v26, %v4899_v36  ;;  %v6382_v26 = vld [vmem:[%s10132_s0 + $0xa8] sm:$0xff] }
 0x5b4   :  { %5123 = vst.msk [vmem:[%s10136_s4 + $0x40] sm:$0xff] %vm49_vm0, %v5091_v45 }
 0x5b5   :  { %v4784_v33 = vpop.permute.xlu0 %4783 }
 0x5b6   :  { %v4779_v62 = vpop.permute.xlu1 %4778  ;;  %v4901_v28 = vmul.f32 %v6371_v63, %v4784_v33 }
 0x5b7   :  { %v4900_v9 = vmul.f32 %v6370_v37, %v4779_v62  ;;  %v6383_v62 = vld [vmem:[%s10132_s0 + $0xb0] sm:$0xff] }
 0x5b9   :  { %v5092_v31 = vadd.f32 %v4971_v39, %v4900_v9 }
 0x5ba   :  { %v4981_v44 = vpop.permute.xlu0 %4980 }
 0x5bb   :  { %5124 = vst.msk [vmem:[%s10136_s4 + $0x48] sm:$0xff] %vm49_vm0, %v5092_v31  ;;  %v4976_v2 = vpop.permute.xlu1 %4975 }
 0x5bc   :  { %v5093_v1 = vadd.f32 %v4976_v2, %v4901_v28  ;;  %v6384_v2 = vld [vmem:[%s10132_s0 + $0xb8] sm:$0xff] }
 0x5be   :  { %5125 = vst.msk [vmem:[%s10136_s4 + $0x50] sm:$0xff] %vm49_vm0, %v5093_v1 }
 0x5bf   :  { %v4794_v49 = vpop.permute.xlu0 %4793 }
 0x5c0   :  { %v4789_v21 = vpop.permute.xlu1 %4788  ;;  %v4903_v16 = vmul.f32 %v6373_v35, %v4794_v49 }
 0x5c1   :  { %v4902_v34 = vmul.f32 %v6372_v47, %v4789_v21  ;;  %v6385_v21 = vld [vmem:[%s10132_s0 + $0xc0] sm:$0xff] }
 0x5c3   :  { %v5094_v8 = vadd.f32 %v4981_v44, %v4902_v34 }
 0x5c4   :  { %v4991_v46 = vpop.permute.xlu0 %4990 }
 0x5c5   :  { %5126 = vst.msk [vmem:[%s10136_s4 + $0x58] sm:$0xff] %vm49_vm0, %v5094_v8  ;;  %v4986_v20 = vpop.permute.xlu1 %4985 }
 0x5c6   :  { %v5095_v60 = vadd.f32 %v4986_v20, %v4903_v16  ;;  %v6386_v20 = vld [vmem:[%s10132_s0 + $0xc8] sm:$0xff] }
 0x5c8   :  { %5127 = vst.msk [vmem:[%s10136_s4 + $0x60] sm:$0xff] %vm49_vm0, %v5095_v60 }
 0x5c9   :  { %v4804_v18 = vpop.permute.xlu0 %4803 }
 0x5ca   :  { %v4799_v15 = vpop.permute.xlu1 %4798  ;;  %v4905_v14 = vmul.f32 %v6375_v57, %v4804_v18 }
 0x5cb   :  { %v4904_v53 = vmul.f32 %v6374_v3, %v4799_v15  ;;  %v6387_v15 = vld [vmem:[%s10132_s0 + $0xd0] sm:$0xff] }
 0x5cd   :  { %v5096_v24 = vadd.f32 %v4991_v46, %v4904_v53 }
 0x5ce   :  { %v5001_v7 = vpop.permute.xlu0 %5000 }
 0x5cf   :  { %5128 = vst.msk [vmem:[%s10136_s4 + $0x68] sm:$0xff] %vm49_vm0, %v5096_v24  ;;  %v4996_v30 = vpop.permute.xlu1 %4995 }
 0x5d0   :  { %v5097_v12 = vadd.f32 %v4996_v30, %v4905_v14  ;;  %v6388_v30 = vld [vmem:[%s10132_s0 + $0xd8] sm:$0xff] }
 0x5d2   :  { %5129 = vst.msk [vmem:[%s10136_s4 + $0x70] sm:$0xff] %vm49_vm0, %v5097_v12 }
 0x5d3   :  { %v4814_v29 = vpop.permute.xlu0 %4813 }
 0x5d4   :  { %v4809_v22 = vpop.permute.xlu1 %4808  ;;  %v4907_v17 = vmul.f32 %v6377_v0, %v4814_v29 }
 0x5d5   :  { %v4906_v55 = vmul.f32 %v6376_v42, %v4809_v22  ;;  %v6389_v22 = vld [vmem:[%s10132_s0 + $0xe0] sm:$0xff] }
 0x5d7   :  { %v5098_v19 = vadd.f32 %v5001_v7, %v4906_v55 }
 0x5d8   :  { %v5011_v51 = vpop.permute.xlu0 %5010 }
 0x5d9   :  { %5130 = vst.msk [vmem:[%s10136_s4 + $0x78] sm:$0xff] %vm49_vm0, %v5098_v19  ;;  %v5006_v13 = vpop.permute.xlu1 %5005 }
 0x5da   :  { %v5099_v27 = vadd.f32 %v5006_v13, %v4907_v17  ;;  %v6390_v13 = vld [vmem:[%s10132_s0 + $0xe8] sm:$0xff] }
 0x5dc   :  { %5131 = vst.msk [vmem:[%s10136_s4 + $0x80] sm:$0xff] %vm49_vm0, %v5099_v27 }
 0x5dd   :  { %v4824_v5 = vpop.permute.xlu0 %4823 }
 0x5de   :  { %v4819_v48 = vpop.permute.xlu1 %4818  ;;  %v4909_v11 = vmul.f32 %v6379_v10, %v4824_v5 }
 0x5df   :  { %v4908_v50 = vmul.f32 %v6378_v58, %v4819_v48  ;;  %v6391_v58 = vld [vmem:[%s10132_s0 + $0xf8] sm:$0x3] }
 0x5e1   :  { %v5100_v59 = vadd.f32 %v5011_v51, %v4908_v50 }
 0x5e2   :  { %v5021_v40 = vpop.permute.xlu0 %5020 }
 0x5e3   :  { %5132 = vst.msk [vmem:[%s10136_s4 + $0x88] sm:$0xff] %vm49_vm0, %v5100_v59  ;;  %v5016_v41 = vpop.permute.xlu1 %5015 }
 0x5e4   :  { %v5101_v54 = vadd.f32 %v5016_v41, %v4909_v11  ;;  %v6392_v11 = vld [vmem:[%s10132_s0 + $0xf0] sm:$0xff] }
 0x5e6   :  { %5133 = vst.msk [vmem:[%s10136_s4 + $0x90] sm:$0xff] %vm49_vm0, %v5101_v54 }
 0x5e7   :  { %v4834_v6 = vpop.permute.xlu0 %4833 }
 0x5e8   :  { %v4829_v43 = vpop.permute.xlu1 %4828  ;;  %v4911_v25 = vmul.f32 %v6381_v38, %v4834_v6 }
 0x5e9   :  { %v4910_v23 = vmul.f32 %v6380_v4, %v4829_v43 }
 0x5eb   :  { %v5102_v32 = vadd.f32 %v5021_v40, %v4910_v23 }
 0x5ec   :  { %v5031_v56 = vpop.permute.xlu0 %5030 }
 0x5ed   :  { %5134 = vst.msk [vmem:[%s10136_s4 + $0x98] sm:$0xff] %vm49_vm0, %v5102_v32  ;;  %v5026_v52 = vpop.permute.xlu1 %5025 }
 0x5ee   :  { %v5103_v61 = vadd.f32 %v5026_v52, %v4911_v25 }
 0x5f0   :  { %5135 = vst.msk [vmem:[%s10136_s4 + $0xa0] sm:$0xff] %vm49_vm0, %v5103_v61 }
 0x5f1   :  { %v4844_v36 = vpop.permute.xlu0 %4843 }
 0x5f2   :  { %v4839_v39 = vpop.permute.xlu1 %4838  ;;  %v4913_v37 = vmul.f32 %v6383_v62, %v4844_v36 }
 0x5f3   :  { %v4912_v45 = vmul.f32 %v6382_v26, %v4839_v39 }
 0x5f5   :  { %v5104_v33 = vadd.f32 %v5031_v56, %v4912_v45 }
 0x5f6   :  { %v5041_v9 = vpop.permute.xlu0 %5040 }
 0x5f7   :  { %5136 = vst.msk [vmem:[%s10136_s4 + $0xa8] sm:$0xff] %vm49_vm0, %v5104_v33  ;;  %v5036_v31 = vpop.permute.xlu1 %5035 }
 0x5f8   :  { %v5105_v63 = vadd.f32 %v5036_v31, %v4913_v37 }
 0x5fa   :  { %5137 = vst.msk [vmem:[%s10136_s4 + $0xb0] sm:$0xff] %vm49_vm0, %v5105_v63 }
 0x5fb   :  { %v4854_v28 = vpop.permute.xlu0 %4853 }
 0x5fc   :  { %v4849_v44 = vpop.permute.xlu1 %4848  ;;  %v4915_v47 = vmul.f32 %v6385_v21, %v4854_v28 }
 0x5fd   :  { %v4914_v1 = vmul.f32 %v6384_v2, %v4849_v44 }
 0x5ff   :  { %v5106_v49 = vadd.f32 %v5041_v9, %v4914_v1 }
 0x600   :  { %v5051_v34 = vpop.permute.xlu0 %5050 }
 0x601   :  { %5138 = vst.msk [vmem:[%s10136_s4 + $0xb8] sm:$0xff] %vm49_vm0, %v5106_v49  ;;  %v5046_v8 = vpop.permute.xlu1 %5045 }
 0x602   :  { %v5107_v35 = vadd.f32 %v5046_v8, %v4915_v47 }
 0x604   :  { %5139 = vst.msk [vmem:[%s10136_s4 + $0xc0] sm:$0xff] %vm49_vm0, %v5107_v35 }
 0x605   :  { %v4864_v16 = vpop.permute.xlu0 %4863 }
 0x606   :  { %v4859_v46 = vpop.permute.xlu1 %4858  ;;  %v4917_v3 = vmul.f32 %v6387_v15, %v4864_v16 }
 0x607   :  { %v4916_v60 = vmul.f32 %v6386_v20, %v4859_v46 }
 0x609   :  { %v5108_v18 = vadd.f32 %v5051_v34, %v4916_v60 }
 0x60a   :  { %v5061_v53 = vpop.permute.xlu0 %5060 }
 0x60b   :  { %5140 = vst.msk [vmem:[%s10136_s4 + $0xc8] sm:$0xff] %vm49_vm0, %v5108_v18  ;;  %v5056_v24 = vpop.permute.xlu1 %5055 }
 0x60c   :  { %v5109_v57 = vadd.f32 %v5056_v24, %v4917_v3 }
 0x60e   :  { %5141 = vst.msk [vmem:[%s10136_s4 + $0xd0] sm:$0xff] %vm49_vm0, %v5109_v57 }
 0x60f   :  { %v4874_v14 = vpop.permute.xlu0 %4873 }
 0x610   :  { %v4869_v7 = vpop.permute.xlu1 %4868  ;;  %v4919_v42 = vmul.f32 %v6389_v22, %v4874_v14 }
 0x611   :  { %v4918_v12 = vmul.f32 %v6388_v30, %v4869_v7 }
 0x613   :  { %v5110_v29 = vadd.f32 %v5061_v53, %v4918_v12 }
 0x614   :  { %v5071_v55 = vpop.permute.xlu0 %5070 }
 0x615   :  { %5142 = vst.msk [vmem:[%s10136_s4 + $0xd8] sm:$0xff] %vm49_vm0, %v5110_v29  ;;  %v5066_v19 = vpop.permute.xlu1 %5065 }
 0x616   :  { %v5111_v0 = vadd.f32 %v5066_v19, %v4919_v42 }
 0x618   :  { %5143 = vst.msk [vmem:[%s10136_s4 + $0xe0] sm:$0xff] %vm49_vm0, %v5111_v0 }
 0x619   :  { %v4884_v17 = vpop.permute.xlu0 %4883 }
 0x61a   :  { %v4879_v51 = vpop.permute.xlu1 %4878  ;;  %v4921_v40 = vmul.f32 %v6392_v11, %v4884_v17 }
 0x61b   :  { %v4920_v27 = vmul.f32 %v6390_v13, %v4879_v51 }
 0x61d   :  { %v5112_v5 = vadd.f32 %v5071_v55, %v4920_v27 }
 0x61e   :  { %v4889_v48 = vpop.permute.xlu1 %4888  ;;  %v5081_v59 = vpop.permute.xlu0 %5080 }
 0x61f   :  { %5144 = vst.msk [vmem:[%s10136_s4 + $0xe8] sm:$0xff] %vm49_vm0, %v5112_v5  ;;  %v4922_v50 = vmul.f32 %v6391_v58, %v4889_v48 }
 0x621   :  { %v5114_v10 = vadd.f32 %v5081_v59, %v4922_v50 }
 0x623   :  { %5146 = vst.msk [vmem:[%s10136_s4 + $0xf8] sm:$0x3] %vm143_vm1, %v5114_v10  ;;  %v5076_v41 = vpop.permute.xlu1 %5075 }
 0x624   :  { %v5113_v54 = vadd.f32 %v5076_v41, %v4921_v40 }
 0x626   :  { %5145 = vst.msk [vmem:[%s10136_s4 + $0xf0] sm:$0xff] %vm49_vm0, %v5113_v54 }

</bundles_post_ra>
